<compile_context>
chip_gen: v7x
topology: tpu7x:2x2x1
jax: 0.10.0
libtpu: 0.0.40
codegen_flags: <defaults>
</compile_context>

<pallas_src>
import functools

import jax
import jax.numpy as jnp
from jax.experimental import pallas as pl
from jax.experimental.pallas import tpu as pltpu

EPS = 1e-5
CONV_ROW_TILE = 32      # row tile cap for the 3x3 conv / BN stages
UP_ROW_TILE = 64        # row tile cap for the transposed conv
VMEM_LIMIT = 48 * 1024 * 1024   # safe on v5e/v6e (128 MiB phys) and v7x (64 MiB phys)


def _row_block(h, cap):
    """Largest divisor of h that is <= cap."""
    th = min(h, cap)
    while h % th:
        th -= 1
    return th


# --------------------------------------------------------------------------
# Kernel: ConvTranspose2d(k=2, s=2) as two weight-stationary matmuls writing
# the 2x2 sub-pixel interleaved layout directly (lane-dense stores).
# --------------------------------------------------------------------------
def _upconv_kernel(x_ref, w0_ref, w1_ref, b_ref, o_ref):
    # x_ref: (1, TH, W, Cin) bf16  w{0,1}_ref: (Cin, 2*Ch) bf16  b_ref: (1, 2*Ch) f32
    # o_ref: (1, TH, 2, W, 2*Ch) bf16 (contiguous view of TH rows of (2H, 2W, Ch))
    _, TH, W, Cin = x_ref.shape
    C2h = o_ref.shape[-1]                         # 2 * C_half, columns ordered (kj, c)
    x = x_ref[0].reshape(TH * W, Cin)
    b = b_ref[...]
    y0 = jnp.dot(x, w0_ref[...], preferred_element_type=jnp.float32) + b   # ki = 0
    y1 = jnp.dot(x, w1_ref[...], preferred_element_type=jnp.float32) + b   # ki = 1
    o_ref[0, :, 0, :, :] = y0.reshape(TH, W, C2h).astype(o_ref.dtype)      # rows 2h
    o_ref[0, :, 1, :, :] = y1.reshape(TH, W, C2h).astype(o_ref.dtype)      # rows 2h+1


def conv_transpose2x2_s2(x_nhwc, w_iohw, bias):
    """nn.ConvTranspose2d(Cin, Cin//2, kernel_size=2, stride=2), NHWC, bf16 MXU."""
    B, H, W, Cin = x_nhwc.shape
    Ch = w_iohw.shape[1]
    # PyTorch weight (Cin, Ch, 2, 2) -> (Cin, ki, kj, Ch); split on ki.
    w = jnp.transpose(w_iohw, (0, 2, 3, 1))
    w0 = w[:, 0].reshape(Cin, 2 * Ch).astype(jnp.bfloat16)   # columns ordered (kj, c)
    w1 = w[:, 1].reshape(Cin, 2 * Ch).astype(jnp.bfloat16)
    b2 = jnp.tile(bias, 2).reshape(1, 2 * Ch).astype(jnp.float32)
    th = _row_block(H, UP_ROW_TILE)
    y = pl.pallas_call(
        _upconv_kernel,
        out_shape=jax.ShapeDtypeStruct((B, H, 2, W, 2 * Ch), jnp.bfloat16),
        grid=(B, H // th),
        in_specs=[
            pl.BlockSpec((1, th, W, Cin), lambda b, h: (b, h, 0, 0)),
            pl.BlockSpec((Cin, 2 * Ch), lambda b, h: (0, 0)),
            pl.BlockSpec((Cin, 2 * Ch), lambda b, h: (0, 0)),
            pl.BlockSpec((1, 2 * Ch), lambda b, h: (0, 0)),
        ],
        out_specs=pl.BlockSpec((1, th, 2, W, 2 * Ch), lambda b, h: (b, h, 0, 0, 0)),
        compiler_params=pltpu.CompilerParams(
            dimension_semantics=("parallel", "parallel"),
            vmem_limit_bytes=VMEM_LIMIT),
    )(x_nhwc.astype(jnp.bfloat16), w0, w1, b2)
    # (B, H, 2, W, 2*Ch) is already the interleaved layout: contiguous reshape.
    return y.reshape(B, 2 * H, 2 * W, Ch)


# --------------------------------------------------------------------------
# 3x3 conv core shared by both DoubleConv stages.
#   xpad_ref: (TH+2, W+2, Cin) bf16 padded tile (interior + halos + zero border)
#   xcol_ref: (TH, W, 3*Cin)  bf16 per-ki im2col slab (taps folded into K)
#   w_ref   : (3, 3*Cin, Cout) bf16 (ki-major; inner order kj, cin)
#   o_ref   : (1, TH, W, Cout) bf16 raw (pre-BN) output
#   st_ref  : (1, 1, 2, Cout) f32 per-tile (sum, sumsq) BatchNorm partials
# --------------------------------------------------------------------------
def _conv3x3_compute(xpad_ref, xcol_ref, w_ref, o_ref, st_ref):
    _, TH, W, Cout = o_ref.shape
    Cin = xpad_ref.shape[-1]
    acc = None
    for ki in range(3):
        for kj in range(3):
            xcol_ref[:, :, kj * Cin:(kj + 1) * Cin] = xpad_ref[ki:ki + TH, kj:kj + W, :]
        lhs = xcol_ref[...].reshape(TH * W, 3 * Cin)
        part = jnp.dot(lhs, w_ref[ki], preferred_element_type=jnp.float32)
        acc = part if acc is None else acc + part
    o_ref[...] = acc.reshape(1, TH, W, Cout).astype(o_ref.dtype)
    st_ref[0, 0, 0:1, :] = jnp.sum(acc, axis=0, keepdims=True)
    st_ref[0, 0, 1:2, :] = jnp.sum(acc * acc, axis=0, keepdims=True)


def _conv1_kernel(x2_ref, x1_ref, x2t_ref, x1t_ref, x2b_ref, x1b_ref, w_ref,
                  o_ref, st_ref, xpad_ref, xcol_ref):
    # First DoubleConv conv: channel concat [x2 | x1] and zero pad done in VMEM.
    h = pl.program_id(1)
    nh = pl.num_programs(1)
    _, TH, W, C2 = x2_ref.shape
    C1 = x1_ref.shape[-1]
    Ct = C2 + C1

    # Zero only the 1-pixel border (left/right columns every step; top/bottom rows
    # only when this tile touches the image edge -- interior tiles get halo rows).
    xpad_ref[:, 0:1, :] = jnp.zeros((TH + 2, 1, Ct), jnp.bfloat16)
    xpad_ref[:, W + 1:W + 2, :] = jnp.zeros((TH + 2, 1, Ct), jnp.bfloat16)
    xpad_ref[1:TH + 1, 1:W + 1, 0:C2] = x2_ref[0]
    xpad_ref[1:TH + 1, 1:W + 1, C2:Ct] = x1_ref[0]

    @pl.when(h > 0)
    def _():
        xpad_ref[0:1, 1:W + 1, 0:C2] = x2t_ref[0]
        xpad_ref[0:1, 1:W + 1, C2:Ct] = x1t_ref[0]

    @pl.when(h == 0)
    def _():
        xpad_ref[0:1, 1:W + 1, :] = jnp.zeros((1, W, Ct), jnp.bfloat16)

    @pl.when(h < nh - 1)
    def _():
        xpad_ref[TH + 1:TH + 2, 1:W + 1, 0:C2] = x2b_ref[0]
        xpad_ref[TH + 1:TH + 2, 1:W + 1, C2:Ct] = x1b_ref[0]

    @pl.when(h == nh - 1)
    def _():
        xpad_ref[TH + 1:TH + 2, 1:W + 1, :] = jnp.zeros((1, W, Ct), jnp.bfloat16)

    _conv3x3_compute(xpad_ref, xcol_ref, w_ref, o_ref, st_ref)


def _conv2_kernel(x_ref, xt_ref, xb_ref, sc_ref, sh_ref, w_ref,
                  o_ref, st_ref, xpad_ref, xcol_ref):
    # Second DoubleConv conv: BN1 scale/shift + ReLU applied on load (f32 vector
    # math, bf16 only for the MXU input), zero pad done in VMEM.
    h = pl.program_id(1)
    nh = pl.num_programs(1)
    _, TH, W, Cm = x_ref.shape
    sc = sc_ref[0]
    sh = sh_ref[0]

    def bn_relu(v):
        return jnp.maximum(v.astype(jnp.float32) * sc + sh, 0.0).astype(jnp.bfloat16)

    xpad_ref[:, 0:1, :] = jnp.zeros((TH + 2, 1, Cm), jnp.bfloat16)
    xpad_ref[:, W + 1:W + 2, :] = jnp.zeros((TH + 2, 1, Cm), jnp.bfloat16)
    xpad_ref[1:TH + 1, 1:W + 1, :] = bn_relu(x_ref[0])

    @pl.when(h > 0)
    def _():
        xpad_ref[0:1, 1:W + 1, :] = bn_relu(xt_ref[0])

    @pl.when(h == 0)
    def _():
        xpad_ref[0:1, 1:W + 1, :] = jnp.zeros((1, W, Cm), jnp.bfloat16)

    @pl.when(h < nh - 1)
    def _():
        xpad_ref[TH + 1:TH + 2, 1:W + 1, :] = bn_relu(xb_ref[0])

    @pl.when(h == nh - 1)
    def _():
        xpad_ref[TH + 1:TH + 2, 1:W + 1, :] = jnp.zeros((1, W, Cm), jnp.bfloat16)

    _conv3x3_compute(xpad_ref, xcol_ref, w_ref, o_ref, st_ref)


def _bn_relu_kernel(x_ref, sc_ref, sh_ref, o_ref):
    o_ref[...] = jnp.maximum(
        x_ref[...].astype(jnp.float32) * sc_ref[0] + sh_ref[0], 0.0)


# --------------------------------------------------------------------------
# pallas_call wrappers
# --------------------------------------------------------------------------
def _halo_maps(th, H):
    main = lambda b, h: (b, h, 0, 0)
    top = lambda b, h: (b, jnp.maximum(h * th - 1, 0), 0, 0)          # row r0-1
    bot = lambda b, h: (b, jnp.minimum(h * th + th, H - 1), 0, 0)     # row r0+TH
    return main, top, bot


def conv3x3_concat_bn_partial(x2, x1, w_oihw, th):
    B, H, W, C2 = x2.shape
    C1 = x1.shape[-1]
    Ct = C2 + C1
    Cm = w_oihw.shape[0]
    nH = H // th
    # PyTorch (Cm, Ct, 3, 3) -> (3, 3, Ct, Cm) -> (3, 3*Ct, Cm): slab ki, rows (kj, c)
    w9 = jnp.transpose(w_oihw, (2, 3, 1, 0)).reshape(3, 3 * Ct, Cm).astype(jnp.bfloat16)
    main, top, bot = _halo_maps(th, H)
    return pl.pallas_call(
        _conv1_kernel,
        out_shape=(jax.ShapeDtypeStruct((B, H, W, Cm), jnp.bfloat16),
                   jax.ShapeDtypeStruct((B, nH, 2, Cm), jnp.float32)),
        grid=(B, nH),
        in_specs=[
            pl.BlockSpec((1, th, W, C2), main),
            pl.BlockSpec((1, th, W, C1), main),
            pl.BlockSpec((1, 1, W, C2), top),
            pl.BlockSpec((1, 1, W, C1), top),
            pl.BlockSpec((1, 1, W, C2), bot),
            pl.BlockSpec((1, 1, W, C1), bot),
            pl.BlockSpec((3, 3 * Ct, Cm), lambda b, h: (0, 0, 0)),
        ],
        out_specs=(pl.BlockSpec((1, th, W, Cm), main),
                   pl.BlockSpec((1, 1, 2, Cm), lambda b, h: (b, h, 0, 0))),
        scratch_shapes=[pltpu.VMEM((th + 2, W + 2, Ct), jnp.bfloat16),
                        pltpu.VMEM((th, W, 3 * Ct), jnp.bfloat16)],
        compiler_params=pltpu.CompilerParams(
            dimension_semantics=("parallel", "parallel"),
            vmem_limit_bytes=VMEM_LIMIT),
    )(x2, x1, x2, x1, x2, x1, w9)


def conv3x3_bnrelu_in_bn_partial(raw, scale, shift, w_oihw, th):
    B, H, W, Cm = raw.shape
    Co = w_oihw.shape[0]
    nH = H // th
    w9 = jnp.transpose(w_oihw, (2, 3, 1, 0)).reshape(3, 3 * Cm, Co).astype(jnp.bfloat16)
    main, top, bot = _halo_maps(th, H)
    return pl.pallas_call(
        _conv2_kernel,
        out_shape=(jax.ShapeDtypeStruct((B, H, W, Co), jnp.bfloat16),
                   jax.ShapeDtypeStruct((B, nH, 2, Co), jnp.float32)),
        grid=(B, nH),
        in_specs=[
            pl.BlockSpec((1, th, W, Cm), main),
            pl.BlockSpec((1, 1, W, Cm), top),
            pl.BlockSpec((1, 1, W, Cm), bot),
            pl.BlockSpec((1, Cm), lambda b, h: (0, 0)),
            pl.BlockSpec((1, Cm), lambda b, h: (0, 0)),
            pl.BlockSpec((3, 3 * Cm, Co), lambda b, h: (0, 0, 0)),
        ],
        out_specs=(pl.BlockSpec((1, th, W, Co), main),
                   pl.BlockSpec((1, 1, 2, Co), lambda b, h: (b, h, 0, 0))),
        scratch_shapes=[pltpu.VMEM((th + 2, W + 2, Cm), jnp.bfloat16),
                        pltpu.VMEM((th, W, 3 * Cm), jnp.bfloat16)],
        compiler_params=pltpu.CompilerParams(
            dimension_semantics=("parallel", "parallel"),
            vmem_limit_bytes=VMEM_LIMIT),
    )(raw, raw, raw, scale, shift, w9)


def bn_relu_apply(raw, scale, shift, th):
    B, H, W, C = raw.shape
    return pl.pallas_call(
        _bn_relu_kernel,
        out_shape=jax.ShapeDtypeStruct((B, H, W, C), jnp.float32),
        grid=(B, H // th),
        in_specs=[
            pl.BlockSpec((1, th, W, C), lambda b, h: (b, h, 0, 0)),
            pl.BlockSpec((1, C), lambda b, h: (0, 0)),
            pl.BlockSpec((1, C), lambda b, h: (0, 0)),
        ],
        out_specs=pl.BlockSpec((1, th, W, C), lambda b, h: (b, h, 0, 0)),
        compiler_params=pltpu.CompilerParams(
            dimension_semantics=("parallel", "parallel"),
            vmem_limit_bytes=VMEM_LIMIT),
    )(raw, scale, shift)


def bn_scale_shift(stats, gamma, beta, count):
    """Per-tile (sum, sumsq) partials -> training-mode BatchNorm scale/shift.

    NOTE: uses batch statistics (training mode, biased variance).  If eval-mode
    BN with running stats is ever needed, the dropped conv biases must also be
    reinstated (they only cancel against batch statistics).
    """
    s = jnp.sum(stats.astype(jnp.float32), axis=(0, 1))        # (2, C)
    mean = s[0] / count
    var = jnp.maximum(s[1] / count - mean * mean, 0.0)
    scale = gamma * jax.lax.rsqrt(var + EPS)
    shift = beta - scale * mean
    return (scale.reshape(1, -1).astype(jnp.float32),
            shift.reshape(1, -1).astype(jnp.float32))


# --------------------------------------------------------------------------
# UpBlock forward (bilinear=False branch)
# --------------------------------------------------------------------------
def up_block_forward(params, x1_nchw, x2_nchw):
    # NCHW -> NHWC; bf16 activations for the MXU, f32 accumulation / BN math.
    x1 = jnp.transpose(x1_nchw, (0, 2, 3, 1)).astype(jnp.bfloat16)
    x2 = jnp.transpose(x2_nchw, (0, 2, 3, 1)).astype(jnp.bfloat16)

    # self.up : ConvTranspose2d(k=2, s=2); interleaved layout written by the kernel.
    x1 = conv_transpose2x2_s2(x1, params["up_w"], params["up_b"])

    # F.pad to the skip connection's spatial size (no-op when shapes already match).
    dy = x2.shape[1] - x1.shape[1]
    dx = x2.shape[2] - x1.shape[2]
    if dy or dx:
        x1 = jnp.pad(x1, ((0, 0), (dy // 2, dy - dy // 2),
                          (dx // 2, dx - dx // 2), (0, 0)))

    B, Hc, Wc, _ = x2.shape
    count = B * Hc * Wc                      # BatchNorm reduction size over (N, H, W)
    th = _row_block(Hc, CONV_ROW_TILE)       # row tile shared by all three stages

    # DoubleConv with two-pass training-mode BatchNorm:
    raw1, st1 = conv3x3_concat_bn_partial(x2, x1, params["c1_w"], th)   # concat fused
    sc1, sh1 = bn_scale_shift(st1, params["bn1_g"], params["bn1_b"], count)
    raw2, st2 = conv3x3_bnrelu_in_bn_partial(raw1, sc1, sh1, params["c2_w"], th)
    sc2, sh2 = bn_scale_shift(st2, params["bn2_g"], params["bn2_b"], count)
    out = bn_relu_apply(raw2, sc2, sh2, th)

    # NOTE: conv biases (c1_b, c2_b) cancel exactly under training-mode BatchNorm
    # (a per-channel constant is removed by the batch mean), so they are skipped.
    return jnp.transpose(out, (0, 3, 1, 2))


# --------------------------------------------------------------------------
# Deterministic parameter init (shapes from UpBlock.__init__, bilinear=False)
# --------------------------------------------------------------------------
def init_params(key, in_channels, out_channels):
    ks = jax.random.split(key, 6)
    half = in_channels // 2
    mid = out_channels          # DoubleConv(in, out) -> mid = out_channels
    return {
        # nn.ConvTranspose2d(in, in//2, 2, 2): weight (Cin, Cout, 2, 2), bias (Cout,)
        "up_w": 0.1 * jax.random.normal(ks[0], (in_channels, half, 2, 2), jnp.float32),
        "up_b": 0.1 * jax.random.normal(ks[1], (half,), jnp.float32),
        # Conv2d(in_channels, mid, 3, padding=1)
        "c1_w": 0.1 * jax.random.normal(ks[2], (mid, in_channels, 3, 3), jnp.float32),
        "c1_b": 0.1 * jax.random.normal(ks[3], (mid,), jnp.float32),   # cancels in BN
        "bn1_g": jnp.ones((mid,), jnp.float32),
        "bn1_b": jnp.zeros((mid,), jnp.float32),
        # Conv2d(mid, out_channels, 3, padding=1)
        "c2_w": 0.1 * jax.random.normal(ks[4], (out_channels, mid, 3, 3), jnp.float32),
        "c2_b": 0.1 * jax.random.normal(ks[5], (out_channels,), jnp.float32),  # cancels
        "bn2_g": jnp.ones((out_channels,), jnp.float32),
        "bn2_b": jnp.zeros((out_channels,), jnp.float32),
    }


if __name__ == "__main__":
    key = jax.random.PRNGKey(0)
    k1, k2, kp = jax.random.split(key, 3)

    in_channels, out_channels = 8, 4
    B, H, W = 2, 8, 8

    # NCHW like PyTorch: x1 = low-res feature map, x2 = skip connection.
    x1 = jax.random.normal(k1, (B, in_channels, H, W), jnp.float32)
    x2 = jax.random.normal(k2, (B, in_channels // 2, 2 * H, 2 * W), jnp.float32)

    params = init_params(kp, in_channels, out_channels)

    fwd = jax.jit(functools.partial(up_block_forward, params))
    out = jax.block_until_ready(fwd(x1, x2))

    assert out.shape == (B, out_channels, 2 * H, 2 * W), out.shape
    assert bool(jnp.all(jnp.isfinite(out)))
    print("KERNEL_OK")
</pallas_src>

<mosaic_0001>
module attributes {stable_mosaic.version = 11 : i64} {
  func.func @_upconv_kernel(%arg0: i32, %arg1: i32, %arg2: memref<1x8x8x8xbf16, #tpu.memory_space<vmem>>, %arg3: memref<8x8xbf16, #tpu.memory_space<vmem>>, %arg4: memref<8x8xbf16, #tpu.memory_space<vmem>>, %arg5: memref<1x8xf32, #tpu.memory_space<vmem>>, %arg6: memref<1x8x2x8x8xbf16, #tpu.memory_space<vmem>>) attributes {dimension_semantics = [#tpu.dimension_semantics<parallel>, #tpu.dimension_semantics<parallel>], iteration_bounds = array<i64: 2, 1>, scalar_prefetch = 0 : i64, scratch_operands = 0 : i64, tpu.core_type = #tpu.core_type<tc>, window_params = [{transform_indices = @transform_0, window_bounds = array<i64: 1, 8, 8, 8>}, {pipeline_mode = #tpu.pipeline_mode<synchronous>, transform_indices = @transform_1, window_bounds = array<i64: 8, 8>}, {pipeline_mode = #tpu.pipeline_mode<synchronous>, transform_indices = @transform_2, window_bounds = array<i64: 8, 8>}, {pipeline_mode = #tpu.pipeline_mode<synchronous>, transform_indices = @transform_3, window_bounds = array<i64: 1, 8>}, {transform_indices = @transform_4, window_bounds = array<i64: 1, 8, 2, 8, 8>}]} {
    %c0 = arith.constant 0 : index
    %c0_0 = arith.constant 0 : index
    %c0_1 = arith.constant 0 : index
    %c0_2 = arith.constant 0 : index
    %0 = vector.load %arg2[%c0, %c0_0, %c0_1, %c0_2] : memref<1x8x8x8xbf16, #tpu.memory_space<vmem>>, vector<1x8x8x8xbf16>
    %1 = vector.shape_cast %0 : vector<1x8x8x8xbf16> to vector<8x8x8xbf16>
    %2 = vector.shape_cast %1 : vector<8x8x8xbf16> to vector<64x8xbf16>
    %c0_3 = arith.constant 0 : index
    %c0_4 = arith.constant 0 : index
    %3 = vector.load %arg5[%c0_3, %c0_4] : memref<1x8xf32, #tpu.memory_space<vmem>>, vector<1x8xf32>
    %c0_5 = arith.constant 0 : index
    %c0_6 = arith.constant 0 : index
    %4 = vector.load %arg3[%c0_5, %c0_6] : memref<8x8xbf16, #tpu.memory_space<vmem>>, vector<8x8xbf16>
    %cst = arith.constant dense<0.000000e+00> : vector<64x8xf32>
    %5 = tpu.matmul %2, %4, %cst {dimension_numbers = #tpu.dot_dimension_numbers<[1], [0], [0], [1], [0, 0, 1, 1], [], []>} : vector<64x8xbf16>, vector<8x8xbf16>, vector<64x8xf32> -> vector<64x8xf32>
    %6 = vector.broadcast %3 : vector<1x8xf32> to vector<64x8xf32>
    %7 = arith.addf %5, %6 : vector<64x8xf32>
    %c0_7 = arith.constant 0 : index
    %c0_8 = arith.constant 0 : index
    %8 = vector.load %arg4[%c0_7, %c0_8] : memref<8x8xbf16, #tpu.memory_space<vmem>>, vector<8x8xbf16>
    %cst_9 = arith.constant dense<0.000000e+00> : vector<64x8xf32>
    %9 = tpu.matmul %2, %8, %cst_9 {dimension_numbers = #tpu.dot_dimension_numbers<[1], [0], [0], [1], [0, 0, 1, 1], [], []>} : vector<64x8xbf16>, vector<8x8xbf16>, vector<64x8xf32> -> vector<64x8xf32>
    %10 = vector.broadcast %3 : vector<1x8xf32> to vector<64x8xf32>
    %11 = arith.addf %9, %10 : vector<64x8xf32>
    %12 = vector.shape_cast %7 : vector<64x8xf32> to vector<8x8x8xf32>
    %13 = arith.truncf %12 : vector<8x8x8xf32> to vector<8x8x8xbf16>
    %c0_10 = arith.constant 0 : index
    %c0_11 = arith.constant 0 : index
    %c0_12 = arith.constant 0 : index
    %c0_13 = arith.constant 0 : index
    %c0_14 = arith.constant 0 : index
    %14 = vector.load %arg6[%c0_10, %c0_11, %c0_12, %c0_13, %c0_14] : memref<1x8x2x8x8xbf16, #tpu.memory_space<vmem>>, vector<1x8x1x8x8xbf16>
    %15 = vector.shape_cast %14 : vector<1x8x1x8x8xbf16> to vector<8x8x8xbf16>
    %16 = vector.shape_cast %13 : vector<8x8x8xbf16> to vector<1x8x1x8x8xbf16>
    tpu.vector_store %arg6[%c0_10, %c0_11, %c0_12, %c0_13, %c0_14], %16 {strides = array<i32>} : memref<1x8x2x8x8xbf16, #tpu.memory_space<vmem>>, vector<1x8x1x8x8xbf16>,
    %17 = vector.shape_cast %11 : vector<64x8xf32> to vector<8x8x8xf32>
    %18 = arith.truncf %17 : vector<8x8x8xf32> to vector<8x8x8xbf16>
    %c0_15 = arith.constant 0 : index
    %c0_16 = arith.constant 0 : index
    %c1 = arith.constant 1 : index
    %c0_17 = arith.constant 0 : index
    %c0_18 = arith.constant 0 : index
    %19 = vector.load %arg6[%c0_15, %c0_16, %c1, %c0_17, %c0_18] : memref<1x8x2x8x8xbf16, #tpu.memory_space<vmem>>, vector<1x8x1x8x8xbf16>
    %20 = vector.shape_cast %19 : vector<1x8x1x8x8xbf16> to vector<8x8x8xbf16>
    %21 = vector.shape_cast %18 : vector<8x8x8xbf16> to vector<1x8x1x8x8xbf16>
    tpu.vector_store %arg6[%c0_15, %c0_16, %c1, %c0_17, %c0_18], %21 {strides = array<i32>} : memref<1x8x2x8x8xbf16, #tpu.memory_space<vmem>>, vector<1x8x1x8x8xbf16>,
    return
  }
  func.func @transform_0(%arg0: i32, %arg1: i32) -> (i32, i32, i32, i32) {
    %c0_i32 = arith.constant 0 : i32
    %c0_i32_0 = arith.constant 0 : i32
    %c0_i32_1 = arith.constant 0 : i32
    return %arg0, %arg1, %c0_i32, %c0_i32_0 : i32, i32, i32, i32
  }
  func.func @transform_1(%arg0: i32, %arg1: i32) -> (i32, i32) {
    %c0_i32 = arith.constant 0 : i32
    %c0_i32_0 = arith.constant 0 : i32
    %c0_i32_1 = arith.constant 0 : i32
    return %c0_i32, %c0_i32_0 : i32, i32
  }
  func.func @transform_2(%arg0: i32, %arg1: i32) -> (i32, i32) {
    %c0_i32 = arith.constant 0 : i32
    %c0_i32_0 = arith.constant 0 : i32
    %c0_i32_1 = arith.constant 0 : i32
    return %c0_i32, %c0_i32_0 : i32, i32
  }
  func.func @transform_3(%arg0: i32, %arg1: i32) -> (i32, i32) {
    %c0_i32 = arith.constant 0 : i32
    %c0_i32_0 = arith.constant 0 : i32
    %c0_i32_1 = arith.constant 0 : i32
    return %c0_i32, %c0_i32_0 : i32, i32
  }
  func.func @transform_4(%arg0: i32, %arg1: i32) -> (i32, i32, i32, i32, i32) {
    %c0_i32 = arith.constant 0 : i32
    %c0_i32_0 = arith.constant 0 : i32
    %c0_i32_1 = arith.constant 0 : i32
    %c0_i32_2 = arith.constant 0 : i32
    return %arg0, %arg1, %c0_i32, %c0_i32_0, %c0_i32_1 : i32, i32, i32, i32, i32
  }
}

module attributes {stable_mosaic.version = 11 : i64} {
  func.func @_conv1_kernel(%arg0: i32, %arg1: i32, %arg2: memref<1x16x16x4xbf16, #tpu.memory_space<vmem>>, %arg3: memref<1x16x16x4xbf16, #tpu.memory_space<vmem>>, %arg4: memref<1x1x16x4xbf16, #tpu.memory_space<vmem>>, %arg5: memref<1x1x16x4xbf16, #tpu.memory_space<vmem>>, %arg6: memref<1x1x16x4xbf16, #tpu.memory_space<vmem>>, %arg7: memref<1x1x16x4xbf16, #tpu.memory_space<vmem>>, %arg8: memref<3x24x4xbf16, #tpu.memory_space<vmem>>, %arg9: memref<1x16x16x4xbf16, #tpu.memory_space<vmem>>, %arg10: memref<1x1x2x4xf32, #tpu.memory_space<vmem>>, %arg11: memref<18x18x8xbf16, #tpu.memory_space<vmem>>, %arg12: memref<16x16x24xbf16, #tpu.memory_space<vmem>>) attributes {dimension_semantics = [#tpu.dimension_semantics<parallel>, #tpu.dimension_semantics<parallel>], iteration_bounds = array<i64: 2, 1>, scalar_prefetch = 0 : i64, scratch_operands = 2 : i64, tpu.core_type = #tpu.core_type<tc>, window_params = [{transform_indices = @transform_0, window_bounds = array<i64: 1, 16, 16, 4>}, {transform_indices = @transform_1, window_bounds = array<i64: 1, 16, 16, 4>}, {transform_indices = @transform_2, window_bounds = array<i64: 1, 1, 16, 4>}, {transform_indices = @transform_3, window_bounds = array<i64: 1, 1, 16, 4>}, {transform_indices = @transform_4, window_bounds = array<i64: 1, 1, 16, 4>}, {transform_indices = @transform_5, window_bounds = array<i64: 1, 1, 16, 4>}, {pipeline_mode = #tpu.pipeline_mode<synchronous>, transform_indices = @transform_6, window_bounds = array<i64: 3, 24, 4>}, {transform_indices = @transform_7, window_bounds = array<i64: 1, 16, 16, 4>}, {transform_indices = @transform_8, window_bounds = array<i64: 1, 1, 2, 4>}]} {
    %cst = arith.constant 0.000000e+00 : bf16
    %0 = vector.broadcast %cst : bf16 to vector<18x1x8xbf16>
    %c0 = arith.constant 0 : index
    %c0_0 = arith.constant 0 : index
    %c0_1 = arith.constant 0 : index
    %1 = vector.load %arg11[%c0, %c0_0, %c0_1] : memref<18x18x8xbf16, #tpu.memory_space<vmem>>, vector<18x1x8xbf16>
    tpu.vector_store %arg11[%c0, %c0_0, %c0_1], %0 {strides = array<i32>} : memref<18x18x8xbf16, #tpu.memory_space<vmem>>, vector<18x1x8xbf16>,
    %cst_2 = arith.constant 0.000000e+00 : bf16
    %2 = vector.broadcast %cst_2 : bf16 to vector<18x1x8xbf16>
    %c0_3 = arith.constant 0 : index
    %c17 = arith.constant 17 : index
    %c0_4 = arith.constant 0 : index
    %3 = vector.load %arg11[%c0_3, %c17, %c0_4] : memref<18x18x8xbf16, #tpu.memory_space<vmem>>, vector<18x1x8xbf16>
    tpu.vector_store %arg11[%c0_3, %c17, %c0_4], %2 {strides = array<i32>} : memref<18x18x8xbf16, #tpu.memory_space<vmem>>, vector<18x1x8xbf16>,
    %c0_5 = arith.constant 0 : index
    %c0_6 = arith.constant 0 : index
    %c0_7 = arith.constant 0 : index
    %c0_8 = arith.constant 0 : index
    %4 = vector.load %arg2[%c0_5, %c0_6, %c0_7, %c0_8] : memref<1x16x16x4xbf16, #tpu.memory_space<vmem>>, vector<1x16x16x4xbf16>
    %5 = vector.shape_cast %4 : vector<1x16x16x4xbf16> to vector<16x16x4xbf16>
    %c1 = arith.constant 1 : index
    %c1_9 = arith.constant 1 : index
    %c0_10 = arith.constant 0 : index
    %6 = vector.load %arg11[%c1, %c1_9, %c0_10] : memref<18x18x8xbf16, #tpu.memory_space<vmem>>, vector<16x16x4xbf16>
    tpu.vector_store %arg11[%c1, %c1_9, %c0_10], %5 {strides = array<i32>} : memref<18x18x8xbf16, #tpu.memory_space<vmem>>, vector<16x16x4xbf16>,
    %c0_11 = arith.constant 0 : index
    %c0_12 = arith.constant 0 : index
    %c0_13 = arith.constant 0 : index
    %c0_14 = arith.constant 0 : index
    %7 = vector.load %arg3[%c0_11, %c0_12, %c0_13, %c0_14] : memref<1x16x16x4xbf16, #tpu.memory_space<vmem>>, vector<1x16x16x4xbf16>
    %8 = vector.shape_cast %7 : vector<1x16x16x4xbf16> to vector<16x16x4xbf16>
    %c1_15 = arith.constant 1 : index
    %c1_16 = arith.constant 1 : index
    %c4 = arith.constant 4 : index
    %9 = vector.load %arg11[%c1_15, %c1_16, %c4] : memref<18x18x8xbf16, #tpu.memory_space<vmem>>, vector<16x16x4xbf16>
    tpu.vector_store %arg11[%c1_15, %c1_16, %c4], %8 {strides = array<i32>} : memref<18x18x8xbf16, #tpu.memory_space<vmem>>, vector<16x16x4xbf16>,
    %c0_i32 = arith.constant 0 : i32
    %10 = arith.cmpi sgt, %arg1, %c0_i32 : i32
    %11 = arith.extui %10 : i1 to i32
    %c0_i32_17 = arith.constant 0 : i32
    %12 = arith.cmpi ne, %11, %c0_i32_17 : i32
    scf.if %12 {
      %c0_110 = arith.constant 0 : index
      %c0_111 = arith.constant 0 : index
      %c0_112 = arith.constant 0 : index
      %c0_113 = arith.constant 0 : index
      %71 = vector.load %arg4[%c0_110, %c0_111, %c0_112, %c0_113] : memref<1x1x16x4xbf16, #tpu.memory_space<vmem>>, vector<1x1x16x4xbf16>
      %72 = vector.shape_cast %71 : vector<1x1x16x4xbf16> to vector<1x16x4xbf16>
      %c0_114 = arith.constant 0 : index
      %c1_115 = arith.constant 1 : index
      %c0_116 = arith.constant 0 : index
      %73 = vector.load %arg11[%c0_114, %c1_115, %c0_116] : memref<18x18x8xbf16, #tpu.memory_space<vmem>>, vector<1x16x4xbf16>
      tpu.vector_store %arg11[%c0_114, %c1_115, %c0_116], %72 {strides = array<i32>} : memref<18x18x8xbf16, #tpu.memory_space<vmem>>, vector<1x16x4xbf16>,
      %c0_117 = arith.constant 0 : index
      %c0_118 = arith.constant 0 : index
      %c0_119 = arith.constant 0 : index
      %c0_120 = arith.constant 0 : index
      %74 = vector.load %arg5[%c0_117, %c0_118, %c0_119, %c0_120] : memref<1x1x16x4xbf16, #tpu.memory_space<vmem>>, vector<1x1x16x4xbf16>
      %75 = vector.shape_cast %74 : vector<1x1x16x4xbf16> to vector<1x16x4xbf16>
      %c0_121 = arith.constant 0 : index
      %c1_122 = arith.constant 1 : index
      %c4_123 = arith.constant 4 : index
      %76 = vector.load %arg11[%c0_121, %c1_122, %c4_123] : memref<18x18x8xbf16, #tpu.memory_space<vmem>>, vector<1x16x4xbf16>
      tpu.vector_store %arg11[%c0_121, %c1_122, %c4_123], %75 {strides = array<i32>} : memref<18x18x8xbf16, #tpu.memory_space<vmem>>, vector<1x16x4xbf16>,
    } else {
    }
    %c0_i32_18 = arith.constant 0 : i32
    %13 = arith.cmpi eq, %arg1, %c0_i32_18 : i32
    %14 = arith.extui %13 : i1 to i32
    %c0_i32_19 = arith.constant 0 : i32
    %15 = arith.cmpi ne, %14, %c0_i32_19 : i32
    scf.if %15 {
      %cst_110 = arith.constant 0.000000e+00 : bf16
      %71 = vector.broadcast %cst_110 : bf16 to vector<1x16x8xbf16>
      %c0_111 = arith.constant 0 : index
      %c1_112 = arith.constant 1 : index
      %c0_113 = arith.constant 0 : index
      %72 = vector.load %arg11[%c0_111, %c1_112, %c0_113] : memref<18x18x8xbf16, #tpu.memory_space<vmem>>, vector<1x16x8xbf16>
      tpu.vector_store %arg11[%c0_111, %c1_112, %c0_113], %71 {strides = array<i32>} : memref<18x18x8xbf16, #tpu.memory_space<vmem>>, vector<1x16x8xbf16>,
    } else {
    }
    %c0_i32_20 = arith.constant 0 : i32
    %16 = arith.cmpi slt, %arg1, %c0_i32_20 : i32
    %17 = arith.extui %16 : i1 to i32
    %c0_i32_21 = arith.constant 0 : i32
    %18 = arith.cmpi ne, %17, %c0_i32_21 : i32
    scf.if %18 {
      %c0_110 = arith.constant 0 : index
      %c0_111 = arith.constant 0 : index
      %c0_112 = arith.constant 0 : index
      %c0_113 = arith.constant 0 : index
      %71 = vector.load %arg6[%c0_110, %c0_111, %c0_112, %c0_113] : memref<1x1x16x4xbf16, #tpu.memory_space<vmem>>, vector<1x1x16x4xbf16>
      %72 = vector.shape_cast %71 : vector<1x1x16x4xbf16> to vector<1x16x4xbf16>
      %c17_114 = arith.constant 17 : index
      %c1_115 = arith.constant 1 : index
      %c0_116 = arith.constant 0 : index
      %73 = vector.load %arg11[%c17_114, %c1_115, %c0_116] : memref<18x18x8xbf16, #tpu.memory_space<vmem>>, vector<1x16x4xbf16>
      tpu.vector_store %arg11[%c17_114, %c1_115, %c0_116], %72 {strides = array<i32>} : memref<18x18x8xbf16, #tpu.memory_space<vmem>>, vector<1x16x4xbf16>,
      %c0_117 = arith.constant 0 : index
      %c0_118 = arith.constant 0 : index
      %c0_119 = arith.constant 0 : index
      %c0_120 = arith.constant 0 : index
      %74 = vector.load %arg7[%c0_117, %c0_118, %c0_119, %c0_120] : memref<1x1x16x4xbf16, #tpu.memory_space<vmem>>, vector<1x1x16x4xbf16>
      %75 = vector.shape_cast %74 : vector<1x1x16x4xbf16> to vector<1x16x4xbf16>
      %c17_121 = arith.constant 17 : index
      %c1_122 = arith.constant 1 : index
      %c4_123 = arith.constant 4 : index
      %76 = vector.load %arg11[%c17_121, %c1_122, %c4_123] : memref<18x18x8xbf16, #tpu.memory_space<vmem>>, vector<1x16x4xbf16>
      tpu.vector_store %arg11[%c17_121, %c1_122, %c4_123], %75 {strides = array<i32>} : memref<18x18x8xbf16, #tpu.memory_space<vmem>>, vector<1x16x4xbf16>,
    } else {
    }
    %c0_i32_22 = arith.constant 0 : i32
    %19 = arith.cmpi eq, %arg1, %c0_i32_22 : i32
    %20 = arith.extui %19 : i1 to i32
    %c0_i32_23 = arith.constant 0 : i32
    %21 = arith.cmpi ne, %20, %c0_i32_23 : i32
    scf.if %21 {
      %cst_110 = arith.constant 0.000000e+00 : bf16
      %71 = vector.broadcast %cst_110 : bf16 to vector<1x16x8xbf16>
      %c17_111 = arith.constant 17 : index
      %c1_112 = arith.constant 1 : index
      %c0_113 = arith.constant 0 : index
      %72 = vector.load %arg11[%c17_111, %c1_112, %c0_113] : memref<18x18x8xbf16, #tpu.memory_space<vmem>>, vector<1x16x8xbf16>
      tpu.vector_store %arg11[%c17_111, %c1_112, %c0_113], %71 {strides = array<i32>} : memref<18x18x8xbf16, #tpu.memory_space<vmem>>, vector<1x16x8xbf16>,
    } else {
    }
    %c0_24 = arith.constant 0 : index
    %c0_25 = arith.constant 0 : index
    %c0_26 = arith.constant 0 : index
    %22 = vector.load %arg11[%c0_24, %c0_25, %c0_26] : memref<18x18x8xbf16, #tpu.memory_space<vmem>>, vector<16x16x8xbf16>
    %c0_27 = arith.constant 0 : index
    %c0_28 = arith.constant 0 : index
    %c0_29 = arith.constant 0 : index
    %23 = vector.load %arg12[%c0_27, %c0_28, %c0_29] : memref<16x16x24xbf16, #tpu.memory_space<vmem>>, vector<16x16x8xbf16>
    tpu.vector_store %arg12[%c0_27, %c0_28, %c0_29], %22 {strides = array<i32>} : memref<16x16x24xbf16, #tpu.memory_space<vmem>>, vector<16x16x8xbf16>,
    %c0_30 = arith.constant 0 : index
    %c1_31 = arith.constant 1 : index
    %c0_32 = arith.constant 0 : index
    %24 = vector.load %arg11[%c0_30, %c1_31, %c0_32] : memref<18x18x8xbf16, #tpu.memory_space<vmem>>, vector<16x16x8xbf16>
    %c0_33 = arith.constant 0 : index
    %c0_34 = arith.constant 0 : index
    %c8 = arith.constant 8 : index
    %25 = vector.load %arg12[%c0_33, %c0_34, %c8] : memref<16x16x24xbf16, #tpu.memory_space<vmem>>, vector<16x16x8xbf16>
    tpu.vector_store %arg12[%c0_33, %c0_34, %c8], %24 {strides = array<i32>} : memref<16x16x24xbf16, #tpu.memory_space<vmem>>, vector<16x16x8xbf16>,
    %c0_35 = arith.constant 0 : index
    %c2 = arith.constant 2 : index
    %c0_36 = arith.constant 0 : index
    %26 = vector.load %arg11[%c0_35, %c2, %c0_36] : memref<18x18x8xbf16, #tpu.memory_space<vmem>>, vector<16x16x8xbf16>
    %c0_37 = arith.constant 0 : index
    %c0_38 = arith.constant 0 : index
    %c16 = arith.constant 16 : index
    %27 = vector.load %arg12[%c0_37, %c0_38, %c16] : memref<16x16x24xbf16, #tpu.memory_space<vmem>>, vector<16x16x8xbf16>
    tpu.vector_store %arg12[%c0_37, %c0_38, %c16], %26 {strides = array<i32>} : memref<16x16x24xbf16, #tpu.memory_space<vmem>>, vector<16x16x8xbf16>,
    %c0_39 = arith.constant 0 : index
    %c0_40 = arith.constant 0 : index
    %c0_41 = arith.constant 0 : index
    %28 = vector.load %arg12[%c0_39, %c0_40, %c0_41] : memref<16x16x24xbf16, #tpu.memory_space<vmem>>, vector<16x16x24xbf16>
    %29 = vector.shape_cast %28 : vector<16x16x24xbf16> to vector<256x24xbf16>
    %c0_42 = arith.constant 0 : index
    %c0_43 = arith.constant 0 : index
    %c0_44 = arith.constant 0 : index
    %30 = vector.load %arg8[%c0_42, %c0_43, %c0_44] : memref<3x24x4xbf16, #tpu.memory_space<vmem>>, vector<1x24x4xbf16>
    %31 = vector.shape_cast %30 : vector<1x24x4xbf16> to vector<24x4xbf16>
    %cst_45 = arith.constant dense<0.000000e+00> : vector<256x4xf32>
    %32 = tpu.matmul %29, %31, %cst_45 {dimension_numbers = #tpu.dot_dimension_numbers<[1], [0], [0], [1], [0, 0, 1, 1], [], []>} : vector<256x24xbf16>, vector<24x4xbf16>, vector<256x4xf32> -> vector<256x4xf32>
    %c1_46 = arith.constant 1 : index
    %c0_47 = arith.constant 0 : index
    %c0_48 = arith.constant 0 : index
    %33 = vector.load %arg11[%c1_46, %c0_47, %c0_48] : memref<18x18x8xbf16, #tpu.memory_space<vmem>>, vector<16x16x8xbf16>
    %c0_49 = arith.constant 0 : index
    %c0_50 = arith.constant 0 : index
    %c0_51 = arith.constant 0 : index
    %34 = vector.load %arg12[%c0_49, %c0_50, %c0_51] : memref<16x16x24xbf16, #tpu.memory_space<vmem>>, vector<16x16x8xbf16>
    tpu.vector_store %arg12[%c0_49, %c0_50, %c0_51], %33 {strides = array<i32>} : memref<16x16x24xbf16, #tpu.memory_space<vmem>>, vector<16x16x8xbf16>,
    %c1_52 = arith.constant 1 : index
    %c1_53 = arith.constant 1 : index
    %c0_54 = arith.constant 0 : index
    %35 = vector.load %arg11[%c1_52, %c1_53, %c0_54] : memref<18x18x8xbf16, #tpu.memory_space<vmem>>, vector<16x16x8xbf16>
    %c0_55 = arith.constant 0 : index
    %c0_56 = arith.constant 0 : index
    %c8_57 = arith.constant 8 : index
    %36 = vector.load %arg12[%c0_55, %c0_56, %c8_57] : memref<16x16x24xbf16, #tpu.memory_space<vmem>>, vector<16x16x8xbf16>
    tpu.vector_store %arg12[%c0_55, %c0_56, %c8_57], %35 {strides = array<i32>} : memref<16x16x24xbf16, #tpu.memory_space<vmem>>, vector<16x16x8xbf16>,
    %c1_58 = arith.constant 1 : index
    %c2_59 = arith.constant 2 : index
    %c0_60 = arith.constant 0 : index
    %37 = vector.load %arg11[%c1_58, %c2_59, %c0_60] : memref<18x18x8xbf16, #tpu.memory_space<vmem>>, vector<16x16x8xbf16>
    %c0_61 = arith.constant 0 : index
    %c0_62 = arith.constant 0 : index
    %c16_63 = arith.constant 16 : index
    %38 = vector.load %arg12[%c0_61, %c0_62, %c16_63] : memref<16x16x24xbf16, #tpu.memory_space<vmem>>, vector<16x16x8xbf16>
    tpu.vector_store %arg12[%c0_61, %c0_62, %c16_63], %37 {strides = array<i32>} : memref<16x16x24xbf16, #tpu.memory_space<vmem>>, vector<16x16x8xbf16>,
    %c0_64 = arith.constant 0 : index
    %c0_65 = arith.constant 0 : index
    %c0_66 = arith.constant 0 : index
    %39 = vector.load %arg12[%c0_64, %c0_65, %c0_66] : memref<16x16x24xbf16, #tpu.memory_space<vmem>>, vector<16x16x24xbf16>
    %40 = vector.shape_cast %39 : vector<16x16x24xbf16> to vector<256x24xbf16>
    %c1_67 = arith.constant 1 : index
    %c0_68 = arith.constant 0 : index
    %c0_69 = arith.constant 0 : index
    %41 = vector.load %arg8[%c1_67, %c0_68, %c0_69] : memref<3x24x4xbf16, #tpu.memory_space<vmem>>, vector<1x24x4xbf16>
    %42 = vector.shape_cast %41 : vector<1x24x4xbf16> to vector<24x4xbf16>
    %cst_70 = arith.constant dense<0.000000e+00> : vector<256x4xf32>
    %43 = tpu.matmul %40, %42, %cst_70 {dimension_numbers = #tpu.dot_dimension_numbers<[1], [0], [0], [1], [0, 0, 1, 1], [], []>} : vector<256x24xbf16>, vector<24x4xbf16>, vector<256x4xf32> -> vector<256x4xf32>
    %44 = arith.addf %32, %43 : vector<256x4xf32>
    %c2_71 = arith.constant 2 : index
    %c0_72 = arith.constant 0 : index
    %c0_73 = arith.constant 0 : index
    %45 = vector.load %arg11[%c2_71, %c0_72, %c0_73] : memref<18x18x8xbf16, #tpu.memory_space<vmem>>, vector<16x16x8xbf16>
    %c0_74 = arith.constant 0 : index
    %c0_75 = arith.constant 0 : index
    %c0_76 = arith.constant 0 : index
    %46 = vector.load %arg12[%c0_74, %c0_75, %c0_76] : memref<16x16x24xbf16, #tpu.memory_space<vmem>>, vector<16x16x8xbf16>
    tpu.vector_store %arg12[%c0_74, %c0_75, %c0_76], %45 {strides = array<i32>} : memref<16x16x24xbf16, #tpu.memory_space<vmem>>, vector<16x16x8xbf16>,
    %c2_77 = arith.constant 2 : index
    %c1_78 = arith.constant 1 : index
    %c0_79 = arith.constant 0 : index
    %47 = vector.load %arg11[%c2_77, %c1_78, %c0_79] : memref<18x18x8xbf16, #tpu.memory_space<vmem>>, vector<16x16x8xbf16>
    %c0_80 = arith.constant 0 : index
    %c0_81 = arith.constant 0 : index
    %c8_82 = arith.constant 8 : index
    %48 = vector.load %arg12[%c0_80, %c0_81, %c8_82] : memref<16x16x24xbf16, #tpu.memory_space<vmem>>, vector<16x16x8xbf16>
    tpu.vector_store %arg12[%c0_80, %c0_81, %c8_82], %47 {strides = array<i32>} : memref<16x16x24xbf16, #tpu.memory_space<vmem>>, vector<16x16x8xbf16>,
    %c2_83 = arith.constant 2 : index
    %c2_84 = arith.constant 2 : index
    %c0_85 = arith.constant 0 : index
    %49 = vector.load %arg11[%c2_83, %c2_84, %c0_85] : memref<18x18x8xbf16, #tpu.memory_space<vmem>>, vector<16x16x8xbf16>
    %c0_86 = arith.constant 0 : index
    %c0_87 = arith.constant 0 : index
    %c16_88 = arith.constant 16 : index
    %50 = vector.load %arg12[%c0_86, %c0_87, %c16_88] : memref<16x16x24xbf16, #tpu.memory_space<vmem>>, vector<16x16x8xbf16>
    tpu.vector_store %arg12[%c0_86, %c0_87, %c16_88], %49 {strides = array<i32>} : memref<16x16x24xbf16, #tpu.memory_space<vmem>>, vector<16x16x8xbf16>,
    %c0_89 = arith.constant 0 : index
    %c0_90 = arith.constant 0 : index
    %c0_91 = arith.constant 0 : index
    %51 = vector.load %arg12[%c0_89, %c0_90, %c0_91] : memref<16x16x24xbf16, #tpu.memory_space<vmem>>, vector<16x16x24xbf16>
    %52 = vector.shape_cast %51 : vector<16x16x24xbf16> to vector<256x24xbf16>
    %c2_92 = arith.constant 2 : index
    %c0_93 = arith.constant 0 : index
    %c0_94 = arith.constant 0 : index
    %53 = vector.load %arg8[%c2_92, %c0_93, %c0_94] : memref<3x24x4xbf16, #tpu.memory_space<vmem>>, vector<1x24x4xbf16>
    %54 = vector.shape_cast %53 : vector<1x24x4xbf16> to vector<24x4xbf16>
    %cst_95 = arith.constant dense<0.000000e+00> : vector<256x4xf32>
    %55 = tpu.matmul %52, %54, %cst_95 {dimension_numbers = #tpu.dot_dimension_numbers<[1], [0], [0], [1], [0, 0, 1, 1], [], []>} : vector<256x24xbf16>, vector<24x4xbf16>, vector<256x4xf32> -> vector<256x4xf32>
    %56 = arith.addf %44, %55 : vector<256x4xf32>
    %57 = vector.shape_cast %56 : vector<256x4xf32> to vector<1x16x16x4xf32>
    %58 = arith.truncf %57 : vector<1x16x16x4xf32> to vector<1x16x16x4xbf16>
    %c0_96 = arith.constant 0 : index
    %c0_97 = arith.constant 0 : index
    %c0_98 = arith.constant 0 : index
    %c0_99 = arith.constant 0 : index
    %59 = vector.load %arg9[%c0_96, %c0_97, %c0_98, %c0_99] : memref<1x16x16x4xbf16, #tpu.memory_space<vmem>>, vector<1x16x16x4xbf16>
    tpu.vector_store %arg9[%c0_96, %c0_97, %c0_98, %c0_99], %58 {strides = array<i32>} : memref<1x16x16x4xbf16, #tpu.memory_space<vmem>>, vector<1x16x16x4xbf16>,
    %cst_100 = arith.constant dense<0.000000e+00> : vector<4xf32>
    %60 = vector.multi_reduction <add>, %56, %cst_100 [0] : vector<256x4xf32> to vector<4xf32>
    %61 = vector.shape_cast %60 : vector<4xf32> to vector<1x4xf32>
    %c0_101 = arith.constant 0 : index
    %c0_102 = arith.constant 0 : index
    %c0_103 = arith.constant 0 : index
    %c0_104 = arith.constant 0 : index
    %62 = vector.load %arg10[%c0_101, %c0_102, %c0_103, %c0_104] : memref<1x1x2x4xf32, #tpu.memory_space<vmem>>, vector<1x1x1x4xf32>
    %63 = vector.shape_cast %62 : vector<1x1x1x4xf32> to vector<1x4xf32>
    %64 = vector.shape_cast %61 : vector<1x4xf32> to vector<1x1x1x4xf32>
    tpu.vector_store %arg10[%c0_101, %c0_102, %c0_103, %c0_104], %64 {strides = array<i32>} : memref<1x1x2x4xf32, #tpu.memory_space<vmem>>, vector<1x1x1x4xf32>,
    %65 = arith.mulf %56, %56 : vector<256x4xf32>
    %cst_105 = arith.constant dense<0.000000e+00> : vector<4xf32>
    %66 = vector.multi_reduction <add>, %65, %cst_105 [0] : vector<256x4xf32> to vector<4xf32>
    %67 = vector.shape_cast %66 : vector<4xf32> to vector<1x4xf32>
    %c0_106 = arith.constant 0 : index
    %c0_107 = arith.constant 0 : index
    %c1_108 = arith.constant 1 : index
    %c0_109 = arith.constant 0 : index
    %68 = vector.load %arg10[%c0_106, %c0_107, %c1_108, %c0_109] : memref<1x1x2x4xf32, #tpu.memory_space<vmem>>, vector<1x1x1x4xf32>
    %69 = vector.shape_cast %68 : vector<1x1x1x4xf32> to vector<1x4xf32>
    %70 = vector.shape_cast %67 : vector<1x4xf32> to vector<1x1x1x4xf32>
    tpu.vector_store %arg10[%c0_106, %c0_107, %c1_108, %c0_109], %70 {strides = array<i32>} : memref<1x1x2x4xf32, #tpu.memory_space<vmem>>, vector<1x1x1x4xf32>,
    return
  }
  func.func @transform_0(%arg0: i32, %arg1: i32) -> (i32, i32, i32, i32) {
    %c0_i32 = arith.constant 0 : i32
    %c0_i32_0 = arith.constant 0 : i32
    %c0_i32_1 = arith.constant 0 : i32
    return %arg0, %arg1, %c0_i32, %c0_i32_0 : i32, i32, i32, i32
  }
  func.func @transform_1(%arg0: i32, %arg1: i32) -> (i32, i32, i32, i32) {
    %c0_i32 = arith.constant 0 : i32
    %c0_i32_0 = arith.constant 0 : i32
    %c0_i32_1 = arith.constant 0 : i32
    return %arg0, %arg1, %c0_i32, %c0_i32_0 : i32, i32, i32, i32
  }
  func.func @transform_2(%arg0: i32, %arg1: i32) -> (i32, i32, i32, i32) {
    %c16_i32 = arith.constant 16 : i32
    %0 = arith.muli %arg1, %c16_i32 : i32
    %c1_i32 = arith.constant 1 : i32
    %1 = arith.subi %0, %c1_i32 : i32
    %c0_i32 = arith.constant 0 : i32
    %2 = arith.maxsi %1, %c0_i32 : i32
    %c0_i32_0 = arith.constant 0 : i32
    %c0_i32_1 = arith.constant 0 : i32
    %c0_i32_2 = arith.constant 0 : i32
    return %arg0, %2, %c0_i32_0, %c0_i32_1 : i32, i32, i32, i32
  }
  func.func @transform_3(%arg0: i32, %arg1: i32) -> (i32, i32, i32, i32) {
    %c16_i32 = arith.constant 16 : i32
    %0 = arith.muli %arg1, %c16_i32 : i32
    %c1_i32 = arith.constant 1 : i32
    %1 = arith.subi %0, %c1_i32 : i32
    %c0_i32 = arith.constant 0 : i32
    %2 = arith.maxsi %1, %c0_i32 : i32
    %c0_i32_0 = arith.constant 0 : i32
    %c0_i32_1 = arith.constant 0 : i32
    %c0_i32_2 = arith.constant 0 : i32
    return %arg0, %2, %c0_i32_0, %c0_i32_1 : i32, i32, i32, i32
  }
  func.func @transform_4(%arg0: i32, %arg1: i32) -> (i32, i32, i32, i32) {
    %c16_i32 = arith.constant 16 : i32
    %0 = arith.muli %arg1, %c16_i32 : i32
    %c16_i32_0 = arith.constant 16 : i32
    %1 = arith.addi %0, %c16_i32_0 : i32
    %c15_i32 = arith.constant 15 : i32
    %2 = arith.minsi %1, %c15_i32 : i32
    %c0_i32 = arith.constant 0 : i32
    %c0_i32_1 = arith.constant 0 : i32
    %c0_i32_2 = arith.constant 0 : i32
    return %arg0, %2, %c0_i32, %c0_i32_1 : i32, i32, i32, i32
  }
  func.func @transform_5(%arg0: i32, %arg1: i32) -> (i32, i32, i32, i32) {
    %c16_i32 = arith.constant 16 : i32
    %0 = arith.muli %arg1, %c16_i32 : i32
    %c16_i32_0 = arith.constant 16 : i32
    %1 = arith.addi %0, %c16_i32_0 : i32
    %c15_i32 = arith.constant 15 : i32
    %2 = arith.minsi %1, %c15_i32 : i32
    %c0_i32 = arith.constant 0 : i32
    %c0_i32_1 = arith.constant 0 : i32
    %c0_i32_2 = arith.constant 0 : i32
    return %arg0, %2, %c0_i32, %c0_i32_1 : i32, i32, i32, i32
  }
  func.func @transform_6(%arg0: i32, %arg1: i32) -> (i32, i32, i32) {
    %c0_i32 = arith.constant 0 : i32
    %c0_i32_0 = arith.constant 0 : i32
    %c0_i32_1 = arith.constant 0 : i32
    %c0_i32_2 = arith.constant 0 : i32
    return %c0_i32, %c0_i32_0, %c0_i32_1 : i32, i32, i32
  }
  func.func @transform_7(%arg0: i32, %arg1: i32) -> (i32, i32, i32, i32) {
    %c0_i32 = arith.constant 0 : i32
    %c0_i32_0 = arith.constant 0 : i32
    %c0_i32_1 = arith.constant 0 : i32
    return %arg0, %arg1, %c0_i32, %c0_i32_0 : i32, i32, i32, i32
  }
  func.func @transform_8(%arg0: i32, %arg1: i32) -> (i32, i32, i32, i32) {
    %c0_i32 = arith.constant 0 : i32
    %c0_i32_0 = arith.constant 0 : i32
    %c0_i32_1 = arith.constant 0 : i32
    return %arg0, %arg1, %c0_i32, %c0_i32_0 : i32, i32, i32, i32
  }
}

module attributes {stable_mosaic.version = 11 : i64} {
  func.func @_conv2_kernel(%arg0: i32, %arg1: i32, %arg2: memref<1x16x16x4xbf16, #tpu.memory_space<vmem>>, %arg3: memref<1x1x16x4xbf16, #tpu.memory_space<vmem>>, %arg4: memref<1x1x16x4xbf16, #tpu.memory_space<vmem>>, %arg5: memref<1x4xf32, #tpu.memory_space<vmem>>, %arg6: memref<1x4xf32, #tpu.memory_space<vmem>>, %arg7: memref<3x12x4xbf16, #tpu.memory_space<vmem>>, %arg8: memref<1x16x16x4xbf16, #tpu.memory_space<vmem>>, %arg9: memref<1x1x2x4xf32, #tpu.memory_space<vmem>>, %arg10: memref<18x18x4xbf16, #tpu.memory_space<vmem>>, %arg11: memref<16x16x12xbf16, #tpu.memory_space<vmem>>) attributes {dimension_semantics = [#tpu.dimension_semantics<parallel>, #tpu.dimension_semantics<parallel>], iteration_bounds = array<i64: 2, 1>, scalar_prefetch = 0 : i64, scratch_operands = 2 : i64, tpu.core_type = #tpu.core_type<tc>, window_params = [{transform_indices = @transform_0, window_bounds = array<i64: 1, 16, 16, 4>}, {transform_indices = @transform_1, window_bounds = array<i64: 1, 1, 16, 4>}, {transform_indices = @transform_2, window_bounds = array<i64: 1, 1, 16, 4>}, {pipeline_mode = #tpu.pipeline_mode<synchronous>, transform_indices = @transform_3, window_bounds = array<i64: 1, 4>}, {pipeline_mode = #tpu.pipeline_mode<synchronous>, transform_indices = @transform_4, window_bounds = array<i64: 1, 4>}, {pipeline_mode = #tpu.pipeline_mode<synchronous>, transform_indices = @transform_5, window_bounds = array<i64: 3, 12, 4>}, {transform_indices = @transform_6, window_bounds = array<i64: 1, 16, 16, 4>}, {transform_indices = @transform_7, window_bounds = array<i64: 1, 1, 2, 4>}]} {
    %c0 = arith.constant 0 : index
    %c0_0 = arith.constant 0 : index
    %0 = vector.load %arg5[%c0, %c0_0] : memref<1x4xf32, #tpu.memory_space<vmem>>, vector<1x4xf32>
    %1 = vector.shape_cast %0 : vector<1x4xf32> to vector<4xf32>
    %c0_1 = arith.constant 0 : index
    %c0_2 = arith.constant 0 : index
    %2 = vector.load %arg6[%c0_1, %c0_2] : memref<1x4xf32, #tpu.memory_space<vmem>>, vector<1x4xf32>
    %3 = vector.shape_cast %2 : vector<1x4xf32> to vector<4xf32>
    %cst = arith.constant 0.000000e+00 : bf16
    %4 = vector.broadcast %cst : bf16 to vector<18x1x4xbf16>
    %c0_3 = arith.constant 0 : index
    %c0_4 = arith.constant 0 : index
    %c0_5 = arith.constant 0 : index
    %5 = vector.load %arg10[%c0_3, %c0_4, %c0_5] : memref<18x18x4xbf16, #tpu.memory_space<vmem>>, vector<18x1x4xbf16>
    tpu.vector_store %arg10[%c0_3, %c0_4, %c0_5], %4 {strides = array<i32>} : memref<18x18x4xbf16, #tpu.memory_space<vmem>>, vector<18x1x4xbf16>,
    %cst_6 = arith.constant 0.000000e+00 : bf16
    %6 = vector.broadcast %cst_6 : bf16 to vector<18x1x4xbf16>
    %c0_7 = arith.constant 0 : index
    %c17 = arith.constant 17 : index
    %c0_8 = arith.constant 0 : index
    %7 = vector.load %arg10[%c0_7, %c17, %c0_8] : memref<18x18x4xbf16, #tpu.memory_space<vmem>>, vector<18x1x4xbf16>
    tpu.vector_store %arg10[%c0_7, %c17, %c0_8], %6 {strides = array<i32>} : memref<18x18x4xbf16, #tpu.memory_space<vmem>>, vector<18x1x4xbf16>,
    %c0_9 = arith.constant 0 : index
    %c0_10 = arith.constant 0 : index
    %c0_11 = arith.constant 0 : index
    %c0_12 = arith.constant 0 : index
    %8 = vector.load %arg2[%c0_9, %c0_10, %c0_11, %c0_12] : memref<1x16x16x4xbf16, #tpu.memory_space<vmem>>, vector<1x16x16x4xbf16>
    %9 = vector.shape_cast %8 : vector<1x16x16x4xbf16> to vector<16x16x4xbf16>
    %10 = arith.extf %9 : vector<16x16x4xbf16> to vector<16x16x4xf32>
    %11 = vector.shape_cast %1 : vector<4xf32> to vector<1x1x4xf32>
    %12 = vector.broadcast %11 : vector<1x1x4xf32> to vector<16x16x4xf32>
    %13 = arith.mulf %10, %12 : vector<16x16x4xf32>
    %14 = vector.shape_cast %3 : vector<4xf32> to vector<1x1x4xf32>
    %15 = vector.broadcast %14 : vector<1x1x4xf32> to vector<16x16x4xf32>
    %16 = arith.addf %13, %15 : vector<16x16x4xf32>
    %cst_13 = arith.constant 0.000000e+00 : f32
    %17 = vector.broadcast %cst_13 : f32 to vector<16x16x4xf32>
    %18 = arith.maximumf %16, %17 : vector<16x16x4xf32>
    %19 = arith.truncf %18 : vector<16x16x4xf32> to vector<16x16x4xbf16>
    %c1 = arith.constant 1 : index
    %c1_14 = arith.constant 1 : index
    %c0_15 = arith.constant 0 : index
    %20 = vector.load %arg10[%c1, %c1_14, %c0_15] : memref<18x18x4xbf16, #tpu.memory_space<vmem>>, vector<16x16x4xbf16>
    tpu.vector_store %arg10[%c1, %c1_14, %c0_15], %19 {strides = array<i32>} : memref<18x18x4xbf16, #tpu.memory_space<vmem>>, vector<16x16x4xbf16>,
    %c0_i32 = arith.constant 0 : i32
    %21 = arith.cmpi sgt, %arg1, %c0_i32 : i32
    %22 = arith.extui %21 : i1 to i32
    %c0_i32_16 = arith.constant 0 : i32
    %23 = arith.cmpi ne, %22, %c0_i32_16 : i32
    scf.if %23 {
      %c0_109 = arith.constant 0 : index
      %c0_110 = arith.constant 0 : index
      %c0_111 = arith.constant 0 : index
      %c0_112 = arith.constant 0 : index
      %82 = vector.load %arg3[%c0_109, %c0_110, %c0_111, %c0_112] : memref<1x1x16x4xbf16, #tpu.memory_space<vmem>>, vector<1x1x16x4xbf16>
      %83 = vector.shape_cast %82 : vector<1x1x16x4xbf16> to vector<1x16x4xbf16>
      %84 = arith.extf %83 : vector<1x16x4xbf16> to vector<1x16x4xf32>
      %85 = vector.shape_cast %1 : vector<4xf32> to vector<1x1x4xf32>
      %86 = vector.broadcast %85 : vector<1x1x4xf32> to vector<1x16x4xf32>
      %87 = arith.mulf %84, %86 : vector<1x16x4xf32>
      %88 = vector.shape_cast %3 : vector<4xf32> to vector<1x1x4xf32>
      %89 = vector.broadcast %88 : vector<1x1x4xf32> to vector<1x16x4xf32>
      %90 = arith.addf %87, %89 : vector<1x16x4xf32>
      %cst_113 = arith.constant 0.000000e+00 : f32
      %91 = vector.broadcast %cst_113 : f32 to vector<1x16x4xf32>
      %92 = arith.maximumf %90, %91 : vector<1x16x4xf32>
      %93 = arith.truncf %92 : vector<1x16x4xf32> to vector<1x16x4xbf16>
      %c0_114 = arith.constant 0 : index
      %c1_115 = arith.constant 1 : index
      %c0_116 = arith.constant 0 : index
      %94 = vector.load %arg10[%c0_114, %c1_115, %c0_116] : memref<18x18x4xbf16, #tpu.memory_space<vmem>>, vector<1x16x4xbf16>
      tpu.vector_store %arg10[%c0_114, %c1_115, %c0_116], %93 {strides = array<i32>} : memref<18x18x4xbf16, #tpu.memory_space<vmem>>, vector<1x16x4xbf16>,
    } else {
    }
    %c0_i32_17 = arith.constant 0 : i32
    %24 = arith.cmpi eq, %arg1, %c0_i32_17 : i32
    %25 = arith.extui %24 : i1 to i32
    %c0_i32_18 = arith.constant 0 : i32
    %26 = arith.cmpi ne, %25, %c0_i32_18 : i32
    scf.if %26 {
      %cst_109 = arith.constant 0.000000e+00 : bf16
      %82 = vector.broadcast %cst_109 : bf16 to vector<1x16x4xbf16>
      %c0_110 = arith.constant 0 : index
      %c1_111 = arith.constant 1 : index
      %c0_112 = arith.constant 0 : index
      %83 = vector.load %arg10[%c0_110, %c1_111, %c0_112] : memref<18x18x4xbf16, #tpu.memory_space<vmem>>, vector<1x16x4xbf16>
      tpu.vector_store %arg10[%c0_110, %c1_111, %c0_112], %82 {strides = array<i32>} : memref<18x18x4xbf16, #tpu.memory_space<vmem>>, vector<1x16x4xbf16>,
    } else {
    }
    %c0_i32_19 = arith.constant 0 : i32
    %27 = arith.cmpi slt, %arg1, %c0_i32_19 : i32
    %28 = arith.extui %27 : i1 to i32
    %c0_i32_20 = arith.constant 0 : i32
    %29 = arith.cmpi ne, %28, %c0_i32_20 : i32
    scf.if %29 {
      %c0_109 = arith.constant 0 : index
      %c0_110 = arith.constant 0 : index
      %c0_111 = arith.constant 0 : index
      %c0_112 = arith.constant 0 : index
      %82 = vector.load %arg4[%c0_109, %c0_110, %c0_111, %c0_112] : memref<1x1x16x4xbf16, #tpu.memory_space<vmem>>, vector<1x1x16x4xbf16>
      %83 = vector.shape_cast %82 : vector<1x1x16x4xbf16> to vector<1x16x4xbf16>
      %84 = arith.extf %83 : vector<1x16x4xbf16> to vector<1x16x4xf32>
      %85 = vector.shape_cast %1 : vector<4xf32> to vector<1x1x4xf32>
      %86 = vector.broadcast %85 : vector<1x1x4xf32> to vector<1x16x4xf32>
      %87 = arith.mulf %84, %86 : vector<1x16x4xf32>
      %88 = vector.shape_cast %3 : vector<4xf32> to vector<1x1x4xf32>
      %89 = vector.broadcast %88 : vector<1x1x4xf32> to vector<1x16x4xf32>
      %90 = arith.addf %87, %89 : vector<1x16x4xf32>
      %cst_113 = arith.constant 0.000000e+00 : f32
      %91 = vector.broadcast %cst_113 : f32 to vector<1x16x4xf32>
      %92 = arith.maximumf %90, %91 : vector<1x16x4xf32>
      %93 = arith.truncf %92 : vector<1x16x4xf32> to vector<1x16x4xbf16>
      %c17_114 = arith.constant 17 : index
      %c1_115 = arith.constant 1 : index
      %c0_116 = arith.constant 0 : index
      %94 = vector.load %arg10[%c17_114, %c1_115, %c0_116] : memref<18x18x4xbf16, #tpu.memory_space<vmem>>, vector<1x16x4xbf16>
      tpu.vector_store %arg10[%c17_114, %c1_115, %c0_116], %93 {strides = array<i32>} : memref<18x18x4xbf16, #tpu.memory_space<vmem>>, vector<1x16x4xbf16>,
    } else {
    }
    %c0_i32_21 = arith.constant 0 : i32
    %30 = arith.cmpi eq, %arg1, %c0_i32_21 : i32
    %31 = arith.extui %30 : i1 to i32
    %c0_i32_22 = arith.constant 0 : i32
    %32 = arith.cmpi ne, %31, %c0_i32_22 : i32
    scf.if %32 {
      %cst_109 = arith.constant 0.000000e+00 : bf16
      %82 = vector.broadcast %cst_109 : bf16 to vector<1x16x4xbf16>
      %c17_110 = arith.constant 17 : index
      %c1_111 = arith.constant 1 : index
      %c0_112 = arith.constant 0 : index
      %83 = vector.load %arg10[%c17_110, %c1_111, %c0_112] : memref<18x18x4xbf16, #tpu.memory_space<vmem>>, vector<1x16x4xbf16>
      tpu.vector_store %arg10[%c17_110, %c1_111, %c0_112], %82 {strides = array<i32>} : memref<18x18x4xbf16, #tpu.memory_space<vmem>>, vector<1x16x4xbf16>,
    } else {
    }
    %c0_23 = arith.constant 0 : index
    %c0_24 = arith.constant 0 : index
    %c0_25 = arith.constant 0 : index
    %33 = vector.load %arg10[%c0_23, %c0_24, %c0_25] : memref<18x18x4xbf16, #tpu.memory_space<vmem>>, vector<16x16x4xbf16>
    %c0_26 = arith.constant 0 : index
    %c0_27 = arith.constant 0 : index
    %c0_28 = arith.constant 0 : index
    %34 = vector.load %arg11[%c0_26, %c0_27, %c0_28] : memref<16x16x12xbf16, #tpu.memory_space<vmem>>, vector<16x16x4xbf16>
    tpu.vector_store %arg11[%c0_26, %c0_27, %c0_28], %33 {strides = array<i32>} : memref<16x16x12xbf16, #tpu.memory_space<vmem>>, vector<16x16x4xbf16>,
    %c0_29 = arith.constant 0 : index
    %c1_30 = arith.constant 1 : index
    %c0_31 = arith.constant 0 : index
    %35 = vector.load %arg10[%c0_29, %c1_30, %c0_31] : memref<18x18x4xbf16, #tpu.memory_space<vmem>>, vector<16x16x4xbf16>
    %c0_32 = arith.constant 0 : index
    %c0_33 = arith.constant 0 : index
    %c4 = arith.constant 4 : index
    %36 = vector.load %arg11[%c0_32, %c0_33, %c4] : memref<16x16x12xbf16, #tpu.memory_space<vmem>>, vector<16x16x4xbf16>
    tpu.vector_store %arg11[%c0_32, %c0_33, %c4], %35 {strides = array<i32>} : memref<16x16x12xbf16, #tpu.memory_space<vmem>>, vector<16x16x4xbf16>,
    %c0_34 = arith.constant 0 : index
    %c2 = arith.constant 2 : index
    %c0_35 = arith.constant 0 : index
    %37 = vector.load %arg10[%c0_34, %c2, %c0_35] : memref<18x18x4xbf16, #tpu.memory_space<vmem>>, vector<16x16x4xbf16>
    %c0_36 = arith.constant 0 : index
    %c0_37 = arith.constant 0 : index
    %c8 = arith.constant 8 : index
    %38 = vector.load %arg11[%c0_36, %c0_37, %c8] : memref<16x16x12xbf16, #tpu.memory_space<vmem>>, vector<16x16x4xbf16>
    tpu.vector_store %arg11[%c0_36, %c0_37, %c8], %37 {strides = array<i32>} : memref<16x16x12xbf16, #tpu.memory_space<vmem>>, vector<16x16x4xbf16>,
    %c0_38 = arith.constant 0 : index
    %c0_39 = arith.constant 0 : index
    %c0_40 = arith.constant 0 : index
    %39 = vector.load %arg11[%c0_38, %c0_39, %c0_40] : memref<16x16x12xbf16, #tpu.memory_space<vmem>>, vector<16x16x12xbf16>
    %40 = vector.shape_cast %39 : vector<16x16x12xbf16> to vector<256x12xbf16>
    %c0_41 = arith.constant 0 : index
    %c0_42 = arith.constant 0 : index
    %c0_43 = arith.constant 0 : index
    %41 = vector.load %arg7[%c0_41, %c0_42, %c0_43] : memref<3x12x4xbf16, #tpu.memory_space<vmem>>, vector<1x12x4xbf16>
    %42 = vector.shape_cast %41 : vector<1x12x4xbf16> to vector<12x4xbf16>
    %cst_44 = arith.constant dense<0.000000e+00> : vector<256x4xf32>
    %43 = tpu.matmul %40, %42, %cst_44 {dimension_numbers = #tpu.dot_dimension_numbers<[1], [0], [0], [1], [0, 0, 1, 1], [], []>} : vector<256x12xbf16>, vector<12x4xbf16>, vector<256x4xf32> -> vector<256x4xf32>
    %c1_45 = arith.constant 1 : index
    %c0_46 = arith.constant 0 : index
    %c0_47 = arith.constant 0 : index
    %44 = vector.load %arg10[%c1_45, %c0_46, %c0_47] : memref<18x18x4xbf16, #tpu.memory_space<vmem>>, vector<16x16x4xbf16>
    %c0_48 = arith.constant 0 : index
    %c0_49 = arith.constant 0 : index
    %c0_50 = arith.constant 0 : index
    %45 = vector.load %arg11[%c0_48, %c0_49, %c0_50] : memref<16x16x12xbf16, #tpu.memory_space<vmem>>, vector<16x16x4xbf16>
    tpu.vector_store %arg11[%c0_48, %c0_49, %c0_50], %44 {strides = array<i32>} : memref<16x16x12xbf16, #tpu.memory_space<vmem>>, vector<16x16x4xbf16>,
    %c1_51 = arith.constant 1 : index
    %c1_52 = arith.constant 1 : index
    %c0_53 = arith.constant 0 : index
    %46 = vector.load %arg10[%c1_51, %c1_52, %c0_53] : memref<18x18x4xbf16, #tpu.memory_space<vmem>>, vector<16x16x4xbf16>
    %c0_54 = arith.constant 0 : index
    %c0_55 = arith.constant 0 : index
    %c4_56 = arith.constant 4 : index
    %47 = vector.load %arg11[%c0_54, %c0_55, %c4_56] : memref<16x16x12xbf16, #tpu.memory_space<vmem>>, vector<16x16x4xbf16>
    tpu.vector_store %arg11[%c0_54, %c0_55, %c4_56], %46 {strides = array<i32>} : memref<16x16x12xbf16, #tpu.memory_space<vmem>>, vector<16x16x4xbf16>,
    %c1_57 = arith.constant 1 : index
    %c2_58 = arith.constant 2 : index
    %c0_59 = arith.constant 0 : index
    %48 = vector.load %arg10[%c1_57, %c2_58, %c0_59] : memref<18x18x4xbf16, #tpu.memory_space<vmem>>, vector<16x16x4xbf16>
    %c0_60 = arith.constant 0 : index
    %c0_61 = arith.constant 0 : index
    %c8_62 = arith.constant 8 : index
    %49 = vector.load %arg11[%c0_60, %c0_61, %c8_62] : memref<16x16x12xbf16, #tpu.memory_space<vmem>>, vector<16x16x4xbf16>
    tpu.vector_store %arg11[%c0_60, %c0_61, %c8_62], %48 {strides = array<i32>} : memref<16x16x12xbf16, #tpu.memory_space<vmem>>, vector<16x16x4xbf16>,
    %c0_63 = arith.constant 0 : index
    %c0_64 = arith.constant 0 : index
    %c0_65 = arith.constant 0 : index
    %50 = vector.load %arg11[%c0_63, %c0_64, %c0_65] : memref<16x16x12xbf16, #tpu.memory_space<vmem>>, vector<16x16x12xbf16>
    %51 = vector.shape_cast %50 : vector<16x16x12xbf16> to vector<256x12xbf16>
    %c1_66 = arith.constant 1 : index
    %c0_67 = arith.constant 0 : index
    %c0_68 = arith.constant 0 : index
    %52 = vector.load %arg7[%c1_66, %c0_67, %c0_68] : memref<3x12x4xbf16, #tpu.memory_space<vmem>>, vector<1x12x4xbf16>
    %53 = vector.shape_cast %52 : vector<1x12x4xbf16> to vector<12x4xbf16>
    %cst_69 = arith.constant dense<0.000000e+00> : vector<256x4xf32>
    %54 = tpu.matmul %51, %53, %cst_69 {dimension_numbers = #tpu.dot_dimension_numbers<[1], [0], [0], [1], [0, 0, 1, 1], [], []>} : vector<256x12xbf16>, vector<12x4xbf16>, vector<256x4xf32> -> vector<256x4xf32>
    %55 = arith.addf %43, %54 : vector<256x4xf32>
    %c2_70 = arith.constant 2 : index
    %c0_71 = arith.constant 0 : index
    %c0_72 = arith.constant 0 : index
    %56 = vector.load %arg10[%c2_70, %c0_71, %c0_72] : memref<18x18x4xbf16, #tpu.memory_space<vmem>>, vector<16x16x4xbf16>
    %c0_73 = arith.constant 0 : index
    %c0_74 = arith.constant 0 : index
    %c0_75 = arith.constant 0 : index
    %57 = vector.load %arg11[%c0_73, %c0_74, %c0_75] : memref<16x16x12xbf16, #tpu.memory_space<vmem>>, vector<16x16x4xbf16>
    tpu.vector_store %arg11[%c0_73, %c0_74, %c0_75], %56 {strides = array<i32>} : memref<16x16x12xbf16, #tpu.memory_space<vmem>>, vector<16x16x4xbf16>,
    %c2_76 = arith.constant 2 : index
    %c1_77 = arith.constant 1 : index
    %c0_78 = arith.constant 0 : index
    %58 = vector.load %arg10[%c2_76, %c1_77, %c0_78] : memref<18x18x4xbf16, #tpu.memory_space<vmem>>, vector<16x16x4xbf16>
    %c0_79 = arith.constant 0 : index
    %c0_80 = arith.constant 0 : index
    %c4_81 = arith.constant 4 : index
    %59 = vector.load %arg11[%c0_79, %c0_80, %c4_81] : memref<16x16x12xbf16, #tpu.memory_space<vmem>>, vector<16x16x4xbf16>
    tpu.vector_store %arg11[%c0_79, %c0_80, %c4_81], %58 {strides = array<i32>} : memref<16x16x12xbf16, #tpu.memory_space<vmem>>, vector<16x16x4xbf16>,
    %c2_82 = arith.constant 2 : index
    %c2_83 = arith.constant 2 : index
    %c0_84 = arith.constant 0 : index
    %60 = vector.load %arg10[%c2_82, %c2_83, %c0_84] : memref<18x18x4xbf16, #tpu.memory_space<vmem>>, vector<16x16x4xbf16>
    %c0_85 = arith.constant 0 : index
    %c0_86 = arith.constant 0 : index
    %c8_87 = arith.constant 8 : index
    %61 = vector.load %arg11[%c0_85, %c0_86, %c8_87] : memref<16x16x12xbf16, #tpu.memory_space<vmem>>, vector<16x16x4xbf16>
    tpu.vector_store %arg11[%c0_85, %c0_86, %c8_87], %60 {strides = array<i32>} : memref<16x16x12xbf16, #tpu.memory_space<vmem>>, vector<16x16x4xbf16>,
    %c0_88 = arith.constant 0 : index
    %c0_89 = arith.constant 0 : index
    %c0_90 = arith.constant 0 : index
    %62 = vector.load %arg11[%c0_88, %c0_89, %c0_90] : memref<16x16x12xbf16, #tpu.memory_space<vmem>>, vector<16x16x12xbf16>
    %63 = vector.shape_cast %62 : vector<16x16x12xbf16> to vector<256x12xbf16>
    %c2_91 = arith.constant 2 : index
    %c0_92 = arith.constant 0 : index
    %c0_93 = arith.constant 0 : index
    %64 = vector.load %arg7[%c2_91, %c0_92, %c0_93] : memref<3x12x4xbf16, #tpu.memory_space<vmem>>, vector<1x12x4xbf16>
    %65 = vector.shape_cast %64 : vector<1x12x4xbf16> to vector<12x4xbf16>
    %cst_94 = arith.constant dense<0.000000e+00> : vector<256x4xf32>
    %66 = tpu.matmul %63, %65, %cst_94 {dimension_numbers = #tpu.dot_dimension_numbers<[1], [0], [0], [1], [0, 0, 1, 1], [], []>} : vector<256x12xbf16>, vector<12x4xbf16>, vector<256x4xf32> -> vector<256x4xf32>
    %67 = arith.addf %55, %66 : vector<256x4xf32>
    %68 = vector.shape_cast %67 : vector<256x4xf32> to vector<1x16x16x4xf32>
    %69 = arith.truncf %68 : vector<1x16x16x4xf32> to vector<1x16x16x4xbf16>
    %c0_95 = arith.constant 0 : index
    %c0_96 = arith.constant 0 : index
    %c0_97 = arith.constant 0 : index
    %c0_98 = arith.constant 0 : index
    %70 = vector.load %arg8[%c0_95, %c0_96, %c0_97, %c0_98] : memref<1x16x16x4xbf16, #tpu.memory_space<vmem>>, vector<1x16x16x4xbf16>
    tpu.vector_store %arg8[%c0_95, %c0_96, %c0_97, %c0_98], %69 {strides = array<i32>} : memref<1x16x16x4xbf16, #tpu.memory_space<vmem>>, vector<1x16x16x4xbf16>,
    %cst_99 = arith.constant dense<0.000000e+00> : vector<4xf32>
    %71 = vector.multi_reduction <add>, %67, %cst_99 [0] : vector<256x4xf32> to vector<4xf32>
    %72 = vector.shape_cast %71 : vector<4xf32> to vector<1x4xf32>
    %c0_100 = arith.constant 0 : index
    %c0_101 = arith.constant 0 : index
    %c0_102 = arith.constant 0 : index
    %c0_103 = arith.constant 0 : index
    %73 = vector.load %arg9[%c0_100, %c0_101, %c0_102, %c0_103] : memref<1x1x2x4xf32, #tpu.memory_space<vmem>>, vector<1x1x1x4xf32>
    %74 = vector.shape_cast %73 : vector<1x1x1x4xf32> to vector<1x4xf32>
    %75 = vector.shape_cast %72 : vector<1x4xf32> to vector<1x1x1x4xf32>
    tpu.vector_store %arg9[%c0_100, %c0_101, %c0_102, %c0_103], %75 {strides = array<i32>} : memref<1x1x2x4xf32, #tpu.memory_space<vmem>>, vector<1x1x1x4xf32>,
    %76 = arith.mulf %67, %67 : vector<256x4xf32>
    %cst_104 = arith.constant dense<0.000000e+00> : vector<4xf32>
    %77 = vector.multi_reduction <add>, %76, %cst_104 [0] : vector<256x4xf32> to vector<4xf32>
    %78 = vector.shape_cast %77 : vector<4xf32> to vector<1x4xf32>
    %c0_105 = arith.constant 0 : index
    %c0_106 = arith.constant 0 : index
    %c1_107 = arith.constant 1 : index
    %c0_108 = arith.constant 0 : index
    %79 = vector.load %arg9[%c0_105, %c0_106, %c1_107, %c0_108] : memref<1x1x2x4xf32, #tpu.memory_space<vmem>>, vector<1x1x1x4xf32>
    %80 = vector.shape_cast %79 : vector<1x1x1x4xf32> to vector<1x4xf32>
    %81 = vector.shape_cast %78 : vector<1x4xf32> to vector<1x1x1x4xf32>
    tpu.vector_store %arg9[%c0_105, %c0_106, %c1_107, %c0_108], %81 {strides = array<i32>} : memref<1x1x2x4xf32, #tpu.memory_space<vmem>>, vector<1x1x1x4xf32>,
    return
  }
  func.func @transform_0(%arg0: i32, %arg1: i32) -> (i32, i32, i32, i32) {
    %c0_i32 = arith.constant 0 : i32
    %c0_i32_0 = arith.constant 0 : i32
    %c0_i32_1 = arith.constant 0 : i32
    return %arg0, %arg1, %c0_i32, %c0_i32_0 : i32, i32, i32, i32
  }
  func.func @transform_1(%arg0: i32, %arg1: i32) -> (i32, i32, i32, i32) {
    %c16_i32 = arith.constant 16 : i32
    %0 = arith.muli %arg1, %c16_i32 : i32
    %c1_i32 = arith.constant 1 : i32
    %1 = arith.subi %0, %c1_i32 : i32
    %c0_i32 = arith.constant 0 : i32
    %2 = arith.maxsi %1, %c0_i32 : i32
    %c0_i32_0 = arith.constant 0 : i32
    %c0_i32_1 = arith.constant 0 : i32
    %c0_i32_2 = arith.constant 0 : i32
    return %arg0, %2, %c0_i32_0, %c0_i32_1 : i32, i32, i32, i32
  }
  func.func @transform_2(%arg0: i32, %arg1: i32) -> (i32, i32, i32, i32) {
    %c16_i32 = arith.constant 16 : i32
    %0 = arith.muli %arg1, %c16_i32 : i32
    %c16_i32_0 = arith.constant 16 : i32
    %1 = arith.addi %0, %c16_i32_0 : i32
    %c15_i32 = arith.constant 15 : i32
    %2 = arith.minsi %1, %c15_i32 : i32
    %c0_i32 = arith.constant 0 : i32
    %c0_i32_1 = arith.constant 0 : i32
    %c0_i32_2 = arith.constant 0 : i32
    return %arg0, %2, %c0_i32, %c0_i32_1 : i32, i32, i32, i32
  }
  func.func @transform_3(%arg0: i32, %arg1: i32) -> (i32, i32) {
    %c0_i32 = arith.constant 0 : i32
    %c0_i32_0 = arith.constant 0 : i32
    %c0_i32_1 = arith.constant 0 : i32
    return %c0_i32, %c0_i32_0 : i32, i32
  }
  func.func @transform_4(%arg0: i32, %arg1: i32) -> (i32, i32) {
    %c0_i32 = arith.constant 0 : i32
    %c0_i32_0 = arith.constant 0 : i32
    %c0_i32_1 = arith.constant 0 : i32
    return %c0_i32, %c0_i32_0 : i32, i32
  }
  func.func @transform_5(%arg0: i32, %arg1: i32) -> (i32, i32, i32) {
    %c0_i32 = arith.constant 0 : i32
    %c0_i32_0 = arith.constant 0 : i32
    %c0_i32_1 = arith.constant 0 : i32
    %c0_i32_2 = arith.constant 0 : i32
    return %c0_i32, %c0_i32_0, %c0_i32_1 : i32, i32, i32
  }
  func.func @transform_6(%arg0: i32, %arg1: i32) -> (i32, i32, i32, i32) {
    %c0_i32 = arith.constant 0 : i32
    %c0_i32_0 = arith.constant 0 : i32
    %c0_i32_1 = arith.constant 0 : i32
    return %arg0, %arg1, %c0_i32, %c0_i32_0 : i32, i32, i32, i32
  }
  func.func @transform_7(%arg0: i32, %arg1: i32) -> (i32, i32, i32, i32) {
    %c0_i32 = arith.constant 0 : i32
    %c0_i32_0 = arith.constant 0 : i32
    %c0_i32_1 = arith.constant 0 : i32
    return %arg0, %arg1, %c0_i32, %c0_i32_0 : i32, i32, i32, i32
  }
}

module attributes {stable_mosaic.version = 11 : i64} {
  func.func @_bn_relu_kernel(%arg0: i32, %arg1: i32, %arg2: memref<1x16x16x4xbf16, #tpu.memory_space<vmem>>, %arg3: memref<1x4xf32, #tpu.memory_space<vmem>>, %arg4: memref<1x4xf32, #tpu.memory_space<vmem>>, %arg5: memref<1x16x16x4xf32, #tpu.memory_space<vmem>>) attributes {dimension_semantics = [#tpu.dimension_semantics<parallel>, #tpu.dimension_semantics<parallel>], iteration_bounds = array<i64: 2, 1>, scalar_prefetch = 0 : i64, scratch_operands = 0 : i64, tpu.core_type = #tpu.core_type<tc>, window_params = [{transform_indices = @transform_0, window_bounds = array<i64: 1, 16, 16, 4>}, {pipeline_mode = #tpu.pipeline_mode<synchronous>, transform_indices = @transform_1, window_bounds = array<i64: 1, 4>}, {pipeline_mode = #tpu.pipeline_mode<synchronous>, transform_indices = @transform_2, window_bounds = array<i64: 1, 4>}, {transform_indices = @transform_3, window_bounds = array<i64: 1, 16, 16, 4>}]} {
    %c0 = arith.constant 0 : index
    %c0_0 = arith.constant 0 : index
    %c0_1 = arith.constant 0 : index
    %c0_2 = arith.constant 0 : index
    %0 = vector.load %arg2[%c0, %c0_0, %c0_1, %c0_2] : memref<1x16x16x4xbf16, #tpu.memory_space<vmem>>, vector<1x16x16x4xbf16>
    %1 = arith.extf %0 : vector<1x16x16x4xbf16> to vector<1x16x16x4xf32>
    %c0_3 = arith.constant 0 : index
    %c0_4 = arith.constant 0 : index
    %2 = vector.load %arg3[%c0_3, %c0_4] : memref<1x4xf32, #tpu.memory_space<vmem>>, vector<1x4xf32>
    %3 = vector.shape_cast %2 : vector<1x4xf32> to vector<4xf32>
    %4 = vector.shape_cast %3 : vector<4xf32> to vector<1x1x1x4xf32>
    %5 = vector.broadcast %4 : vector<1x1x1x4xf32> to vector<1x16x16x4xf32>
    %6 = arith.mulf %1, %5 : vector<1x16x16x4xf32>
    %c0_5 = arith.constant 0 : index
    %c0_6 = arith.constant 0 : index
    %7 = vector.load %arg4[%c0_5, %c0_6] : memref<1x4xf32, #tpu.memory_space<vmem>>, vector<1x4xf32>
    %8 = vector.shape_cast %7 : vector<1x4xf32> to vector<4xf32>
    %9 = vector.shape_cast %8 : vector<4xf32> to vector<1x1x1x4xf32>
    %10 = vector.broadcast %9 : vector<1x1x1x4xf32> to vector<1x16x16x4xf32>
    %11 = arith.addf %6, %10 : vector<1x16x16x4xf32>
    %cst = arith.constant 0.000000e+00 : f32
    %12 = vector.broadcast %cst : f32 to vector<1x16x16x4xf32>
    %13 = arith.maximumf %11, %12 : vector<1x16x16x4xf32>
    %c0_7 = arith.constant 0 : index
    %c0_8 = arith.constant 0 : index
    %c0_9 = arith.constant 0 : index
    %c0_10 = arith.constant 0 : index
    %14 = vector.load %arg5[%c0_7, %c0_8, %c0_9, %c0_10] : memref<1x16x16x4xf32, #tpu.memory_space<vmem>>, vector<1x16x16x4xf32>
    tpu.vector_store %arg5[%c0_7, %c0_8, %c0_9, %c0_10], %13 {strides = array<i32>} : memref<1x16x16x4xf32, #tpu.memory_space<vmem>>, vector<1x16x16x4xf32>,
    return
  }
  func.func @transform_0(%arg0: i32, %arg1: i32) -> (i32, i32, i32, i32) {
    %c0_i32 = arith.constant 0 : i32
    %c0_i32_0 = arith.constant 0 : i32
    %c0_i32_1 = arith.constant 0 : i32
    return %arg0, %arg1, %c0_i32, %c0_i32_0 : i32, i32, i32, i32
  }
  func.func @transform_1(%arg0: i32, %arg1: i32) -> (i32, i32) {
    %c0_i32 = arith.constant 0 : i32
    %c0_i32_0 = arith.constant 0 : i32
    %c0_i32_1 = arith.constant 0 : i32
    return %c0_i32, %c0_i32_0 : i32, i32
  }
  func.func @transform_2(%arg0: i32, %arg1: i32) -> (i32, i32) {
    %c0_i32 = arith.constant 0 : i32
    %c0_i32_0 = arith.constant 0 : i32
    %c0_i32_1 = arith.constant 0 : i32
    return %c0_i32, %c0_i32_0 : i32, i32
  }
  func.func @transform_3(%arg0: i32, %arg1: i32) -> (i32, i32, i32, i32) {
    %c0_i32 = arith.constant 0 : i32
    %c0_i32_0 = arith.constant 0 : i32
    %c0_i32_1 = arith.constant 0 : i32
    return %arg0, %arg1, %c0_i32, %c0_i32_0 : i32, i32, i32, i32
  }
}

</mosaic_0001>

<bundles_post_ra>
// kernel: tile.7
= control target key start
LH: loop header
LB: loop body
LE: loop exit
PB: predicated region body
PF: predicated region fallthrough
CT: control target
= control target key end

     0   :  { %vm7_vm0 = vcmask 31744   ;;  %vm13_vm1 = vcmask 64544   ;;  %s39_s0 = inlined_call_operand.vmem [shape: f32[2,4], index: 0, kind: input, shape index: {}]   ;;  %s40_s1 = inlined_call_operand.vmem [shape: f32[1,8], index: 1, kind: output, shape index: {}]  }
   0x1   :  { %v4_v0 = vld [vmem:[%s39_s0] sm:$0x3]  ;;  %s22_s0 = smov 4  }
   0x2   :  { %5 = vst [vmem:[#allocation1] sm:$0x3] %v4_v0 }
   0x9   :  { %v10_v1 = vld [vmem:[#allocation1 + $0x1] sm:$0x1]   ;;  %v6_v2 = vld [vmem:[#allocation1] sm:$0x1]  }
   0xa   :  { %11 = vrot.lane.b32.xlu0 %v10_v1, %s22_s0  ;;  %8 = vst.msk [vmem:[#allocation0] sm:$0x1] %vm7_vm0, %v6_v2  }
  0x7c   :  { %v12_v3 = vpop.permute.xlu0 %11  }
  0x7d   :  { %14 = vst.msk [vmem:[#allocation0] sm:$0x1] %vm13_vm1, %v12_v3  }
  0x84   :  { %v18_v4 = vld [vmem:[#allocation0] sm:$0x1] }
  0x85   :  { %20 = vst [vmem:[%s40_s1] sm:$0x1] %v18_v4 }

// kernel: tile.6
= control target key start
LH: loop header
LB: loop body
LE: loop exit
PB: predicated region body
PF: predicated region fallthrough
CT: control target
= control target key end

     0   :  { %s22_s0 = inlined_call_operand.vmem [shape: f32[4], index: 0, kind: input, shape index: {}]   ;;  %s23_s1 = inlined_call_operand.vmem [shape: f32[2,4], index: 1, kind: output, shape index: {}]  }
   0x1   :  { %v4_v0 = vld [vmem:[%s22_s0] ss:$0 sm:$0xff] }
   0x2   :  { %5 = vst [vmem:[%s23_s1] sm:$0x3] %v4_v0 }

// kernel: up_block_forward.4
= control target key start
LH: loop header
LB: loop body
LE: loop exit
PB: predicated region body
PF: predicated region fallthrough
CT: control target
= control target key end

     0   :  { %s697_s15 = smov 0   ;;  %s699_s16 = smov 0   ;;  %s773_s0 = inlined_call_operand.vmem [shape: bf16[2,8,8,8], index: 0, kind: input, shape index: {}]   ;;  %s774_s1 = inlined_call_operand.vmem [shape: bf16[8,8], index: 1, kind: input, shape index: {}]   ;;  %s775_s2 = inlined_call_operand.vmem [shape: bf16[8,8], index: 2, kind: input, shape index: {}]   ;;  %s776_s3 = inlined_call_operand.vmem [shape: f32[1,8], index: 3, kind: input, shape index: {}]   ;;  %s777_s4 = inlined_call_operand.vmem [shape: bf16[2,8,2,8,8], index: 4, kind: output, shape index: {}]  }
   0x1   :  { %s701_s17 = smov 0  }
   0x2 LB: > { %s26_s18 = sadd.s32 1, %s666_s16  ;;  %p558_p0 = scmp.ge.s32.totalorder %s670_s17, 1  ;;  %s670_s17 = sphi %s701_s17, %s14_s17   ;;  %s666_s16 = sphi %s699_s16, %s779_s16   ;;  %s662_s15 = sphi %s697_s15, %s778_s15  }
   0x3   : > { %p28_p1 = scmp.ge.s32.totalorder %s26_s18, 2  ;;  %p183_p2 = scmp.lt.s32.totalorder %s670_s17, 3 }
   0x5   : > { %s781_s18 = smov (%p28_p1, %s26_s18), 0  ;;  %p184_p3 = pnand %p558_p0, %p183_p2 }
   0x6   : > { %v249_v0 = vld [vmem:[%s774_s1] sm:$0xf] (!%p184_p3)  ;;  %vm289_vm0 = vcmask (!%p184_p3), 1043456   ;;  %p219_p4 = scmp.lt.s32.totalorder (!%p184_p3), %s662_s15, 1  ;;  %vm276_vm1 = vcmask (!%p184_p3), 64512   ;;  %vm435_vm2 = vcmask (!%p184_p3), 60416  }
   0x7   : > { %187 = sbr.rel (%p184_p3) target bundleno = 247 (0xf7), region = 36  ;;  %v358_v1 = vld [vmem:[%s775_s2] sm:$0xf] (!%p184_p3)  ;;  %618 = vmatprep.subr.msk.bf16.mxu0 (!%p184_p3), %vm289_vm0, %v249_v0  ;;  %v291_v2 = vsel (!%p184_p3), %vm289_vm0, %v249_v0, 0 }
   0x8   : > { %619 = vmatprep.subr.msk.bf16.mxu1 (!%p184_p3), %vm289_vm0, %v358_v1  ;;  %v360_v3 = vsel (!%p184_p3), %vm289_vm0, %v358_v1, 0  ;;  %599 = vmatpush3.bf16.msra.mxu0 (!%p184_p3), %v291_v2  ;;  %v563_v8 = vld [vmem:[%s776_s3] ss:$0 sm:$0xff] (!%p184_p3) }
   0x9   : > { %609 = vmatpush3.bf16.msra.mxu1 (!%p184_p3), %v360_v3 }
   0xe   : > { %s783_s15 = smov (!%p219_p4, %s662_s15), 1 }
   0xf   : > { %s586_s23 = sshll.u32 %s783_s15, 5  ;;  %s587_s29 = sshll.u32 %s783_s15, 6 }
  0x10   : > { %s226_s26 = scalar_lea.vmem %s773_s0, %s586_s23  ;;  %s730_s6 = scalar_lea.vmem %s777_s4, %s587_s29 }
  0x11   : > { %v644_v4 = vld [vmem:[%s226_s26] sm:$0xff]   ;;  %v645_v5 = vld [vmem:[%s226_s26 + $0x8] sm:$0xff]   ;;  %v646_v6 = vld [vmem:[%s226_s26 + $0x10] sm:$0xff]  }
  0x12   : > { %600 = vmatprep.mubr.msk.bf16.mxu0 %vm276_vm1, %v644_v4  ;;  %610 = vmatprep.mubr.msk.bf16.mxu1 %vm276_vm1, %v644_v4  ;;  %v647_v7 = vld [vmem:[%s226_s26 + $0x18] sm:$0xff]  }
  0x13   : > { %601 = vmatmul.mubr.msk.bf16.vlgmr.msra.gmra.mrb[0].mxu0 %vm276_vm1, %v645_v5  ;;  %611 = vmatmul.mubr.msk.bf16.vlgmr.msra.gmra.mrb[0].mxu1 %vm276_vm1, %v645_v5 }
  0x14   : > { %604 = vmatprep.mubr.msk.bf16.mxu0 %vm276_vm1, %v646_v6  ;;  %614 = vmatprep.mubr.msk.bf16.mxu1 %vm276_vm1, %v646_v6 }
  0x1b   : > { %605 = vmatmul.mubr.msk.bf16.gmra.mrb[4].mxu0 %vm276_vm1, %v647_v7  ;;  %615 = vmatmul.mubr.msk.bf16.gmra.mrb[4].mxu1 %vm276_vm1, %v647_v7 }
  0xe6   : > { %v602_v9 = vpop.f32.mrb[0].mxu0  ;;  %v612_v10 = vpop.f32.mrb[0].mxu1 }
  0xe7   : > { %v336_v11 = vadd.f32 %v602_v9, %v563_v8  ;;  %v405_v12 = vadd.f32 %v612_v10, %v563_v8  ;;  %v327_v13 = vpop.f32.mrb[1].mxu0  ;;  %v396_v14 = vpop.f32.mrb[1].mxu1 }
  0xe8   : > { %v328_v15 = vadd.f32 %v563_v8, %v327_v13  ;;  %v397_v16 = vadd.f32 %v563_v8, %v396_v14  ;;  %v603_v17 = vpop.f32.mrb[2].mxu0  ;;  %v613_v18 = vpop.f32.mrb[2].mxu1 }
  0xe9   : > { %v429_v19 = vpack.c.bf16 %v336_v11, %v336_v11  ;;  %v446_v20 = vpack.c.bf16 %v405_v12, %v405_v12  ;;  %v339_v21 = vadd.f32 %v603_v17, %v563_v8  ;;  %v408_v22 = vadd.f32 %v613_v18, %v563_v8  ;;  %v330_v23 = vpop.f32.mrb[3].mxu0  ;;  %v399_v24 = vpop.f32.mrb[3].mxu1 }
  0xea   : > { %v427_v25 = vpack.c.bf16 %v328_v15, %v328_v15  ;;  %v444_v26 = vpack.c.bf16 %v397_v16, %v397_v16  ;;  %v331_v27 = vadd.f32 %v563_v8, %v330_v23  ;;  %v400_v28 = vadd.f32 %v563_v8, %v399_v24 }
  0xeb   : > { %438 = vst.msk [vmem:[%s730_s6 + $0x10] sm:$0xf] %vm435_vm2, %v429_v19  ;;  %578 = vst.msk [vmem:[%s730_s6 + $0x14] sm:$0xf] %vm435_vm2, %v446_v20  ;;  %v430_v29 = vpack.c.bf16 %v339_v21, %v339_v21  ;;  %v447_v30 = vpack.c.bf16 %v408_v22, %v408_v22 }
  0xec   : > { %436 = vst.msk [vmem:[%s730_s6] sm:$0xf] %vm435_vm2, %v427_v25  ;;  %576 = vst.msk [vmem:[%s730_s6 + $0x4] sm:$0xf] %vm435_vm2, %v444_v26  ;;  %v428_v31 = vpack.c.bf16 %v331_v27, %v331_v27  ;;  %v445_v32 = vpack.c.bf16 %v400_v28, %v400_v28 }
  0xed   : > { %439 = vst.msk [vmem:[%s730_s6 + $0x18] sm:$0xf] %vm435_vm2, %v430_v29  ;;  %579 = vst.msk [vmem:[%s730_s6 + $0x1c] sm:$0xf] %vm435_vm2, %v447_v30 }
  0xee   : > { %437 = vst.msk [vmem:[%s730_s6 + $0x8] sm:$0xf] %vm435_vm2, %v428_v31  ;;  %577 = vst.msk [vmem:[%s730_s6 + $0xc] sm:$0xf] %vm435_vm2, %v445_v32  ;;  %v606_v33 = vpop.f32.mrb[4].mxu0  ;;  %v616_v34 = vpop.f32.mrb[4].mxu1 }
  0xef   : > { %v352_v35 = vadd.f32 %v606_v33, %v563_v8  ;;  %v421_v36 = vadd.f32 %v616_v34, %v563_v8  ;;  %v343_v37 = vpop.f32.mrb[5].mxu0  ;;  %v412_v38 = vpop.f32.mrb[5].mxu1 }
  0xf0   : > { %v344_v39 = vadd.f32 %v563_v8, %v343_v37  ;;  %v413_v40 = vadd.f32 %v563_v8, %v412_v38  ;;  %v607_v41 = vpop.f32.mrb[6].mxu0  ;;  %v617_v42 = vpop.f32.mrb[6].mxu1 }
  0xf1   : > { %v433_v43 = vpack.c.bf16 %v352_v35, %v352_v35  ;;  %v450_v44 = vpack.c.bf16 %v421_v36, %v421_v36  ;;  %v355_v45 = vadd.f32 %v607_v41, %v563_v8  ;;  %v424_v46 = vadd.f32 %v617_v42, %v563_v8  ;;  %v346_v47 = vpop.f32.mrb[7].mxu0  ;;  %v415_v48 = vpop.f32.mrb[7].mxu1 }
  0xf2   : > { %v431_v49 = vpack.c.bf16 %v344_v39, %v344_v39  ;;  %v448_v50 = vpack.c.bf16 %v413_v40, %v413_v40  ;;  %v347_v51 = vadd.f32 %v563_v8, %v346_v47  ;;  %v416_v52 = vadd.f32 %v563_v8, %v415_v48 }
  0xf3   : > { %442 = vst.msk [vmem:[%s730_s6 + $0x30] sm:$0xf] %vm435_vm2, %v433_v43  ;;  %582 = vst.msk [vmem:[%s730_s6 + $0x34] sm:$0xf] %vm435_vm2, %v450_v44  ;;  %v434_v53 = vpack.c.bf16 %v355_v45, %v355_v45  ;;  %v451_v54 = vpack.c.bf16 %v424_v46, %v424_v46 }
  0xf4   : > { %440 = vst.msk [vmem:[%s730_s6 + $0x20] sm:$0xf] %vm435_vm2, %v431_v49  ;;  %580 = vst.msk [vmem:[%s730_s6 + $0x24] sm:$0xf] %vm435_vm2, %v448_v50  ;;  %v432_v55 = vpack.c.bf16 %v347_v51, %v347_v51  ;;  %v449_v56 = vpack.c.bf16 %v416_v52, %v416_v52 }
  0xf5   : > { %443 = vst.msk [vmem:[%s730_s6 + $0x38] sm:$0xf] %vm435_vm2, %v434_v53  ;;  %583 = vst.msk [vmem:[%s730_s6 + $0x3c] sm:$0xf] %vm435_vm2, %v451_v54 }
  0xf6   : > { %441 = vst.msk [vmem:[%s730_s6 + $0x28] sm:$0xf] %vm435_vm2, %v432_v55  ;;  %581 = vst.msk [vmem:[%s730_s6 + $0x2c] sm:$0xf] %vm435_vm2, %v449_v56 }
  0xf7 PF: > { %s14_s17 = sadd.s32 1, %s670_s17   ;;  %s778_s15 = smov %s666_s16 }
  0xf8   : > { %p11_p5 = scmp.ge.s32.totalorder %s14_s17, 4   ;;  %s779_s16 = smov %s781_s18 }
  0xfa   :  { %13 = sbr.rel (!%p11_p5) target bundleno = 2 (0x2), region = 67 }

// kernel: up_block_forward.7
= control target key start
LH: loop header
LB: loop body
LE: loop exit
PB: predicated region body
PF: predicated region fallthrough
CT: control target
= control target key end

     0   :  { %s680_s12 = smov 0   ;;  %s682_s13 = smov 0   ;;  %s875_s0 = inlined_call_operand.vmem [shape: bf16[2,16,16,4], index: 0, kind: input, shape index: {}]   ;;  %s876_s1 = inlined_call_operand.vmem [shape: f32[1,4], index: 1, kind: input, shape index: {}]   ;;  %s877_s2 = inlined_call_operand.vmem [shape: f32[1,4], index: 2, kind: input, shape index: {}]   ;;  %s878_s3 = inlined_call_operand.vmem [shape: f32[2,16,16,4], index: 3, kind: output, shape index: {}]  }
   0x1   :  { %s684_s14 = smov 0  }
   0x2 LB: > { %s25_s15 = sadd.s32 1, %s654_s13  ;;  %p522_p0 = scmp.ge.s32.totalorder %s658_s14, 1  ;;  %s658_s14 = sphi %s684_s14, %s13_s14   ;;  %s654_s13 = sphi %s682_s13, %s880_s13   ;;  %s650_s12 = sphi %s680_s12, %s879_s12  }
   0x3   : > { %p27_p1 = scmp.ge.s32.totalorder %s25_s15, 2  ;;  %p159_p2 = scmp.lt.s32.totalorder %s658_s14, 3 }
   0x5   : > { %s882_s15 = smov (%p27_p1, %s25_s15), 0  ;;  %p160_p3 = pnand %p522_p0, %p159_p2 }
   0x6   : > { %p194_p4 = scmp.lt.s32.totalorder (!%p160_p3), %s650_s12, 1  ;;  %v709_v0 = vld [vmem:[%s876_s1] ss:$0 sm:$0xff] (!%p160_p3)  ;;  %vm389_vm0 = vcmask (!%p160_p3), 31744  }
   0x7   : > { %163 = sbr.rel (%p160_p3) target bundleno = 54 (0x36), region = 32  ;;  %v718_v9 = vld [vmem:[%s877_s2] ss:$0 sm:$0xff] (!%p160_p3) }
   0xe   : > { %s884_s12 = smov (!%p194_p4, %s650_s12), 1 }
   0xf   : > { %s531_s16 = sshll.u32 %s884_s12, 7  ;;  %s532_s24 = sshll.u32 %s884_s12, 8 }
  0x10   : > { %s704_s19 = scalar_lea.vmem %s875_s0, %s531_s16  ;;  %s736_s27 = scalar_lea.vmem %s878_s3, %s532_s24 }
  0x11   : > { %v534_v1 = vld [vmem:[%s704_s19] sm:$0xff]   ;;  %v597_v2 = vld [vmem:[%s704_s19 + $0x8] sm:$0xff]   ;;  %v598_v3 = vld [vmem:[%s704_s19 + $0x10] sm:$0xff]  }
  0x12   : > { %v535_v4 = vunpack.c.l.bf16 %v534_v1  ;;  %v536_v5 = vunpack.c.h.bf16 %v534_v1  ;;  %v539_v6 = vunpack.c.l.bf16 %v597_v2  ;;  %v540_v7 = vunpack.c.h.bf16 %v597_v2  ;;  %v599_v8 = vld [vmem:[%s704_s19 + $0x18] sm:$0xff]   ;;  %v600_v30 = vld [vmem:[%s704_s19 + $0x20] sm:$0xff]   ;;  %v601_v31 = vld [vmem:[%s704_s19 + $0x28] sm:$0xff]  }
  0x13   : > { %v543_v10 = vunpack.c.l.bf16 %v598_v3  ;;  %v544_v11 = vunpack.c.h.bf16 %v598_v3  ;;  %v547_v12 = vunpack.c.l.bf16 %v599_v8  ;;  %v548_v13 = vunpack.c.h.bf16 %v599_v8  ;;  %v602_v36 = vld [vmem:[%s704_s19 + $0x30] sm:$0xff]   ;;  %v603_v37 = vld [vmem:[%s704_s19 + $0x38] sm:$0xff]   ;;  %v604_v3 = vld [vmem:[%s704_s19 + $0x40] sm:$0xff]  }
  0x14   : > { %v286_v14 = vmul.f32 %v535_v4, %v709_v0  ;;  %v287_v15 = vmul.f32 %v536_v5, %v709_v0  ;;  %v288_v16 = vmul.f32 %v539_v6, %v709_v0  ;;  %v289_v17 = vmul.f32 %v540_v7, %v709_v0  ;;  %v605_v4 = vld [vmem:[%s704_s19 + $0x48] sm:$0xff]  }
  0x15   : > { %v290_v18 = vmul.f32 %v543_v10, %v709_v0  ;;  %v291_v19 = vmul.f32 %v544_v11, %v709_v0  ;;  %v292_v20 = vmul.f32 %v547_v12, %v709_v0  ;;  %v293_v21 = vmul.f32 %v548_v13, %v709_v0  ;;  %v606_v10 = vld [vmem:[%s704_s19 + $0x50] sm:$0xff]   ;;  %v607_v11 = vld [vmem:[%s704_s19 + $0x58] sm:$0xff]  }
  0x16   : > { %v325_v22 = vadd.f32 %v718_v9, %v286_v14  ;;  %v326_v23 = vadd.f32 %v718_v9, %v287_v15  ;;  %v327_v24 = vadd.f32 %v718_v9, %v288_v16  ;;  %v328_v25 = vadd.f32 %v718_v9, %v289_v17 }
  0x17   : > { %v329_v26 = vadd.f32 %v718_v9, %v290_v18  ;;  %v330_v27 = vadd.f32 %v718_v9, %v291_v19  ;;  %v331_v28 = vadd.f32 %v718_v9, %v292_v20  ;;  %v332_v29 = vadd.f32 %v718_v9, %v293_v21 }
  0x18   : > { %v357_v32 = vmax.f32 %v325_v22, 0.0  ;;  %v358_v33 = vmax.f32 %v326_v23, 0.0  ;;  %v359_v34 = vmax.f32 %v327_v24, 0.0  ;;  %v360_v35 = vmax.f32 %v328_v25, 0.0 }
  0x19   : > { %v361_v38 = vmax.f32 %v329_v26, 0.0  ;;  %v362_v39 = vmax.f32 %v330_v27, 0.0  ;;  %v363_v40 = vmax.f32 %v331_v28, 0.0  ;;  %v364_v41 = vmax.f32 %v332_v29, 0.0 }
  0x1a   : > { %390 = vst.msk [vmem:[%s736_s27] sm:$0xff] %vm389_vm0, %v357_v32  ;;  %391 = vst.msk [vmem:[%s736_s27 + $0x8] sm:$0xff] %vm389_vm0, %v358_v33  ;;  %v551_v42 = vunpack.c.l.bf16 %v600_v30  ;;  %v552_v43 = vunpack.c.h.bf16 %v600_v30  ;;  %v555_v44 = vunpack.c.l.bf16 %v601_v31  ;;  %v556_v45 = vunpack.c.h.bf16 %v601_v31 }
  0x1b   : > { %392 = vst.msk [vmem:[%s736_s27 + $0x10] sm:$0xff] %vm389_vm0, %v359_v34  ;;  %393 = vst.msk [vmem:[%s736_s27 + $0x18] sm:$0xff] %vm389_vm0, %v360_v35  ;;  %v559_v46 = vunpack.c.l.bf16 %v602_v36  ;;  %v560_v47 = vunpack.c.h.bf16 %v602_v36  ;;  %v563_v48 = vunpack.c.l.bf16 %v603_v37  ;;  %v564_v49 = vunpack.c.h.bf16 %v603_v37 }
  0x1c   : > { %394 = vst.msk [vmem:[%s736_s27 + $0x20] sm:$0xff] %vm389_vm0, %v361_v38  ;;  %395 = vst.msk [vmem:[%s736_s27 + $0x28] sm:$0xff] %vm389_vm0, %v362_v39  ;;  %v294_v50 = vmul.f32 %v551_v42, %v709_v0  ;;  %v295_v51 = vmul.f32 %v552_v43, %v709_v0  ;;  %v296_v52 = vmul.f32 %v555_v44, %v709_v0  ;;  %v567_v16 = vunpack.c.l.bf16 %v604_v3 }
  0x1d   : > { %396 = vst.msk [vmem:[%s736_s27 + $0x30] sm:$0xff] %vm389_vm0, %v363_v40  ;;  %397 = vst.msk [vmem:[%s736_s27 + $0x38] sm:$0xff] %vm389_vm0, %v364_v41  ;;  %v297_v53 = vmul.f32 %v556_v45, %v709_v0  ;;  %v298_v54 = vmul.f32 %v559_v46, %v709_v0  ;;  %v299_v55 = vmul.f32 %v560_v47, %v709_v0  ;;  %v568_v17 = vunpack.c.h.bf16 %v604_v3  ;;  %v608_v40 = vld [vmem:[%s704_s19 + $0x60] sm:$0xff]   ;;  %v609_v41 = vld [vmem:[%s704_s19 + $0x68] sm:$0xff]  }
  0x1e   : > { %v300_v56 = vmul.f32 %v563_v48, %v709_v0  ;;  %v301_v57 = vmul.f32 %v564_v49, %v709_v0  ;;  %v333_v58 = vadd.f32 %v718_v9, %v294_v50  ;;  %v334_v59 = vadd.f32 %v718_v9, %v295_v51  ;;  %v610_v46 = vld [vmem:[%s704_s19 + $0x70] sm:$0xff]   ;;  %v611_v47 = vld [vmem:[%s704_s19 + $0x78] sm:$0xff]  }
  0x1f   : > { %v335_v60 = vadd.f32 %v718_v9, %v296_v52  ;;  %v336_v61 = vadd.f32 %v718_v9, %v297_v53  ;;  %v337_v62 = vadd.f32 %v718_v9, %v298_v54  ;;  %v338_v63 = vadd.f32 %v718_v9, %v299_v55 }
  0x20   : > { %v339_v1 = vadd.f32 %v718_v9, %v300_v56  ;;  %v340_v2 = vadd.f32 %v718_v9, %v301_v57  ;;  %v365_v5 = vmax.f32 %v333_v58, 0.0  ;;  %v366_v6 = vmax.f32 %v334_v59, 0.0 }
  0x21   : > { %v367_v7 = vmax.f32 %v335_v60, 0.0  ;;  %v368_v8 = vmax.f32 %v336_v61, 0.0  ;;  %v369_v12 = vmax.f32 %v337_v62, 0.0  ;;  %v370_v13 = vmax.f32 %v338_v63, 0.0 }
  0x22   : > { %v371_v14 = vmax.f32 %v339_v1, 0.0  ;;  %v372_v15 = vmax.f32 %v340_v2, 0.0  ;;  %398 = vst.msk [vmem:[%s736_s27 + $0x40] sm:$0xff] %vm389_vm0, %v365_v5  ;;  %399 = vst.msk [vmem:[%s736_s27 + $0x48] sm:$0xff] %vm389_vm0, %v366_v6  ;;  %v571_v18 = vunpack.c.l.bf16 %v605_v4  ;;  %v572_v19 = vunpack.c.h.bf16 %v605_v4 }
  0x23   : > { %400 = vst.msk [vmem:[%s736_s27 + $0x50] sm:$0xff] %vm389_vm0, %v367_v7  ;;  %401 = vst.msk [vmem:[%s736_s27 + $0x58] sm:$0xff] %vm389_vm0, %v368_v8  ;;  %v575_v20 = vunpack.c.l.bf16 %v606_v10  ;;  %v576_v21 = vunpack.c.h.bf16 %v606_v10  ;;  %v579_v22 = vunpack.c.l.bf16 %v607_v11  ;;  %v580_v23 = vunpack.c.h.bf16 %v607_v11 }
  0x24   : > { %402 = vst.msk [vmem:[%s736_s27 + $0x60] sm:$0xff] %vm389_vm0, %v369_v12  ;;  %403 = vst.msk [vmem:[%s736_s27 + $0x68] sm:$0xff] %vm389_vm0, %v370_v13  ;;  %v302_v24 = vmul.f32 %v567_v16, %v709_v0  ;;  %v303_v25 = vmul.f32 %v568_v17, %v709_v0  ;;  %v304_v26 = vmul.f32 %v571_v18, %v709_v0  ;;  %v583_v52 = vunpack.c.l.bf16 %v608_v40 }
  0x25   : > { %404 = vst.msk [vmem:[%s736_s27 + $0x70] sm:$0xff] %vm389_vm0, %v371_v14  ;;  %405 = vst.msk [vmem:[%s736_s27 + $0x78] sm:$0xff] %vm389_vm0, %v372_v15  ;;  %v305_v27 = vmul.f32 %v572_v19, %v709_v0  ;;  %v306_v28 = vmul.f32 %v575_v20, %v709_v0  ;;  %v307_v29 = vmul.f32 %v576_v21, %v709_v0  ;;  %v584_v53 = vunpack.c.h.bf16 %v608_v40 }
  0x26   : > { %v308_v30 = vmul.f32 %v579_v22, %v709_v0  ;;  %v309_v31 = vmul.f32 %v580_v23, %v709_v0  ;;  %v341_v32 = vadd.f32 %v718_v9, %v302_v24  ;;  %v342_v33 = vadd.f32 %v718_v9, %v303_v25 }
  0x27   : > { %v343_v34 = vadd.f32 %v718_v9, %v304_v26  ;;  %v344_v35 = vadd.f32 %v718_v9, %v305_v27  ;;  %v345_v36 = vadd.f32 %v718_v9, %v306_v28  ;;  %v346_v37 = vadd.f32 %v718_v9, %v307_v29 }
  0x28   : > { %v347_v38 = vadd.f32 %v718_v9, %v308_v30  ;;  %v348_v39 = vadd.f32 %v718_v9, %v309_v31  ;;  %v373_v42 = vmax.f32 %v341_v32, 0.0  ;;  %v374_v43 = vmax.f32 %v342_v33, 0.0 }
  0x29   : > { %v375_v44 = vmax.f32 %v343_v34, 0.0  ;;  %v376_v45 = vmax.f32 %v344_v35, 0.0  ;;  %v377_v48 = vmax.f32 %v345_v36, 0.0  ;;  %v378_v49 = vmax.f32 %v346_v37, 0.0 }
  0x2a   : > { %v379_v50 = vmax.f32 %v347_v38, 0.0  ;;  %v380_v51 = vmax.f32 %v348_v39, 0.0  ;;  %406 = vst.msk [vmem:[%s736_s27 + $0x80] sm:$0xff] %vm389_vm0, %v373_v42  ;;  %407 = vst.msk [vmem:[%s736_s27 + $0x88] sm:$0xff] %vm389_vm0, %v374_v43  ;;  %v587_v54 = vunpack.c.l.bf16 %v609_v41  ;;  %v588_v55 = vunpack.c.h.bf16 %v609_v41 }
  0x2b   : > { %408 = vst.msk [vmem:[%s736_s27 + $0x90] sm:$0xff] %vm389_vm0, %v375_v44  ;;  %409 = vst.msk [vmem:[%s736_s27 + $0x98] sm:$0xff] %vm389_vm0, %v376_v45  ;;  %v591_v56 = vunpack.c.l.bf16 %v610_v46  ;;  %v592_v57 = vunpack.c.h.bf16 %v610_v46  ;;  %v595_v58 = vunpack.c.l.bf16 %v611_v47  ;;  %v596_v59 = vunpack.c.h.bf16 %v611_v47 }
  0x2c   : > { %410 = vst.msk [vmem:[%s736_s27 + $0xa0] sm:$0xff] %vm389_vm0, %v377_v48  ;;  %411 = vst.msk [vmem:[%s736_s27 + $0xa8] sm:$0xff] %vm389_vm0, %v378_v49  ;;  %v310_v60 = vmul.f32 %v583_v52, %v709_v0  ;;  %v311_v61 = vmul.f32 %v584_v53, %v709_v0  ;;  %v312_v62 = vmul.f32 %v587_v54, %v709_v0 }
  0x2d   : > { %412 = vst.msk [vmem:[%s736_s27 + $0xb0] sm:$0xff] %vm389_vm0, %v379_v50  ;;  %413 = vst.msk [vmem:[%s736_s27 + $0xb8] sm:$0xff] %vm389_vm0, %v380_v51  ;;  %v313_v63 = vmul.f32 %v588_v55, %v709_v0  ;;  %v314_v1 = vmul.f32 %v591_v56, %v709_v0  ;;  %v315_v2 = vmul.f32 %v592_v57, %v709_v0 }
  0x2e   : > { %v316_v3 = vmul.f32 %v595_v58, %v709_v0  ;;  %v317_v4 = vmul.f32 %v596_v59, %v709_v0  ;;  %v349_v5 = vadd.f32 %v718_v9, %v310_v60  ;;  %v350_v6 = vadd.f32 %v718_v9, %v311_v61 }
  0x2f   : > { %v351_v7 = vadd.f32 %v718_v9, %v312_v62  ;;  %v352_v8 = vadd.f32 %v718_v9, %v313_v63  ;;  %v353_v10 = vadd.f32 %v718_v9, %v314_v1  ;;  %v354_v11 = vadd.f32 %v718_v9, %v315_v2 }
  0x30   : > { %v355_v0 = vadd.f32 %v718_v9, %v316_v3  ;;  %v356_v12 = vadd.f32 %v718_v9, %v317_v4  ;;  %v381_v13 = vmax.f32 %v349_v5, 0.0  ;;  %v382_v14 = vmax.f32 %v350_v6, 0.0 }
  0x31   : > { %v383_v15 = vmax.f32 %v351_v7, 0.0  ;;  %v384_v16 = vmax.f32 %v352_v8, 0.0  ;;  %v385_v17 = vmax.f32 %v353_v10, 0.0  ;;  %v386_v18 = vmax.f32 %v354_v11, 0.0 }
  0x32   : > { %v387_v19 = vmax.f32 %v355_v0, 0.0  ;;  %v388_v20 = vmax.f32 %v356_v12, 0.0  ;;  %414 = vst.msk [vmem:[%s736_s27 + $0xc0] sm:$0xff] %vm389_vm0, %v381_v13  ;;  %415 = vst.msk [vmem:[%s736_s27 + $0xc8] sm:$0xff] %vm389_vm0, %v382_v14 }
  0x33   : > { %416 = vst.msk [vmem:[%s736_s27 + $0xd0] sm:$0xff] %vm389_vm0, %v383_v15  ;;  %417 = vst.msk [vmem:[%s736_s27 + $0xd8] sm:$0xff] %vm389_vm0, %v384_v16 }
  0x34   : > { %418 = vst.msk [vmem:[%s736_s27 + $0xe0] sm:$0xff] %vm389_vm0, %v385_v17  ;;  %419 = vst.msk [vmem:[%s736_s27 + $0xe8] sm:$0xff] %vm389_vm0, %v386_v18 }
  0x35   : > { %420 = vst.msk [vmem:[%s736_s27 + $0xf0] sm:$0xff] %vm389_vm0, %v387_v19  ;;  %421 = vst.msk [vmem:[%s736_s27 + $0xf8] sm:$0xff] %vm389_vm0, %v388_v20 }
  0x36 PF: > { %s13_s14 = sadd.s32 1, %s658_s14   ;;  %s879_s12 = smov %s654_s13 }
  0x37   : > { %p10_p5 = scmp.ge.s32.totalorder %s13_s14, 4   ;;  %s880_s13 = smov %s882_s15 }
  0x39   :  { %12 = sbr.rel (!%p10_p5) target bundleno = 2 (0x2), region = 62 }

// kernel: up_block_forward.6
= control target key start
LH: loop header
LB: loop body
LE: loop exit
PB: predicated region body
PF: predicated region fallthrough
CT: control target
= control target key end

     0   :  { %s6353_s24 = smov 0   ;;  %s6355_s1 = smov 0   ;;  %s7749_s0 = inlined_call_operand.vmem [shape: bf16[2,16,16,4], index: 0, kind: input, shape index: {}, may-alias: {0,1,2}]   ;;  %s7750_s1 = inlined_call_operand.vmem [shape: bf16[2,16,16,4], index: 1, kind: input, shape index: {}, may-alias: {0,1,2}]   ;;  %s7751_s2 = inlined_call_operand.vmem [shape: bf16[2,16,16,4], index: 2, kind: input, shape index: {}, may-alias: {0,1,2}]   ;;  %s7752_s3 = inlined_call_operand.vmem [shape: f32[1,4], index: 3, kind: input, shape index: {}]   ;;  %s7753_s4 = inlined_call_operand.vmem [shape: f32[1,4], index: 4, kind: input, shape index: {}]   ;;  %s7754_s5 = inlined_call_operand.vmem [shape: bf16[3,12,4], index: 5, kind: input, shape index: {}]   ;;  %s7755_s6 = inlined_call_operand.vmem [shape: bf16[2,16,16,4], index: 6, kind: output, shape index: {0}]   ;;  %s7756_s7 = inlined_call_operand.vmem [shape: f32[2,1,2,4], index: 7, kind: output, shape index: {1}]  }
   0x1   :  { %s6357_s2 = smov 0  }
   0x2 LB: > { %s30_s25 = sadd.s32 1, %s6304_s1  ;;  %p5260_p0 = scmp.ge.s32.totalorder %s6308_s2, 1  ;;  %s6308_s2 = sphi %s6357_s2, %s18_s2   ;;  %s6304_s1 = sphi %s6355_s1, %s7772_s1   ;;  %s6300_s24 = sphi %s6353_s24, %s7771_s24  }
   0x3   : > { %p32_p1 = scmp.ge.s32.totalorder %s30_s25, 2  ;;  %p328_p2 = scmp.lt.s32.totalorder %s6308_s2, 3 }
   0x5   : > { %s7774_s25 = smov (%p32_p1, %s30_s25), 0  ;;  %p329_p3 = pnand %p5260_p0, %p328_p2 }
   0x6   : > { %vm469_vm0 = vcmask (!%p329_p3), 24576   ;;  %vm470_vm1 = vsmask.f32 (!%p329_p3), 256  ;;  %v472_v0 = vld [vmem:[#allocation2] sm:$0x1] (!%p329_p3)  ;;  %vm1173_vm4 = vcmask (!%p329_p3), 27648  }
   0x7   : > { %332 = sbr.rel (%p329_p3) target bundleno = 667 (0x29b), region = 44  ;;  %vm6373_vm2 = vmand (!%p329_p3), %vm469_vm0, %vm470_vm1  ;;  %vm526_vm3 = vsmask.f32 (!%p329_p3), 7938  ;;  %v528_v2 = vld [vmem:[#allocation2 + $0x8] sm:$0x1] (!%p329_p3)  ;;  %v6310_v5 = vmov (!%p329_p3), 0  }
   0x8   : > { %v473_v3 = vsel (!%p329_p3), %vm6373_vm2, 0, %v472_v0  ;;  %vm6381_vm5 = vmand (!%p329_p3), %vm469_vm0, %vm526_vm3  ;;  %1342 = vst.msk [vmem:[#allocation2 + $0x4] sm:$0xf] (!%p329_p3), %vm1173_vm4, %v6310_v5  ;;  %p404_p4 = scmp.lt.s32.totalorder (!%p329_p3), %s6300_s24, 1  ;;  %v478_v7 = vld [vmem:[#allocation2 + $0x18] sm:$0x1] (!%p329_p3) }
   0x9   : > { %1401 = vst.msk [vmem:[#allocation2 + $0xd0] sm:$0xf] (!%p329_p3), %vm1173_vm4, %v6310_v5  ;;  %474 = vst [vmem:[#allocation2] sm:$0x1] (!%p329_p3), %v473_v3  ;;  %v529_v6 = vsel (!%p329_p3), %vm6381_vm5, 0, %v528_v2  ;;  %v479_v9 = vsel (!%p329_p3), %vm6373_vm2, 0, %v478_v7 }
   0xa   : > { %530 = vst [vmem:[#allocation2 + $0x8] sm:$0x1] (!%p329_p3), %v529_v6  ;;  %v534_v8 = vld [vmem:[#allocation2 + $0x20] sm:$0x1] (!%p329_p3)  ;;  %v475_v11 = vld [vmem:[#allocation2 + $0xc] sm:$0x1] (!%p329_p3)  ;;  %vm6409_vm6 = vmand (!%p329_p3), %vm1173_vm4, %vm526_vm3 }
   0xb   : > { %v535_v10 = vsel (!%p329_p3), %vm6381_vm5, 0, %v534_v8  ;;  %480 = vst [vmem:[#allocation2 + $0x18] sm:$0x1] (!%p329_p3), %v479_v9  ;;  %v476_v12 = vsel (!%p329_p3), %vm6373_vm2, 0, %v475_v11  ;;  %v531_v13 = vld [vmem:[#allocation2 + $0x14] sm:$0x1] (!%p329_p3) }
   0xc   : > { %536 = vst [vmem:[#allocation2 + $0x20] sm:$0x1] (!%p329_p3), %v535_v10  ;;  %v481_v14 = vld [vmem:[#allocation2 + $0x24] sm:$0x1] (!%p329_p3)  ;;  %v6401_v15 = vld [vmem:[%s7752_s3] ss:$0 sm:$0xff] (!%p329_p3) }
   0xd   : > { %477 = vst [vmem:[#allocation2 + $0xc] sm:$0x1] (!%p329_p3), %v476_v12  ;;  %v532_v16 = vsel (!%p329_p3), %vm6381_vm5, 0, %v531_v13  ;;  %v482_v17 = vsel (!%p329_p3), %vm6373_vm2, 0, %v481_v14  ;;  %v537_v18 = vld [vmem:[#allocation2 + $0x2c] sm:$0x1] (!%p329_p3) }
   0xe   : > { %s7776_s24 = smov (!%p404_p4, %s6300_s24), 1  ;;  %533 = vst [vmem:[#allocation2 + $0x14] sm:$0x1] %v532_v16  ;;  %483 = vst [vmem:[#allocation2 + $0x24] sm:$0x1] %v482_v17  ;;  %v538_v20 = vsel %vm6381_vm5, 0, %v537_v18 }
   0xf   : > { %s5637_s26 = sshll.u32 %s7776_s24, 7  ;;  %v484_v21 = vld [vmem:[#allocation2 + $0x30] sm:$0x1]  ;;  %v540_v22 = vld [vmem:[#allocation2 + $0x38] sm:$0x1]  ;;  %vm2160_vm7 = vcmask 1046528  }
  0x10   : > { %s6418_s8 = scalar_lea.vmem %s7749_s0, %s5637_s26  ;;  %539 = vst [vmem:[#allocation2 + $0x2c] sm:$0x1] %v538_v20  ;;  %v485_v24 = vsel %vm6373_vm2, 0, %v484_v21  ;;  %v1339_v25 = vld [vmem:[#allocation2] sm:$0xf]  ;;  %v541_v30 = vsel %vm6381_vm5, 0, %v540_v22  ;;  %s7596_s9 = scalar_lea.vmem %s7755_s6, %s5637_s26 }
  0x11   : > { %v5774_v23 = vld [vmem:[%s6418_s8 + $0x8] sm:$0xff]   ;;  %v5711_v28 = vld [vmem:[%s6418_s8] sm:$0xff]   ;;  %v5775_v29 = vld [vmem:[%s6418_s8 + $0x10] sm:$0xff]   ;;  %486 = vst [vmem:[#allocation2 + $0x30] sm:$0x1] %v485_v24  ;;  %v1340_v31 = vsel %vm6409_vm6, 0, %v1339_v25 }
  0x12   : > { %v5716_v26 = vunpack.c.l.bf16 %v5774_v23  ;;  %v5717_v27 = vunpack.c.h.bf16 %v5774_v23  ;;  %v1343_v32 = vld [vmem:[#allocation2 + $0x8] sm:$0x1]  ;;  %v6434_v33 = vld [vmem:[%s7753_s4] ss:$0 sm:$0xff]  ;;  %v5712_v34 = vunpack.c.l.bf16 %v5711_v28  ;;  %v5713_v35 = vunpack.c.h.bf16 %v5711_v28  ;;  %542 = vst [vmem:[#allocation2 + $0x38] sm:$0x1] %v541_v30 }
  0x13   : > { %v5720_v36 = vunpack.c.l.bf16 %v5775_v29  ;;  %v5776_v37 = vld [vmem:[%s6418_s8 + $0x18] sm:$0xff]   ;;  %1341 = vst [vmem:[#allocation2] sm:$0xf] %v1340_v31  ;;  %v1344_v38 = vsel %vm6373_vm2, 0, %v1343_v32  ;;  %v5721_v41 = vunpack.c.h.bf16 %v5775_v29  ;;  %v6454_v58 = vld [vmem:[%s6418_s8 + $0x20] sm:$0xff]   ;;  %s6311_s11 = smov 8  }
  0x14   : > { %v654_v39 = vmul.f32 %v5716_v26, %v6401_v15  ;;  %v655_v40 = vmul.f32 %v5717_v27, %v6401_v15  ;;  %1345 = vst [vmem:[#allocation2 + $0x8] sm:$0x1] %v1344_v38  ;;  %v652_v42 = vmul.f32 %v5712_v34, %v6401_v15  ;;  %v653_v43 = vmul.f32 %v5713_v35, %v6401_v15  ;;  %v1183_v34 = vld [vmem:[#allocation2 + $0x18] sm:$0xf]  ;;  %s6312_s12 = smov 4   ;;  %s5269_s26 = sshll.u32 %s7776_s24, 1 }
  0x15   : > { %v656_v44 = vmul.f32 %v5720_v36, %v6401_v15  ;;  %v5724_v45 = vunpack.c.l.bf16 %v5776_v37  ;;  %v657_v48 = vmul.f32 %v5721_v41, %v6401_v15  ;;  %v5725_v49 = vunpack.c.h.bf16 %v5776_v37  ;;  %v1187_v41 = vld [vmem:[#allocation2 + $0x20] sm:$0x1] }
  0x16   : > { %v692_v46 = vadd.f32 %v6434_v33, %v654_v39  ;;  %v693_v47 = vadd.f32 %v6434_v33, %v655_v40  ;;  %v690_v50 = vadd.f32 %v6434_v33, %v652_v42  ;;  %v691_v51 = vadd.f32 %v6434_v33, %v653_v43  ;;  %v1175_v43 = vld [vmem:[#allocation2 + $0xc] sm:$0xf] }
  0x17   : > { %v694_v52 = vadd.f32 %v6434_v33, %v656_v44  ;;  %v658_v53 = vmul.f32 %v5724_v45, %v6401_v15  ;;  %v695_v56 = vadd.f32 %v6434_v33, %v657_v48  ;;  %v659_v57 = vmul.f32 %v5725_v49, %v6401_v15  ;;  %v1180_v48 = vld [vmem:[#allocation2 + $0x14] sm:$0x1]  ;;  %v487_v49 = vld [vmem:[#allocation2 + $0x3c] sm:$0x1] }
  0x18   : > { %v724_v54 = vmax.f32 %v692_v46, 0.0  ;;  %v725_v55 = vmax.f32 %v693_v47, 0.0  ;;  %v722_v59 = vmax.f32 %v690_v50, 0.0  ;;  %v723_v60 = vmax.f32 %v691_v51, 0.0 }
  0x19   : > { %v726_v61 = vmax.f32 %v694_v52, 0.0  ;;  %vm1726_vm8 = vsmask.f32 7424  ;;  %vm850_vm9 = vsmask.f32 4368  ;;  %v727_v63 = vmax.f32 %v695_v56, 0.0 }
  0x1a   : > { %v5644_v62 = vpack.c.bf16 %v724_v54, %v724_v54  ;;  %v6039_v0 = vld [vmem:[#allocation2] sm:$0xfe]   ;;  %v5645_v2 = vpack.c.bf16 %v725_v55, %v725_v55  ;;  %v6457_v3 = vadd.f32 %v6434_v33, %v658_v53  ;;  %v5728_v5 = vunpack.c.l.bf16 %v6454_v58  ;;  %vm6475_vm10 = vmor %vm470_vm1, %vm850_vm9 }
  0x1b   : > { %v6040_v6 = vld [vmem:[#allocation2 + $0x8] ss:$0 sps:$4 sm:$0x11]   ;;  %v6041_v7 = vld [vmem:[#allocation2] sm:$0xff]   ;;  %v5642_v8 = vpack.c.bf16 %v722_v59, %v722_v59  ;;  %v5643_v9 = vpack.c.bf16 %v723_v60, %v723_v60  ;;  %v6460_v10 = vpack.c.bf16 %v726_v61, %v726_v61  ;;  %v6463_v11 = vadd.f32 %v6434_v33, %v659_v57 }
  0x1c   : > { %v2161_v12 = vrot.slane %v6039_v0, 1  ;;  %v6042_v13 = vld [vmem:[#allocation2 + $0x8] ss:$0 sps:$4 sm:$0x11]   ;;  %v6465_v14 = vpack.c.bf16 %v727_v63, %v727_v63  ;;  %v5729_v16 = vunpack.c.h.bf16 %v6454_v58  ;;  %v6469_v17 = vmul.f32 %v5728_v5, %v6401_v15  ;;  %v543_v54 = vld [vmem:[#allocation2 + $0x44] sm:$0x1] }
  0x1d   : > { %v2162_v18 = vrot.slane %v6040_v6, 1  ;;  %v1728_v20 = vshrl.u32 %v6041_v7, 16  ;;  %v1730_v21 = vshll.u32 %v6041_v7, 16  ;;  %v870_v22 = vshrl.u32 %v5644_v62, 16  ;;  %v1190_v6 = vld [vmem:[#allocation2 + $0x24] sm:$0xf] }
  0x1e   : > { %v1735_v23 = vshll.u32 %v6042_v13, 16  ;;  %v873_v24 = vshll.u32 %v5644_v62, 16  ;;  %v878_v25 = vshrl.u32 %v5645_v2, 16  ;;  %v881_v26 = vshll.u32 %v5645_v2, 16 }
  0x1f   : > { %v2163_v27 = vsel %vm2160_vm7, %v2161_v12, %v2162_v18  ;;  %v1732_v28 = vrot.slane %v1730_v21, 1  ;;  %v872_v29 = vrot.slane %v870_v22, 7  ;;  %v853_v30 = vshrl.u32 %v5642_v8, 16 }
  0x20   : > { %2209 = vrot.lane.b32.xlu1 %v2163_v27, %s6311_s11  ;;  %v1737_v31 = vrot.slane %v1735_v23, 1  ;;  %v880_v32 = vrot.slane %v878_v25, 7  ;;  %v856_v35 = vshll.u32 %v5642_v8, 16  ;;  %v861_v36 = vshrl.u32 %v5643_v9, 16 }
  0x21   : > { %v1733_v37 = vor.u32 %v1732_v28, %v1728_v20  ;;  %v875_v39 = vor.u32 %v873_v24, %v872_v29  ;;  %v876_v40 = vrot.slane %v872_v29, 4  ;;  %v855_v42 = vrot.slane %v853_v30, 7 }
  0x22   : > { %v883_v44 = vor.u32 %v881_v26, %v880_v32  ;;  %v885_v45 = vrot.slane %v880_v32, 4  ;;  %v863_v46 = vrot.slane %v861_v36, 7  ;;  %v864_v47 = vshll.u32 %v5643_v9, 16 }
  0x23   : > { %v1738_v50 = vsel %vm1726_vm8, %v1733_v37, %v1737_v31  ;;  %v1184_v51 = vsel %vm6409_vm6, %v875_v39, %v1183_v34  ;;  %v858_v52 = vor.u32 %v856_v35, %v855_v42  ;;  %v859_v53 = vrot.slane %v855_v42, 4  ;;  %v1197_v34 = vld [vmem:[#allocation2 + $0x30] sm:$0xf] }
  0x24   : > { %1919 = vrot.lane.b32.xlu0 %v1738_v50, %s6312_s12  ;;  %v884_v55 = vsel %vm6475_vm10, %v876_v40, %v883_v44  ;;  %1185 = vst [vmem:[#allocation2 + $0x18] sm:$0xf] %v1184_v51  ;;  %v1188_v56 = vsel %vm6373_vm2, %v885_v45, %v1187_v41  ;;  %v866_v57 = vor.u32 %v864_v47, %v863_v46  ;;  %v868_v59 = vrot.slane %v863_v46, 4  ;;  %v1201_v47 = vld [vmem:[#allocation2 + $0x38] sm:$0x1] }
  0x25   : > { %1186 = vst.msk [vmem:[#allocation2 + $0x1c] sm:$0xf] %vm1173_vm4, %v884_v55  ;;  %1189 = vst [vmem:[#allocation2 + $0x20] sm:$0x1] %v1188_v56  ;;  %v1176_v60 = vsel %vm6409_vm6, %v858_v52, %v1175_v43  ;;  %v887_v61 = vshrl.u32 %v6460_v10, 16  ;;  %v890_v62 = vshll.u32 %v6460_v10, 16 }
  0x26   : > { %v895_v63 = vshrl.u32 %v6465_v14, 16  ;;  %v867_v0 = vsel %vm6475_vm10, %v859_v53, %v866_v57  ;;  %1177 = vst [vmem:[#allocation2 + $0xc] sm:$0xf] %v1176_v60  ;;  %v1181_v2 = vsel %vm6373_vm2, %v868_v59, %v1180_v48  ;;  %v898_v5 = vshll.u32 %v6465_v14, 16  ;;  %v1194_v10 = vld [vmem:[#allocation2 + $0x2c] sm:$0x1] }
  0x27   : > { %v728_v7 = vmax.f32 %v6457_v3, 0.0  ;;  %1179 = vst.msk [vmem:[#allocation2 + $0x10] sm:$0xf] %vm1173_vm4, %v867_v0  ;;  %1182 = vst [vmem:[#allocation2 + $0x14] sm:$0x1] %v1181_v2  ;;  %v889_v8 = vrot.slane %v887_v61, 7  ;;  %v698_v14 = vadd.f32 %v6434_v33, %v6469_v17 }
  0x28   : > { %v897_v9 = vrot.slane %v895_v63, 7  ;;  %v729_v12 = vmax.f32 %v6463_v11, 0.0  ;;  %v488_v13 = vsel %vm6373_vm2, 0, %v487_v49  ;;  %v544_v20 = vsel %vm6381_vm5, 0, %v543_v54 }
  0x29   : > { %v5648_v18 = vpack.c.bf16 %v728_v7, %v728_v7  ;;  %489 = vst [vmem:[#allocation2 + $0x3c] sm:$0x1] %v488_v13  ;;  %v892_v3 = vor.u32 %v890_v62, %v889_v8  ;;  %v893_v21 = vrot.slane %v889_v8, 4  ;;  %545 = vst [vmem:[#allocation2 + $0x44] sm:$0x1] %v544_v20  ;;  %v661_v11 = vmul.f32 %v5729_v16, %v6401_v15 }
  0x2a   : > { %v900_v22 = vor.u32 %v898_v5, %v897_v9  ;;  %v902_v23 = vrot.slane %v897_v9, 4  ;;  %v5649_v24 = vpack.c.bf16 %v729_v12, %v729_v12  ;;  %v730_v29 = vmax.f32 %v698_v14, 0.0 }
  0x2b   : > { %v904_v25 = vshrl.u32 %v5648_v18, 16  ;;  %v907_v26 = vshll.u32 %v5648_v18, 16  ;;  %v1191_v28 = vsel %vm6409_vm6, %v892_v3, %v1190_v6  ;;  %v699_v35 = vadd.f32 %v6434_v33, %v661_v11 }
  0x2c   : > { %v901_v27 = vsel %vm6475_vm10, %v893_v21, %v900_v22  ;;  %v1195_v17 = vsel %vm6373_vm2, %v902_v23, %v1194_v10  ;;  %v6043_v30 = vld [vmem:[#allocation2 + $0x18] sm:$0xfe]   ;;  %1192 = vst [vmem:[#allocation2 + $0x24] sm:$0xf] %v1191_v28  ;;  %v912_v16 = vshrl.u32 %v5649_v24, 16  ;;  %v5650_v41 = vpack.c.bf16 %v730_v29, %v730_v29 }
  0x2d   : > { %1193 = vst.msk [vmem:[#allocation2 + $0x28] sm:$0xf] %vm1173_vm4, %v901_v27  ;;  %1196 = vst [vmem:[#allocation2 + $0x2c] sm:$0x1] %v1195_v17  ;;  %v906_v32 = vrot.slane %v904_v25, 7  ;;  %v2167_v58 = vrot.slane %v6043_v30, 1 }
  0x2e   : > { %v6044_v31 = vld [vmem:[#allocation2 + $0x20] ss:$0 sps:$4 sm:$0x11]   ;;  %v6045_v37 = vld [vmem:[#allocation2 + $0xc] sm:$0xfe]   ;;  %v914_v49 = vrot.slane %v912_v16, 7 }
  0x2f   : > { %v2168_v36 = vrot.slane %v6044_v31, 1  ;;  %v6046_v39 = vld [vmem:[#allocation2 + $0x14] ss:$0 sps:$4 sm:$0x11]   ;;  %v909_v40 = vor.u32 %v907_v26, %v906_v32  ;;  %v2164_v43 = vrot.slane %v6045_v37, 1  ;;  %v910_v46 = vrot.slane %v906_v32, 4 }
  0x30   : > { %v2165_v44 = vrot.slane %v6046_v39, 1  ;;  %v6047_v45 = vld [vmem:[#allocation2 + $0xc] sm:$0xfe]   ;;  %v6048_v48 = vld [vmem:[#allocation2 + $0x14] ss:$0 sps:$4 sm:$0x11]  }
  0x31   : > { %v2169_v42 = vsel %vm2160_vm7, %v2167_v58, %v2168_v36  ;;  %v915_v50 = vshll.u32 %v5649_v24, 16  ;;  %v1198_v51 = vsel %vm6409_vm6, %v909_v40, %v1197_v34  ;;  %v731_v52 = vmax.f32 %v699_v35, 0.0  ;;  %v6053_v7 = vld [vmem:[#allocation2 + $0x18] sm:$0xfe]   ;;  %v6061_v10 = vld [vmem:[#allocation2 + $0xc] sm:$0xff]  }
  0x32   : > { %2213 = vrot.lane.b32.xlu0 %v2169_v42, %s6311_s11  ;;  %v2166_v53 = vsel %vm2160_vm7, %v2164_v43, %v2165_v44  ;;  %v3044_v54 = vrot.slane %v6047_v45, 1  ;;  %1199 = vst [vmem:[#allocation2 + $0x30] sm:$0xf] %v1198_v51  ;;  %v921_v55 = vshrl.u32 %v5650_v41, 16  ;;  %v3045_v56 = vrot.slane %v6048_v48, 1  ;;  %v5779_v35 = vld [vmem:[%s6418_s8 + $0x30] sm:$0xff]  }
  0x33   : > { %2211 = vrot.lane.b32.xlu1 %v2166_v53, %s6311_s11  ;;  %v917_v59 = vor.u32 %v915_v50, %v914_v49  ;;  %v919_v60 = vrot.slane %v914_v49, 4  ;;  %v5651_v62 = vpack.c.bf16 %v731_v52, %v731_v52  ;;  %v6054_v9 = vld [vmem:[#allocation2 + $0x20] ss:$0 sps:$4 sm:$0x11]   ;;  %v3047_v12 = vrot.slane %v6053_v7, 1  ;;  %v5778_v39 = vld [vmem:[%s6418_s8 + $0x28] sm:$0xff]  }
  0x34   : > { %v6049_v57 = vld [vmem:[#allocation2 + $0x24] sm:$0xfe]   ;;  %v6050_v61 = vld [vmem:[#allocation2 + $0x2c] ss:$0 sps:$4 sm:$0x11]   ;;  %v923_v63 = vrot.slane %v921_v55, 7  ;;  %v3046_v0 = vsel %vm2160_vm7, %v3044_v54, %v3045_v56  ;;  %v5736_v53 = vunpack.c.l.bf16 %v5779_v35  ;;  %v5737_v54 = vunpack.c.h.bf16 %v5779_v35 }
  0x35   : > { %v2170_v2 = vrot.slane %v6049_v57, 1  ;;  %v918_v5 = vsel %vm6475_vm10, %v910_v46, %v917_v59  ;;  %v1202_v6 = vsel %vm6373_vm2, %v919_v60, %v1201_v47  ;;  %v2171_v8 = vrot.slane %v6050_v61, 1  ;;  %v6055_v14 = vld [vmem:[#allocation2 + $0x24] sm:$0xfe]   ;;  %v1204_v27 = vld [vmem:[#allocation2 + $0x3c] sm:$0xf] }
  0x36   : > { %3092 = vrot.lane.b32.xlu0 %v3046_v0, %s6311_s11  ;;  %1200 = vst.msk [vmem:[#allocation2 + $0x34] sm:$0xf] %vm1173_vm4, %v918_v5  ;;  %1203 = vst [vmem:[#allocation2 + $0x38] sm:$0x1] %v1202_v6  ;;  %v924_v13 = vshll.u32 %v5650_v41, 16  ;;  %v3048_v20 = vrot.slane %v6054_v9, 1  ;;  %v5732_v59 = vunpack.c.l.bf16 %v5778_v39  ;;  %v5733_v60 = vunpack.c.h.bf16 %v5778_v39 }
  0x37   : > { %v2172_v18 = vsel %vm2160_vm7, %v2170_v2, %v2171_v8  ;;  %v6056_v3 = vld [vmem:[#allocation2 + $0x2c] ss:$0 sps:$4 sm:$0x11]   ;;  %v929_v22 = vshrl.u32 %v5651_v62, 16  ;;  %v932_v23 = vshll.u32 %v5651_v62, 16  ;;  %v3050_v25 = vrot.slane %v6055_v14, 1 }
  0x38   : > { %2215 = vrot.lane.b32.xlu1 %v2172_v18, %s6311_s11  ;;  %v926_v21 = vor.u32 %v924_v13, %v923_v63  ;;  %v3049_v24 = vsel %vm2160_vm7, %v3047_v12, %v3048_v20  ;;  %v3051_v26 = vrot.slane %v6056_v3, 1  ;;  %v927_v11 = vrot.slane %v923_v63, 4  ;;  %v6534_v28 = vld [vmem:[#allocation2 + $0x24] sm:$0xff]   ;;  %v6065_v44 = vld [vmem:[#allocation2 + $0x18] sm:$0xff]  }
  0x39   : > { %v931_v17 = vrot.slane %v929_v22, 7  ;;  %v1208_v30 = vld [vmem:[#allocation2 + $0x44] sm:$0x1]  ;;  %v1740_v31 = vshrl.u32 %v6061_v10, 16  ;;  %v1742_v32 = vshll.u32 %v6061_v10, 16  ;;  %v1764_v34 = vshrl.u32 %v6534_v28, 16 }
  0x3a   : > { %v1205_v29 = vsel %vm6409_vm6, %v926_v21, %v1204_v27  ;;  %v6062_v49 = vld [vmem:[#allocation2 + $0x14] ss:$0 sps:$4 sm:$0x11]   ;;  %v6064_v52 = vld [vmem:[#allocation2 + $0x2c] ss:$0 sps:$4 sm:$0x11]   ;;  %v3052_v61 = vsel %vm2160_vm7, %v3050_v25, %v3051_v26  ;;  %v664_v10 = vmul.f32 %v5736_v53, %v6401_v15  ;;  %v665_v20 = vmul.f32 %v5737_v54, %v6401_v15 }
  0x3b   : > { %1206 = vst [vmem:[#allocation2 + $0x3c] sm:$0xf] %v1205_v29  ;;  %v934_v16 = vor.u32 %v932_v23, %v931_v17  ;;  %v936_v37 = vrot.slane %v931_v17, 4  ;;  %v1744_v43 = vrot.slane %v1742_v32, 1  ;;  %v5781_v55 = vld [vmem:[%s6418_s8 + $0x40] sm:$0xff]   ;;  %v1747_v56 = vshll.u32 %v6062_v49, 16 }
  0x3c   : > { %3094 = vrot.lane.b32.xlu1 %v3049_v24, %s6311_s11  ;;  %v1766_v57 = vshll.u32 %v6534_v28, 16  ;;  %v1771_v63 = vshll.u32 %v6064_v52, 16  ;;  %v1752_v0 = vshrl.u32 %v6065_v44, 16  ;;  %v6066_v6 = vld [vmem:[#allocation2 + $0x20] ss:$0 sps:$4 sm:$0x11]   ;;  %v5744_v14 = vunpack.c.l.bf16 %v5781_v55 }
  0x3d   : > { %v6051_v58 = vld [vmem:[#allocation2 + $0x30] sm:$0xfe]   ;;  %v6052_v36 = vld [vmem:[#allocation2 + $0x38] ss:$0 sps:$4 sm:$0x11]   ;;  %v935_v41 = vsel %vm6475_vm10, %v927_v11, %v934_v16  ;;  %v1209_v46 = vsel %vm6373_vm2, %v936_v37, %v1208_v30  ;;  %v1745_v62 = vor.u32 %v1744_v43, %v1740_v31  ;;  %v1749_v2 = vrot.slane %v1747_v56, 1 }
  0x3e   : > { %v2173_v40 = vrot.slane %v6051_v58, 1  ;;  %v6544_v42 = vld [vmem:[#allocation2 + $0x30] sm:$0xfe]   ;;  %v2174_v45 = vrot.slane %v6052_v36, 1  ;;  %1207 = vst.msk [vmem:[#allocation2 + $0x40] sm:$0xf] %vm1173_vm4, %v935_v41  ;;  %v662_v23 = vmul.f32 %v5732_v59, %v6401_v15  ;;  %v663_v24 = vmul.f32 %v5733_v60, %v6401_v15 }
  0x3f   : > { %v6549_v47 = vld [vmem:[#allocation2 + $0x38] ss:$0 sps:$4 sm:$0x11]   ;;  %1210 = vst [vmem:[#allocation2 + $0x44] sm:$0x1] %v1209_v46  ;;  %v3053_v48 = vrot.slane %v6544_v42, 1  ;;  %v1750_v21 = vsel %vm1726_vm8, %v1745_v62, %v1749_v2  ;;  %v5745_v27 = vunpack.c.h.bf16 %v5781_v55  ;;  %v6574_v16 = vadd.f32 %v6434_v33, %v664_v10 }
  0x40   : > { %v2175_v50 = vsel %vm2160_vm7, %v2173_v40, %v2174_v45  ;;  %v3054_v51 = vrot.slane %v6549_v47, 1  ;;  %v1768_v5 = vrot.slane %v1766_v57, 1  ;;  %v1754_v7 = vshll.u32 %v6065_v44, 16  ;;  %v6560_v9 = vld [vmem:[#allocation2 + $0x18] sm:$0xff]   ;;  %v6069_v31 = vld [vmem:[#allocation2 + $0xc] sm:$0xff]  }
  0x41   : > { %2217 = vrot.lane.b32.xlu0 %v2175_v50, %s6311_s11  ;;  %v6558_v8 = vrot.slane %v1771_v63, 1  ;;  %v1759_v18 = vshll.u32 %v6066_v6, 16  ;;  %v2625_v22 = vshrl.u32 %v6560_v9, 16  ;;  %v6068_v29 = vld [vmem:[#allocation2 + $0x20] ss:$0 sps:$4 sm:$0x11]   ;;  %v6577_v35 = vadd.f32 %v6434_v33, %v665_v20 }
  0x42   : > { %v1756_v13 = vrot.slane %v1754_v7, 1  ;;  %v2627_v30 = vshll.u32 %v6560_v9, 16  ;;  %v5780_v32 = vld [vmem:[%s6418_s8 + $0x38] sm:$0xff]   ;;  %v668_v36 = vmul.f32 %v5744_v14, %v6401_v15  ;;  %v2632_v40 = vshll.u32 %v6068_v29, 16  ;;  %v6073_v55 = vld [vmem:[#allocation2 + $0x30] sm:$0xff]   ;;  %v6077_v29 = vld [vmem:[#allocation2 + $0x24] sm:$0xff]  }
  0x43   : > { %v1761_v11 = vrot.slane %v1759_v18, 1  ;;  %v6070_v41 = vld [vmem:[#allocation2 + $0x14] ss:$0 sps:$4 sm:$0x11]   ;;  %v2613_v42 = vshrl.u32 %v6069_v31, 16  ;;  %v2615_v43 = vshll.u32 %v6069_v31, 16  ;;  %v6583_v45 = vadd.f32 %v6434_v33, %v662_v23 }
  0x44   : > { %v1757_v26 = vor.u32 %v1756_v13, %v1752_v0  ;;  %v2629_v39 = vrot.slane %v2627_v30, 1  ;;  %v6586_v46 = vadd.f32 %v6434_v33, %v663_v24  ;;  %v669_v47 = vmul.f32 %v5745_v27, %v6401_v15  ;;  %v6075_v60 = vld [vmem:[#allocation2 + $0x30] sm:$0xff]   ;;  %v549_v9 = vld [vmem:[#allocation2 + $0x5c] sm:$0x1] }
  0x45   : > { %3096 = vrot.lane.b32.xlu0 %v3052_v61, %s6311_s11  ;;  %v6057_v12 = vld [vmem:[#allocation2 + $0x3c] sm:$0xfe]   ;;  %v3055_v49 = vsel %vm2160_vm7, %v3053_v48, %v3054_v51  ;;  %v1769_v50 = vor.u32 %v1768_v5, %v1764_v34  ;;  %v2634_v52 = vrot.slane %v2632_v40, 1  ;;  %v2620_v53 = vshll.u32 %v6070_v41, 16  ;;  %v493_v0 = vld [vmem:[#allocation2 + $0x54] sm:$0x1] }
  0x46   : > { %v6058_v3 = vld [vmem:[#allocation2 + $0x44] ss:$0 sps:$4 sm:$0x11]   ;;  %v2176_v25 = vrot.slane %v6057_v12, 1  ;;  %v1762_v58 = vsel %vm1726_vm8, %v1757_v26, %v1761_v11  ;;  %v6071_v44 = vld [vmem:[#allocation2 + $0x3c] sm:$0xff]   ;;  %v2617_v56 = vrot.slane %v2615_v43, 1  ;;  %v5740_v61 = vunpack.c.l.bf16 %v5780_v32 }
  0x47   : > { %v2177_v17 = vrot.slane %v6058_v3, 1  ;;  %v6072_v54 = vld [vmem:[#allocation2 + $0x44] ss:$0 sps:$4 sm:$0x11]   ;;  %v1788_v57 = vshrl.u32 %v6071_v44, 16  ;;  %v1790_v59 = vshll.u32 %v6071_v44, 16  ;;  %v6594_v48 = vadd.f32 %v6434_v33, %v668_v36 }
  0x48   : > { %v2622_v62 = vrot.slane %v2620_v53, 1  ;;  %v1795_v63 = vshll.u32 %v6072_v54, 16  ;;  %v5741_v28 = vunpack.c.h.bf16 %v5780_v32  ;;  %v6597_v34 = vld [vmem:[%s6418_s8 + $0x50] sm:$0xff]   ;;  %v2618_v51 = vor.u32 %v2617_v56, %v2613_v42  ;;  %v6074_v5 = vld [vmem:[#allocation2 + $0x38] ss:$0 sps:$4 sm:$0x11]  }
  0x49   : > { %1921 = vrot.lane.b32.xlu0 %v1750_v21, %s6312_s12  ;;  %v2178_v37 = vsel %vm2160_vm7, %v2176_v25, %v2177_v17  ;;  %v1792_v2 = vrot.slane %v1790_v59, 1  ;;  %v1776_v6 = vshrl.u32 %v6073_v55, 16  ;;  %v1778_v7 = vshll.u32 %v6073_v55, 16  ;;  %v6076_v24 = vld [vmem:[#allocation2 + $0x38] ss:$0 sps:$4 sm:$0x11]  }
  0x4a   : > { %2219 = vrot.lane.b32.xlu1 %v2178_v37, %s6311_s11  ;;  %v1774_v10 = vsel %vm1726_vm8, %v1769_v50, %v6558_v8  ;;  %v2630_v12 = vor.u32 %v2629_v39, %v2625_v22  ;;  %v1797_v13 = vrot.slane %v1795_v63, 1  ;;  %v2649_v18 = vshrl.u32 %v6075_v60, 16  ;;  %v490_v26 = vld [vmem:[#allocation2 + $0x48] sm:$0x1]  ;;  %v546_v11 = vld [vmem:[#allocation2 + $0x50] sm:$0x1] }
  0x4b   : > { %v2623_v20 = vsel %vm1726_vm8, %v2618_v51, %v2622_v62  ;;  %v1780_v14 = vrot.slane %v1778_v7, 1  ;;  %v1783_v3 = vshll.u32 %v6074_v5, 16  ;;  %v6604_v21 = vadd.f32 %v6434_v33, %v669_v47  ;;  %v6078_v37 = vld [vmem:[#allocation2 + $0x2c] ss:$0 sps:$4 sm:$0x11]   ;;  %v6630_v51 = vld [vmem:[#allocation2 + $0x3c] sm:$0xff]  }
  0x4c   : > { %v1793_v23 = vor.u32 %v1792_v2, %v1788_v57  ;;  %v2651_v25 = vshll.u32 %v6075_v60, 16  ;;  %v666_v27 = vmul.f32 %v5740_v61, %v6401_v15  ;;  %v6609_v8 = vmul.f32 %v5741_v28, %v6401_v15 }
  0x4d   : > { %1923 = vrot.lane.b32.xlu0 %v1762_v58, %s6312_s12  ;;  %v1781_v22 = vor.u32 %v1780_v14, %v1776_v6  ;;  %v1785_v17 = vrot.slane %v1783_v3, 1  ;;  %v494_v30 = vsel %vm6373_vm2, 0, %v493_v0  ;;  %v5752_v31 = vunpack.c.l.bf16 %v6597_v34 }
  0x4e   : > { %3098 = vrot.lane.b32.xlu1 %v3055_v49, %s6311_s11  ;;  %v2635_v32 = vsel %vm1726_vm8, %v2630_v12, %v2634_v52  ;;  %v2653_v58 = vrot.slane %v2651_v25, 1  ;;  %v2656_v36 = vshll.u32 %v6076_v24, 16  ;;  %495 = vst [vmem:[#allocation2 + $0x54] sm:$0x1] %v494_v30  ;;  %v550_v39 = vsel %vm6381_vm5, 0, %v549_v9 }
  0x4f   : > { %v1786_v40 = vsel %vm1726_vm8, %v1781_v22, %v1785_v17  ;;  %v2637_v41 = vshrl.u32 %v6077_v29, 16  ;;  %v2639_v42 = vshll.u32 %v6077_v29, 16  ;;  %551 = vst [vmem:[#allocation2 + $0x5c] sm:$0x1] %v550_v39  ;;  %v734_v43 = vmax.f32 %v6574_v16, 0.0 }
  0x50   : > { %v1798_v44 = vsel %vm1726_vm8, %v1793_v23, %v1797_v13  ;;  %v2654_v47 = vor.u32 %v2653_v58, %v2649_v18  ;;  %v2644_v49 = vshll.u32 %v6078_v37, 16  ;;  %v735_v50 = vmax.f32 %v6577_v35, 0.0  ;;  %v499_v25 = vld [vmem:[#allocation2 + $0x6c] sm:$0x1]  ;;  %v6641_v17 = vld [vmem:[#allocation2 + $0x3c] sm:$0xfe]  }
  0x51   : > { %2804 = vrot.lane.b32.xlu0 %v2623_v20, %s6312_s12  ;;  %v2641_v52 = vrot.slane %v2639_v42, 1  ;;  %v5654_v53 = vpack.c.bf16 %v734_v43, %v734_v43  ;;  %v491_v54 = vsel %vm6373_vm2, 0, %v490_v26  ;;  %v547_v55 = vsel %vm6381_vm5, 0, %v546_v11  ;;  %v555_v26 = vld [vmem:[#allocation2 + $0x74] sm:$0x1] }
  0x52   : > { %1925 = vrot.lane.b32.xlu1 %v1774_v10, %s6312_s12  ;;  %v2658_v56 = vrot.slane %v2656_v36, 1  ;;  %v2646_v16 = vrot.slane %v2644_v49, 1  ;;  %v5655_v57 = vpack.c.bf16 %v735_v50, %v735_v50  ;;  %492 = vst [vmem:[#allocation2 + $0x48] sm:$0x1] %v491_v54  ;;  %548 = vst [vmem:[#allocation2 + $0x50] sm:$0x1] %v547_v55  ;;  %v6633_v2 = vadd.f32 %v6434_v33, %v666_v27 }
  0x53   : > { %v732_v59 = vmax.f32 %v6583_v45, 0.0  ;;  %v2642_v60 = vor.u32 %v2641_v52, %v2637_v41  ;;  %v955_v61 = vshrl.u32 %v5654_v53, 16  ;;  %v958_v35 = vshll.u32 %v5654_v53, 16  ;;  %v6090_v45 = vld [vmem:[#allocation2 + $0x44] ss:$0 sps:$4 sm:$0x11]  }
  0x54   : > { %v733_v62 = vmax.f32 %v6586_v46, 0.0  ;;  %v963_v63 = vshrl.u32 %v5655_v57, 16  ;;  %v966_v0 = vshll.u32 %v5655_v57, 16  ;;  %v672_v9 = vmul.f32 %v5752_v31, %v6401_v15  ;;  %v6646_v36 = vld [vmem:[#allocation2 + $0x44] ss:$0 sps:$4 sm:$0x11]  }
  0x55   : > { %1927 = vrot.lane.b32.xlu0 %v1786_v40, %s6312_s12  ;;  %v5652_v28 = vpack.c.bf16 %v732_v59, %v732_v59  ;;  %v2647_v5 = vsel %vm1726_vm8, %v2642_v60, %v2646_v16  ;;  %v957_v6 = vrot.slane %v955_v61, 7  ;;  %v2659_v10 = vsel %vm1726_vm8, %v2654_v47, %v2658_v56  ;;  %v1218_v12 = vld [vmem:[#allocation2 + $0x54] sm:$0xf]  ;;  %v496_v37 = vld [vmem:[#allocation2 + $0x60] sm:$0x1] }
  0x56   : > { %2806 = vrot.lane.b32.xlu1 %v2635_v32, %s6312_s12  ;;  %v5653_v7 = vpack.c.bf16 %v733_v62, %v733_v62  ;;  %v965_v46 = vrot.slane %v963_v63, 7  ;;  %v1222_v3 = vld [vmem:[#allocation2 + $0x5c] sm:$0x1]  ;;  %v2663_v15 = vshll.u32 %v6630_v51, 16  ;;  %v2668_v58 = vshll.u32 %v6090_v45, 16 }
  0x57   : > { %v938_v13 = vshrl.u32 %v5652_v28, 16  ;;  %v941_v18 = vshll.u32 %v5652_v28, 16  ;;  %v960_v20 = vor.u32 %v958_v35, %v957_v6  ;;  %v961_v14 = vrot.slane %v957_v6, 4  ;;  %v552_v39 = vld [vmem:[#allocation2 + $0x68] sm:$0x1] }
  0x58   : > { %v946_v23 = vshrl.u32 %v5653_v7, 16  ;;  %v949_v24 = vshll.u32 %v5653_v7, 16  ;;  %v968_v11 = vor.u32 %v966_v0, %v965_v46  ;;  %v970_v27 = vrot.slane %v965_v46, 4  ;;  %v505_v47 = vld [vmem:[#allocation2 + $0x84] sm:$0x1] }
  0x59   : > { %2808 = vrot.lane.b32.xlu0 %v2647_v5, %s6312_s12  ;;  %v940_v22 = vrot.slane %v938_v13, 7  ;;  %v1219_v29 = vsel %vm6409_vm6, %v960_v20, %v1218_v12  ;;  %v1211_v31 = vld [vmem:[#allocation2 + $0x48] sm:$0xf]  ;;  %v1215_v32 = vld [vmem:[#allocation2 + $0x50] sm:$0x1]  ;;  %v6650_v40 = vadd.f32 %v6434_v33, %v6609_v8  ;;  %v2661_v52 = vshrl.u32 %v6630_v51, 16 }
  0x5a   : > { %1929 = vrot.lane.b32.xlu1 %v1798_v44, %s6312_s12  ;;  %v948_v30 = vrot.slane %v946_v23, 7  ;;  %v969_v41 = vsel %vm6475_vm10, %v961_v14, %v968_v11  ;;  %1220 = vst [vmem:[#allocation2 + $0x54] sm:$0xf] %v1219_v29  ;;  %v1223_v42 = vsel %vm6373_vm2, %v970_v27, %v1222_v3  ;;  %v6659_v8 = vadd.f32 %v6434_v33, %v672_v9  ;;  %v561_v16 = vld [vmem:[#allocation2 + $0x8c] sm:$0x1] }
  0x5b   : > { %v943_v43 = vor.u32 %v941_v18, %v940_v22  ;;  %v944_v44 = vrot.slane %v940_v22, 4  ;;  %1221 = vst.msk [vmem:[#allocation2 + $0x58] sm:$0xf] %vm1173_vm4, %v969_v41  ;;  %1224 = vst [vmem:[#allocation2 + $0x5c] sm:$0x1] %v1223_v42  ;;  %v2665_v54 = vrot.slane %v2663_v15, 1  ;;  %v5753_v13 = vunpack.c.h.bf16 %v6597_v34 }
  0x5c   : > { %v951_v49 = vor.u32 %v949_v24, %v948_v30  ;;  %v953_v50 = vrot.slane %v948_v30, 4  ;;  %v500_v55 = vsel %vm6373_vm2, 0, %v499_v25  ;;  %v556_v56 = vsel %vm6381_vm5, 0, %v555_v26  ;;  %v6696_v26 = vld [vmem:[%s6418_s8 + $0x48] sm:$0xff]   ;;  %v6701_v29 = vld [vmem:[%s7752_s3] ss:$0 sm:$0xff] }
  0x5d   : > { %v1212_v53 = vsel %vm6409_vm6, %v943_v43, %v1211_v31  ;;  %v6671_v33 = vrot.slane %v2668_v58, 1  ;;  %501 = vst [vmem:[#allocation2 + $0x6c] sm:$0x1] %v500_v55  ;;  %557 = vst [vmem:[#allocation2 + $0x74] sm:$0x1] %v556_v56  ;;  %v738_v60 = vmax.f32 %v6594_v48, 0.0  ;;  %v673_v34 = vmul.f32 %v6701_v29, %v5753_v13 }
  0x5e   : > { %2810 = vrot.lane.b32.xlu1 %v2659_v10, %s6312_s12  ;;  %v952_v57 = vsel %vm6475_vm10, %v944_v44, %v951_v49  ;;  %1213 = vst [vmem:[#allocation2 + $0x48] sm:$0xf] %v1212_v53  ;;  %v1216_v59 = vsel %vm6373_vm2, %v953_v50, %v1215_v32  ;;  %v3056_v61 = vrot.slane %v6641_v17, 1  ;;  %v739_v35 = vmax.f32 %v6604_v21, 0.0  ;;  %v6709_v50 = vld [vmem:[%s7753_s4] ss:$0 sm:$0xff] }
  0x5f   : > { %1214 = vst.msk [vmem:[#allocation2 + $0x4c] sm:$0xf] %vm1173_vm4, %v952_v57  ;;  %1217 = vst [vmem:[#allocation2 + $0x50] sm:$0x1] %v1216_v59  ;;  %v497_v62 = vsel %vm6373_vm2, 0, %v496_v37  ;;  %v553_v63 = vsel %vm6381_vm5, 0, %v552_v39  ;;  %v5658_v28 = vpack.c.bf16 %v738_v60, %v738_v60  ;;  %v2666_v58 = vor.u32 %v2665_v54, %v2661_v52 }
  0x60   : > { %v3057_v0 = vrot.slane %v6646_v36, 1  ;;  %498 = vst [vmem:[#allocation2 + $0x60] sm:$0x1] %v497_v62  ;;  %554 = vst [vmem:[#allocation2 + $0x68] sm:$0x1] %v553_v63  ;;  %v736_v48 = vmax.f32 %v6633_v2, 0.0  ;;  %v6685_v5 = vpack.c.bf16 %v739_v35, %v739_v35  ;;  %v5748_v52 = vunpack.c.l.bf16 %v6696_v26 }
  0x61   : > { %v506_v51 = vsel %vm6373_vm2, 0, %v505_v47  ;;  %v737_v21 = vmax.f32 %v6650_v40, 0.0  ;;  %v562_v6 = vsel %vm6381_vm5, 0, %v561_v16  ;;  %v742_v7 = vmax.f32 %v6659_v8, 0.0 }
  0x62   : > { %507 = vst [vmem:[#allocation2 + $0x84] sm:$0x1] %v506_v51  ;;  %v989_v45 = vshrl.u32 %v5658_v28, 16  ;;  %v992_v9 = vshll.u32 %v5658_v28, 16  ;;  %563 = vst [vmem:[#allocation2 + $0x8c] sm:$0x1] %v562_v6  ;;  %v711_v8 = vadd.f32 %v6709_v50, %v673_v34  ;;  %v2671_v56 = vsel %vm1726_vm8, %v2666_v58, %v6671_v33 }
  0x63   : > { %v6079_v10 = vld [vmem:[#allocation2 + $0x54] sm:$0xff]   ;;  %v997_v2 = vshrl.u32 %v6685_v5, 16  ;;  %v6080_v46 = vld [vmem:[#allocation2 + $0x5c] ss:$0 sps:$4 sm:$0x11]   ;;  %v5656_v35 = vpack.c.bf16 %v736_v48, %v736_v48  ;;  %v5657_v6 = vpack.c.bf16 %v737_v21, %v737_v21  ;;  %vm1533_vm11 = vcmask 31744  }
  0x64   : > { %v6692_v12 = vrot.slane %v989_v45, 7  ;;  %v1812_v18 = vshrl.u32 %v6079_v10, 16  ;;  %v1814_v20 = vshll.u32 %v6079_v10, 16  ;;  %v1819_v14 = vshll.u32 %v6080_v46, 16  ;;  %v6083_v25 = vld [vmem:[#allocation2 + $0x54] sm:$0xfe]  }
  0x65   : > { %v6084_v15 = vld [vmem:[#allocation2 + $0x5c] ss:$0 sps:$4 sm:$0x11]   ;;  %v2182_v32 = vrot.slane %v6083_v25, 1  ;;  %v6720_v45 = vpack.c.bf16 %v742_v7, %v742_v7  ;;  %v999_v10 = vrot.slane %v997_v2, 7  ;;  %v1000_v46 = vshll.u32 %v6685_v5, 16 }
  0x66   : > { %v6081_v3 = vld [vmem:[#allocation2 + $0x48] sm:$0xff]   ;;  %v1816_v23 = vrot.slane %v1814_v20, 1  ;;  %v6082_v24 = vld [vmem:[#allocation2 + $0x50] ss:$0 sps:$4 sm:$0x11]   ;;  %v1821_v11 = vrot.slane %v1819_v14, 1  ;;  %v994_v16 = vor.u32 %v992_v9, %v6692_v12 }
  0x67   : > { %v1800_v27 = vshrl.u32 %v6081_v3, 16  ;;  %v1802_v22 = vshll.u32 %v6081_v3, 16  ;;  %v1807_v31 = vshll.u32 %v6082_v24, 16  ;;  %v2183_v39 = vrot.slane %v6084_v15, 1  ;;  %v6085_v40 = vld [vmem:[#allocation2 + $0x48] sm:$0xfe]  }
  0x68   : > { %v1817_v30 = vor.u32 %v1816_v23, %v1812_v18  ;;  %v6086_v43 = vld [vmem:[#allocation2 + $0x50] ss:$0 sps:$4 sm:$0x11]   ;;  %v2179_v47 = vrot.slane %v6085_v40, 1  ;;  %v6087_v49 = vld [vmem:[#allocation2 + $0x48] sm:$0xff]   ;;  %v995_v9 = vrot.slane %v6692_v12, 4  ;;  %v1002_v7 = vor.u32 %v1000_v46, %v999_v10 }
  0x69   : > { %v1804_v37 = vrot.slane %v1802_v22, 1  ;;  %v1809_v42 = vrot.slane %v1807_v31, 1  ;;  %v2184_v53 = vsel %vm2160_vm7, %v2182_v32, %v2183_v39  ;;  %v2180_v54 = vrot.slane %v6086_v43, 1  ;;  %v6088_v55 = vld [vmem:[#allocation2 + $0x50] ss:$0 sps:$4 sm:$0x11]  }
  0x6a   : > { %v1822_v41 = vsel %vm1726_vm8, %v1817_v30, %v1821_v11  ;;  %v2673_v59 = vshrl.u32 %v6087_v49, 16  ;;  %v2675_v60 = vshll.u32 %v6087_v49, 16  ;;  %v2680_v63 = vshll.u32 %v6088_v55, 16  ;;  %v6091_v28 = vld [vmem:[#allocation2 + $0x48] sm:$0xfe]   ;;  %v6727_v23 = vld [vmem:[#allocation2 + $0x54] sm:$0xff]  }
  0x6b   : > { %1933 = vrot.lane.b32.xlu1 %v1822_v41, %s6312_s12  ;;  %v1805_v44 = vor.u32 %v1804_v37, %v1800_v27  ;;  %v2181_v62 = vsel %vm2160_vm7, %v2179_v47, %v2180_v54  ;;  %v6092_v51 = vld [vmem:[#allocation2 + $0x50] ss:$0 sps:$4 sm:$0x11]   ;;  %v1232_v13 = vld [vmem:[#allocation2 + $0x6c] sm:$0xf]  ;;  %v3059_v18 = vrot.slane %v6091_v28, 1  ;;  %v1003_v15 = vsel %vm6475_vm10, %v995_v9, %v1002_v7 }
  0x6c   : > { %v2677_v33 = vrot.slane %v2675_v60, 1  ;;  %v2682_v48 = vrot.slane %v2680_v63, 1  ;;  %v3060_v20 = vrot.slane %v6092_v51, 1  ;;  %v1233_v14 = vsel %vm6409_vm6, %v994_v16, %v1232_v13  ;;  %v1236_v3 = vld [vmem:[#allocation2 + $0x74] sm:$0x1] }
  0x6d   : > { %v1810_v57 = vsel %vm1726_vm8, %v1805_v44, %v1809_v42  ;;  %v1004_v24 = vrot.slane %v999_v10, 4  ;;  %1234 = vst [vmem:[#allocation2 + $0x6c] sm:$0xf] %v1233_v14  ;;  %v972_v25 = vshrl.u32 %v5656_v35, 16  ;;  %v975_v2 = vshll.u32 %v5656_v35, 16 }
  0x6e   : > { %1931 = vrot.lane.b32.xlu0 %v1810_v57, %s6312_s12  ;;  %v2678_v21 = vor.u32 %v2677_v33, %v2673_v59  ;;  %v980_v12 = vshrl.u32 %v5657_v6, 16  ;;  %v983_v5 = vshll.u32 %v5657_v6, 16  ;;  %v1225_v11 = vld [vmem:[#allocation2 + $0x60] sm:$0xf]  ;;  %v743_v27 = vmax.f32 %v711_v8, 0.0 }
  0x6f   : > { %2223 = vrot.lane.b32.xlu1 %v2184_v53, %s6311_s11  ;;  %v1237_v34 = vsel %vm6373_vm2, %v1004_v24, %v1236_v3  ;;  %v974_v30 = vrot.slane %v972_v25, 7  ;;  %v1229_v31 = vld [vmem:[#allocation2 + $0x68] sm:$0x1]  ;;  %1235 = vst.msk [vmem:[#allocation2 + $0x70] sm:$0xf] %vm1173_vm4, %v1003_v15  ;;  %v2687_v37 = vshll.u32 %v6727_v23, 16  ;;  %v670_v39 = vmul.f32 %v6701_v29, %v5748_v52 }
  0x70   : > { %v2683_v22 = vsel %vm1726_vm8, %v2678_v21, %v2682_v48  ;;  %1238 = vst [vmem:[#allocation2 + $0x74] sm:$0x1] %v1237_v34  ;;  %v982_v32 = vrot.slane %v980_v12, 7  ;;  %v6106_v58 = vld [vmem:[#allocation2 + $0x5c] ss:$0 sps:$4 sm:$0x11]   ;;  %v3061_v40 = vsel %vm2160_vm7, %v3059_v18, %v3060_v20  ;;  %v5663_v8 = vpack.c.bf16 %v743_v27, %v743_v27 }
  0x71   : > { %v977_v41 = vor.u32 %v975_v2, %v974_v30  ;;  %v978_v42 = vrot.slane %v974_v30, 4  ;;  %v1023_v43 = vshrl.u32 %v6720_v45, 16  ;;  %v2692_v49 = vshll.u32 %v6106_v58, 16  ;;  %v502_v55 = vld [vmem:[#allocation2 + $0x78] sm:$0x1] }
  0x72   : > { %2221 = vrot.lane.b32.xlu0 %v2181_v62, %s6311_s11  ;;  %v985_v44 = vor.u32 %v983_v5, %v982_v32  ;;  %v987_v47 = vrot.slane %v982_v32, 4  ;;  %v3058_v53 = vsel %vm2160_vm7, %v3056_v61, %v3057_v0  ;;  %v558_v57 = vld [vmem:[#allocation2 + $0x80] sm:$0x1]  ;;  %v6755_v36 = vadd.f32 %v6709_v50, %v670_v39  ;;  %v1246_v63 = vld [vmem:[#allocation2 + $0x84] sm:$0xf] }
  0x73   : > { %2814 = vrot.lane.b32.xlu1 %v2683_v22, %s6312_s12  ;;  %v1226_v52 = vsel %vm6409_vm6, %v977_v41, %v1225_v11  ;;  %v1025_v54 = vrot.slane %v1023_v43, 7  ;;  %v2685_v17 = vshrl.u32 %v6727_v23, 16  ;;  %v6759_v61 = vrot.slane %v2687_v37, 1  ;;  %v1250_v33 = vld [vmem:[#allocation2 + $0x8c] sm:$0x1] }
  0x74   : > { %1227 = vst [vmem:[#allocation2 + $0x60] sm:$0xf] %v1226_v52  ;;  %v1230_v16 = vsel %vm6373_vm2, %v987_v47, %v1229_v31  ;;  %v6761_v0 = vrot.slane %v2692_v49, 1  ;;  %v1026_v59 = vshll.u32 %v6720_v45, 16  ;;  %v1031_v35 = vshrl.u32 %v5663_v8, 16 }
  0x75   : > { %1231 = vst [vmem:[#allocation2 + $0x68] sm:$0x1] %v1230_v16  ;;  %v1029_v60 = vrot.slane %v1025_v54, 4  ;;  %v1034_v62 = vshll.u32 %v5663_v8, 16  ;;  %v503_v28 = vsel %vm6373_vm2, 0, %v502_v55  ;;  %v559_v9 = vsel %vm6381_vm5, 0, %v558_v57 }
  0x76   : > { %2812 = vrot.lane.b32.xlu0 %v2671_v56, %s6312_s12  ;;  %v986_v56 = vsel %vm6475_vm10, %v978_v42, %v985_v44  ;;  %v6095_v51 = vld [vmem:[#allocation2 + $0x6c] sm:$0xff]   ;;  %v1028_v6 = vor.u32 %v1026_v59, %v1025_v54  ;;  %504 = vst [vmem:[#allocation2 + $0x78] sm:$0x1] %v503_v28  ;;  %v1033_v46 = vrot.slane %v1031_v35, 7  ;;  %560 = vst [vmem:[#allocation2 + $0x80] sm:$0x1] %v559_v9  ;;  %v5749_v20 = vunpack.c.h.bf16 %v6696_v26 }
  0x77   : > { %3102 = vrot.lane.b32.xlu1 %v3061_v40, %s6311_s11  ;;  %1228 = vst.msk [vmem:[#allocation2 + $0x64] sm:$0xf] %vm1173_vm4, %v986_v56  ;;  %v6096_v10 = vld [vmem:[#allocation2 + $0x74] ss:$0 sps:$4 sm:$0x11]   ;;  %v1836_v45 = vshrl.u32 %v6095_v51, 16  ;;  %v2690_v9 = vor.u32 %v6759_v61, %v2685_v17 }
  0x78   : > { %v1838_v13 = vshll.u32 %v6095_v51, 16  ;;  %v6099_v48 = vld [vmem:[#allocation2 + $0x6c] sm:$0xfe]   ;;  %v1247_v18 = vsel %vm6409_vm6, %v1028_v6, %v1246_v63  ;;  %v1843_v14 = vshll.u32 %v6096_v10, 16  ;;  %v1036_v21 = vor.u32 %v1034_v62, %v1033_v46  ;;  %v6777_v34 = vld [vmem:[#allocation2 + $0x54] sm:$0xfe]  }
  0x79   : > { %v6100_v3 = vld [vmem:[#allocation2 + $0x74] ss:$0 sps:$4 sm:$0x11]   ;;  %v1038_v7 = vrot.slane %v1033_v46, 4  ;;  %1248 = vst [vmem:[#allocation2 + $0x84] sm:$0xf] %v1247_v18  ;;  %v671_v30 = vmul.f32 %v6701_v29, %v5749_v20 }
  0x7a   : > { %3100 = vrot.lane.b32.xlu0 %v3058_v53, %s6311_s11  ;;  %v740_v24 = vmax.f32 %v6755_v36, 0.0  ;;  %v1840_v25 = vrot.slane %v1838_v13, 1  ;;  %v2188_v2 = vrot.slane %v6099_v48, 1  ;;  %v1845_v12 = vrot.slane %v1843_v14, 1  ;;  %v6119_v20 = vld [vmem:[#allocation2 + $0x18] sm:$0xff]  }
  0x7b   : > { %v1037_v11 = vsel %vm6475_vm10, %v1029_v60, %v1036_v21  ;;  %v1251_v27 = vsel %vm6373_vm2, %v1038_v7, %v1250_v33  ;;  %v2189_v26 = vrot.slane %v6100_v3, 1  ;;  %v709_v53 = vadd.f32 %v6709_v50, %v671_v30  ;;  %v6110_v54 = vld [vmem:[#allocation2 + $0x5c] ss:$0 sps:$4 sm:$0x11]  }
  0x7c   : > { %v1841_v22 = vor.u32 %v1840_v25, %v1836_v45  ;;  %v6098_v15 = vld [vmem:[#allocation2 + $0x68] ss:$0 sps:$4 sm:$0x11]   ;;  %1249 = vst.msk [vmem:[#allocation2 + $0x88] sm:$0xf] %vm1173_vm4, %v1037_v11  ;;  %v3062_v36 = vrot.slane %v6777_v34, 1  ;;  %v5660_v62 = vpack.c.bf16 %v740_v24, %v740_v24 }
  0x7d   : > { %1252 = vst [vmem:[#allocation2 + $0x8c] sm:$0x1] %v1251_v27  ;;  %v1831_v39 = vshll.u32 %v6098_v15, 16  ;;  %v6102_v40 = vld [vmem:[#allocation2 + $0x68] ss:$0 sps:$4 sm:$0x11]   ;;  %v2190_v44 = vsel %vm2160_vm7, %v2188_v2, %v2189_v26 }
  0x7e   : > { %v6097_v5 = vld [vmem:[#allocation2 + $0x60] sm:$0xff]   ;;  %v1846_v37 = vsel %vm1726_vm8, %v1841_v22, %v1845_v12  ;;  %v2186_v47 = vrot.slane %v6102_v40, 1  ;;  %v6104_v8 = vld [vmem:[#allocation2 + $0x68] ss:$0 sps:$4 sm:$0x11]   ;;  %v741_v6 = vmax.f32 %v709_v53, 0.0  ;;  %v2695_v12 = vsel %vm1726_vm8, %v2690_v9, %v6761_v0 }
  0x7f   : > { %v1824_v31 = vshrl.u32 %v6097_v5, 16  ;;  %v1826_v32 = vshll.u32 %v6097_v5, 16  ;;  %v6101_v58 = vld [vmem:[#allocation2 + $0x60] sm:$0xfe]   ;;  %1937 = vrot.lane.b32.xlu1 %v1846_v37, %s6312_s12  ;;  %v1833_v43 = vrot.slane %v1831_v39, 1  ;;  %v2704_v16 = vshll.u32 %v6104_v8, 16 }
  0x80   : > { %v2185_v42 = vrot.slane %v6101_v58, 1  ;;  %v6103_v49 = vld [vmem:[#allocation2 + $0x60] sm:$0xff]   ;;  %v6108_v60 = vld [vmem:[#allocation2 + $0x68] ss:$0 sps:$4 sm:$0x11]   ;;  %v5661_v18 = vpack.c.bf16 %v741_v6, %v741_v6  ;;  %v3063_v3 = vrot.slane %v6110_v54, 1 }
  0x81   : > { %v1828_v41 = vrot.slane %v1826_v32, 1  ;;  %v2697_v55 = vshrl.u32 %v6103_v49, 16  ;;  %v2699_v56 = vshll.u32 %v6103_v49, 16  ;;  %v6107_v57 = vld [vmem:[#allocation2 + $0x60] sm:$0xfe]   ;;  %v2706_v28 = vrot.slane %v2704_v16, 1 }
  0x82   : > { %v3065_v51 = vrot.slane %v6107_v57, 1  ;;  %v2187_v33 = vsel %vm2160_vm7, %v2185_v42, %v2186_v47  ;;  %v3066_v10 = vrot.slane %v6108_v60, 1  ;;  %v6120_v14 = vld [vmem:[#allocation2 + $0x20] ss:$0 sps:$4 sm:$0x11]   ;;  %v1006_v7 = vshrl.u32 %v5660_v62, 16 }
  0x83   : > { %v1829_v52 = vor.u32 %v1828_v41, %v1824_v31  ;;  %2227 = vrot.lane.b32.xlu1 %v2190_v44, %s6311_s11  ;;  %v6111_v35 = vld [vmem:[#allocation2 + $0x84] sm:$0xff]   ;;  %v2701_v63 = vrot.slane %v2699_v56, 1  ;;  %v1009_v24 = vshll.u32 %v5660_v62, 16  ;;  %v1014_v2 = vshrl.u32 %v5661_v18, 16  ;;  %v1239_v61 = vld [vmem:[#allocation2 + $0x78] sm:$0xf] }
  0x84   : > { %v6112_v46 = vld [vmem:[#allocation2 + $0x8c] ss:$0 sps:$4 sm:$0x11]   ;;  %v1860_v13 = vshrl.u32 %v6111_v35, 16  ;;  %v1862_v48 = vshll.u32 %v6111_v35, 16  ;;  %v1017_v17 = vshll.u32 %v5661_v18, 16  ;;  %v3067_v22 = vsel %vm2160_vm7, %v3065_v51, %v3066_v10 }
  0x85   : > { %v1834_v59 = vsel %vm1726_vm8, %v1829_v52, %v1833_v43  ;;  %v2702_v45 = vor.u32 %v2701_v63, %v2697_v55  ;;  %v1867_v21 = vshll.u32 %v6112_v46, 16  ;;  %v1008_v11 = vrot.slane %v1006_v7, 7  ;;  %v6115_v27 = vld [vmem:[#allocation2 + $0x84] sm:$0xfe]   ;;  %v6799_v31 = vld [vmem:[#allocation2 + $0x6c] sm:$0xff]   ;;  %v5784_v35 = vld [vmem:[%s6418_s8 + $0x58] sm:$0xff]  }
  0x86   : > { %1935 = vrot.lane.b32.xlu0 %v1834_v59, %s6312_s12  ;;  %v1864_v23 = vrot.slane %v1862_v48, 1  ;;  %v1016_v26 = vrot.slane %v1014_v2, 7  ;;  %v6116_v34 = vld [vmem:[#allocation2 + $0x8c] ss:$0 sps:$4 sm:$0x11]   ;;  %v3935_v30 = vshll.u32 %v6119_v20, 16  ;;  %v3064_v0 = vsel %vm2160_vm7, %v3062_v36, %v3063_v3 }
  0x87   : > { %v2707_v25 = vsel %vm1726_vm8, %v2702_v45, %v2706_v28  ;;  %v1869_v5 = vrot.slane %v1867_v21, 1  ;;  %v5785_v32 = vld [vmem:[%s6418_s8 + $0x60] sm:$0xff]   ;;  %v1011_v58 = vor.u32 %v1009_v24, %v1008_v11  ;;  %v1012_v37 = vrot.slane %v1008_v11, 4  ;;  %v6802_v41 = vld [vmem:[#allocation2 + $0x18] sm:$0xfe]  }
  0x88   : > { %2818 = vrot.lane.b32.xlu1 %v2707_v25, %s6312_s12  ;;  %v1865_v15 = vor.u32 %v1864_v23, %v1860_v13  ;;  %v1243_v39 = vld [vmem:[#allocation2 + $0x80] sm:$0x1]  ;;  %v3940_v40 = vshll.u32 %v6120_v14, 16  ;;  %v1019_v42 = vor.u32 %v1017_v17, %v1016_v26  ;;  %v1021_v43 = vrot.slane %v1016_v26, 4  ;;  %v6818_v59 = vld [vmem:[#allocation2 + $0x24] sm:$0xff]  }
  0x89   : > { %v3933_v44 = vshrl.u32 %v6119_v20, 16  ;;  %v6806_v47 = vld [vmem:[#allocation2 + $0x20] ss:$0 sps:$4 sm:$0x11]   ;;  %v1240_v8 = vsel %vm6409_vm6, %v1011_v58, %v1239_v61  ;;  %v2194_v53 = vrot.slane %v6115_v27, 1  ;;  %v2195_v52 = vrot.slane %v6116_v34, 1 }
  0x8a   : > { %2225 = vrot.lane.b32.xlu0 %v2187_v33, %s6311_s11  ;;  %v1870_v49 = vsel %vm1726_vm8, %v1865_v15, %v1869_v5  ;;  %v6122_v54 = vld [vmem:[#allocation2 + $0x74] ss:$0 sps:$4 sm:$0x11]   ;;  %v1020_v55 = vsel %vm6475_vm10, %v1012_v37, %v1019_v42  ;;  %1241 = vst [vmem:[#allocation2 + $0x78] sm:$0xf] %v1240_v8  ;;  %v1244_v56 = vsel %vm6373_vm2, %v1021_v43, %v1243_v39  ;;  %v3937_v16 = vrot.slane %v3935_v30, 1 }
  0x8b   : > { %v2711_v57 = vshll.u32 %v6799_v31, 16  ;;  %1242 = vst.msk [vmem:[#allocation2 + $0x7c] sm:$0xf] %vm1173_vm4, %v1020_v55  ;;  %1245 = vst [vmem:[#allocation2 + $0x80] sm:$0x1] %v1244_v56  ;;  %v3942_v36 = vrot.slane %v3940_v40, 1  ;;  %v5760_v60 = vunpack.c.l.bf16 %v5785_v32  ;;  %v2196_v51 = vsel %vm2160_vm7, %v2194_v53, %v2195_v52 }
  0x8c   : > { %3106 = vrot.lane.b32.xlu1 %v3067_v22, %s6311_s11  ;;  %v2716_v62 = vshll.u32 %v6122_v54, 16  ;;  %v6123_v63 = vld [vmem:[#allocation2 + $0x6c] sm:$0xfe]   ;;  %v6124_v28 = vld [vmem:[#allocation2 + $0x74] ss:$0 sps:$4 sm:$0x11]   ;;  %v3938_v9 = vor.u32 %v3937_v16, %v3933_v44  ;;  %v5761_v48 = vunpack.c.h.bf16 %v5785_v32  ;;  %v5756_v20 = vunpack.c.l.bf16 %v5784_v35 }
  0x8d   : > { %v2709_v6 = vshrl.u32 %v6799_v31, 16  ;;  %v4364_v33 = vrot.slane %v6802_v41, 1  ;;  %v2713_v10 = vrot.slane %v2711_v57, 1  ;;  %v4365_v46 = vrot.slane %v6806_v47, 1  ;;  %v6131_v17 = vld [vmem:[#allocation2 + $0x24] sm:$0xfe]  }
  0x8e   : > { %2816 = vrot.lane.b32.xlu0 %v2695_v12, %s6312_s12  ;;  %v6130_v45 = vld [vmem:[#allocation2 + $0x2c] ss:$0 sps:$4 sm:$0x11]   ;;  %v3945_v13 = vshrl.u32 %v6818_v59, 16  ;;  %v676_v18 = vmul.f32 %v6701_v29, %v5760_v60  ;;  %v2718_v14 = vrot.slane %v2716_v62, 1  ;;  %v3068_v3 = vrot.slane %v6123_v63, 1 }
  0x8f   : > { %v3069_v21 = vrot.slane %v6124_v28, 1  ;;  %v3947_v7 = vshll.u32 %v6818_v59, 16  ;;  %v5757_v24 = vunpack.c.h.bf16 %v5784_v35  ;;  %v3943_v23 = vsel %vm1726_vm8, %v3938_v9, %v3942_v36  ;;  %v511_v26 = vld [vmem:[#allocation2 + $0x9c] sm:$0x1]  ;;  %v567_v43 = vld [vmem:[#allocation2 + $0xa4] sm:$0x1] }
  0x90   : > { %1941 = vrot.lane.b32.xlu1 %v1870_v49, %s6312_s12  ;;  %v3952_v2 = vshll.u32 %v6130_v45, 16  ;;  %v677_v11 = vmul.f32 %v6701_v29, %v5761_v48  ;;  %v714_v34 = vadd.f32 %v6709_v50, %v676_v18  ;;  %v674_v30 = vmul.f32 %v6701_v29, %v5756_v20  ;;  %v6132_v55 = vld [vmem:[#allocation2 + $0x2c] ss:$0 sps:$4 sm:$0x11]   ;;  %v508_v20 = vld [vmem:[#allocation2 + $0x90] sm:$0x1] }
  0x91   : > { %v2714_v58 = vor.u32 %v2713_v10, %v2709_v6  ;;  %v3070_v37 = vsel %vm2160_vm7, %v3068_v3, %v3069_v21  ;;  %v675_v39 = vmul.f32 %v6701_v29, %v5757_v24  ;;  %v4367_v56 = vrot.slane %v6131_v17, 1  ;;  %v564_v21 = vld [vmem:[#allocation2 + $0x98] sm:$0x1] }
  0x92   : > { %3104 = vrot.lane.b32.xlu0 %v3064_v0, %s6311_s11  ;;  %v6113_v25 = vld [vmem:[#allocation2 + $0x78] sm:$0xff]   ;;  %v6114_v12 = vld [vmem:[#allocation2 + $0x80] ss:$0 sps:$4 sm:$0x11]   ;;  %v3949_v0 = vrot.slane %v3947_v7, 1  ;;  %v6842_v42 = vrot.slane %v3952_v2, 1  ;;  %v6844_v44 = vpop.permute.xlu1 %2209  ;;  %v715_v52 = vadd.f32 %v6709_v50, %v677_v11  ;;  %v712_v60 = vadd.f32 %v6709_v50, %v674_v30 }
  0x93   : > { %v6834_v5 = vld [vmem:[#allocation2 + $0x78] sm:$0xff]   ;;  %v1848_v27 = vshrl.u32 %v6113_v25, 16  ;;  %v1850_v22 = vshll.u32 %v6113_v25, 16  ;;  %v1855_v31 = vshll.u32 %v6114_v12, 16  ;;  %v512_v36 = vsel %vm6373_vm2, 0, %v511_v26  ;;  %v6869_v7 = vld [vmem:[#allocation2 + $0x30] sm:$0xff]  }
  0x94   : > { %2231 = vrot.lane.b32.xlu1 %v2196_v51, %s6311_s11  ;;  %v6117_v15 = vld [vmem:[#allocation2 + $0x78] sm:$0xfe]   ;;  %v6118_v32 = vld [vmem:[#allocation2 + $0x80] ss:$0 sps:$4 sm:$0x11]   ;;  %v2723_v53 = vshll.u32 %v6834_v5, 16  ;;  %v713_v35 = vadd.f32 %v6709_v50, %v675_v39  ;;  %v2719_v63 = vsel %vm1726_vm8, %v2714_v58, %v2718_v14  ;;  %v4366_v28 = vsel %vm2160_vm7, %v4364_v33, %v4365_v46 }
  0x95   : > { %v1852_v40 = vrot.slane %v1850_v22, 1  ;;  %v2191_v41 = vrot.slane %v6117_v15, 1  ;;  %v1857_v47 = vrot.slane %v1855_v31, 1  ;;  %v2192_v49 = vrot.slane %v6118_v32, 1  ;;  %v6858_v6 = vld [vmem:[#allocation2 + $0x78] sm:$0xfe]  }
  0x96   : > { %v6832_v61 = vpop.permute.xlu0 %1919  ;;  %v6126_v8 = vld [vmem:[#allocation2 + $0x80] ss:$0 sps:$4 sm:$0x11]   ;;  %v4368_v51 = vrot.slane %v6132_v55, 1  ;;  %513 = vst [vmem:[#allocation2 + $0x9c] sm:$0x1] %v512_v36 }
  0x97   : > { %v1853_v54 = vor.u32 %v1852_v40, %v1848_v27  ;;  %v2728_v57 = vshll.u32 %v6126_v8, 16  ;;  %v6860_v9 = vld [vmem:[#allocation2 + $0x80] ss:$0 sps:$4 sm:$0x11]   ;;  %v2721_v10 = vshrl.u32 %v6834_v5, 16  ;;  %v568_v45 = vsel %vm6381_vm5, 0, %v567_v43 }
  0x98   : > { %4124 = vrot.lane.b32.xlu1 %v3943_v23, %s6312_s12  ;;  %v746_v48 = vmax.f32 %v714_v34, 0.0  ;;  %v747_v18 = vmax.f32 %v715_v52, 0.0  ;;  %v2193_v14 = vsel %vm2160_vm7, %v2191_v41, %v2192_v49  ;;  %v2725_v3 = vrot.slane %v2723_v53, 1  ;;  %569 = vst [vmem:[#allocation2 + $0xa4] sm:$0x1] %v568_v45  ;;  %v6886_v49 = vld [vmem:[#allocation2 + $0x84] sm:$0xff]  }
  0x99   : > { %v1858_v62 = vsel %vm1726_vm8, %v1853_v54, %v1857_v47  ;;  %v2730_v33 = vrot.slane %v2728_v57, 1  ;;  %v509_v46 = vsel %vm6373_vm2, 0, %v508_v20  ;;  %v4369_v25 = vsel %vm2160_vm7, %v4367_v56, %v4368_v51  ;;  %v6146_v20 = vld [vmem:[#allocation2 + $0x8c] ss:$0 sps:$4 sm:$0x11]  }
  0x9a   : > { %1939 = vrot.lane.b32.xlu0 %v1858_v62, %s6312_s12  ;;  %v5666_v23 = vpack.c.bf16 %v746_v48, %v746_v48  ;;  %v5667_v2 = vpack.c.bf16 %v747_v18, %v747_v18  ;;  %510 = vst [vmem:[#allocation2 + $0x90] sm:$0x1] %v509_v46  ;;  %v565_v17 = vsel %vm6381_vm5, 0, %v564_v21  ;;  %v3071_v12 = vrot.slane %v6858_v6, 1  ;;  %v6902_v21 = vld [vmem:[#allocation2 + $0x84] sm:$0xfe]  }
  0x9b   : > { %v3072_v5 = vrot.slane %v6860_v9, 1  ;;  %566 = vst [vmem:[#allocation2 + $0x98] sm:$0x1] %v565_v17  ;;  %v744_v11 = vmax.f32 %v712_v60, 0.0  ;;  %v745_v27 = vmax.f32 %v713_v35, 0.0  ;;  %v2726_v31 = vor.u32 %v2725_v3, %v2721_v10 }
  0x9c   : > { %3108 = vrot.lane.b32.xlu1 %v3070_v37, %s6311_s11  ;;  %v1057_v15 = vshrl.u32 %v5666_v23, 16  ;;  %v1060_v26 = vshll.u32 %v5666_v23, 16  ;;  %v1065_v34 = vshrl.u32 %v5667_v2, 16  ;;  %v1068_v30 = vshll.u32 %v5667_v2, 16 }
  0x9d   : > { %v5664_v32 = vpack.c.bf16 %v744_v11, %v744_v11  ;;  %v5665_v58 = vpack.c.bf16 %v745_v27, %v745_v27  ;;  %v6144_v37 = vld [vmem:[#allocation2 + $0x38] ss:$0 sps:$4 sm:$0x11]   ;;  %v3959_v39 = vshll.u32 %v6869_v7, 16  ;;  %v3950_v40 = vor.u32 %v3949_v0, %v3945_v13  ;;  %v1260_v47 = vld [vmem:[#allocation2 + $0x9c] sm:$0xf] }
  0x9e   : > { %2229 = vrot.lane.b32.xlu0 %v2193_v14, %s6311_s11  ;;  %v1059_v41 = vrot.slane %v1057_v15, 7  ;;  %v1067_v43 = vrot.slane %v1065_v34, 7  ;;  %v2731_v0 = vsel %vm1726_vm8, %v2726_v31, %v2730_v33  ;;  %v3964_v18 = vshll.u32 %v6144_v37, 16  ;;  %v6912_v27 = vld [vmem:[#allocation2 + $0x8c] ss:$0 sps:$4 sm:$0x11]  }
  0x9f   : > { %v1040_v8 = vshrl.u32 %v5664_v32, 16  ;;  %v1043_v53 = vshll.u32 %v5664_v32, 16  ;;  %v1048_v52 = vshrl.u32 %v5665_v58, 16  ;;  %v1051_v54 = vshll.u32 %v5665_v58, 16  ;;  %v1264_v13 = vld [vmem:[#allocation2 + $0xa4] sm:$0x1] }
  0xa0   : > { %4412 = vrot.lane.b32.xlu1 %v4366_v28, %s6311_s11  ;;  %v1062_v56 = vor.u32 %v1060_v26, %v1059_v41  ;;  %v1063_v57 = vrot.slane %v1059_v41, 4  ;;  %v1070_v36 = vor.u32 %v1068_v30, %v1067_v43  ;;  %v1072_v59 = vrot.slane %v1067_v43, 4  ;;  %v5786_v41 = vld [vmem:[%s6418_s8 + $0x68] sm:$0xff]  }
  0xa1   : > { %v1042_v60 = vrot.slane %v1040_v8, 7  ;;  %v1050_v35 = vrot.slane %v1048_v52, 7  ;;  %v1253_v62 = vld [vmem:[#allocation2 + $0x90] sm:$0xf]  ;;  %v3957_v28 = vshrl.u32 %v6869_v7, 16  ;;  %v3955_v23 = vsel %vm1726_vm8, %v3950_v40, %v6842_v42 }
  0xa2   : > { %2820 = vrot.lane.b32.xlu0 %v2719_v63, %s6312_s12  ;;  %v1071_v10 = vsel %vm6475_vm10, %v1063_v57, %v1070_v36  ;;  %v1261_v63 = vsel %vm6409_vm6, %v1062_v56, %v1260_v47  ;;  %v1265_v45 = vsel %vm6373_vm2, %v1072_v59, %v1264_v13  ;;  %v1257_v48 = vld [vmem:[#allocation2 + $0x98] sm:$0x1]  ;;  %v6909_v2 = vrot.slane %v3959_v39, 1  ;;  %v5787_v42 = vld [vmem:[%s6418_s8 + $0x70] sm:$0xff]  }
  0xa3   : > { %1262 = vst [vmem:[#allocation2 + $0x9c] sm:$0xf] %v1261_v63  ;;  %1263 = vst.msk [vmem:[#allocation2 + $0xa0] sm:$0xf] %vm1173_vm4, %v1071_v10  ;;  %v1045_v14 = vor.u32 %v1043_v53, %v1042_v60  ;;  %v1046_v3 = vrot.slane %v1042_v60, 4  ;;  %v1053_v33 = vor.u32 %v1051_v54, %v1050_v35  ;;  %v1055_v46 = vrot.slane %v1050_v35, 4 }
  0xa4   : > { %v6848_v16 = vpop.permute.xlu0 %2213  ;;  %4414 = vrot.lane.b32.xlu1 %v4369_v25, %s6311_s11  ;;  %1266 = vst [vmem:[#allocation2 + $0xa4] sm:$0x1] %v1265_v45  ;;  %v6904_v25 = vld [vmem:[#allocation2 + $0x3c] sm:$0xff]   ;;  %v2735_v17 = vshll.u32 %v6886_v49, 16  ;;  %v2740_v11 = vshll.u32 %v6146_v20, 16  ;;  %v2733_v30 = vshrl.u32 %v6886_v49, 16  ;;  %v3073_v53 = vsel %vm2160_vm7, %v3071_v12, %v3072_v5 }
  0xa5   : > { %v6871_v24 = vpop.permute.xlu1 %2211  ;;  %v1054_v15 = vsel %vm6475_vm10, %v1046_v3, %v1053_v33  ;;  %v1254_v26 = vsel %vm6409_vm6, %v1045_v14, %v1253_v62  ;;  %v1258_v34 = vsel %vm6373_vm2, %v1055_v46, %v1257_v48  ;;  %v6927_v58 = vrot.slane %v3964_v18, 1  ;;  %v6936_v47 = vld [vmem:[#allocation2 + $0x30] sm:$0xfe]   ;;  %v6938_v8 = vld [vmem:[#allocation2 + $0x38] ss:$0 sps:$4 sm:$0x11]  }
  0xa6   : > { %2822 = vrot.lane.b32.xlu0 %v2731_v0, %s6312_s12  ;;  %1255 = vst [vmem:[#allocation2 + $0x90] sm:$0xf] %v1254_v26  ;;  %1256 = vst.msk [vmem:[#allocation2 + $0x94] sm:$0xf] %vm1173_vm4, %v1054_v15  ;;  %v6929_v37 = vrot.slane %v2735_v17, 1  ;;  %v6931_v39 = vrot.slane %v2740_v11, 1  ;;  %v5768_v52 = vunpack.c.l.bf16 %v5787_v42  ;;  %v5769_v13 = vunpack.c.h.bf16 %v5787_v42 }
  0xa7   : > { %1259 = vst [vmem:[#allocation2 + $0x98] sm:$0x1] %v1258_v34  ;;  %v3971_v36 = vshll.u32 %v6904_v25, 16  ;;  %v5764_v35 = vunpack.c.l.bf16 %v5786_v41  ;;  %v5765_v14 = vunpack.c.h.bf16 %v5786_v41  ;;  %v6154_v17 = vld [vmem:[#allocation2 + $0x44] ss:$0 sps:$4 sm:$0x11]  }
  0xa8   : > { %v6879_v22 = vpop.permute.xlu0 %3092  ;;  %v680_v63 = vmul.f32 %v6701_v29, %v5768_v52  ;;  %v681_v20 = vmul.f32 %v6701_v29, %v5769_v13  ;;  %v6176_v41 = vld [vmem:[#allocation2 + $0xc] sm:$0xff]   ;;  %v6181_v13 = vld [vmem:[#allocation2 + $0x24] sm:$0xff]   ;;  %v2738_v7 = vor.u32 %v6929_v37, %v2733_v30  ;;  %v3976_v43 = vshll.u32 %v6154_v17, 16  ;;  %v7001_v30 = vld [vmem:[#allocation2 + $0x3c] sm:$0xfe]  }
  0xa9   : > { %v678_v11 = vmul.f32 %v6701_v29, %v5764_v35  ;;  %v3973_v40 = vrot.slane %v3971_v36, 1  ;;  %vm1967_vm12 = vcmask 64544   ;;  %1535 = vst.msk [vmem:[#allocation3 + $0x8] sm:$0xff] %vm1533_vm11, %v6176_v41  ;;  %1537 = vst.msk [vmem:[#allocation3 + $0x18] sm:$0xff] %vm1533_vm11, %v6181_v13  ;;  %vm2257_vm13 = vcmask 97344  }
  0xaa   : > { %v6888_v55 = vpop.permute.xlu1 %2215  ;;  %4126 = vrot.lane.b32.xlu0 %v3955_v23, %s6312_s12  ;;  %v6135_v0 = vld [vmem:[#allocation2 + $0x9c] sm:$0xff]   ;;  %v6969_v35 = vadd.f32 %v6709_v50, %v681_v20  ;;  %v3978_v49 = vrot.slane %v3976_v43, 1  ;;  %v7018_v17 = vld [vmem:[#allocation2 + $0x44] ss:$0 sps:$4 sm:$0x11]   ;;  %vm3180_vm14 = vcmask 97280  }
  0xab   : > { %v6136_v60 = vld [vmem:[#allocation2 + $0xa4] ss:$0 sps:$4 sm:$0x11]   ;;  %v6139_v6 = vld [vmem:[#allocation2 + $0x9c] sm:$0xfe]   ;;  %v1884_v12 = vshrl.u32 %v6135_v0, 16 }
  0xac   : > { %v1886_v5 = vshll.u32 %v6135_v0, 16  ;;  %v1891_v62 = vshll.u32 %v6136_v60, 16  ;;  %v2200_v48 = vrot.slane %v6139_v6, 1  ;;  %v6140_v34 = vld [vmem:[#allocation2 + $0xa4] ss:$0 sps:$4 sm:$0x11]   ;;  %v6966_v60 = vadd.f32 %v6709_v50, %v680_v63 }
  0xad   : > { %v6137_v10 = vld [vmem:[#allocation2 + $0x90] sm:$0xff]   ;;  %v6155_v0 = vld [vmem:[#allocation2] sm:$0xff]   ;;  %v6182_v6 = vld [vmem:[#allocation2 + $0x18] sm:$0xff]   ;;  %v2201_v56 = vrot.slane %v6140_v34, 1  ;;  %vm3229_vm15 = vcmask 1045504  }
  0xae   : > { %v6922_v31 = vpop.permute.xlu1 %3094  ;;  %3110 = vrot.lane.b32.xlu0 %v3073_v53, %s6311_s11  ;;  %v6958_v18 = vld [vmem:[#allocation2 + $0x90] sm:$0xff]   ;;  %v1888_v3 = vrot.slane %v1886_v5, 1  ;;  %v1893_v33 = vrot.slane %v1891_v62, 1  ;;  %v6138_v46 = vld [vmem:[#allocation2 + $0x98] ss:$0 sps:$4 sm:$0x11]  }
  0xaf   : > { %v1872_v23 = vshrl.u32 %v6137_v10, 16  ;;  %v1874_v26 = vshll.u32 %v6137_v10, 16  ;;  %v1879_v53 = vshll.u32 %v6138_v46, 16  ;;  %v6194_v5 = vld [vmem:[#allocation2 + $0x3c] sm:$0xff]   ;;  %v6195_v62 = vld [vmem:[#allocation2 + $0x30] sm:$0xff]   ;;  %1534 = vst.msk [vmem:[#allocation3] sm:$0xff] %vm1533_vm11, %v6155_v0 }
  0xb0   : > { %v1889_v42 = vor.u32 %v1888_v3, %v1884_v12  ;;  %v6141_v29 = vld [vmem:[#allocation2 + $0x90] sm:$0xfe]   ;;  %v6974_v12 = vld [vmem:[%s7752_s3] ss:$0 sm:$0xff]  ;;  %1536 = vst.msk [vmem:[#allocation3 + $0x10] sm:$0xff] %vm1533_vm11, %v6182_v6  ;;  %1539 = vst.msk [vmem:[#allocation3 + $0x28] sm:$0xff] %vm1533_vm11, %v6194_v5 }
  0xb1   : > { %v1876_v54 = vrot.slane %v1874_v26, 1  ;;  %v679_v10 = vmul.f32 %v6974_v12, %v5765_v14  ;;  %v1881_v46 = vrot.slane %v1879_v53, 1  ;;  %v6142_v52 = vld [vmem:[#allocation2 + $0x98] ss:$0 sps:$4 sm:$0x11]   ;;  %v3962_v26 = vor.u32 %v6909_v2, %v3957_v28  ;;  %1538 = vst.msk [vmem:[#allocation3 + $0x20] sm:$0xff] %vm1533_vm11, %v6195_v62 }
  0xb2   : > { %v1894_v3 = vsel %vm1726_vm8, %v1889_v42, %v1893_v33  ;;  %v6986_v50 = vld [vmem:[%s7753_s4] ss:$0 sm:$0xff]  ;;  %v2202_v33 = vsel %vm2160_vm7, %v2200_v48, %v2201_v56  ;;  %v2197_v42 = vrot.slane %v6141_v29, 1  ;;  %v6150_v28 = vld [vmem:[#allocation2 + $0x98] ss:$0 sps:$4 sm:$0x11]  }
  0xb3   : > { %v6893_v51 = vpop.permute.xlu0 %2217  ;;  %v6989_v20 = vadd.f32 %v6986_v50, %v678_v11  ;;  %1945 = vrot.lane.b32.xlu1 %v1894_v3, %s6312_s12  ;;  %v1877_v14 = vor.u32 %v1876_v54, %v1872_v23  ;;  %v2198_v2 = vrot.slane %v6142_v52, 1  ;;  %v2747_v53 = vshll.u32 %v6958_v18, 16  ;;  %1968 = vst.msk [vmem:[#allocation3] sm:$0xff] %vm1967_vm12, %v6832_v61  ;;  %v517_v41 = vld [vmem:[#allocation2 + $0xb4] sm:$0x1]  ;;  %v6189_v5 = vld [vmem:[#allocation2 + $0xc] sm:$0xff]  }
  0xb4   : > { %v2752_v57 = vshll.u32 %v6150_v28, 16  ;;  %v7004_v37 = vadd.f32 %v6986_v50, %v679_v10  ;;  %v7765_v48 = vshrl.u32 %v6904_v25, 16  ;;  %v750_v52 = vmax.f32 %v6966_v60, 0.0  ;;  %2258 = vst.msk [vmem:[#allocation3] sm:$0xff] %vm2257_vm13, %v6844_v44  ;;  %v573_v29 = vld [vmem:[#allocation2 + $0xbc] sm:$0x1] }
  0xb5   : > { %v1882_v11 = vsel %vm1726_vm8, %v1877_v14, %v1881_v46  ;;  %v2199_v54 = vsel %vm2160_vm7, %v2197_v42, %v2198_v2  ;;  %v2749_v56 = vrot.slane %v2747_v53, 1  ;;  %v3967_v25 = vsel %vm1726_vm8, %v3962_v26, %v6927_v58  ;;  %v7072_v10 = vld [vmem:[#allocation2 + $0x48] sm:$0xff]   ;;  %v6207_v46 = vld [vmem:[#allocation2 + $0x54] sm:$0xff]   ;;  %v570_v2 = vld [vmem:[#allocation2 + $0xb0] sm:$0x1] }
  0xb6   : > { %1943 = vrot.lane.b32.xlu0 %v1882_v11, %s6312_s12  ;;  %v2754_v43 = vrot.slane %v2752_v57, 1  ;;  %v3974_v23 = vor.u32 %v3973_v40, %v7765_v48  ;;  %v7766_v40 = vrot.slane %v6912_v27, 1  ;;  %v7767_v61 = vrot.slane %v6902_v21, 1  ;;  %v7049_v27 = vld [vmem:[#allocation2 + $0x90] sm:$0xfe]   ;;  %1541 = vst.msk [vmem:[#allocation3 + $0x38] sm:$0xff] %vm1533_vm11, %v6207_v46 }
  0xb7   : > { %v6924_v32 = vpop.permute.xlu0 %3096  ;;  %2235 = vrot.lane.b32.xlu1 %v2202_v33, %s6311_s11  ;;  %v751_v0 = vmax.f32 %v6969_v35, 0.0  ;;  %v2743_v21 = vsel %vm1726_vm8, %v2738_v7, %v6931_v39  ;;  %v4374_v44 = vrot.slane %v7018_v17, 1  ;;  %v5670_v58 = vpack.c.bf16 %v750_v52, %v750_v52  ;;  %v7062_v39 = vld [vmem:[#allocation2 + $0x98] ss:$0 sps:$4 sm:$0x11]   ;;  %v6208_v11 = vld [vmem:[#allocation2 + $0x48] sm:$0xff]  }
  0xb8   : > { %v3076_v57 = vsel %vm2160_vm7, %v7767_v61, %v7766_v40  ;;  %v7770_v60 = vrot.slane %v6936_v47, 1  ;;  %v749_v6 = vmax.f32 %v7004_v37, 0.0  ;;  %v518_v47 = vsel %vm6373_vm2, 0, %v517_v41  ;;  %v514_v33 = vld [vmem:[#allocation2 + $0xa8] sm:$0x1]  ;;  %v7088_v40 = vld [vmem:[#allocation2 + $0x9c] sm:$0xff]  }
  0xb9   : > { %v5671_v13 = vpack.c.bf16 %v751_v0, %v751_v0  ;;  %v1091_v35 = vshrl.u32 %v5670_v58, 16  ;;  %v3078_v26 = vrot.slane %v7062_v39, 1  ;;  %519 = vst [vmem:[#allocation2 + $0xb4] sm:$0x1] %v518_v47  ;;  %v515_v28 = vsel %vm6373_vm2, 0, %v514_v33  ;;  %1540 = vst.msk [vmem:[#allocation3 + $0x30] sm:$0xff] %vm1533_vm11, %v6208_v11 }
  0xba   : > { %2233 = vrot.lane.b32.xlu0 %v2199_v54, %s6311_s11  ;;  %516 = vst [vmem:[#allocation2 + $0xa8] sm:$0x1] %v515_v28  ;;  %v6171_v46 = vld [vmem:[#allocation2 + $0xa4] ss:$0 sps:$4 sm:$0x11]   ;;  %v6258_v1 = vld [vmem:[#allocation2 + $0x90] sm:$0xff]  }
  0xbb   : > { %v6950_v59 = vpop.permute.xlu0 %1921  ;;  %4128 = vrot.lane.b32.xlu1 %v3967_v25, %s6312_s12  ;;  %v1099_v14 = vshrl.u32 %v5671_v13, 16  ;;  %v1093_v42 = vrot.slane %v1091_v35, 7  ;;  %v1102_v7 = vshll.u32 %v5671_v13, 16  ;;  %v2274_v25 = vld [vmem:[#allocation3] sm:$0xff]  ;;  %v7159_v11 = vld [vmem:[#allocation2 + $0x48] sm:$0xfe]  }
  0xbc   : > { %v6952_v9 = vpop.permute.xlu1 %2219  ;;  %1969 = vst.msk [vmem:[#allocation3 + $0x8] sm:$0xff] %vm1967_vm12, %v6950_v59  ;;  %v4373_v59 = vrot.slane %v7001_v30, 1  ;;  %5876 = vmatprep.mubr.msk.bf16.mxu0 %vm3180_vm14, %v2274_v25  ;;  %v7146_v28 = vld [vmem:[#allocation2 + $0x9c] sm:$0xfe]  }
  0xbd   : > { %2259 = vst.msk [vmem:[#allocation3 + $0x8] sm:$0xff] %vm2257_vm13, %v6871_v24  ;;  %v7768_v24 = vshrl.u32 %v6958_v18, 16  ;;  %v7067_v18 = vsel %vm1726_vm8, %v3974_v23, %v3978_v49  ;;  %v1101_v54 = vrot.slane %v1099_v14, 7  ;;  %v6188_v49 = vld [vmem:[#allocation2 + $0x18] sm:$0xff]   ;;  %v1097_v48 = vrot.slane %v1093_v42, 4 }
  0xbe   : > { %2824 = vrot.lane.b32.xlu0 %v2743_v21, %s6312_s12  ;;  %2420 = vst.msk [vmem:[#allocation3] sm:$0xff] %vm1533_vm11, %v6189_v5  ;;  %1546 = vst.msk [vmem:[#allocation3 + $0x60] sm:$0xff] %vm1533_vm11, %v6258_v1 }
  0xbf   : > { %v6956_v45 = vpop.permute.xlu0 %1923  ;;  %3112 = vrot.lane.b32.xlu1 %v3076_v57, %s6311_s11  ;;  %v1106_v61 = vrot.slane %v1101_v54, 4  ;;  %v3981_v57 = vshrl.u32 %v7072_v10, 16 }
  0xc0   : > { %v6962_v15 = vpop.permute.xlu1 %3098  ;;  %1970 = vst.msk [vmem:[#allocation3 + $0x10] sm:$0xff] %vm1967_vm12, %v6956_v45  ;;  %v748_v45 = vmax.f32 %v6989_v20, 0.0  ;;  %v574_v20 = vsel %vm6381_vm5, 0, %v573_v29 }
  0xc1   : > { %2260 = vst.msk [vmem:[#allocation3 + $0x10] sm:$0xff] %vm2257_vm13, %v6848_v16  ;;  %v7769_v16 = vrot.slane %v6938_v8, 1  ;;  %v3077_v8 = vrot.slane %v7049_v27, 1  ;;  %575 = vst [vmem:[#allocation2 + $0xbc] sm:$0x1] %v574_v20  ;;  %v2759_v20 = vshll.u32 %v7088_v40, 16 }
  0xc2   : > { %v5668_v53 = vpack.c.bf16 %v748_v45, %v748_v45  ;;  %v1267_v35 = vld [vmem:[#allocation2 + $0xa8] sm:$0xf]  ;;  %v3080_v27 = vrot.slane %v7146_v28, 1 }
  0xc3   : > { %v6977_v63 = vpop.permute.xlu0 %2804 }
  0xc4   : > { %v1926_v34 = vpop.permute.xlu1 %1925  ;;  %v1074_v23 = vshrl.u32 %v5668_v53, 16  ;;  %v1077_v52 = vshll.u32 %v5668_v53, 16  ;;  %2852 = vst.msk [vmem:[#allocation3] sm:$0xff] %vm1967_vm12, %v6977_v63  ;;  %v1274_v63 = vld [vmem:[#allocation2 + $0xb4] sm:$0xf] }
  0xc5   : > { %1971 = vst.msk [vmem:[#allocation3 + $0x18] sm:$0xff] %vm1967_vm12, %v1926_v34  ;;  %v1094_v34 = vshll.u32 %v5670_v58, 16  ;;  %v6169_v58 = vld [vmem:[#allocation2 + $0x50] ss:$0 sps:$4 sm:$0x11]  }
  0xc6   : > { %2261 = vst.msk [vmem:[#allocation3 + $0x18] sm:$0xff] %vm2257_vm13, %v6888_v55  ;;  %v2750_v55 = vor.u32 %v2749_v56, %v7768_v24  ;;  %v5669_v56 = vpack.c.bf16 %v749_v6, %v749_v6  ;;  %v1076_v45 = vrot.slane %v1074_v23, 7  ;;  %v3983_v24 = vshll.u32 %v7072_v10, 16  ;;  %3140 = vst.msk [vmem:[#allocation3] sm:$0xff] %vm2257_vm13, %v6879_v22 }
  0xc7   : > { %v1928_v3 = vpop.permute.xlu0 %1927  ;;  %v1096_v37 = vor.u32 %v1094_v34, %v1093_v42  ;;  %v3988_v41 = vshll.u32 %v6169_v58, 16  ;;  %v7144_v42 = vrot.slane %v2759_v20, 1 }
  0xc8   : > { %v7009_v36 = vpop.permute.xlu1 %2806  ;;  %1972 = vst.msk [vmem:[#allocation3 + $0x20] sm:$0xff] %vm1967_vm12, %v1928_v3  ;;  %v2755_v3 = vsel %vm1726_vm8, %v2750_v55, %v2754_v43  ;;  %v1104_v43 = vor.u32 %v1102_v7, %v1101_v54  ;;  %v1082_v0 = vshrl.u32 %v5669_v56, 16  ;;  %v1085_v21 = vshll.u32 %v5669_v56, 16  ;;  %v1278_v5 = vld [vmem:[#allocation2 + $0xbc] sm:$0x1] }
  0xc9   : > { %2262 = vst.msk [vmem:[#allocation3 + $0x20] sm:$0xff] %vm2257_vm13, %v6893_v51  ;;  %v7060_v51 = vsel %vm2160_vm7, %v7770_v60, %v7769_v16  ;;  %2826 = vrot.lane.b32.xlu0 %v2755_v3, %s6312_s12  ;;  %v4375_v55 = vsel %vm2160_vm7, %v4373_v59, %v4374_v44  ;;  %v1079_v17 = vor.u32 %v1077_v52, %v1076_v45  ;;  %v1080_v30 = vrot.slane %v1076_v45, 4  ;;  %v7113_v44 = vld [vmem:[#allocation3 + $0x8] sm:$0xff] }
  0xca   : > { %v1105_v16 = vsel %vm6475_vm10, %v1097_v48, %v1104_v43  ;;  %v1084_v60 = vrot.slane %v1082_v0, 7  ;;  %4416 = vrot.lane.b32.xlu1 %v7060_v51, %s6311_s11  ;;  %v7110_v13 = vrot.slane %v3983_v24, 1  ;;  %v2757_v59 = vshrl.u32 %v7088_v40, 16  ;;  %v7119_v51 = vld [vmem:[#allocation2 + $0x54] sm:$0xff]   ;;  %2421 = vst.msk [vmem:[#allocation3 + $0x8] sm:$0xff] %vm1533_vm11, %v6188_v49 }
  0xcb   : > { %1277 = vst.msk [vmem:[#allocation2 + $0xb8] sm:$0xf] %vm1173_vm4, %v1105_v16  ;;  %v1275_v6 = vsel %vm6409_vm6, %v1096_v37, %v1274_v63  ;;  %v7117_v47 = vrot.slane %v3988_v41, 1  ;;  %v1279_v29 = vsel %vm6373_vm2, %v1106_v61, %v1278_v5  ;;  %v1268_v14 = vsel %vm6409_vm6, %v1079_v17, %v1267_v35  ;;  %v7164_v49 = vpop.permute.xlu0 %2808 }
  0xcc   : > { %v1930_v62 = vpop.permute.xlu1 %1929  ;;  %v1089_v22 = vrot.slane %v1084_v60, 4  ;;  %1276 = vst [vmem:[#allocation2 + $0xb4] sm:$0xf] %v1275_v6  ;;  %2853 = vst.msk [vmem:[#allocation3 + $0x8] sm:$0xff] %vm1967_vm12, %v7009_v36  ;;  %v3079_v36 = vsel %vm2160_vm7, %v3077_v8, %v3078_v26  ;;  %v2764_v7 = vshll.u32 %v6171_v46, 16  ;;  %v3993_v39 = vshrl.u32 %v7119_v51, 16 }
  0xcd   : > { %1973 = vst.msk [vmem:[#allocation3 + $0x28] sm:$0xff] %vm1967_vm12, %v1930_v62  ;;  %v1087_v62 = vor.u32 %v1085_v21, %v1084_v60  ;;  %4130 = vrot.lane.b32.xlu0 %v7067_v18, %s6312_s12  ;;  %1280 = vst [vmem:[#allocation2 + $0xbc] sm:$0x1] %v1279_v29  ;;  %v3995_v26 = vshll.u32 %v7119_v51, 16  ;;  %v4376_v56 = vrot.slane %v7159_v11, 1 }
  0xce   : > { %2263 = vst.msk [vmem:[#allocation3 + $0x28] sm:$0xff] %vm2257_vm13, %v6952_v9  ;;  %v571_v9 = vsel %vm6381_vm5, 0, %v570_v2  ;;  %3141 = vst.msk [vmem:[#allocation3 + $0x8] sm:$0xff] %vm2257_vm13, %v6922_v31  ;;  %4418 = vrot.lane.b32.xlu1 %v4375_v55, %s6311_s11  ;;  %v7148_v31 = vld [vmem:[#allocation2 + $0xa4] ss:$0 sps:$4 sm:$0x11]  }
  0xcf   : > { %572 = vst [vmem:[#allocation2 + $0xb0] sm:$0x1] %v571_v9  ;;  %v1088_v34 = vsel %vm6475_vm10, %v1080_v30, %v1087_v62  ;;  %1269 = vst [vmem:[#allocation2 + $0xa8] sm:$0xf] %v1268_v14  ;;  %v7151_v2 = vrot.slane %v2764_v7, 1  ;;  %v3081_v8 = vrot.slane %v7148_v31, 1 }
  0xd0   : > { %1270 = vst.msk [vmem:[#allocation2 + $0xac] sm:$0xf] %vm1173_vm4, %v1088_v34  ;;  %v7157_v53 = vpop.permute.xlu1 %2810  ;;  %v7161_v54 = vrot.slane %v3995_v26, 1  ;;  %v5788_v55 = vld [vmem:[%s6418_s8 + $0x78] sm:$0xff]  }
  0xd1   : > { %3114 = vrot.lane.b32.xlu0 %v3079_v36, %s6311_s11 }
  0xd2   : > { %v3998_v28 = vor.u32 %v7161_v54, %v3993_v39 }
  0xd3   : > { %v6160_v3 = vld [vmem:[#allocation2 + $0xb4] sm:$0xff]  }
  0xd4   : > { %v6161_v9 = vld [vmem:[#allocation2 + $0xbc] ss:$0 sps:$4 sm:$0x11]   ;;  %v1908_v37 = vshrl.u32 %v6160_v3, 16  ;;  %v1910_v48 = vshll.u32 %v6160_v3, 16 }
  0xd5   : > { %v1915_v23 = vshll.u32 %v6161_v9, 16  ;;  %v6164_v61 = vld [vmem:[#allocation2 + $0xb4] sm:$0xfe]   ;;  %v6165_v24 = vld [vmem:[#allocation2 + $0xbc] ss:$0 sps:$4 sm:$0x11]  }
  0xd6   : > { %v1271_v33 = vld [vmem:[#allocation2 + $0xb0] sm:$0x1]  ;;  %v1912_v25 = vrot.slane %v1910_v48, 1  ;;  %v2206_v41 = vrot.slane %v6164_v61, 1  ;;  %v2207_v17 = vrot.slane %v6165_v24, 1 }
  0xd7   : > { %v1272_v18 = vsel %vm6373_vm2, %v1089_v22, %v1271_v33  ;;  %v6162_v52 = vld [vmem:[#allocation2 + $0xa8] sm:$0xff]   ;;  %v1917_v21 = vrot.slane %v1915_v23, 1  ;;  %v3986_v33 = vor.u32 %v7110_v13, %v3981_v57  ;;  %v6178_v9 = vld [vmem:[#allocation2 + $0x50] ss:$0 sps:$4 sm:$0x11]   ;;  %v2762_v57 = vor.u32 %v7144_v42, %v2757_v59 }
  0xd8   : > { %1273 = vst [vmem:[#allocation2 + $0xb0] sm:$0x1] %v1272_v18  ;;  %v1896_v58 = vshrl.u32 %v6162_v52, 16  ;;  %v1898_v45 = vshll.u32 %v6162_v52, 16  ;;  %v1913_v16 = vor.u32 %v1912_v25, %v1908_v37  ;;  %v6166_v30 = vld [vmem:[#allocation2 + $0xa8] sm:$0xfe]   ;;  %v2208_v34 = vsel %vm2160_vm7, %v2206_v41, %v2207_v17 }
  0xd9   : > { %v2203_v46 = vrot.slane %v6166_v30, 1  ;;  %v6174_v20 = vld [vmem:[#allocation2 + $0xa8] sm:$0xff]   ;;  %v5772_v18 = vunpack.c.l.bf16 %v5788_v55  ;;  %v6180_v23 = vld [vmem:[#allocation2 + $0x5c] ss:$0 sps:$4 sm:$0x11]   ;;  %v6190_v52 = vld [vmem:[#allocation2 + $0x60] sm:$0xff]   ;;  %v3082_v41 = vsel %vm2160_vm7, %v3080_v27, %v3081_v8 }
  0xda   : > { %v1900_v63 = vrot.slane %v1898_v45, 1  ;;  %v1918_v5 = vsel %vm1726_vm8, %v1913_v16, %v1917_v21  ;;  %v2769_v26 = vshrl.u32 %v6174_v20, 16  ;;  %v2771_v3 = vshll.u32 %v6174_v20, 16  ;;  %v6184_v24 = vld [vmem:[#allocation2 + $0x54] sm:$0xfe]  }
  0xdb   : > { %1949 = vrot.lane.b32.xlu1 %v1918_v5, %s6312_s12  ;;  %v4377_v25 = vrot.slane %v6178_v9, 1  ;;  %v5773_v21 = vunpack.c.h.bf16 %v5788_v55  ;;  %v682_v45 = vmul.f32 %v6974_v12, %v5772_v18  ;;  %v4005_v59 = vshrl.u32 %v6190_v52, 16  ;;  %v6185_v55 = vld [vmem:[#allocation2 + $0x5c] ss:$0 sps:$4 sm:$0x11]   ;;  %v6201_v9 = vld [vmem:[#allocation2 + $0x30] sm:$0xff]  }
  0xdc   : > { %v1901_v35 = vor.u32 %v1900_v63, %v1896_v58  ;;  %v2773_v13 = vrot.slane %v2771_v3, 1  ;;  %v7189_v58 = vld [vmem:[%s7754_s5] sm:$0x3f]   ;;  %v4379_v63 = vrot.slane %v6184_v24, 1  ;;  %v4380_v30 = vrot.slane %v6185_v55, 1  ;;  %v2276_v55 = vld [vmem:[#allocation3 + $0x10] sm:$0xff] }
  0xdd   : > { %v1934_v0 = vpop.permute.xlu1 %1933  ;;  %6009 = vmatprep.subr.msk.bf16.mxu0 %vm3229_vm15, %v7189_v58  ;;  %v7200_v16 = vsel %vm3229_vm15, %v7189_v58, 0  ;;  %v683_v17 = vmul.f32 %v6974_v12, %v5773_v21  ;;  %v4378_v12 = vsel %vm2160_vm7, %v4376_v56, %v4377_v25  ;;  %v520_v25 = vld [vmem:[#allocation2 + $0xc0] sm:$0x1] }
  0xde   : > { %1975 = vst.msk [vmem:[#allocation3 + $0x38] sm:$0xff] %vm1967_vm12, %v1934_v0  ;;  %v4000_v0 = vshll.u32 %v6180_v23, 16  ;;  %v2774_v42 = vor.u32 %v2773_v13, %v2769_v26  ;;  %5875 = vmatpush3.bf16.msra.mxu0 %v7200_v16  ;;  %v6197_v13 = vld [vmem:[#allocation2 + $0xbc] ss:$0 sps:$4 sm:$0x11]   ;;  %v521_v21 = vsel %vm6373_vm2, 0, %v520_v25 }
  0xdf   : > { %v6163_v43 = vld [vmem:[#allocation2 + $0xb0] ss:$0 sps:$4 sm:$0x11]   ;;  %2239 = vrot.lane.b32.xlu1 %v2208_v34, %s6311_s11  ;;  %522 = vst [vmem:[#allocation2 + $0xc0] sm:$0x1] %v521_v21 }
  0xe0   : > { %v1903_v60 = vshll.u32 %v6163_v43, 16  ;;  %v1932_v6 = vpop.permute.xlu0 %1931  ;;  %v6167_v22 = vld [vmem:[#allocation2 + $0xb0] ss:$0 sps:$4 sm:$0x11]   ;;  %v3991_v43 = vsel %vm1726_vm8, %v3986_v33, %v7117_v47  ;;  %v4002_v40 = vrot.slane %v4000_v0, 1  ;;  %v2767_v47 = vsel %vm1726_vm8, %v2762_v57, %v7151_v2 }
  0xe1   : > { %1974 = vst.msk [vmem:[#allocation3 + $0x30] sm:$0xff] %vm1967_vm12, %v1932_v6  ;;  %v2224_v29 = vpop.permute.xlu1 %2223  ;;  %v2204_v14 = vrot.slane %v6167_v22, 1  ;;  %v6175_v36 = vld [vmem:[#allocation2 + $0xb0] ss:$0 sps:$4 sm:$0x11]   ;;  %v4007_v2 = vshll.u32 %v6190_v52, 16  ;;  %5877 = vmatmul.mubr.msk.bf16.vlgmr.msra.gmra.mrb[0].mxu0 %vm3180_vm14, %v7113_v44  ;;  %v4381_v33 = vsel %vm2160_vm7, %v4379_v63, %v4380_v30 }
  0xe2   : > { %v1905_v62 = vrot.slane %v1903_v60, 1  ;;  %2265 = vst.msk [vmem:[#allocation3 + $0x38] sm:$0xff] %vm2257_vm13, %v2224_v29  ;;  %v2776_v48 = vshll.u32 %v6175_v36, 16  ;;  %v6186_v6 = vld [vmem:[#allocation2 + $0xa8] sm:$0xfe]   ;;  %v6192_v29 = vld [vmem:[#allocation2 + $0xb4] sm:$0xff]   ;;  %v4003_v44 = vsel %vm1726_vm8, %v3998_v28, %v4002_v40  ;;  %5880 = vmatprep.mubr.msk.bf16.mxu0 %vm3180_vm14, %v2276_v55 }
  0xe3   : > { %v2205_v10 = vsel %vm2160_vm7, %v2203_v46, %v2204_v14  ;;  %4132 = vrot.lane.b32.xlu1 %v3991_v43, %s6312_s12  ;;  %v6187_v5 = vld [vmem:[#allocation2 + $0xb0] ss:$0 sps:$4 sm:$0x11]   ;;  %v3083_v27 = vrot.slane %v6186_v6, 1  ;;  %v4009_v22 = vrot.slane %v4007_v2, 1  ;;  %v2781_v51 = vshrl.u32 %v6192_v29, 16 }
  0xe4   : > { %v1906_v7 = vsel %vm1726_vm8, %v1901_v35, %v1905_v62  ;;  %v2222_v37 = vpop.permute.xlu0 %2221  ;;  %v2778_v61 = vrot.slane %v2776_v48, 1  ;;  %v720_v62 = vadd.f32 %v6986_v50, %v682_v45  ;;  %v3084_v8 = vrot.slane %v6187_v5, 1  ;;  %v6191_v46 = vld [vmem:[#allocation2 + $0x68] ss:$0 sps:$4 sm:$0x11]   ;;  %v7236_v43 = vld [vmem:[#allocation2 + $0x6c] sm:$0xff]  }
  0xe5   : > { %1947 = vrot.lane.b32.xlu0 %v1906_v7, %s6312_s12  ;;  %2264 = vst.msk [vmem:[#allocation3 + $0x30] sm:$0xff] %vm2257_vm13, %v2222_v37  ;;  %v7202_v60 = vpop.permute.xlu1 %2814  ;;  %v721_v35 = vadd.f32 %v6986_v50, %v683_v17  ;;  %v2783_v39 = vshll.u32 %v6192_v29, 16  ;;  %v4010_v54 = vor.u32 %v4009_v22, %v4005_v59  ;;  %v4012_v11 = vshll.u32 %v6191_v46, 16  ;;  %v6193_v14 = vld [vmem:[#allocation2 + $0xbc] ss:$0 sps:$4 sm:$0x11]  }
  0xe6   : > { %v2779_v31 = vsel %vm1726_vm8, %v2774_v42, %v2778_v61  ;;  %v752_v20 = vmax.f32 %v720_v62, 0.0  ;;  %v6202_v7 = vld [vmem:[#allocation2 + $0x24] sm:$0xff]   ;;  %v2788_v3 = vshll.u32 %v6193_v14, 16  ;;  %v6196_v37 = vld [vmem:[#allocation2 + $0xb4] sm:$0xfe]   ;;  %v3085_v23 = vsel %vm2160_vm7, %v3083_v27, %v3084_v8 }
  0xe7   : > { %3116 = vrot.lane.b32.xlu1 %v3082_v41, %s6311_s11  ;;  %v2785_v50 = vrot.slane %v2783_v39, 1  ;;  %v753_v36 = vmax.f32 %v721_v35, 0.0  ;;  %v4014_v26 = vrot.slane %v4012_v11, 1  ;;  %v3086_v0 = vrot.slane %v6196_v37, 1  ;;  %v576_v45 = vld [vmem:[#allocation2 + $0xc8] sm:$0x1] }
  0xe8   : > { %v7229_v56 = vpop.permute.xlu0 %2812  ;;  %v5672_v18 = vpack.c.bf16 %v752_v20, %v752_v20  ;;  %v2790_v57 = vrot.slane %v2788_v3, 1  ;;  %v3087_v59 = vrot.slane %v6197_v13, 1  ;;  %v6200_v41 = vld [vmem:[%s7754_s5 + $0x8] sm:$0x3f]   ;;  %v2277_v30 = vld [vmem:[#allocation3 + $0x18] sm:$0xff]  ;;  %2422 = vst.msk [vmem:[#allocation3 + $0x10] sm:$0xff] %vm1533_vm11, %v6202_v7 }
  0xe9   : > { %2237 = vrot.lane.b32.xlu0 %v2205_v10, %s6311_s11  ;;  %v7224_v34 = vpop.permute.xlu1 %3102  ;;  %v5673_v48 = vpack.c.bf16 %v753_v36, %v753_v36  ;;  %v4015_v52 = vsel %vm1726_vm8, %v4010_v54, %v4014_v26  ;;  %v2786_v10 = vor.u32 %v2785_v50, %v2781_v51  ;;  %6008 = vmatprep.subr.msk.bf16.mxu1 %vm3229_vm15, %v6200_v41  ;;  %v3231_v62 = vsel %vm3229_vm15, %v6200_v41, 0  ;;  %v6204_v29 = vld [vmem:[#allocation2 + $0x68] ss:$0 sps:$4 sm:$0x11]   ;;  %v1281_v46 = vld [vmem:[#allocation2 + $0xc0] sm:$0xf] }
  0xea   : > { %v1108_v40 = vshrl.u32 %v5672_v18, 16  ;;  %v1111_v24 = vshll.u32 %v5672_v18, 16  ;;  %2423 = vst.msk [vmem:[#allocation3 + $0x18] sm:$0xff] %vm1533_vm11, %v6201_v9  ;;  %5841 = vmatpush3.bf16.msra.mxu1 %v3231_v62  ;;  %5881 = vmatmul.mubr.msk.bf16.gmra.mrb[4].mxu0 %vm3180_vm14, %v2277_v30  ;;  %v4383_v51 = vrot.slane %v6204_v29, 1  ;;  %v3157_v54 = vld [vmem:[#allocation3 + $0x8] sm:$0xff]  ;;  %v4017_v26 = vshrl.u32 %v7236_v43, 16 }
  0xeb   : > { %4420 = vrot.lane.b32.xlu1 %v4378_v12, %s6311_s11  ;;  %v1116_v42 = vshrl.u32 %v5673_v48, 16  ;;  %v1119_v17 = vshll.u32 %v5673_v48, 16  ;;  %v2791_v6 = vsel %vm1726_vm8, %v2786_v10, %v2790_v57  ;;  %2854 = vst.msk [vmem:[#allocation3 + $0x10] sm:$0xff] %vm1967_vm12, %v7164_v49  ;;  %2855 = vst.msk [vmem:[#allocation3 + $0x18] sm:$0xff] %vm1967_vm12, %v7157_v53  ;;  %v4019_v49 = vshll.u32 %v7236_v43, 16  ;;  %v3156_v12 = vld [vmem:[#allocation3] sm:$0xff]  ;;  %6010 = vmatprep.subr.msk.bf16.mxu1 %vm3229_vm15, %v7189_v58 }
  0xec   : > { %v7247_v63 = vpop.permute.xlu0 %3100  ;;  %v1110_v2 = vrot.slane %v1108_v40, 7  ;;  %3142 = vst.msk [vmem:[#allocation3 + $0x10] sm:$0xff] %vm2257_vm13, %v6924_v32  ;;  %3143 = vst.msk [vmem:[#allocation3 + $0x18] sm:$0xff] %vm2257_vm13, %v6962_v15  ;;  %v6203_v32 = vld [vmem:[#allocation2 + $0x60] sm:$0xfe]   ;;  %5842 = vmatprep.mubr.msk.bf16.mxu1 %vm3180_vm14, %v3156_v12  ;;  %v7294_v9 = vld [vmem:[#allocation2 + $0x78] sm:$0xff]  }
  0xed   : > { %2828 = vrot.lane.b32.xlu0 %v2767_v47, %s6312_s12  ;;  %v577_v47 = vsel %vm6381_vm5, 0, %v576_v45  ;;  %v1118_v5 = vrot.slane %v1116_v42, 7  ;;  %v4382_v20 = vrot.slane %v6203_v32, 1  ;;  %5843 = vmatmul.mubr.msk.bf16.vlgmr.msra.gmra.mrb[0].mxu1 %vm3180_vm14, %v3157_v54  ;;  %v6209_v36 = vld [vmem:[#allocation2 + $0x6c] sm:$0xfe]   ;;  %v4029_v43 = vshrl.u32 %v7294_v9, 16 }
  0xee   : > { %578 = vst [vmem:[#allocation2 + $0xc8] sm:$0x1] %v577_v47  ;;  %v1114_v28 = vrot.slane %v1110_v2, 4  ;;  %v1113_v27 = vor.u32 %v1111_v24, %v1110_v2  ;;  %5943 = vmatpush3.bf16.msra.mxu1 %v7200_v16  ;;  %v6210_v18 = vld [vmem:[#allocation2 + $0x74] ss:$0 sps:$4 sm:$0x11]  }
  0xef   : > { %4422 = vrot.lane.b32.xlu1 %v4381_v33, %s6311_s11  ;;  %v1121_v8 = vor.u32 %v1119_v17, %v1118_v5  ;;  %v1123_v53 = vrot.slane %v1118_v5, 4  ;;  %v4384_v38 = vsel %vm2160_vm7, %v4382_v20, %v4383_v51  ;;  %v2278_v33 = vld [vmem:[#allocation3 + $0x20] sm:$0xff]  ;;  %v4385_v3 = vrot.slane %v6209_v36, 1  ;;  %v6214_v57 = vld [vmem:[#allocation2 + $0x80] ss:$0 sps:$4 sm:$0x11]  }
  0xf0   : > { %v1282_v58 = vsel %vm6409_vm6, %v1113_v27, %v1281_v46  ;;  %5884 = vmatprep.mubr.msk.bf16.mxu0 %vm3180_vm14, %v2278_v33  ;;  %v4386_v48 = vrot.slane %v6210_v18, 1  ;;  %v4031_v16 = vshll.u32 %v7294_v9, 16  ;;  %v6215_v45 = vld [vmem:[#allocation2 + $0x84] sm:$0xff]   ;;  %v4036_v2 = vshll.u32 %v6214_v57, 16  ;;  %v6218_v32 = vld [vmem:[#allocation2 + $0x3c] sm:$0xff]  }
  0xf1   : > { %2830 = vrot.lane.b32.xlu0 %v2779_v31, %s6312_s12  ;;  %v7238_v61 = vpop.permute.xlu1 %1937  ;;  %v3088_v31 = vsel %vm2160_vm7, %v3086_v0, %v3087_v59  ;;  %v1122_v15 = vsel %vm6475_vm10, %v1114_v28, %v1121_v8  ;;  %1283 = vst [vmem:[#allocation2 + $0xc0] sm:$0xf] %v1282_v58  ;;  %v4041_v30 = vshrl.u32 %v6215_v45, 16  ;;  %v6216_v8 = vld [vmem:[#allocation2 + $0x8c] ss:$0 sps:$4 sm:$0x11]  }
  0xf2   : > { %1284 = vst.msk [vmem:[#allocation2 + $0xc4] sm:$0xf] %vm1173_vm4, %v1122_v15  ;;  %v4387_v25 = vsel %vm2160_vm7, %v4385_v3, %v4386_v48  ;;  %v4033_v41 = vrot.slane %v4031_v16, 1  ;;  %v4048_v15 = vshll.u32 %v6216_v8, 16  ;;  %v6219_v58 = vld [vmem:[#allocation2 + $0x78] sm:$0xfe]  }
  0xf3   : > { %4136 = vrot.lane.b32.xlu1 %v4015_v52, %s6312_s12  ;;  %v3158_v37 = vld [vmem:[#allocation3 + $0x10] sm:$0xff]  ;;  %v4021_v52 = vrot.slane %v4019_v49, 1  ;;  %v3159_v46 = vld [vmem:[#allocation3 + $0x18] sm:$0xff]  ;;  %2424 = vst.msk [vmem:[#allocation3 + $0x20] sm:$0xff] %vm1533_vm11, %v6218_v32 }
  0xf4   : > { %5846 = vmatprep.mubr.msk.bf16.mxu1 %vm3180_vm14, %v3158_v37  ;;  %v6217_v49 = vld [vmem:[#allocation2 + $0x48] sm:$0xff]   ;;  %2856 = vst.msk [vmem:[#allocation3 + $0x20] sm:$0xff] %vm1967_vm12, %v7229_v56  ;;  %v6220_v54 = vld [vmem:[#allocation2 + $0x80] ss:$0 sps:$4 sm:$0x11]   ;;  %v4034_v56 = vor.u32 %v4033_v41, %v4029_v43 }
  0xf5   : > { %4134 = vrot.lane.b32.xlu0 %v4003_v44, %s6312_s12  ;;  %v7268_v22 = vpop.permute.xlu1 %2227  ;;  %v1285_v39 = vld [vmem:[#allocation2 + $0xc8] sm:$0x1]  ;;  %v6206_v44 = vld [vmem:[#allocation2 + $0x74] ss:$0 sps:$4 sm:$0x11]   ;;  %v4022_v27 = vor.u32 %v4021_v52, %v4017_v26  ;;  %5847 = vmatmul.mubr.msk.bf16.gmra.mrb[4].mxu1 %vm3180_vm14, %v3159_v46  ;;  %3144 = vst.msk [vmem:[#allocation3 + $0x20] sm:$0xff] %vm2257_vm13, %v7247_v63 }
  0xf6   : > { %v1286_v11 = vsel %vm6373_vm2, %v1123_v53, %v1285_v39  ;;  %v4024_v14 = vshll.u32 %v6206_v44, 16  ;;  %v4050_v44 = vrot.slane %v4048_v15, 1  ;;  %v6221_v33 = vld [vmem:[#allocation2 + $0x84] sm:$0xfe]   ;;  %v6223_v63 = vld [vmem:[#allocation2 + $0x90] sm:$0xff]   ;;  %v4389_v48 = vrot.slane %v6220_v54, 1 }
  0xf7   : > { %3120 = vrot.lane.b32.xlu1 %v3088_v31, %s6311_s11  ;;  %1287 = vst [vmem:[#allocation2 + $0xc8] sm:$0x1] %v1286_v11  ;;  %v4043_v31 = vshll.u32 %v6215_v45, 16  ;;  %v4038_v11 = vrot.slane %v4036_v2, 1  ;;  %v4391_v26 = vrot.slane %v6221_v33, 1  ;;  %v4055_v57 = vshll.u32 %v6223_v63, 16 }
  0xf8   : > { %v7277_v35 = vpop.permute.xlu0 %1935  ;;  %v4026_v10 = vrot.slane %v4024_v14, 1  ;;  %v4388_v14 = vrot.slane %v6219_v58, 1  ;;  %v6222_v36 = vld [vmem:[#allocation2 + $0x8c] ss:$0 sps:$4 sm:$0x11]   ;;  %v6228_v2 = vld [vmem:[#allocation2 + $0x60] sm:$0xff]  }
  0xf9   : > { %3118 = vrot.lane.b32.xlu0 %v3085_v23, %s6311_s11  ;;  %v2279_v23 = vld [vmem:[#allocation3 + $0x28] sm:$0xff]  ;;  %v4045_v53 = vrot.slane %v4043_v31, 1  ;;  %v4392_v3 = vrot.slane %v6222_v36, 1  ;;  %v6224_v9 = vld [vmem:[#allocation2 + $0x98] ss:$0 sps:$4 sm:$0x11]  }
  0xfa   : > { %v7287_v50 = vpop.permute.xlu1 %2818  ;;  %5885 = vmatmul.mubr.msk.bf16.gmra.mrb[8].mxu0 %vm3180_vm14, %v2279_v23  ;;  %v6198_v13 = vld [vmem:[#allocation2 + $0xc0] sm:$0xff]   ;;  %2425 = vst.msk [vmem:[#allocation3 + $0x28] sm:$0xff] %vm1533_vm11, %v6217_v49  ;;  %v4027_v39 = vsel %vm1726_vm8, %v4022_v27, %v4026_v10  ;;  %v2281_v23 = vld [vmem:[#allocation3 + $0x38] sm:$0xff]  ;;  %v4053_v10 = vshrl.u32 %v6223_v63, 16  ;;  %v4060_v16 = vshll.u32 %v6224_v9, 16  ;;  %v4057_v45 = vrot.slane %v4055_v57, 1 }
  0xfb   : > { %4424 = vrot.lane.b32.xlu1 %v4384_v38, %s6311_s11  ;;  %v2793_v40 = vshrl.u32 %v6198_v13, 16  ;;  %v2795_v24 = vshll.u32 %v6198_v13, 16  ;;  %v6211_v59 = vld [vmem:[#allocation2 + $0xc0] sm:$0xfe]   ;;  %v4046_v51 = vor.u32 %v4045_v53, %v4041_v30  ;;  %2857 = vst.msk [vmem:[#allocation3 + $0x28] sm:$0xff] %vm1967_vm12, %v7202_v60  ;;  %v2280_v60 = vld [vmem:[#allocation3 + $0x30] sm:$0xff]  ;;  %v4393_v52 = vsel %vm2160_vm7, %v4391_v26, %v4392_v3 }
  0xfc   : > { %v7291_v7 = vpop.permute.xlu0 %2225  ;;  %v3089_v5 = vrot.slane %v6211_v59, 1  ;;  %3145 = vst.msk [vmem:[#allocation3 + $0x28] sm:$0xff] %vm2257_vm13, %v7224_v34  ;;  %5888 = vmatprep.mubr.msk.bf16.mxu0 %vm3180_vm14, %v2280_v60  ;;  %v6225_v13 = vld [vmem:[#allocation2 + $0x9c] sm:$0xff]   ;;  %v6226_v43 = vld [vmem:[#allocation2 + $0xa4] ss:$0 sps:$4 sm:$0x11]   ;;  %v4390_v31 = vsel %vm2160_vm7, %v4388_v14, %v4389_v48 }
  0xfd   : > { %2832 = vrot.lane.b32.xlu0 %v2791_v6, %s6312_s12  ;;  %v2797_v17 = vrot.slane %v2795_v24, 1  ;;  %v4051_v38 = vsel %vm1726_vm8, %v4046_v51, %v4050_v44  ;;  %v4065_v24 = vshrl.u32 %v6225_v13, 16  ;;  %v4067_v59 = vshll.u32 %v6225_v13, 16  ;;  %v3160_v30 = vld [vmem:[#allocation3 + $0x20] sm:$0xff]  ;;  %1542 = vst.msk [vmem:[#allocation3 + $0x40] sm:$0xff] %vm1533_vm11, %v6228_v2  ;;  %v6247_v57 = vld [vmem:[#allocation2 + $0x84] sm:$0xff]  }
  0xfe   : > { %v7301_v0 = vpop.permute.xlu1 %3106  ;;  %v6199_v21 = vld [vmem:[#allocation2 + $0xc8] ss:$0 sps:$4 sm:$0x11]   ;;  %v4072_v41 = vshll.u32 %v6226_v43, 16  ;;  %5850 = vmatprep.mubr.msk.bf16.mxu1 %vm3180_vm14, %v3160_v30  ;;  %1976 = vst.msk [vmem:[#allocation3 + $0x40] sm:$0xff] %vm1967_vm12, %v7277_v35  ;;  %v6235_v14 = vld [vmem:[#allocation2 + $0xb4] sm:$0xff]  }
  0xff   : > { %4426 = vrot.lane.b32.xlu1 %v4387_v25, %s6311_s11  ;;  %v2800_v42 = vshll.u32 %v6199_v21, 16  ;;  %v6212_v55 = vld [vmem:[#allocation2 + $0xc8] ss:$0 sps:$4 sm:$0x11]   ;;  %v2798_v28 = vor.u32 %v2797_v17, %v2793_v40  ;;  %v4039_v25 = vsel %vm1726_vm8, %v4034_v56, %v4038_v11  ;;  %v6227_v21 = vld [vmem:[#allocation2 + $0x6c] sm:$0xff]   ;;  %v4062_v40 = vrot.slane %v4060_v16, 1 }
 0x100   : > { %v7304_v47 = vpop.permute.xlu0 %2816  ;;  %v3090_v62 = vrot.slane %v6212_v55, 1  ;;  %1543 = vst.msk [vmem:[#allocation3 + $0x48] sm:$0xff] %vm1533_vm11, %v6227_v21  ;;  %v4069_v17 = vrot.slane %v4067_v59, 1  ;;  %v6231_v15 = vld [vmem:[#allocation2 + $0x9c] sm:$0xfe]   ;;  %v4089_v3 = vshrl.u32 %v6235_v14, 16 }
 0x101   : > { %v2802_v6 = vrot.slane %v2800_v42, 1  ;;  %1977 = vst.msk [vmem:[#allocation3 + $0x48] sm:$0xff] %vm1967_vm12, %v7238_v61  ;;  %v6230_v61 = vld [vmem:[#allocation2 + $0x98] ss:$0 sps:$4 sm:$0x11]   ;;  %v4397_v58 = vrot.slane %v6231_v15, 1 }
 0x102   : > { %v7306_v12 = vpop.permute.xlu1 %1941  ;;  %v3091_v34 = vsel %vm2160_vm7, %v3089_v5, %v3090_v62  ;;  %5889 = vmatmul.mubr.msk.bf16.gmra.mrb[12].mxu0 %vm3180_vm14, %v2281_v23  ;;  %v6229_v5 = vld [vmem:[#allocation2 + $0x90] sm:$0xfe]   ;;  %2267 = vst.msk [vmem:[#allocation3 + $0x48] sm:$0xff] %vm2257_vm13, %v7268_v22  ;;  %v6233_v62 = vld [vmem:[#allocation2 + $0xa8] sm:$0xff]   ;;  %v4070_v27 = vor.u32 %v4069_v17, %v4065_v24  ;;  %2266 = vst.msk [vmem:[#allocation3 + $0x40] sm:$0xff] %vm2257_vm13, %v7291_v7  ;;  %v4091_v63 = vshll.u32 %v6235_v14, 16 }
 0x103   : > { %v2803_v29 = vsel %vm1726_vm8, %v2798_v28, %v2802_v6  ;;  %4142 = vrot.lane.b32.xlu1 %v4051_v38, %s6312_s12  ;;  %v4074_v6 = vrot.slane %v4072_v41, 1  ;;  %v4058_v28 = vor.u32 %v4057_v45, %v4053_v10  ;;  %v3161_v8 = vld [vmem:[#allocation3 + $0x28] sm:$0xff]  ;;  %v4394_v53 = vrot.slane %v6229_v5, 1  ;;  %v6234_v44 = vld [vmem:[#allocation2 + $0xb0] ss:$0 sps:$4 sm:$0x11]  }
 0x104   : > { %v7310_v20 = vpop.permute.xlu0 %3104  ;;  %2834 = vrot.lane.b32.xlu0 %v2803_v29, %s6312_s12  ;;  %v4077_v32 = vshrl.u32 %v6233_v62, 16  ;;  %5851 = vmatmul.mubr.msk.bf16.gmra.mrb[8].mxu1 %vm3180_vm14, %v3161_v8  ;;  %v4395_v29 = vrot.slane %v6230_v61, 1  ;;  %v6232_v46 = vld [vmem:[#allocation2 + $0xa4] ss:$0 sps:$4 sm:$0x11]   ;;  %v4079_v7 = vshll.u32 %v6233_v62, 16 }
 0x105   : > { %v4075_v22 = vsel %vm1726_vm8, %v4070_v27, %v4074_v6  ;;  %v4063_v35 = vsel %vm1726_vm8, %v4058_v28, %v4062_v40  ;;  %v4084_v38 = vshll.u32 %v6234_v44, 16  ;;  %v6236_v33 = vld [vmem:[#allocation2 + $0xbc] ss:$0 sps:$4 sm:$0x11]   ;;  %v6237_v56 = vld [vmem:[#allocation2 + $0x60] sm:$0xff]   ;;  %v6238_v9 = vld [vmem:[#allocation2 + $0x54] sm:$0xff]  }
 0x106   : > { %v7326_v18 = vpop.permute.xlu1 %2231  ;;  %v4081_v60 = vrot.slane %v4079_v7, 1  ;;  %v4396_v36 = vsel %vm2160_vm7, %v4394_v53, %v4395_v29  ;;  %v4096_v23 = vshll.u32 %v6236_v33, 16  ;;  %2427 = vst.msk [vmem:[#allocation3 + $0x38] sm:$0xff] %vm1533_vm11, %v6237_v56  ;;  %2426 = vst.msk [vmem:[#allocation3 + $0x30] sm:$0xff] %vm1533_vm11, %v6238_v9  ;;  %v6243_v10 = vld [vmem:[#allocation2 + $0xc0] sm:$0xff]   ;;  %v6248_v28 = vld [vmem:[#allocation2 + $0x78] sm:$0xff]  }
 0x107   : > { %4430 = vrot.lane.b32.xlu1 %v4393_v52, %s6311_s11  ;;  %v4086_v26 = vrot.slane %v4084_v38, 1  ;;  %v4093_v52 = vrot.slane %v4091_v63, 1  ;;  %2859 = vst.msk [vmem:[#allocation3 + $0x38] sm:$0xff] %vm1967_vm12, %v7287_v50  ;;  %2858 = vst.msk [vmem:[#allocation3 + $0x30] sm:$0xff] %vm1967_vm12, %v7304_v47  ;;  %v6239_v13 = vld [vmem:[#allocation2 + $0xa8] sm:$0xfe]  }
 0x108   : > { %4138 = vrot.lane.b32.xlu0 %v4027_v39, %s6312_s12  ;;  %v4398_v39 = vrot.slane %v6232_v46, 1  ;;  %v4098_v16 = vrot.slane %v4096_v23, 1  ;;  %3147 = vst.msk [vmem:[#allocation3 + $0x38] sm:$0xff] %vm2257_vm13, %v7301_v0  ;;  %3146 = vst.msk [vmem:[#allocation3 + $0x30] sm:$0xff] %vm2257_vm13, %v7310_v20  ;;  %v4400_v45 = vrot.slane %v6239_v13, 1  ;;  %v4101_v0 = vshrl.u32 %v6243_v10, 16 }
 0x109   : > { %v4094_v50 = vor.u32 %v4093_v52, %v4089_v3  ;;  %1545 = vst.msk [vmem:[#allocation3 + $0x58] sm:$0xff] %vm1533_vm11, %v6247_v57  ;;  %v6241_v24 = vld [vmem:[#allocation2 + $0xb4] sm:$0xfe]   ;;  %v6242_v59 = vld [vmem:[#allocation2 + $0xbc] ss:$0 sps:$4 sm:$0x11]  }
 0x10a   : > { %v7340_v55 = vpop.permute.xlu1 %4124  ;;  %v4399_v11 = vsel %vm2160_vm7, %v4397_v58, %v4398_v39  ;;  %1979 = vst.msk [vmem:[#allocation3 + $0x58] sm:$0xff] %vm1967_vm12, %v7306_v12  ;;  %v4403_v20 = vrot.slane %v6241_v24, 1  ;;  %v6244_v2 = vld [vmem:[#allocation2 + $0xc8] ss:$0 sps:$4 sm:$0x11]   ;;  %v4404_v30 = vrot.slane %v6242_v59, 1 }
 0x10b   : > { %4146 = vrot.lane.b32.xlu1 %v4075_v22, %s6312_s12  ;;  %v4099_v47 = vsel %vm1726_vm8, %v4094_v50, %v4098_v16  ;;  %2269 = vst.msk [vmem:[#allocation3 + $0x58] sm:$0xff] %vm2257_vm13, %v7326_v18  ;;  %v4103_v6 = vshll.u32 %v6243_v10, 16  ;;  %v523_v12 = vld [vmem:[#allocation2 + $0xcc] sm:$0x1]  ;;  %v579_v5 = vld [vmem:[#allocation2 + $0xd4] sm:$0x1] }
 0x10c   : > { %v7331_v37 = vpop.permute.xlu0 %1939  ;;  %3122 = vrot.lane.b32.xlu0 %v3091_v34, %s6311_s11  ;;  %v4082_v34 = vor.u32 %v4081_v60, %v4077_v32  ;;  %v4108_v62 = vshll.u32 %v6244_v2, 16  ;;  %v580_v18 = vsel %vm6381_vm5, 0, %v579_v5  ;;  %v4405_v61 = vsel %vm2160_vm7, %v4403_v20, %v4404_v30  ;;  %1544 = vst.msk [vmem:[#allocation3 + $0x50] sm:$0xff] %vm1533_vm11, %v6248_v28  ;;  %v6249_v4 = vld [vmem:[#allocation2 + $0xc0] sm:$0xfe]   ;;  %v7412_v44 = vld [vmem:[#allocation3 + $0x40] sm:$0xff] }
 0x10d   : > { %v4105_v8 = vrot.slane %v4103_v6, 1  ;;  %581 = vst [vmem:[#allocation2 + $0xd4] sm:$0x1] %v580_v18  ;;  %1978 = vst.msk [vmem:[#allocation3 + $0x50] sm:$0xff] %vm1967_vm12, %v7331_v37  ;;  %v4406_v39 = vrot.slane %v6249_v4, 1  ;;  %v6254_v37 = vld [vmem:[#allocation2 + $0x6c] sm:$0xff]  }
 0x10e   : > { %v7359_v51 = vpop.permute.xlu1 %3108  ;;  %v4087_v21 = vsel %vm1726_vm8, %v4082_v34, %v4086_v26  ;;  %v4110_v32 = vrot.slane %v4108_v62, 1  ;;  %v6250_v46 = vld [vmem:[#allocation2 + $0xc8] ss:$0 sps:$4 sm:$0x11]   ;;  %2428 = vst.msk [vmem:[#allocation3 + $0x40] sm:$0xff] %vm1533_vm11, %v6254_v37  ;;  %v6257_v26 = vld [vmem:[#allocation2 + $0x9c] sm:$0xff]  }
 0x10f   : > { %4434 = vrot.lane.b32.xlu1 %v4399_v11, %s6311_s11  ;;  %v3163_v53 = vld [vmem:[#allocation3 + $0x38] sm:$0xff]  ;;  %v3162_v22 = vld [vmem:[#allocation3 + $0x30] sm:$0xff]  ;;  %v4106_v29 = vor.u32 %v4105_v8, %v4101_v0  ;;  %v4407_v7 = vrot.slane %v6250_v46, 1  ;;  %v7416_v11 = vld [vmem:[#allocation3 + $0x48] sm:$0xff]  ;;  %1547 = vst.msk [vmem:[#allocation3 + $0x68] sm:$0xff] %vm1533_vm11, %v6257_v26 }
 0x110   : > { %v7338_v42 = vpop.permute.xlu0 %2229  ;;  %4140 = vrot.lane.b32.xlu0 %v4039_v25, %s6312_s12  ;;  %v6240_v25 = vld [vmem:[#allocation2 + $0xb0] ss:$0 sps:$4 sm:$0x11]   ;;  %5854 = vmatprep.mubr.msk.bf16.mxu1 %vm3180_vm14, %v3162_v22  ;;  %v6261_v9 = vld [vmem:[#allocation2 + $0x84] sm:$0xff]   ;;  %v6263_v16 = vld [vmem:[#allocation2 + $0x3c] sm:$0xff]  }
 0x111   : > { %v4401_v40 = vrot.slane %v6240_v25, 1  ;;  %2268 = vst.msk [vmem:[#allocation3 + $0x50] sm:$0xff] %vm2257_vm13, %v7338_v42  ;;  %5855 = vmatmul.mubr.msk.bf16.gmra.mrb[12].mxu1 %vm3180_vm14, %v3163_v53  ;;  %v4111_v58 = vsel %vm1726_vm8, %v4106_v29, %v4110_v32  ;;  %v6255_v42 = vld [vmem:[#allocation2 + $0x78] sm:$0xff]   ;;  %v6262_v57 = vld [vmem:[#allocation2 + $0x90] sm:$0xff]   ;;  %v6265_v5 = vld [vmem:[#allocation2 + $0xa8] sm:$0xff]  }
 0x112   : > { %v7370_v48 = vpop.permute.xlu1 %4412  ;;  %2429 = vst.msk [vmem:[#allocation3 + $0x48] sm:$0xff] %vm1533_vm11, %v6255_v42  ;;  %v7455_v23 = vld [vmem:[#allocation3 + $0x58] sm:$0xff]  ;;  %3743 = vst.msk [vmem:[#allocation3 + $0x18] sm:$0xff] %vm1533_vm11, %v6263_v16  ;;  %v6266_v18 = vld [vmem:[#allocation2 + $0x48] sm:$0xff]  }
 0x113   : > { %4150 = vrot.lane.b32.xlu1 %v4099_v47, %s6312_s12  ;;  %v4402_v17 = vsel %vm2160_vm7, %v4400_v45, %v4401_v40  ;;  %2431 = vst.msk [vmem:[#allocation3 + $0x58] sm:$0xff] %vm1533_vm11, %v6262_v57  ;;  %1548 = vst.msk [vmem:[#allocation3 + $0x70] sm:$0xff] %vm1533_vm11, %v6265_v5  ;;  %v6267_v8 = vld [vmem:[#allocation2 + $0x9c] sm:$0xff]   ;;  %v6268_v4 = vld [vmem:[#allocation2 + $0xa8] sm:$0xff]  }
 0x114   : > { %v7353_v49 = vpop.permute.xlu0 %2820  ;;  %4428 = vrot.lane.b32.xlu0 %v4390_v31, %s6311_s11  ;;  %v524_v31 = vsel %vm6373_vm2, 0, %v523_v12  ;;  %v1402_v33 = vld [vmem:[#allocation2 + $0xd4] sm:$0x1]  ;;  %3744 = vst.msk [vmem:[#allocation3 + $0x20] sm:$0xff] %vm1533_vm11, %v6266_v18  ;;  %v6270_v46 = vld [vmem:[#allocation2 + $0x60] sm:$0xff]  }
 0x115   : > { %525 = vst [vmem:[#allocation2 + $0xcc] sm:$0x1] %v524_v31  ;;  %v1403_v34 = vsel %vm6373_vm2, 0, %v1402_v33  ;;  %2860 = vst.msk [vmem:[#allocation3 + $0x40] sm:$0xff] %vm1967_vm12, %v7353_v49  ;;  %v6259_v49 = vld [vmem:[%s7754_s5 + $0x10] sm:$0x3f]  }
 0x116   : > { %v7392_v41 = vpop.permute.xlu1 %4414  ;;  %1404 = vst [vmem:[#allocation2 + $0xd4] sm:$0x1] %v1403_v34  ;;  %3148 = vst.msk [vmem:[#allocation3 + $0x40] sm:$0xff] %vm2257_vm13, %v7359_v51  ;;  %v6260_v51 = vld [vmem:[#allocation2 + $0x30] sm:$0xff]   ;;  %6011 = vmatprep.subr.msk.bf16.mxu0 %vm3229_vm15, %v6259_v49  ;;  %v6275_v37 = vld [vmem:[#allocation2 + $0x84] sm:$0xff]  }
 0x117   : > { %4438 = vrot.lane.b32.xlu1 %v4405_v61, %s6311_s11  ;;  %3742 = vst.msk [vmem:[#allocation3 + $0x10] sm:$0xff] %vm1533_vm11, %v6260_v51  ;;  %v6264_v12 = vld [vmem:[#allocation2 + $0xb4] sm:$0xff]   ;;  %3746 = vst.msk [vmem:[#allocation3 + $0x30] sm:$0xff] %vm1533_vm11, %v6270_v46  ;;  %v6272_v34 = vld [vmem:[#allocation2 + $0xc0] sm:$0xff]  }
 0x118   : > { %v7364_v54 = vpop.permute.xlu0 %2822  ;;  %4144 = vrot.lane.b32.xlu0 %v4063_v35, %s6312_s12  ;;  %v6253_v35 = vld [vmem:[#allocation2 + $0x18] sm:$0xff]   ;;  %v7451_v63 = vld [vmem:[#allocation3 + $0x50] sm:$0xff]  ;;  %1549 = vst.msk [vmem:[#allocation3 + $0x78] sm:$0xff] %vm1533_vm11, %v6264_v12 }
 0x119   : > { %3740 = vst.msk [vmem:[#allocation3] sm:$0xff] %vm1533_vm11, %v6253_v35  ;;  %2430 = vst.msk [vmem:[#allocation3 + $0x50] sm:$0xff] %vm1533_vm11, %v6261_v9 }
 0x11a   : > { %4172 = vst.msk [vmem:[#allocation3] sm:$0xff] %vm1967_vm12, %v7340_v55  ;;  %v6256_v55 = vld [vmem:[#allocation2 + $0x24] sm:$0xff]   ;;  %2861 = vst.msk [vmem:[#allocation3 + $0x48] sm:$0xff] %vm1967_vm12, %v7364_v54  ;;  %v4549_v54 = vsel %vm3229_vm15, %v6259_v49, 0 }
 0x11b   : > { %4460 = vst.msk [vmem:[#allocation3] sm:$0xff] %vm2257_vm13, %v7370_v48  ;;  %5909 = vmatpush3.bf16.msra.mxu0 %v4549_v54  ;;  %v6278_v54 = vld [vmem:[#allocation2 + $0xa8] sm:$0xff]  }
 0x11c   : > { %4432 = vrot.lane.b32.xlu0 %v4396_v36, %s6311_s11  ;;  %v7381_v43 = vpop.permute.xlu0 %4126  ;;  %v1398_v14 = vld [vmem:[#allocation2 + $0xcc] sm:$0xf]  ;;  %v4408_v36 = vsel %vm2160_vm7, %v4406_v39, %v4407_v7  ;;  %3741 = vst.msk [vmem:[#allocation3 + $0x8] sm:$0xff] %vm1533_vm11, %v6256_v55  ;;  %v6274_v39 = vld [vmem:[#allocation2 + $0x78] sm:$0xff]  }
 0x11d   : > { %v1399_v56 = vsel %vm6409_vm6, 0, %v1398_v14  ;;  %4173 = vst.msk [vmem:[#allocation3 + $0x8] sm:$0xff] %vm1967_vm12, %v7381_v43  ;;  %v6246_v25 = vld [vmem:[#allocation2 + $0xd4] ss:$0 sps:$4 sm:$0x11]   ;;  %v3164_v43 = vld [vmem:[#allocation3 + $0x40] sm:$0xff] }
 0x11e   : > { %1400 = vst [vmem:[#allocation2 + $0xcc] sm:$0xf] %v1399_v56  ;;  %4461 = vst.msk [vmem:[#allocation3 + $0x8] sm:$0xff] %vm2257_vm13, %v7392_v41  ;;  %5858 = vmatprep.mubr.msk.bf16.mxu1 %vm3180_vm14, %v3164_v43  ;;  %v4120_v47 = vshll.u32 %v6246_v25, 16 }
 0x11f   : > { %v6252_v59 = vld [vmem:[#allocation2 + $0xd4] ss:$0 sps:$4 sm:$0x11]   ;;  %3748 = vst.msk [vmem:[#allocation3 + $0x40] sm:$0xff] %vm1533_vm11, %v6274_v39 }
 0x120   : > { %4148 = vrot.lane.b32.xlu0 %v4087_v21, %s6312_s12  ;;  %v3111_v27 = vpop.permute.xlu0 %3110  ;;  %v4410_v30 = vrot.slane %v6252_v59, 1 }
 0x121   : > { %3149 = vst.msk [vmem:[#allocation3 + $0x48] sm:$0xff] %vm2257_vm13, %v3111_v27 }
 0x122   : > { %v4476_v52 = vld [vmem:[#allocation3] sm:$0xff] }
 0x123   : > { %5910 = vmatprep.mubr.msk.bf16.mxu0 %vm3180_vm14, %v4476_v52 }
 0x124   : > { %4436 = vrot.lane.b32.xlu0 %v4402_v17, %s6311_s11  ;;  %v4122_v17 = vrot.slane %v4120_v47, 1 }
 0x125   : > { %v1946_v15 = vpop.permute.xlu1 %1945  ;;  %v6245_v13 = vld [vmem:[#allocation2 + $0xcc] sm:$0xff]   ;;  %v4477_v41 = vld [vmem:[#allocation3 + $0x8] sm:$0xff] }
 0x126   : > { %1981 = vst.msk [vmem:[#allocation3 + $0x68] sm:$0xff] %vm1967_vm12, %v1946_v15  ;;  %v4113_v50 = vshrl.u32 %v6245_v13, 16  ;;  %v4115_v45 = vshll.u32 %v6245_v13, 16  ;;  %v6251_v40 = vld [vmem:[#allocation2 + $0xcc] sm:$0xfe]   ;;  %5911 = vmatmul.mubr.msk.bf16.vlgmr.msra.gmra.mrb[0].mxu0 %vm3180_vm14, %v4477_v41  ;;  %v6269_v15 = vld [vmem:[#allocation2 + $0x54] sm:$0xff]  }
 0x127   : > { %v4409_v2 = vrot.slane %v6251_v40, 1  ;;  %3745 = vst.msk [vmem:[#allocation3 + $0x28] sm:$0xff] %vm1533_vm11, %v6269_v15  ;;  %v6280_v40 = vld [vmem:[#allocation2 + $0xc0] sm:$0xff]   ;;  %v6281_v12 = vld [vmem:[#allocation2 + $0xcc] sm:$0xff]  }
 0x128   : > { %4152 = vrot.lane.b32.xlu0 %v4111_v58, %s6312_s12  ;;  %v1944_v60 = vpop.permute.xlu0 %1943  ;;  %v3165_v0 = vld [vmem:[#allocation3 + $0x48] sm:$0xff]  ;;  %v4117_v20 = vrot.slane %v4115_v45, 1  ;;  %v6273_v58 = vld [vmem:[#allocation2 + $0x6c] sm:$0xff]  }
 0x129   : > { %v2236_v38 = vpop.permute.xlu1 %2235  ;;  %1980 = vst.msk [vmem:[#allocation3 + $0x60] sm:$0xff] %vm1967_vm12, %v1944_v60  ;;  %5859 = vmatmul.mubr.msk.bf16.gmra.mrb[16].mxu1 %vm3180_vm14, %v3165_v0  ;;  %v4411_v22 = vsel %vm2160_vm7, %v4409_v2, %v4410_v30  ;;  %v6276_v60 = vld [vmem:[#allocation2 + $0x90] sm:$0xff]  }
 0x12a   : > { %2271 = vst.msk [vmem:[#allocation3 + $0x68] sm:$0xff] %vm2257_vm13, %v2236_v38  ;;  %v4118_v62 = vor.u32 %v4117_v20, %v4113_v50  ;;  %v6277_v38 = vld [vmem:[#allocation2 + $0x9c] sm:$0xff]  }
 0x12b   : > { %3747 = vst.msk [vmem:[#allocation3 + $0x38] sm:$0xff] %vm1533_vm11, %v6273_v58  ;;  %3749 = vst.msk [vmem:[#allocation3 + $0x48] sm:$0xff] %vm1533_vm11, %v6275_v37 }
 0x12c   : > { %4440 = vrot.lane.b32.xlu0 %v4408_v36, %s6311_s11  ;;  %v2234_v19 = vpop.permute.xlu0 %2233  ;;  %v4123_v27 = vsel %vm1726_vm8, %v4118_v62, %v4122_v17 }
 0x12d   : > { %v4129_v3 = vpop.permute.xlu1 %4128  ;;  %2270 = vst.msk [vmem:[#allocation3 + $0x60] sm:$0xff] %vm2257_vm13, %v2234_v19  ;;  %4154 = vrot.lane.b32.xlu1 %v4123_v27, %s6312_s12  ;;  %v6271_v19 = vld [vmem:[#allocation2 + $0xb4] sm:$0xff]   ;;  %s465_s12 = scalar_lea.vmem %s7756_s7, %s5269_s26 }
 0x12e   : > { %4174 = vst.msk [vmem:[#allocation3 + $0x10] sm:$0xff] %vm1967_vm12, %v4129_v3 }
 0x130   : > { %v2825_v48 = vpop.permute.xlu0 %2824 }
 0x131   : > { %v3113_v10 = vpop.permute.xlu1 %3112  ;;  %2862 = vst.msk [vmem:[#allocation3 + $0x50] sm:$0xff] %vm1967_vm12, %v2825_v48  ;;  %v7480_v32 = vld [vmem:[#allocation3 + $0x68] sm:$0xff]  ;;  %4442 = vrot.lane.b32.xlu1 %v4411_v22, %s6311_s11 }
 0x132   : > { %3150 = vst.msk [vmem:[#allocation3 + $0x50] sm:$0xff] %vm2257_vm13, %v3113_v10 }
 0x133   : > { %2433 = vst.msk [vmem:[#allocation3 + $0x68] sm:$0xff] %vm1533_vm11, %v6268_v4 }
 0x134   : > { %v7474_v28 = vld [vmem:[#allocation3 + $0x60] sm:$0xff] }
 0x135   : > { %2432 = vst.msk [vmem:[#allocation3 + $0x60] sm:$0xff] %vm1533_vm11, %v6267_v8 }
 0x139   : > { %v3166_v61 = vld [vmem:[#allocation3 + $0x50] sm:$0xff] }
 0x13a   : > { %5862 = vmatprep.mubr.msk.bf16.mxu1 %vm3180_vm14, %v3166_v61  ;;  %3750 = vst.msk [vmem:[#allocation3 + $0x50] sm:$0xff] %vm1533_vm11, %v6276_v60 }
 0x13b   : > { %v2827_v21 = vpop.permute.xlu0 %2826 }
 0x13c   : > { %2863 = vst.msk [vmem:[#allocation3 + $0x58] sm:$0xff] %vm1967_vm12, %v2827_v21  ;;  %v4417_v24 = vpop.permute.xlu1 %4416  ;;  %v6279_v21 = vld [vmem:[#allocation2 + $0xb4] sm:$0xff]  }
 0x13d   : > { %4462 = vst.msk [vmem:[#allocation3 + $0x10] sm:$0xff] %vm2257_vm13, %v4417_v24 }
 0x13f   : > { %v4131_v6 = vpop.permute.xlu0 %4130 }
 0x140   : > { %4175 = vst.msk [vmem:[#allocation3 + $0x18] sm:$0xff] %vm1967_vm12, %v4131_v6  ;;  %v4419_v31 = vpop.permute.xlu1 %4418 }
 0x141   : > { %4463 = vst.msk [vmem:[#allocation3 + $0x18] sm:$0xff] %vm2257_vm13, %v4419_v31 }
 0x143   : > { %v3115_v53 = vpop.permute.xlu0 %3114 }
 0x144   : > { %3151 = vst.msk [vmem:[#allocation3 + $0x58] sm:$0xff] %vm2257_vm13, %v3115_v53  ;;  %v4478_v29 = vld [vmem:[#allocation3 + $0x10] sm:$0xff] }
 0x145   : > { %5914 = vmatprep.mubr.msk.bf16.mxu0 %vm3180_vm14, %v4478_v29 }
 0x148   : > { %v4479_v35 = vld [vmem:[#allocation3 + $0x18] sm:$0xff] }
 0x149   : > { %5915 = vmatmul.mubr.msk.bf16.gmra.mrb[4].mxu0 %vm3180_vm14, %v4479_v35 }
 0x14b   : > { %v3167_v7 = vld [vmem:[#allocation3 + $0x58] sm:$0xff] }
 0x14c   : > { %5863 = vmatmul.mubr.msk.bf16.gmra.mrb[20].mxu1 %vm3180_vm14, %v3167_v7  ;;  %3751 = vst.msk [vmem:[#allocation3 + $0x58] sm:$0xff] %vm1533_vm11, %v6277_v38 }
 0x14d   : > { %v1950_v42 = vpop.permute.xlu1 %1949 }
 0x14e   : > { %1983 = vst.msk [vmem:[#allocation3 + $0x78] sm:$0xff] %vm1967_vm12, %v1950_v42 }
 0x151   : > { %v2240_v33 = vpop.permute.xlu1 %2239 }
 0x152   : > { %2273 = vst.msk [vmem:[#allocation3 + $0x78] sm:$0xff] %vm2257_vm13, %v2240_v33 }
 0x155   : > { %v4133_v56 = vpop.permute.xlu1 %4132 }
 0x156   : > { %4176 = vst.msk [vmem:[#allocation3 + $0x20] sm:$0xff] %vm1967_vm12, %v4133_v56 }
 0x157   : > { %v1948_v14 = vpop.permute.xlu0 %1947 }
 0x158   : > { %1982 = vst.msk [vmem:[#allocation3 + $0x70] sm:$0xff] %vm1967_vm12, %v1948_v14 }
 0x159   : > { %v3117_v26 = vpop.permute.xlu1 %3116  ;;  %v7503_v1 = vld [vmem:[#allocation3 + $0x78] sm:$0xff] }
 0x15a   : > { %2435 = vst.msk [vmem:[#allocation3 + $0x78] sm:$0xff] %vm1533_vm11, %v6272_v34 }
 0x15b   : > { %v2238_v36 = vpop.permute.xlu0 %2237 }
 0x15c   : > { %2272 = vst.msk [vmem:[#allocation3 + $0x70] sm:$0xff] %vm2257_vm13, %v2238_v36 }
 0x15d   : > { %v4421_v51 = vpop.permute.xlu1 %4420 }
 0x15e   : > { %4464 = vst.msk [vmem:[#allocation3 + $0x20] sm:$0xff] %vm2257_vm13, %v4421_v51 }
 0x15f   : > { %v2829_v55 = vpop.permute.xlu0 %2828 }
 0x160   : > { %2864 = vst.msk [vmem:[#allocation3 + $0x60] sm:$0xff] %vm1967_vm12, %v2829_v55 }
 0x161   : > { %3152 = vst.msk [vmem:[#allocation3 + $0x60] sm:$0xff] %vm2257_vm13, %v3117_v26  ;;  %v4423_v48 = vpop.permute.xlu1 %4422 }
 0x163   : > { %v2831_v49 = vpop.permute.xlu0 %2830  ;;  %v7507_v3 = vld [vmem:[#allocation3 + $0x70] sm:$0xff] }
 0x164   : > { %2865 = vst.msk [vmem:[#allocation3 + $0x68] sm:$0xff] %vm1967_vm12, %v2831_v49 }
 0x165   : > { %2434 = vst.msk [vmem:[#allocation3 + $0x70] sm:$0xff] %vm1533_vm11, %v6271_v19  ;;  %v4137_v57 = vpop.permute.xlu1 %4136  ;;  %v4480_v16 = vld [vmem:[#allocation3 + $0x20] sm:$0xff] }
 0x166   : > { %4178 = vst.msk [vmem:[#allocation3 + $0x30] sm:$0xff] %vm1967_vm12, %v4137_v57  ;;  %5918 = vmatprep.mubr.msk.bf16.mxu0 %vm3180_vm14, %v4480_v16 }
 0x167   : > { %v4135_v9 = vpop.permute.xlu0 %4134 }
 0x168   : > { %4177 = vst.msk [vmem:[#allocation3 + $0x28] sm:$0xff] %vm1967_vm12, %v4135_v9  ;;  %v3168_v52 = vld [vmem:[#allocation3 + $0x60] sm:$0xff] }
 0x169   : > { %4465 = vst.msk [vmem:[#allocation3 + $0x28] sm:$0xff] %vm2257_vm13, %v4423_v48  ;;  %5866 = vmatprep.mubr.msk.bf16.mxu1 %vm3180_vm14, %v3168_v52  ;;  %v3121_v25 = vpop.permute.xlu1 %3120 }
 0x16a   : > { %3752 = vst.msk [vmem:[#allocation3 + $0x60] sm:$0xff] %vm1533_vm11, %v6278_v54 }
 0x16b   : > { %v3119_v10 = vpop.permute.xlu0 %3118 }
 0x16c   : > { %3153 = vst.msk [vmem:[#allocation3 + $0x68] sm:$0xff] %vm2257_vm13, %v3119_v10 }
 0x16d   : > { %v4425_v45 = vpop.permute.xlu1 %4424 }
 0x16e   : > { %4466 = vst.msk [vmem:[#allocation3 + $0x30] sm:$0xff] %vm2257_vm13, %v4425_v45 }
 0x16f   : > { %v2833_v13 = vpop.permute.xlu0 %2832 }
 0x170   : > { %2866 = vst.msk [vmem:[#allocation3 + $0x70] sm:$0xff] %vm1967_vm12, %v2833_v13  ;;  %v4481_v43 = vld [vmem:[#allocation3 + $0x28] sm:$0xff] }
 0x171   : > { %3154 = vst.msk [vmem:[#allocation3 + $0x70] sm:$0xff] %vm2257_vm13, %v3121_v25  ;;  %5919 = vmatmul.mubr.msk.bf16.gmra.mrb[8].mxu0 %vm3180_vm14, %v4481_v43  ;;  %v4427_v59 = vpop.permute.xlu1 %4426 }
 0x173   : > { %v3169_v50 = vld [vmem:[#allocation3 + $0x68] sm:$0xff] }
 0x174   : > { %5867 = vmatmul.mubr.msk.bf16.gmra.mrb[24].mxu1 %vm3180_vm14, %v3169_v50  ;;  %3753 = vst.msk [vmem:[#allocation3 + $0x68] sm:$0xff] %vm1533_vm11, %v6279_v21 }
 0x175   : > { %v4482_v47 = vld [vmem:[#allocation3 + $0x30] sm:$0xff]  ;;  %v4143_v20 = vpop.permute.xlu1 %4142 }
 0x176   : > { %5922 = vmatprep.mubr.msk.bf16.mxu0 %vm3180_vm14, %v4482_v47  ;;  %v2835_v0 = vpop.permute.xlu0 %2834  ;;  %4181 = vst.msk [vmem:[#allocation3 + $0x48] sm:$0xff] %vm1967_vm12, %v4143_v20 }
 0x177   : > { %2867 = vst.msk [vmem:[#allocation3 + $0x78] sm:$0xff] %vm1967_vm12, %v2835_v0 }
 0x178   : > { %v3170_v24 = vld [vmem:[#allocation3 + $0x70] sm:$0xff] }
 0x179   : > { %5870 = vmatprep.mubr.msk.bf16.mxu1 %vm3180_vm14, %v3170_v24  ;;  %3754 = vst.msk [vmem:[#allocation3 + $0x70] sm:$0xff] %vm1533_vm11, %v6280_v40  ;;  %v4431_v17 = vpop.permute.xlu1 %4430 }
 0x17a   : > { %v4139_v41 = vpop.permute.xlu0 %4138  ;;  %4469 = vst.msk [vmem:[#allocation3 + $0x48] sm:$0xff] %vm2257_vm13, %v4431_v17 }
 0x17b   : > { %4179 = vst.msk [vmem:[#allocation3 + $0x38] sm:$0xff] %vm1967_vm12, %v4139_v41 }
 0x17c   : > { %4467 = vst.msk [vmem:[#allocation3 + $0x38] sm:$0xff] %vm2257_vm13, %v4427_v59 }
 0x17d   : > { %v4147_v31 = vpop.permute.xlu1 %4146 }
 0x17e   : > { %v3123_v2 = vpop.permute.xlu0 %3122  ;;  %4183 = vst.msk [vmem:[#allocation3 + $0x58] sm:$0xff] %vm1967_vm12, %v4147_v31 }
 0x17f   : > { %3155 = vst.msk [vmem:[#allocation3 + $0x78] sm:$0xff] %vm2257_vm13, %v3123_v2 }
 0x181   : > { %v4435_v27 = vpop.permute.xlu1 %4434  ;;  %v4485_v61 = vld [vmem:[#allocation3 + $0x48] sm:$0xff] }
 0x182   : > { %v4141_v30 = vpop.permute.xlu0 %4140  ;;  %4471 = vst.msk [vmem:[#allocation3 + $0x58] sm:$0xff] %vm2257_vm13, %v4435_v27 }
 0x183   : > { %4180 = vst.msk [vmem:[#allocation3 + $0x40] sm:$0xff] %vm1967_vm12, %v4141_v30  ;;  %v4483_v6 = vld [vmem:[#allocation3 + $0x38] sm:$0xff] }
 0x184   : > { %5923 = vmatmul.mubr.msk.bf16.gmra.mrb[12].mxu0 %vm3180_vm14, %v4483_v6 }
 0x185   : > { %v4151_v22 = vpop.permute.xlu1 %4150 }
 0x186   : > { %v4429_v5 = vpop.permute.xlu0 %4428  ;;  %v3171_v62 = vld [vmem:[#allocation3 + $0x78] sm:$0xff]  ;;  %4185 = vst.msk [vmem:[#allocation3 + $0x68] sm:$0xff] %vm1967_vm12, %v4151_v22 }
 0x187   : > { %4468 = vst.msk [vmem:[#allocation3 + $0x40] sm:$0xff] %vm2257_vm13, %v4429_v5  ;;  %5871 = vmatmul.mubr.msk.bf16.gmra.mrb[28].mxu1 %vm3180_vm14, %v3171_v62 }
 0x188   : > { %3755 = vst.msk [vmem:[#allocation3 + $0x78] sm:$0xff] %vm1533_vm11, %v6281_v12  ;;  %5892 = vmatprep.mubr.msk.bf16.mxu1 %vm3180_vm14, %v7412_v44 }
 0x189   : > { %v4487_v29 = vld [vmem:[#allocation3 + $0x58] sm:$0xff]  ;;  %v4439_v15 = vpop.permute.xlu1 %4438 }
 0x18a   : > { %v4145_v18 = vpop.permute.xlu0 %4144  ;;  %4473 = vst.msk [vmem:[#allocation3 + $0x68] sm:$0xff] %vm2257_vm13, %v4439_v15 }
 0x18b   : > { %4182 = vst.msk [vmem:[#allocation3 + $0x50] sm:$0xff] %vm1967_vm12, %v4145_v18 }
 0x18e   : > { %v4433_v8 = vpop.permute.xlu0 %4432  ;;  %v4484_v53 = vld [vmem:[#allocation3 + $0x40] sm:$0xff] }
 0x18f   : > { %4470 = vst.msk [vmem:[#allocation3 + $0x50] sm:$0xff] %vm2257_vm13, %v4433_v8  ;;  %5893 = vmatmul.mubr.msk.bf16.vlgmr.msra.gmra.mrb[16].mxu1 %vm3180_vm14, %v7416_v11  ;;  %5926 = vmatprep.mubr.msk.bf16.mxu0 %vm3180_vm14, %v4484_v53 }
 0x190   : > { %5896 = vmatprep.mubr.msk.bf16.mxu1 %vm3180_vm14, %v7451_v63  ;;  %5927 = vmatmul.mubr.msk.bf16.gmra.mrb[16].mxu0 %vm3180_vm14, %v4485_v61 }
 0x191   : > { %v4489_v58 = vld [vmem:[#allocation3 + $0x68] sm:$0xff] }
 0x192   : > { %v4149_v44 = vpop.permute.xlu0 %4148 }
 0x193   : > { %4184 = vst.msk [vmem:[#allocation3 + $0x60] sm:$0xff] %vm1967_vm12, %v4149_v44 }
 0x196   : > { %v4437_v4 = vpop.permute.xlu0 %4436  ;;  %v4486_v46 = vld [vmem:[#allocation3 + $0x50] sm:$0xff] }
 0x197   : > { %4472 = vst.msk [vmem:[#allocation3 + $0x60] sm:$0xff] %vm2257_vm13, %v4437_v4  ;;  %5897 = vmatmul.mubr.msk.bf16.gmra.mrb[20].mxu1 %vm3180_vm14, %v7455_v23  ;;  %5930 = vmatprep.mubr.msk.bf16.mxu0 %vm3180_vm14, %v4486_v46 }
 0x198   : > { %5900 = vmatprep.mubr.msk.bf16.mxu1 %vm3180_vm14, %v7474_v28  ;;  %5931 = vmatmul.mubr.msk.bf16.gmra.mrb[20].mxu0 %vm3180_vm14, %v4487_v29 }
 0x19a   : > { %v4153_v11 = vpop.permute.xlu0 %4152 }
 0x19b   : > { %4186 = vst.msk [vmem:[#allocation3 + $0x70] sm:$0xff] %vm1967_vm12, %v4153_v11 }
 0x19e   : > { %v4441_v63 = vpop.permute.xlu0 %4440  ;;  %v4488_v35 = vld [vmem:[#allocation3 + $0x60] sm:$0xff] }
 0x19f   : > { %4474 = vst.msk [vmem:[#allocation3 + $0x70] sm:$0xff] %vm2257_vm13, %v4441_v63  ;;  %5901 = vmatmul.mubr.msk.bf16.gmra.mrb[24].mxu1 %vm3180_vm14, %v7480_v32  ;;  %5934 = vmatprep.mubr.msk.bf16.mxu0 %vm3180_vm14, %v4488_v35  ;;  %v4155_v28 = vpop.permute.xlu1 %4154 }
 0x1a0   : > { %5904 = vmatprep.mubr.msk.bf16.mxu1 %vm3180_vm14, %v7507_v3  ;;  %5935 = vmatmul.mubr.msk.bf16.gmra.mrb[24].mxu0 %vm3180_vm14, %v4489_v58  ;;  %4187 = vst.msk [vmem:[#allocation3 + $0x78] sm:$0xff] %vm1967_vm12, %v4155_v28 }
 0x1a3   : > { %v4443_v39 = vpop.permute.xlu1 %4442 }
 0x1a4   : > { %4475 = vst.msk [vmem:[#allocation3 + $0x78] sm:$0xff] %vm2257_vm13, %v4443_v39 }
 0x1a6   : > { %v4490_v23 = vld [vmem:[#allocation3 + $0x70] sm:$0xff] }
 0x1a7   : > { %5905 = vmatmul.mubr.msk.bf16.gmra.mrb[28].mxu1 %vm3180_vm14, %v7503_v1  ;;  %5938 = vmatprep.mubr.msk.bf16.mxu0 %vm3180_vm14, %v4490_v23 }
 0x1ab   : > { %v4491_v32 = vld [vmem:[#allocation3 + $0x78] sm:$0xff] }
 0x1ac   : > { %5939 = vmatmul.mubr.msk.bf16.gmra.mrb[28].mxu0 %vm3180_vm14, %v4491_v32 }
 0x1c0   : > { %v5844_v7 = vpop.f32.mrb[0].mxu1 }
 0x1c1   : > { %v3267_v37 = vpop.f32.mrb[1].mxu1 }
 0x1c2   : > { %v5845_v60 = vpop.f32.mrb[2].mxu1 }
 0x1c3   : > { %v3270_v42 = vpop.f32.mrb[3].mxu1 }
 0x1c8   : > { %v5848_v38 = vpop.f32.mrb[4].mxu1 }
 0x1c9   : > { %v3283_v14 = vpop.f32.mrb[5].mxu1 }
 0x1ca   : > { %v5849_v33 = vpop.f32.mrb[6].mxu1 }
 0x1cb   : > { %v3286_v36 = vpop.f32.mrb[7].mxu1 }
 0x1d7   : > { %v7575_v56 = vpop.f32.mrb[8].mxu1 }
 0x1d8   : > { %v7577_v34 = vpop.f32.mrb[9].mxu1 }
 0x1d9   : > { %v7579_v55 = vpop.f32.mrb[10].mxu1 }
 0x1da   : > { %v7581_v26 = vpop.f32.mrb[11].mxu1 }
 0x1e4   : > { %v7583_v19 = vpop.f32.mrb[12].mxu1 }
 0x1e5   : > { %v7585_v1 = vpop.f32.mrb[13].mxu1 }
 0x1e6   : > { %v7587_v49 = vpop.f32.mrb[14].mxu1 }
 0x1e7   : > { %v7589_v3 = vpop.f32.mrb[15].mxu1 }
 0x1f9   : > { %v5912_v51 = vpop.f32.mrb[0].mxu0 }
 0x1fa   : > { %v5944_v54 = vadd.f32 %v5912_v51, %v5844_v7  ;;  %v4585_v9 = vpop.f32.mrb[1].mxu0 }
 0x1fb   : > { %v5945_v48 = vadd.f32 %v4585_v9, %v3267_v37  ;;  %v5913_v52 = vpop.f32.mrb[2].mxu0 }
 0x1fc   : > { %v5680_v10 = vpack.c.bf16 %v5944_v54, %v5944_v54  ;;  %v5946_v57 = vadd.f32 %v5913_v52, %v5845_v60  ;;  %v4588_v16 = vpop.f32.mrb[3].mxu0  ;;  %v4977_v21 = vmul.f32 %v5944_v54, %v5944_v54  ;;  %v4907_v0 = vsel %vm1533_vm11, %v5944_v54, 0.0 }
 0x1fd   : > { %v5678_v13 = vpack.c.bf16 %v5945_v48, %v5945_v48  ;;  %v4975_v25 = vmul.f32 %v5945_v48, %v5945_v48  ;;  %v5947_v43 = vadd.f32 %v4588_v16, %v3270_v42  ;;  %v4904_v45 = vsel %vm1533_vm11, %v5945_v48, 0.0 }
 0x1fe   : > { %4874 = vst.msk [vmem:[%s7596_s9 + $0x8] sm:$0xf] %vm1173_vm4, %v5680_v10  ;;  %v5681_v50 = vpack.c.bf16 %v5946_v57, %v5946_v57  ;;  %v4978_v20 = vmul.f32 %v5946_v57, %v5946_v57  ;;  %v5010_v6 = vsel %vm1533_vm11, %v4977_v21, 0.0  ;;  %v4909_v12 = vsel %vm1533_vm11, %v5946_v57, 0.0 }
 0x1ff   : > { %4872 = vst.msk [vmem:[%s7596_s9] sm:$0xf] %vm1173_vm4, %v5678_v13  ;;  %v5679_v40 = vpack.c.bf16 %v5947_v43, %v5947_v43  ;;  %v4905_v24 = vsel %vm1533_vm11, %v5947_v43, 0.0  ;;  %v4976_v47 = vmul.f32 %v5947_v43, %v5947_v43  ;;  %v5007_v41 = vsel %vm1533_vm11, %v4975_v25, 0.0 }
 0x200   : > { %4875 = vst.msk [vmem:[%s7596_s9 + $0xc] sm:$0xf] %vm1173_vm4, %v5681_v50  ;;  %v4906_v59 = vadd.f32 %v4905_v24, %v4904_v45  ;;  %v5012_v18 = vsel %vm1533_vm11, %v4978_v20, 0.0 }
 0x201   : > { %4873 = vst.msk [vmem:[%s7596_s9 + $0x4] sm:$0xf] %vm1173_vm4, %v5679_v40  ;;  %v5008_v2 = vsel %vm1533_vm11, %v4976_v47, 0.0 }
 0x202   : > { %v4908_v17 = vadd.f32 %v4907_v0, %v4906_v59  ;;  %v5009_v30 = vadd.f32 %v5008_v2, %v5007_v41 }
 0x204   : > { %v5011_v5 = vadd.f32 %v5010_v6, %v5009_v30  ;;  %v4910_v31 = vadd.f32 %v4909_v12, %v4908_v17 }
 0x206   : > { %v5013_v53 = vadd.f32 %v5012_v18, %v5011_v5 }
 0x21c   : > { %v5916_v62 = vpop.f32.mrb[4].mxu0 }
 0x21d   : > { %v5948_v27 = vadd.f32 %v5916_v62, %v5848_v38  ;;  %v4601_v61 = vpop.f32.mrb[5].mxu0 }
 0x21e   : > { %v5949_v8 = vadd.f32 %v4601_v61, %v3283_v14  ;;  %v5917_v44 = vpop.f32.mrb[6].mxu0 }
 0x21f   : > { %v5684_v22 = vpack.c.bf16 %v5948_v27, %v5948_v27  ;;  %v5950_v29 = vadd.f32 %v5917_v44, %v5849_v33  ;;  %v4604_v4 = vpop.f32.mrb[7].mxu0  ;;  %v4981_v32 = vmul.f32 %v5948_v27, %v5948_v27  ;;  %v4915_v42 = vsel %vm1533_vm11, %v5948_v27, 0.0 }
 0x220   : > { %v5682_v15 = vpack.c.bf16 %v5949_v8, %v5949_v8  ;;  %v4911_v46 = vsel %vm1533_vm11, %v5949_v8, 0.0  ;;  %v4979_v11 = vmul.f32 %v5949_v8, %v5949_v8  ;;  %v5951_v63 = vadd.f32 %v4604_v4, %v3286_v36 }
 0x221   : > { %4878 = vst.msk [vmem:[%s7596_s9 + $0x18] sm:$0xf] %vm1173_vm4, %v5684_v22  ;;  %v4912_v35 = vadd.f32 %v4911_v46, %v4910_v31  ;;  %v5685_v58 = vpack.c.bf16 %v5950_v29, %v5950_v29  ;;  %v4982_v38 = vmul.f32 %v5950_v29, %v5950_v29  ;;  %v4917_v36 = vsel %vm1533_vm11, %v5950_v29, 0.0 }
 0x222   : > { %4876 = vst.msk [vmem:[%s7596_s9 + $0x10] sm:$0xf] %vm1173_vm4, %v5682_v15  ;;  %v5014_v23 = vsel %vm1533_vm11, %v4979_v11, 0.0  ;;  %v5683_v28 = vpack.c.bf16 %v5951_v63, %v5951_v63  ;;  %v4913_v39 = vsel %vm1533_vm11, %v5951_v63, 0.0  ;;  %v4980_v60 = vmul.f32 %v5951_v63, %v5951_v63 }
 0x223   : > { %v5015_v7 = vadd.f32 %v5014_v23, %v5013_v53  ;;  %4879 = vst.msk [vmem:[%s7596_s9 + $0x1c] sm:$0xf] %vm1173_vm4, %v5685_v58  ;;  %v4914_v37 = vadd.f32 %v4913_v39, %v4912_v35  ;;  %v5018_v54 = vsel %vm1533_vm11, %v4981_v32, 0.0  ;;  %v5020_v52 = vsel %vm1533_vm11, %v4982_v38, 0.0 }
 0x224   : > { %4877 = vst.msk [vmem:[%s7596_s9 + $0x14] sm:$0xf] %vm1173_vm4, %v5683_v28  ;;  %v5016_v33 = vsel %vm1533_vm11, %v4980_v60, 0.0 }
 0x225   : > { %v4916_v14 = vadd.f32 %v4915_v42, %v4914_v37  ;;  %v5017_v51 = vadd.f32 %v5016_v33, %v5015_v7 }
 0x227   : > { %v4918_v9 = vadd.f32 %v4917_v36, %v4916_v14  ;;  %v5019_v48 = vadd.f32 %v5018_v54, %v5017_v51 }
 0x229   : > { %v5021_v10 = vadd.f32 %v5020_v52, %v5019_v48 }
 0x244   : > { %v5920_v57 = vpop.f32.mrb[8].mxu0 }
 0x245   : > { %v5952_v16 = vadd.f32 %v5920_v57, %v7575_v56  ;;  %v4617_v13 = vpop.f32.mrb[9].mxu0 }
 0x246   : > { %v5953_v25 = vadd.f32 %v4617_v13, %v7577_v34  ;;  %v5921_v43 = vpop.f32.mrb[10].mxu0 }
 0x247   : > { %v5688_v21 = vpack.c.bf16 %v5952_v16, %v5952_v16  ;;  %v5954_v50 = vadd.f32 %v5921_v43, %v7579_v55  ;;  %v4620_v45 = vpop.f32.mrb[11].mxu0  ;;  %v4985_v55 = vmul.f32 %v5952_v16, %v5952_v16  ;;  %v4923_v6 = vsel %vm1533_vm11, %v5952_v16, 0.0 }
 0x248   : > { %v5686_v40 = vpack.c.bf16 %v5953_v25, %v5953_v25  ;;  %v4919_v24 = vsel %vm1533_vm11, %v5953_v25, 0.0  ;;  %v4983_v47 = vmul.f32 %v5953_v25, %v5953_v25  ;;  %v5955_v59 = vadd.f32 %v4620_v45, %v7581_v26 }
 0x249   : > { %4882 = vst.msk [vmem:[%s7596_s9 + $0x28] sm:$0xf] %vm1173_vm4, %v5688_v21  ;;  %v4920_v0 = vadd.f32 %v4919_v24, %v4918_v9  ;;  %v5689_v56 = vpack.c.bf16 %v5954_v50, %v5954_v50  ;;  %v4986_v26 = vmul.f32 %v5954_v50, %v5954_v50  ;;  %v4925_v62 = vsel %vm1533_vm11, %v5954_v50, 0.0 }
 0x24a   : > { %4880 = vst.msk [vmem:[%s7596_s9 + $0x20] sm:$0xf] %vm1173_vm4, %v5686_v40  ;;  %v5022_v34 = vsel %vm1533_vm11, %v4983_v47, 0.0  ;;  %v5687_v41 = vpack.c.bf16 %v5955_v59, %v5955_v59  ;;  %v4921_v20 = vsel %vm1533_vm11, %v5955_v59, 0.0  ;;  %v4984_v30 = vmul.f32 %v5955_v59, %v5955_v59 }
 0x24b   : > { %v5023_v2 = vadd.f32 %v5022_v34, %v5021_v10  ;;  %4883 = vst.msk [vmem:[%s7596_s9 + $0x2c] sm:$0xf] %vm1173_vm4, %v5689_v56  ;;  %v4922_v17 = vadd.f32 %v4921_v20, %v4920_v0  ;;  %v5026_v18 = vsel %vm1533_vm11, %v4985_v55, 0.0  ;;  %v5028_v8 = vsel %vm1533_vm11, %v4986_v26, 0.0 }
 0x24c   : > { %4881 = vst.msk [vmem:[%s7596_s9 + $0x24] sm:$0xf] %vm1173_vm4, %v5687_v41  ;;  %v5024_v5 = vsel %vm1533_vm11, %v4984_v30, 0.0 }
 0x24d   : > { %v4924_v12 = vadd.f32 %v4923_v6, %v4922_v17  ;;  %v5025_v31 = vadd.f32 %v5024_v5, %v5023_v2 }
 0x24f   : > { %v4926_v27 = vadd.f32 %v4925_v62, %v4924_v12  ;;  %v5027_v61 = vadd.f32 %v5026_v18, %v5025_v31 }
 0x251   : > { %v5029_v53 = vadd.f32 %v5028_v8, %v5027_v61 }
 0x257   : > { %v5924_v44 = vpop.f32.mrb[12].mxu0 }
 0x258   : > { %v5956_v22 = vadd.f32 %v5924_v44, %v7583_v19  ;;  %v4633_v29 = vpop.f32.mrb[13].mxu0 }
 0x259   : > { %v5957_v4 = vadd.f32 %v4633_v29, %v7585_v1  ;;  %v5925_v15 = vpop.f32.mrb[14].mxu0 }
 0x25a   : > { %v5692_v46 = vpack.c.bf16 %v5956_v22, %v5956_v22  ;;  %v5958_v11 = vadd.f32 %v5925_v15, %v7587_v49  ;;  %v4636_v63 = vpop.f32.mrb[15].mxu0  ;;  %v4989_v49 = vmul.f32 %v5956_v22, %v5956_v22  ;;  %v4931_v38 = vsel %vm1533_vm11, %v5956_v22, 0.0 }
 0x25b   : > { %v5690_v35 = vpack.c.bf16 %v5957_v4, %v5957_v4  ;;  %v4927_v58 = vsel %vm1533_vm11, %v5957_v4, 0.0  ;;  %v4987_v23 = vmul.f32 %v5957_v4, %v5957_v4  ;;  %v5959_v28 = vadd.f32 %v4636_v63, %v7589_v3 }
 0x25c   : > { %4886 = vst.msk [vmem:[%s7596_s9 + $0x38] sm:$0xf] %vm1173_vm4, %v5692_v46  ;;  %v4928_v39 = vadd.f32 %v4927_v58, %v4926_v27  ;;  %v5693_v19 = vpack.c.bf16 %v5958_v11, %v5958_v11  ;;  %v4990_v3 = vmul.f32 %v5958_v11, %v5958_v11  ;;  %v4933_v36 = vsel %vm1533_vm11, %v5958_v11, 0.0 }
 0x25d   : > { %4884 = vst.msk [vmem:[%s7596_s9 + $0x30] sm:$0xf] %vm1173_vm4, %v5690_v35  ;;  %v5030_v1 = vsel %vm1533_vm11, %v4987_v23, 0.0  ;;  %v5691_v32 = vpack.c.bf16 %v5959_v28, %v5959_v28  ;;  %v4929_v7 = vsel %vm1533_vm11, %v5959_v28, 0.0  ;;  %v4988_v42 = vmul.f32 %v5959_v28, %v5959_v28 }
 0x25e   : > { %v5031_v37 = vadd.f32 %v5030_v1, %v5029_v53  ;;  %4887 = vst.msk [vmem:[%s7596_s9 + $0x3c] sm:$0xf] %vm1173_vm4, %v5693_v19  ;;  %v4930_v60 = vadd.f32 %v4929_v7, %v4928_v39  ;;  %v5034_v54 = vsel %vm1533_vm11, %v4989_v49, 0.0  ;;  %v5036_v16 = vsel %vm1533_vm11, %v4990_v3, 0.0 }
 0x25f   : > { %4885 = vst.msk [vmem:[%s7596_s9 + $0x34] sm:$0xf] %vm1173_vm4, %v5691_v32  ;;  %v5032_v33 = vsel %vm1533_vm11, %v4988_v42, 0.0 }
 0x260   : > { %v4932_v14 = vadd.f32 %v4931_v38, %v4930_v60  ;;  %v5033_v51 = vadd.f32 %v5032_v33, %v5031_v37 }
 0x262   : > { %v5894_v9 = vpop.f32.mrb[16].mxu1  ;;  %v4934_v48 = vadd.f32 %v4933_v36, %v4932_v14  ;;  %v5035_v52 = vadd.f32 %v5034_v54, %v5033_v51 }
 0x263   : > { %v3548_v10 = vpop.f32.mrb[17].mxu1  ;;  %v5928_v57 = vpop.f32.mrb[16].mxu0 }
 0x264   : > { %v5960_v13 = vadd.f32 %v5928_v57, %v5894_v9  ;;  %v5895_v25 = vpop.f32.mrb[18].mxu1  ;;  %v4649_v43 = vpop.f32.mrb[17].mxu0  ;;  %v5037_v50 = vadd.f32 %v5036_v16, %v5035_v52 }
 0x265   : > { %v5961_v21 = vadd.f32 %v4649_v43, %v3548_v10  ;;  %v3551_v45 = vpop.f32.mrb[19].mxu1  ;;  %v5929_v40 = vpop.f32.mrb[18].mxu0 }
 0x266   : > { %v5696_v24 = vpack.c.bf16 %v5960_v13, %v5960_v13  ;;  %v5962_v47 = vadd.f32 %v5929_v40, %v5895_v25  ;;  %v4652_v59 = vpop.f32.mrb[19].mxu0  ;;  %v4993_v6 = vmul.f32 %v5960_v13, %v5960_v13  ;;  %v4939_v31 = vsel %vm1533_vm11, %v5960_v13, 0.0 }
 0x267   : > { %v5694_v0 = vpack.c.bf16 %v5961_v21, %v5961_v21  ;;  %v4935_v56 = vsel %vm1533_vm11, %v5961_v21, 0.0  ;;  %v4991_v34 = vmul.f32 %v5961_v21, %v5961_v21  ;;  %v5963_v41 = vadd.f32 %v4652_v59, %v3551_v45 }
 0x268   : > { %4890 = vst.msk [vmem:[%s7596_s9 + $0x48] sm:$0xf] %vm1173_vm4, %v5696_v24  ;;  %v4936_v20 = vadd.f32 %v4935_v56, %v4934_v48  ;;  %v5697_v55 = vpack.c.bf16 %v5962_v47, %v5962_v47  ;;  %v4994_v61 = vmul.f32 %v5962_v47, %v5962_v47  ;;  %v4941_v4 = vsel %vm1533_vm11, %v5962_v47, 0.0 }
 0x269   : > { %4888 = vst.msk [vmem:[%s7596_s9 + $0x40] sm:$0xf] %vm1173_vm4, %v5694_v0  ;;  %v5038_v2 = vsel %vm1533_vm11, %v4991_v34, 0.0  ;;  %v5695_v17 = vpack.c.bf16 %v5963_v41, %v5963_v41  ;;  %v4937_v30 = vsel %vm1533_vm11, %v5963_v41, 0.0  ;;  %v4992_v5 = vmul.f32 %v5963_v41, %v5963_v41 }
 0x26a   : > { %v5039_v26 = vadd.f32 %v5038_v2, %v5037_v50  ;;  %4891 = vst.msk [vmem:[%s7596_s9 + $0x4c] sm:$0xf] %vm1173_vm4, %v5697_v55  ;;  %v4938_v12 = vadd.f32 %v4937_v30, %v4936_v20  ;;  %v5898_v62 = vpop.f32.mrb[20].mxu1  ;;  %v5042_v35 = vsel %vm1533_vm11, %v4993_v6, 0.0  ;;  %v5044_v7 = vsel %vm1533_vm11, %v4994_v61, 0.0 }
 0x26b   : > { %4889 = vst.msk [vmem:[%s7596_s9 + $0x44] sm:$0xf] %vm1173_vm4, %v5695_v17  ;;  %v3564_v18 = vpop.f32.mrb[21].mxu1  ;;  %v5932_v27 = vpop.f32.mrb[20].mxu0  ;;  %v5040_v53 = vsel %vm1533_vm11, %v4992_v5, 0.0 }
 0x26c   : > { %v4940_v8 = vadd.f32 %v4939_v31, %v4938_v12  ;;  %v5964_v44 = vadd.f32 %v5932_v27, %v5898_v62  ;;  %v5899_v22 = vpop.f32.mrb[22].mxu1  ;;  %v4665_v29 = vpop.f32.mrb[21].mxu0  ;;  %v5041_v15 = vadd.f32 %v5040_v53, %v5039_v26 }
 0x26d   : > { %v5965_v46 = vadd.f32 %v4665_v29, %v3564_v18  ;;  %v3567_v11 = vpop.f32.mrb[23].mxu1  ;;  %v5933_v63 = vpop.f32.mrb[22].mxu0 }
 0x26e   : > { %v5700_v58 = vpack.c.bf16 %v5964_v44, %v5964_v44  ;;  %v4942_v23 = vadd.f32 %v4941_v4, %v4940_v8  ;;  %v4668_v28 = vpop.f32.mrb[23].mxu0  ;;  %v5043_v39 = vadd.f32 %v5042_v35, %v5041_v15  ;;  %v5966_v37 = vadd.f32 %v5933_v63, %v5899_v22 }
 0x26f   : > { %v5698_v19 = vpack.c.bf16 %v5965_v46, %v5965_v46  ;;  %v4943_v1 = vsel %vm1533_vm11, %v5965_v46, 0.0  ;;  %v4995_v32 = vmul.f32 %v5965_v46, %v5965_v46  ;;  %v5967_v60 = vadd.f32 %v4668_v28, %v3567_v11 }
 0x270   : > { %4894 = vst.msk [vmem:[%s7596_s9 + $0x58] sm:$0xf] %vm1173_vm4, %v5700_v58  ;;  %v4944_v49 = vadd.f32 %v4943_v1, %v4942_v23  ;;  %v5045_v42 = vadd.f32 %v5044_v7, %v5043_v39  ;;  %v4997_v3 = vmul.f32 %v5964_v44, %v5964_v44  ;;  %v5701_v14 = vpack.c.bf16 %v5966_v37, %v5966_v37 }
 0x271   : > { %4892 = vst.msk [vmem:[%s7596_s9 + $0x50] sm:$0xf] %vm1173_vm4, %v5698_v19  ;;  %v5046_v38 = vsel %vm1533_vm11, %v4995_v32, 0.0  ;;  %v5699_v33 = vpack.c.bf16 %v5967_v60, %v5967_v60  ;;  %v4945_v54 = vsel %vm1533_vm11, %v5967_v60, 0.0  ;;  %v4996_v9 = vmul.f32 %v5967_v60, %v5967_v60 }
 0x272   : > { %v5902_v36 = vpop.f32.mrb[24].mxu1  ;;  %v5047_v51 = vadd.f32 %v5046_v38, %v5045_v42  ;;  %4895 = vst.msk [vmem:[%s7596_s9 + $0x5c] sm:$0xf] %vm1173_vm4, %v5701_v14  ;;  %v4946_v10 = vadd.f32 %v4945_v54, %v4944_v49  ;;  %v4947_v25 = vsel %vm1533_vm11, %v5964_v44, 0.0  ;;  %v4998_v43 = vmul.f32 %v5966_v37, %v5966_v37 }
 0x273   : > { %v3580_v48 = vpop.f32.mrb[25].mxu1  ;;  %v5936_v52 = vpop.f32.mrb[24].mxu0  ;;  %4893 = vst.msk [vmem:[%s7596_s9 + $0x54] sm:$0xf] %vm1173_vm4, %v5699_v33  ;;  %v5048_v21 = vsel %vm1533_vm11, %v4996_v9, 0.0  ;;  %v5050_v24 = vsel %vm1533_vm11, %v4997_v3, 0.0 }
 0x274   : > { %v5968_v57 = vadd.f32 %v5936_v52, %v5902_v36  ;;  %v5903_v16 = vpop.f32.mrb[26].mxu1  ;;  %v4681_v13 = vpop.f32.mrb[25].mxu0  ;;  %v4948_v47 = vadd.f32 %v4947_v25, %v4946_v10  ;;  %v5049_v59 = vadd.f32 %v5048_v21, %v5047_v51  ;;  %v4949_v34 = vsel %vm1533_vm11, %v5966_v37, 0.0 }
 0x275   : > { %v5969_v50 = vadd.f32 %v4681_v13, %v3580_v48  ;;  %v3583_v45 = vpop.f32.mrb[27].mxu1  ;;  %v5937_v40 = vpop.f32.mrb[26].mxu0  ;;  %v5052_v26 = vsel %vm1533_vm11, %v4998_v43, 0.0 }
 0x276   : > { %v5704_v0 = vpack.c.bf16 %v5968_v57, %v5968_v57  ;;  %v4684_v56 = vpop.f32.mrb[27].mxu0  ;;  %v5051_v2 = vadd.f32 %v5050_v24, %v5049_v59  ;;  %v4950_v17 = vadd.f32 %v4949_v34, %v4948_v47  ;;  %v5970_v30 = vadd.f32 %v5937_v40, %v5903_v16 }
 0x277   : > { %v5702_v41 = vpack.c.bf16 %v5969_v50, %v5969_v50  ;;  %v4951_v20 = vsel %vm1533_vm11, %v5969_v50, 0.0  ;;  %v4999_v55 = vmul.f32 %v5969_v50, %v5969_v50  ;;  %v5971_v6 = vadd.f32 %v4684_v56, %v3583_v45 }
 0x278   : > { %4898 = vst.msk [vmem:[%s7596_s9 + $0x68] sm:$0xf] %vm1173_vm4, %v5704_v0  ;;  %v4952_v5 = vadd.f32 %v4951_v20, %v4950_v17  ;;  %v5053_v62 = vadd.f32 %v5052_v26, %v5051_v2  ;;  %v5705_v31 = vpack.c.bf16 %v5970_v30, %v5970_v30  ;;  %v5001_v27 = vmul.f32 %v5968_v57, %v5968_v57 }
 0x279   : > { %4896 = vst.msk [vmem:[%s7596_s9 + $0x60] sm:$0xf] %vm1173_vm4, %v5702_v41  ;;  %v5054_v12 = vsel %vm1533_vm11, %v4999_v55, 0.0  ;;  %v5703_v61 = vpack.c.bf16 %v5971_v6, %v5971_v6  ;;  %v4953_v8 = vsel %vm1533_vm11, %v5971_v6, 0.0  ;;  %v5000_v53 = vmul.f32 %v5971_v6, %v5971_v6 }
 0x27a   : > { %v5906_v18 = vpop.f32.mrb[28].mxu1  ;;  %v5055_v22 = vadd.f32 %v5054_v12, %v5053_v62  ;;  %4899 = vst.msk [vmem:[%s7596_s9 + $0x6c] sm:$0xf] %vm1173_vm4, %v5705_v31  ;;  %v4954_v29 = vadd.f32 %v4953_v8, %v4952_v5  ;;  %v4955_v15 = vsel %vm1533_vm11, %v5968_v57, 0.0  ;;  %v5002_v46 = vmul.f32 %v5970_v30, %v5970_v30 }
 0x27b   : > { %v3596_v44 = vpop.f32.mrb[29].mxu1  ;;  %4897 = vst.msk [vmem:[%s7596_s9 + $0x64] sm:$0xf] %vm1173_vm4, %v5703_v61  ;;  %v5056_v11 = vsel %vm1533_vm11, %v5000_v53, 0.0  ;;  %v5058_v23 = vsel %vm1533_vm11, %v5001_v27, 0.0  ;;  %v4957_v28 = vsel %vm1533_vm11, %v5970_v30, 0.0 }
 0x27c   : > { %v5907_v4 = vpop.f32.mrb[30].mxu1  ;;  %v4956_v35 = vadd.f32 %v4955_v15, %v4954_v29  ;;  %v5057_v58 = vadd.f32 %v5056_v11, %v5055_v22  ;;  %v5060_v1 = vsel %vm1533_vm11, %v5002_v46, 0.0 }
 0x27d   : > { %v3599_v63 = vpop.f32.mrb[31].mxu1 }
 0x27e   : > { %v5059_v39 = vadd.f32 %v5058_v23, %v5057_v58  ;;  %v4958_v19 = vadd.f32 %v4957_v28, %v4956_v35 }
 0x27f   : > { %v5940_v7 = vpop.f32.mrb[28].mxu0 }
 0x280   : > { %v5061_v32 = vadd.f32 %v5060_v1, %v5059_v39  ;;  %v5972_v49 = vadd.f32 %v5940_v7, %v5906_v18  ;;  %v4697_v37 = vpop.f32.mrb[29].mxu0 }
 0x281   : > { %v5973_v60 = vadd.f32 %v4697_v37, %v3596_v44  ;;  %v5941_v42 = vpop.f32.mrb[30].mxu0 }
 0x282   : > { %v5708_v38 = vpack.c.bf16 %v5972_v49, %v5972_v49  ;;  %v5974_v3 = vadd.f32 %v5941_v42, %v5907_v4  ;;  %v4700_v14 = vpop.f32.mrb[31].mxu0  ;;  %v5005_v16 = vmul.f32 %v5972_v49, %v5972_v49  ;;  %v4963_v21 = vsel %vm1533_vm11, %v5972_v49, 0.0 }
 0x283   : > { %v5706_v33 = vpack.c.bf16 %v5973_v60, %v5973_v60  ;;  %v4959_v36 = vsel %vm1533_vm11, %v5973_v60, 0.0  ;;  %v5003_v51 = vmul.f32 %v5973_v60, %v5973_v60  ;;  %v5975_v54 = vadd.f32 %v4700_v14, %v3599_v63 }
 0x284   : > { %4902 = vst.msk [vmem:[%s7596_s9 + $0x78] sm:$0xf] %vm1173_vm4, %v5708_v38  ;;  %v4960_v9 = vadd.f32 %v4959_v36, %v4958_v19  ;;  %v5709_v48 = vpack.c.bf16 %v5974_v3, %v5974_v3  ;;  %v5006_v50 = vmul.f32 %v5974_v3, %v5974_v3  ;;  %v4965_v24 = vsel %vm1533_vm11, %v5974_v3, 0.0 }
 0x285   : > { %4900 = vst.msk [vmem:[%s7596_s9 + $0x70] sm:$0xf] %vm1173_vm4, %v5706_v33  ;;  %v5062_v52 = vsel %vm1533_vm11, %v5003_v51, 0.0  ;;  %v5707_v10 = vpack.c.bf16 %v5975_v54, %v5975_v54  ;;  %v4961_v57 = vsel %vm1533_vm11, %v5975_v54, 0.0  ;;  %v5004_v43 = vmul.f32 %v5975_v54, %v5975_v54 }
 0x286   : > { %v5063_v13 = vadd.f32 %v5062_v52, %v5061_v32  ;;  %4903 = vst.msk [vmem:[%s7596_s9 + $0x7c] sm:$0xf] %vm1173_vm4, %v5709_v48  ;;  %v4962_v25 = vadd.f32 %v4961_v57, %v4960_v9  ;;  %v5066_v59 = vsel %vm1533_vm11, %v5005_v16, 0.0  ;;  %v5068_v34 = vsel %vm1533_vm11, %v5006_v50, 0.0 }
 0x287   : > { %4901 = vst.msk [vmem:[%s7596_s9 + $0x74] sm:$0xf] %vm1173_vm4, %v5707_v10  ;;  %v5064_v40 = vsel %vm1533_vm11, %v5004_v43, 0.0 }
 0x288   : > { %v4964_v45 = vadd.f32 %v4963_v21, %v4962_v25  ;;  %v5065_v47 = vadd.f32 %v5064_v40, %v5063_v13 }
 0x28a   : > { %v4966_v0 = vadd.f32 %v4965_v24, %v4964_v45  ;;  %v5067_v56 = vadd.f32 %v5066_v59, %v5065_v47 }
 0x28c   : > { %v4967_v41 = vrot.slane %v4966_v0, 4  ;;  %v5069_v20 = vadd.f32 %v5068_v34, %v5067_v56 }
 0x28e   : > { %v4968_v55 = vadd.f32 %v4967_v41, %v4966_v0  ;;  %v5070_v2 = vrot.slane %v5069_v20, 4 }
 0x290   : > { %v4969_v17 = vrot.slane %v4968_v55, 2  ;;  %v5071_v30 = vadd.f32 %v5070_v2, %v5069_v20 }
 0x292   : > { %v4970_v6 = vadd.f32 %v4969_v17, %v4968_v55  ;;  %v5072_v26 = vrot.slane %v5071_v30, 2 }
 0x294   : > { %v4971_v12 = vrot.slane %v4970_v6, 1  ;;  %v5073_v5 = vadd.f32 %v5072_v26, %v5071_v30 }
 0x296   : > { %v4972_v62 = vadd.f32 %v4971_v12, %v4970_v6  ;;  %v5074_v31 = vrot.slane %v5073_v5, 1 }
 0x298   : > { %4974 = vst.msk [vmem:[%s465_s12] sm:$0x1] %vm469_vm0, %v4972_v62  ;;  %v5075_v18 = vadd.f32 %v5074_v31, %v5073_v5 }
 0x29a   : > { %5076 = vst.msk [vmem:[%s465_s12 + $0x1] sm:$0x1] %vm469_vm0, %v5075_v18 }
 0x29b PF: > { %s18_s2 = sadd.s32 1, %s6308_s2   ;;  %s7771_s24 = smov %s6304_s1 }
 0x29c   : > { %p15_p5 = scmp.ge.s32.totalorder %s18_s2, 4   ;;  %s7772_s1 = smov %s7774_s25 }
 0x29e   :  { %17 = sbr.rel (!%p15_p5) target bundleno = 2 (0x2), region = 114 }

// kernel: up_block_forward.5
= control target key start
LH: loop header
LB: loop body
LE: loop exit
PB: predicated region body
PF: predicated region fallthrough
CT: control target
= control target key end

     0   :  { %s6878_s27 = smov 0   ;;  %s6880_s2 = smov 0   ;;  %s8696_s0 = inlined_call_operand.vmem [shape: bf16[2,16,16,4], index: 0, kind: input, shape index: {}, may-alias: {0,2,4}]   ;;  %s8697_s1 = inlined_call_operand.vmem [shape: bf16[2,16,16,4], index: 1, kind: input, shape index: {}, may-alias: {1,3,5}]   ;;  %s8698_s2 = inlined_call_operand.vmem [shape: bf16[2,16,16,4], index: 2, kind: input, shape index: {}, may-alias: {0,2,4}]   ;;  %s8699_s3 = inlined_call_operand.vmem [shape: bf16[2,16,16,4], index: 3, kind: input, shape index: {}, may-alias: {1,3,5}]   ;;  %s8700_s4 = inlined_call_operand.vmem [shape: bf16[2,16,16,4], index: 4, kind: input, shape index: {}, may-alias: {0,2,4}]   ;;  %s8701_s5 = inlined_call_operand.vmem [shape: bf16[2,16,16,4], index: 5, kind: input, shape index: {}, may-alias: {1,3,5}]   ;;  %s8702_s6 = inlined_call_operand.vmem [shape: bf16[3,24,4], index: 6, kind: input, shape index: {}]   ;;  %s8703_s7 = inlined_call_operand.vmem [shape: bf16[2,16,16,4], index: 7, kind: output, shape index: {0}]   ;;  %s8704_s8 = inlined_call_operand.vmem [shape: f32[2,1,2,4], index: 8, kind: output, shape index: {1}]  }
   0x1   :  { %s6882_s3 = smov 0  }
   0x2 LB: > { %s31_s4 = sadd.s32 1, %s6823_s2  ;;  %p5906_p0 = scmp.ge.s32.totalorder %s6827_s3, 1  ;;  %s6827_s3 = sphi %s6882_s3, %s19_s3   ;;  %s6823_s2 = sphi %s6880_s2, %s8730_s2   ;;  %s6819_s27 = sphi %s6878_s27, %s8729_s27  }
   0x3   : > { %p33_p1 = scmp.ge.s32.totalorder %s31_s4, 2  ;;  %p435_p2 = scmp.lt.s32.totalorder %s6827_s3, 3 }
   0x5   : > { %s8732_s4 = smov (%p33_p1, %s31_s4), 0  ;;  %p436_p3 = pnand %p5906_p0, %p435_p2 }
   0x6   : > { %p549_p4 = scmp.lt.s32.totalorder (!%p436_p3), %s6819_s27, 1  ;;  %vm658_vm0 = vsmask.f32 (!%p436_p3), 256  ;;  %vm657_vm1 = vcmask (!%p436_p3), 57344   ;;  %v660_v0 = vld [vmem:[#allocation2] sm:$0x1] (!%p436_p3) }
   0x7   : > { %439 = sbr.rel (%p436_p3) target bundleno = 749 (0x2ed), region = 48  ;;  %v711_v1 = vld [vmem:[#allocation2 + $0xcc] sm:$0x1] (!%p436_p3)  ;;  %vm6899_vm2 = vmand (!%p436_p3), %vm657_vm1, %vm658_vm0  ;;  %vm714_vm3 = vsmask.f32 (!%p436_p3), 7938  ;;  %vm1879_vm5 = vcmask (!%p436_p3), 60416  }
   0x8   : > { %v716_v3 = vld [vmem:[#allocation2 + $0x8] sm:$0x1] (!%p436_p3)  ;;  %v661_v4 = vsel (!%p436_p3), %vm6899_vm2, 0, %v660_v0  ;;  %v712_v5 = vsel (!%p436_p3), %vm6899_vm2, 0, %v711_v1  ;;  %vm6908_vm4 = vmand (!%p436_p3), %vm657_vm1, %vm714_vm3  ;;  %v6829_v8 = vmov (!%p436_p3), 0   ;;  %s6830_s9 = smov (!%p436_p3), 4  }
   0x9   : > { %662 = vst [vmem:[#allocation2] sm:$0x1] (!%p436_p3), %v661_v4  ;;  %713 = vst [vmem:[#allocation2 + $0xcc] sm:$0x1] (!%p436_p3), %v712_v5  ;;  %v717_v7 = vsel (!%p436_p3), %vm6908_vm4, 0, %v716_v3  ;;  %vm1132_vm9 = vcmask (!%p436_p3), 24576  }
   0xa   : > { %1885 = vst.msk [vmem:[#allocation2 + $0x4] sm:$0xf] (!%p436_p3), %vm1879_vm5, %v6829_v8  ;;  %1968 = vst.msk [vmem:[#allocation2 + $0xd0] sm:$0xf] (!%p436_p3), %vm1879_vm5, %v6829_v8  ;;  %vm802_vm6 = vsmask.f32 (!%p436_p3), 4368 }
   0xb   : > { %718 = vst [vmem:[#allocation2 + $0x8] sm:$0x1] (!%p436_p3), %v717_v7  ;;  %vm6936_vm7 = vmor (!%p436_p3), %vm658_vm0, %vm802_vm6  ;;  %vm1125_vm10 = vcmask (!%p436_p3), 27648   ;;  %vm2293_vm13 = vsmask.f32 (!%p436_p3), 7424  ;;  %vm2727_vm14 = vcmask (!%p436_p3), 1046528  }
   0xc   : > { %vm7082_vm8 = vmand (!%p436_p3), %vm1879_vm5, %vm714_vm3  ;;  %s6831_s13 = smov (!%p436_p3), 8   ;;  %vm2100_vm15 = vcmask (!%p436_p3), 64512   ;;  %s6832_s14 = smov (!%p436_p3), 16   ;;  %vm1690_vm1 = vcmask (!%p436_p3), 60448   ;;  %vm1697_vm5 = vcmask (!%p436_p3), 57376  }
   0xd   : > { %vm7192_vm11 = vmand (!%p436_p3), %vm1132_vm9, %vm658_vm0 }
   0xe   : > { %s8734_s27 = smov (!%p549_p4, %s6819_s27), 1  ;;  %vm7213_vm12 = vmand %vm1125_vm10, %vm714_vm3 }
   0xf   : > { %s6913_s5 = sshll.u32 %s8734_s27, 7  ;;  %vm7658_vm6 = vmand %vm1690_vm1, %vm714_vm3  ;;  %vm2824_vm3 = vcmask 195712  }
  0x10   : > { %s6923_s30 = scalar_lea.vmem %s8697_s1, %s6913_s5  ;;  %s7090_s12 = scalar_lea.vmem %s8696_s0, %s6913_s5 }
  0x11   : > { %v1243_v9 = vld [vmem:[%s6923_s30 + $0x4] sm:$0xf]  ;;  %v1242_v10 = vld [vmem:[%s6923_s30] sm:$0xf]  ;;  %v1244_v11 = vld [vmem:[%s6923_s30 + $0x8] sm:$0xf] }
  0x12   : > { %v1283_v12 = vshrl.u32 %v1243_v9, 16  ;;  %v1275_v13 = vshrl.u32 %v1242_v10, 16  ;;  %v1278_v14 = vshll.u32 %v1242_v10, 16  ;;  %v1245_v15 = vld [vmem:[%s6923_s30 + $0xc] sm:$0xf]  ;;  %v1292_v16 = vshrl.u32 %v1244_v11, 16 }
  0x13   : > { %v1300_v17 = vshrl.u32 %v1245_v15, 16  ;;  %v1246_v18 = vld [vmem:[%s6923_s30 + $0x10] sm:$0xf]  ;;  %v1295_v21 = vshll.u32 %v1244_v11, 16  ;;  %v1247_v23 = vld [vmem:[%s6923_s30 + $0x14] sm:$0xf] }
  0x14   : > { %v1285_v19 = vrot.slane %v1283_v12, 7  ;;  %v1277_v20 = vrot.slane %v1275_v13, 7  ;;  %v1309_v22 = vshrl.u32 %v1246_v18, 16  ;;  %v1286_v24 = vshll.u32 %v1243_v9, 16  ;;  %v1248_v39 = vld [vmem:[%s6923_s30 + $0x18] sm:$0xf] }
  0x15   : > { %v1294_v25 = vrot.slane %v1292_v16, 7  ;;  %v1302_v26 = vrot.slane %v1300_v17, 7  ;;  %v1317_v27 = vshrl.u32 %v1247_v23, 16  ;;  %v1312_v30 = vshll.u32 %v1246_v18, 16  ;;  %v1249_v40 = vld [vmem:[%s6923_s30 + $0x1c] sm:$0xf] }
  0x16   : > { %v1290_v28 = vrot.slane %v1285_v19, 4  ;;  %v1280_v29 = vor.u32 %v1278_v14, %v1277_v20  ;;  %v1303_v31 = vshll.u32 %v1245_v15, 16  ;;  %v1311_v34 = vrot.slane %v1309_v22, 7  ;;  %v1250_v42 = vld [vmem:[%s6923_s30 + $0x20] sm:$0xf] }
  0x17   : > { %v1297_v32 = vor.u32 %v1295_v21, %v1294_v25  ;;  %v1307_v33 = vrot.slane %v1302_v26, 4  ;;  %v1320_v35 = vshll.u32 %v1247_v23, 16  ;;  %v1288_v36 = vor.u32 %v1286_v24, %v1285_v19  ;;  %v1251_v52 = vld [vmem:[%s6923_s30 + $0x24] sm:$0xf]  ;;  %v1253_v53 = vld [vmem:[%s6923_s30 + $0x2c] sm:$0xf] }
  0x18   : > { %1550 = vrot.lane.b32.xlu1 %v1290_v28, %s6830_s9  ;;  %1546 = vrot.lane.b32.xlu0 %v1280_v29, %s6830_s9  ;;  %v1281_v37 = vrot.slane %v1277_v20, 4  ;;  %v1319_v38 = vrot.slane %v1317_v27, 7  ;;  %v1298_v43 = vrot.slane %v1294_v25, 4  ;;  %v1305_v44 = vor.u32 %v1303_v31, %v1302_v26  ;;  %v1252_v56 = vld [vmem:[%s6923_s30 + $0x28] sm:$0xf] }
  0x19   : > { %v1314_v45 = vor.u32 %v1312_v30, %v1311_v34  ;;  %v1326_v46 = vshrl.u32 %v1248_v39, 16  ;;  %v1334_v47 = vshrl.u32 %v1249_v40, 16  ;;  %v1315_v49 = vrot.slane %v1311_v34, 4  ;;  %v1254_v0 = vld [vmem:[%s6923_s30 + $0x30] sm:$0xf] }
  0x1a   : > { %v1289_v48 = vsel %vm6936_vm7, %v1281_v37, %v1288_v36  ;;  %v1322_v50 = vor.u32 %v1320_v35, %v1319_v38  ;;  %v1343_v51 = vshrl.u32 %v1250_v42, 16  ;;  %v1306_v54 = vsel %vm6936_vm7, %v1298_v43, %v1305_v44  ;;  %v1255_v4 = vld [vmem:[%s6923_s30 + $0x34] sm:$0xf]  ;;  %v6959_v5 = vld [vmem:[%s6923_s30 + $0x38] sm:$0xf] }
  0x1b   : > { %v1329_v55 = vshll.u32 %v1248_v39, 16  ;;  %v1328_v57 = vrot.slane %v1326_v46, 7  ;;  %v6952_v58 = vrot.slane %v1334_v47, 7  ;;  %v1337_v59 = vshll.u32 %v1249_v40, 16  ;;  %v1257_v11 = vld [vmem:[%s6923_s30 + $0x3c] sm:$0xf] }
  0x1c   : > { %1552 = vrot.lane.b32.xlu1 %v1297_v32, %s6830_s9  ;;  %1556 = vrot.lane.b32.xlu0 %v1307_v33, %s6830_s9  ;;  %v1351_v60 = vshrl.u32 %v1251_v52, 16  ;;  %v1323_v61 = vsel %vm6936_vm7, %v1315_v49, %v1322_v50  ;;  %v1345_v62 = vrot.slane %v1343_v51, 7  ;;  %v1346_v63 = vshll.u32 %v1250_v42, 16  ;;  %v6968_v16 = vld [vmem:[%s6923_s30 + $0x48] sm:$0xf] }
  0x1d   : > { %v1368_v1 = vshrl.u32 %v1253_v53, 16  ;;  %v1360_v3 = vshrl.u32 %v1252_v56, 16  ;;  %v1324_v7 = vrot.slane %v1319_v38, 4  ;;  %v1332_v8 = vrot.slane %v1328_v57, 4  ;;  %v1261_v17 = vld [vmem:[%s6923_s30 + $0x4c] sm:$0xf] }
  0x1e   : > { %v1354_v9 = vshll.u32 %v1251_v52, 16  ;;  %v1363_v10 = vshll.u32 %v1252_v56, 16  ;;  %v1331_v12 = vor.u32 %v1329_v55, %v1328_v57  ;;  %v1339_v13 = vor.u32 %v1337_v59, %v6952_v58  ;;  %v6975_v26 = vld [vmem:[%s6923_s30 + $0x44] sm:$0xf]  ;;  %v1258_v35 = vld [vmem:[%s6923_s30 + $0x40] sm:$0xf] }
  0x1f   : > { %v6965_v14 = vrot.slane %v1351_v60, 7  ;;  %v1377_v15 = vshrl.u32 %v1254_v0, 16  ;;  %v1348_v18 = vor.u32 %v1346_v63, %v1345_v62  ;;  %v6971_v19 = vrot.slane %v1368_v1, 7  ;;  %v6990_v40 = vld [vmem:[%s6923_s30 + $0x54] sm:$0xf] }
  0x20   : > { %1558 = vrot.lane.b32.xlu1 %v1314_v45, %s6830_s9  ;;  %1548 = vrot.lane.b32.xlu0 %v1289_v48, %s6830_s9  ;;  %v1371_v20 = vshll.u32 %v1253_v53, 16  ;;  %v1385_v21 = vshrl.u32 %v1255_v4, 16  ;;  %v1349_v22 = vrot.slane %v1345_v62, 4  ;;  %v1362_v23 = vrot.slane %v1360_v3, 7  ;;  %v7000_v50 = vld [vmem:[%s6923_s30 + $0x58] sm:$0xf] }
  0x21   : > { %v1394_v24 = vshrl.u32 %v6959_v5, 16  ;;  %v1402_v25 = vshrl.u32 %v1257_v11, 16  ;;  %v1341_v27 = vrot.slane %v6952_v58, 4  ;;  %v1380_v28 = vshll.u32 %v1254_v0, 16  ;;  %v7017_v59 = vld [vmem:[%s6923_s30 + $0x5c] sm:$0xf] }
  0x22   : > { %v1428_v29 = vshrl.u32 %v6968_v16, 16  ;;  %v1436_v30 = vshrl.u32 %v1261_v17, 16  ;;  %v1340_v31 = vsel %vm6936_vm7, %v1332_v8, %v1339_v13  ;;  %v1356_v32 = vor.u32 %v1354_v9, %v6965_v14  ;;  %v7023_v0 = vld [vmem:[%s6923_s30 + $0x64] sm:$0xf] }
  0x23   : > { %v1379_v33 = vrot.slane %v1377_v15, 7  ;;  %v1366_v34 = vrot.slane %v1362_v23, 4  ;;  %v1373_v36 = vor.u32 %v1371_v20, %v6971_v19  ;;  %v6986_v37 = vrot.slane %v1385_v21, 7 }
  0x24   : > { %1560 = vrot.lane.b32.xlu1 %v1323_v61, %s6830_s9  ;;  %1554 = vrot.lane.b32.xlu0 %v1306_v54, %s6830_s9  ;;  %v1388_v38 = vshll.u32 %v1255_v4, 16  ;;  %v1419_v39 = vshrl.u32 %v6975_v26, 16  ;;  %v1358_v42 = vrot.slane %v6965_v14, 4  ;;  %v1396_v43 = vrot.slane %v1394_v24, 7 }
  0x25   : > { %v6993_v44 = vrot.slane %v1402_v25, 7  ;;  %v1405_v45 = vshll.u32 %v1257_v11, 16  ;;  %v1365_v46 = vor.u32 %v1363_v10, %v1362_v23  ;;  %v6995_v47 = vrot.slane %v1428_v29, 7  ;;  %v7058_v23 = vld [vmem:[%s6923_s30 + $0x6c] sm:$0xf] }
  0x26   : > { %v6997_v48 = vrot.slane %v1436_v30, 7  ;;  %v1439_v49 = vshll.u32 %v1261_v17, 16  ;;  %v1357_v51 = vsel %vm6936_vm7, %v1349_v22, %v1356_v32  ;;  %v7006_v52 = vor.u32 %v1380_v28, %v1379_v33  ;;  %v7046_v17 = vld [vmem:[%s6923_s30 + $0x50] sm:$0xf]  ;;  %v7069_v28 = vld [vmem:[%s6923_s30 + $0x74] sm:$0xf] }
  0x27   : > { %v1383_v53 = vrot.slane %v1379_v33, 4  ;;  %v1411_v54 = vshrl.u32 %v1258_v35, 16  ;;  %v7010_v55 = vsel %vm6936_vm7, %v1366_v34, %v1373_v36  ;;  %v1390_v56 = vor.u32 %v1388_v38, %v6986_v37  ;;  %v1881_v29 = vld [vmem:[#allocation2] sm:$0xf]  ;;  %v719_v36 = vld [vmem:[#allocation2 + $0x14] sm:$0x1] }
  0x28   : > { %1564 = vrot.lane.b32.xlu1 %v1331_v12, %s6830_s9  ;;  %1562 = vrot.lane.b32.xlu0 %v1324_v7, %s6830_s9  ;;  %v1375_v57 = vrot.slane %v6971_v19, 4  ;;  %v7014_v58 = vrot.slane %v1419_v39, 7  ;;  %v1400_v60 = vrot.slane %v1396_v43, 4  ;;  %v1407_v61 = vor.u32 %v1405_v45, %v6993_v44  ;;  %v7036_v12 = vld [vmem:[%s6923_s30 + $0x68] sm:$0xf] }
  0x29   : > { %v1453_v62 = vshrl.u32 %v6990_v40, 16  ;;  %v1462_v63 = vshrl.u32 %v7000_v50, 16  ;;  %v1392_v1 = vrot.slane %v6986_v37, 4  ;;  %v1434_v3 = vrot.slane %v6995_v47, 4  ;;  %v1964_v45 = vld [vmem:[#allocation2 + $0xcc] sm:$0xf] }
  0x2a   : > { %v1441_v4 = vor.u32 %v1439_v49, %v6997_v48  ;;  %v1397_v7 = vshll.u32 %v6959_v5, 16  ;;  %v1409_v8 = vrot.slane %v6993_v44, 4  ;;  %v7032_v9 = vrot.slane %v1411_v54, 7  ;;  %v776_v44 = vld [vmem:[%s7090_s12 + $0x18] sm:$0xf] }
  0x2b   : > { %v1414_v10 = vshll.u32 %v1258_v35, 16  ;;  %v1470_v11 = vshrl.u32 %v7017_v59, 16  ;;  %v7040_v13 = vsel %vm6936_vm7, %v1383_v53, %v1390_v56  ;;  %v1426_v5 = vrot.slane %v7014_v58, 4  ;;  %v1886_v35 = vld [vmem:[#allocation2 + $0x8] sm:$0x1] }
  0x2c   : > { %1570 = vrot.lane.b32.xlu1 %v1348_v18, %s6830_s9  ;;  %1566 = vrot.lane.b32.xlu0 %v1340_v31, %s6830_s9  ;;  %v1422_v14 = vshll.u32 %v6975_v26, 16  ;;  %v1487_v15 = vshrl.u32 %v7023_v0, 16  ;;  %v7050_v18 = vsel %vm6936_vm7, %v1400_v60, %v1407_v61  ;;  %v1443_v20 = vrot.slane %v6997_v48, 4  ;;  %v7104_v56 = vld [vmem:[%s6923_s30 + $0x78] sm:$0xf] }
  0x2d   : > { %v7053_v21 = vrot.slane %v1453_v62, 7  ;;  %v7055_v22 = vrot.slane %v1462_v63, 7  ;;  %v7062_v24 = vsel %vm6936_vm7, %v1434_v3, %v1441_v4  ;;  %v7064_v25 = vor.u32 %v1397_v7, %v1396_v43  ;;  %v7110_v61 = vld [vmem:[%s6923_s30 + $0x7c] sm:$0xf]  ;;  %v7117_v3 = vld [vmem:[%s7090_s12 + $0x4] sm:$0xf] }
  0x2e   : > { %v1473_v26 = vshll.u32 %v7017_v59, 16  ;;  %v7074_v30 = vor.u32 %v1414_v10, %v7032_v9  ;;  %v1417_v31 = vrot.slane %v7032_v9, 4  ;;  %v7077_v32 = vrot.slane %v1470_v11, 7  ;;  %v7128_v11 = vld [vmem:[%s6923_s30 + $0x60] sm:$0xf] }
  0x2f   : > { %v1445_v33 = vshrl.u32 %v7046_v17, 16  ;;  %v7093_v38 = vor.u32 %v1422_v14, %v7014_v58  ;;  %v1431_v39 = vshll.u32 %v6968_v16, 16  ;;  %v1504_v43 = vshrl.u32 %v7058_v23, 16  ;;  %v770_v14 = vld [vmem:[%s7090_s12] sm:$0xf] }
  0x30   : > { %1572 = vrot.lane.b32.xlu1 %v1357_v51, %s6830_s9  ;;  %1568 = vrot.lane.b32.xlu0 %v1341_v27, %s6830_s9  ;;  %v1496_v27 = vshrl.u32 %v7036_v12, 16  ;;  %v1460_v49 = vrot.slane %v7053_v21, 4  ;;  %v1468_v51 = vrot.slane %v7055_v22, 4  ;;  %v1448_v53 = vshll.u32 %v7046_v17, 16 }
  0x31   : > { %v1456_v54 = vshll.u32 %v6990_v40, 16  ;;  %v1521_v60 = vshrl.u32 %v7069_v28, 16  ;;  %v1882_v62 = vsel %vm7082_vm8, 0, %v1881_v29  ;;  %v1887_v63 = vsel %vm6899_vm2, 0, %v1886_v35 }
  0x32   : > { %v7106_v59 = vrot.slane %v1496_v27, 7  ;;  %v1475_v40 = vor.u32 %v1473_v26, %v7077_v32  ;;  %v1447_v7 = vrot.slane %v1445_v33, 7  ;;  %1883 = vst [vmem:[#allocation2] sm:$0xf] %v1882_v62  ;;  %1888 = vst [vmem:[#allocation2 + $0x8] sm:$0x1] %v1887_v63 }
  0x33   : > { %v1965_v10 = vsel %vm7082_vm8, 0, %v1964_v45  ;;  %v720_v26 = vsel %vm6908_vm4, 0, %v719_v36  ;;  %v666_v27 = vld [vmem:[#allocation2 + $0x18] sm:$0x1]  ;;  %v1530_v33 = vshrl.u32 %v7104_v56, 16  ;;  %v813_v34 = vshrl.u32 %v7117_v3, 16  ;;  %vm7663_vm8 = vmand %vm1697_vm5, %vm658_vm0 }
  0x34   : > { %1576 = vrot.lane.b32.xlu1 %v1365_v46, %s6830_s9  ;;  %1574 = vrot.lane.b32.xlu0 %v1358_v42, %s6830_s9  ;;  %v7096_v42 = vrot.slane %v1487_v15, 7  ;;  %v663_v46 = vld [vmem:[#allocation2 + $0xc] sm:$0x1]  ;;  %1966 = vst [vmem:[#allocation2 + $0xcc] sm:$0xf] %v1965_v10  ;;  %v1451_v29 = vrot.slane %v1447_v7, 4 }
  0x35   : > { %721 = vst [vmem:[#allocation2 + $0x14] sm:$0x1] %v720_v26  ;;  %v664_v35 = vsel %vm6899_vm2, 0, %v663_v46  ;;  %v772_v45 = vld [vmem:[%s7090_s12 + $0x8] sm:$0xf]  ;;  %v7144_v62 = vrot.slane %v1521_v60, 7 }
  0x36   : > { %665 = vst [vmem:[#allocation2 + $0xc] sm:$0x1] %v664_v35  ;;  %v805_v36 = vshrl.u32 %v770_v14, 16  ;;  %v722_v63 = vld [vmem:[#allocation2 + $0x20] sm:$0x1]  ;;  %v1538_v10 = vshrl.u32 %v7110_v61, 16 }
  0x37   : > { %v7153_v26 = vrot.slane %v813_v34, 7  ;;  %v808_v15 = vshll.u32 %v770_v14, 16  ;;  %v667_v35 = vsel %vm6899_vm2, 0, %v666_v27  ;;  %v822_v4 = vshrl.u32 %v772_v45, 16 }
  0x38   : > { %1582 = vrot.lane.b32.xlu1 %v7006_v52, %s6830_s9  ;;  %1578 = vrot.lane.b32.xlu0 %v7010_v55, %s6830_s9  ;;  %v7132_v52 = vrot.slane %v1504_v43, 7  ;;  %v1507_v55 = vshll.u32 %v7058_v23, 16  ;;  %v1458_v23 = vor.u32 %v1456_v54, %v7053_v21  ;;  %v1479_v54 = vshrl.u32 %v7128_v11, 16  ;;  %668 = vst [vmem:[#allocation2 + $0x18] sm:$0x1] %v667_v35 }
  0x39   : > { %v7156_v60 = vrot.slane %v805_v36, 7  ;;  %v7163_v43 = vrot.slane %v1530_v33, 7  ;;  %v1465_v19 = vshll.u32 %v7000_v50, 16  ;;  %v723_v34 = vsel %vm6908_vm4, 0, %v722_v63  ;;  %v7186_v50 = vld [vmem:[#allocation2] sm:$0xff]  }
  0x3a   : > { %v1425_v14 = vsel %vm6936_vm7, %v1417_v31, %v7093_v38  ;;  %v7176_v27 = vor.u32 %v1431_v39, %v6995_v47  ;;  %v820_v33 = vrot.slane %v7153_v26, 4  ;;  %v7179_v36 = vrot.slane %v822_v4, 7  ;;  %724 = vst [vmem:[#allocation2 + $0x20] sm:$0x1] %v723_v34  ;;  %v669_v31 = vld [vmem:[#allocation2 + $0x24] sm:$0x1] }
  0x3b   : > { %v1482_v9 = vshll.u32 %v7128_v11, 16  ;;  %v1490_v16 = vshll.u32 %v7023_v0, 16  ;;  %v810_v37 = vor.u32 %v808_v15, %v7156_v60  ;;  %v7206_v0 = vor.u32 %v1448_v53, %v1447_v7  ;;  %v6560_v4 = vld [vmem:[#allocation2 + $0x8] ss:$0 sps:$4 sm:$0x11]  }
  0x3c   : > { %1584 = vrot.lane.b32.xlu1 %v7040_v13, %s6830_s9  ;;  %1580 = vrot.lane.b32.xlu0 %v1375_v57, %s6830_s9  ;;  %v7161_v13 = vld [vmem:[%s7090_s12 + $0xc] sm:$0xf]  ;;  %v825_v57 = vshll.u32 %v772_v45, 16  ;;  %v7209_v38 = vor.u32 %v1507_v55, %v7132_v52  ;;  %v7217_v11 = vrot.slane %v1479_v54, 7  ;;  %v1541_v53 = vshll.u32 %v7110_v61, 16 }
  0x3d   : > { %v7227_v15 = vld [vmem:[%s6923_s30 + $0x70] sm:$0xf]  ;;  %v7231_v63 = vrot.slane %v1538_v10, 7  ;;  %v2297_v35 = vshll.u32 %v7186_v50, 16  ;;  %v7243_v34 = vld [vmem:[#allocation2] sm:$0xfe]   ;;  %v7246_v10 = vor.u32 %v1490_v16, %v7096_v42  ;;  %s8507_s30 = scalar_lea.vmem %s8703_s7, %s6913_s5 }
  0x3e   : > { %v827_v7 = vor.u32 %v825_v57, %v7179_v36  ;;  %v774_v55 = vld [vmem:[%s7090_s12 + $0x10] sm:$0xf]  ;;  %v7241_v57 = vor.u32 %v1465_v19, %v7055_v22  ;;  %v670_v22 = vsel %vm6899_vm2, 0, %v669_v31  ;;  %v1485_v19 = vrot.slane %v7217_v11, 4  ;;  %s5921_s5 = sshll.u32 %s8734_s27, 1 }
  0x3f   : > { %v1499_v16 = vshll.u32 %v7036_v12, 16  ;;  %671 = vst [vmem:[#allocation2 + $0x24] sm:$0x1] %v670_v22  ;;  %v842_v31 = vshll.u32 %v774_v55, 16  ;;  %v816_v22 = vshll.u32 %v7117_v3, 16  ;;  %vm2534_vm0 = vcmask 130112   ;;  %s655_s11 = scalar_lea.vmem %s8704_s8, %s5921_s5 }
  0x40   : > { %1586 = vrot.lane.b32.xlu0 %v1392_v1, %s6830_s9  ;;  %1588 = vrot.lane.b32.xlu1 %v7064_v25, %s6830_s9  ;;  %v830_v1 = vshrl.u32 %v7161_v13, 16  ;;  %v7202_v25 = vsel %vm6936_vm7, %v1468_v51, %v1475_v40  ;;  %v7221_v51 = vsel %vm6936_vm7, %v1451_v29, %v1458_v23  ;;  %v1134_v40 = vld [vmem:[#allocation2 + $0x14] sm:$0x1]  ;;  %v1127_v29 = vld [vmem:[#allocation2 + $0xc] sm:$0xf] }
  0x41   : > { %v1135_v54 = vsel %vm7192_vm11, %v820_v33, %v1134_v40  ;;  %v1128_v33 = vsel %vm7213_vm12, %v810_v37, %v1127_v29  ;;  %v2302_v40 = vshll.u32 %v6560_v4, 16  ;;  %v1141_v45 = vld [vmem:[#allocation2 + $0x20] sm:$0x1]  ;;  %v839_v37 = vshrl.u32 %v774_v55, 16  ;;  %v675_v3 = vld [vmem:[#allocation2 + $0x3c] sm:$0x1] }
  0x42   : > { %v832_v23 = vrot.slane %v830_v1, 7  ;;  %1136 = vst [vmem:[#allocation2 + $0x14] sm:$0x1] %v1135_v54  ;;  %v775_v1 = vld [vmem:[%s7090_s12 + $0x14] sm:$0xf]  ;;  %v1513_v29 = vshrl.u32 %v7227_v15, 16 }
  0x43   : > { %1129 = vst [vmem:[#allocation2 + $0xc] sm:$0xf] %v1128_v33  ;;  %v841_v33 = vrot.slane %v839_v37, 7  ;;  %v850_v4 = vshll.u32 %v775_v1, 16  ;;  %v833_v37 = vshll.u32 %v7161_v13, 16 }
  0x44   : > { %1590 = vrot.lane.b32.xlu0 %v7050_v18, %s6830_s9  ;;  %1594 = vrot.lane.b32.xlu1 %v7074_v30, %s6830_s9  ;;  %v7252_v18 = vor.u32 %v1482_v9, %v7217_v11  ;;  %v1137_v30 = vld [vmem:[#allocation2 + $0x18] sm:$0xf]  ;;  %v837_v17 = vrot.slane %v832_v23, 4  ;;  %v778_v55 = vld [vmem:[%s7090_s12 + $0x20] sm:$0xf] }
  0x45   : > { %v1138_v54 = vsel %vm7213_vm12, %v827_v7, %v1137_v30  ;;  %v7268_v7 = vrot.slane %v2297_v35, 1  ;;  %v811_v30 = vrot.slane %v7156_v60, 4  ;;  %v828_v35 = vrot.slane %v7179_v36, 4  ;;  %v725_v60 = vld [vmem:[#allocation2 + $0x2c] sm:$0x1] }
  0x46   : > { %1139 = vst [vmem:[#allocation2 + $0x18] sm:$0xf] %v1138_v54  ;;  %v1142_v9 = vsel %vm7192_vm11, %v837_v17, %v1141_v45  ;;  %v672_v54 = vld [vmem:[#allocation2 + $0x30] sm:$0x1]  ;;  %v7272_v17 = vrot.slane %v2302_v40, 1  ;;  %v847_v45 = vshrl.u32 %v775_v1, 16  ;;  %v835_v13 = vor.u32 %v833_v37, %v832_v23 }
  0x47   : > { %1143 = vst [vmem:[#allocation2 + $0x20] sm:$0x1] %v1142_v9  ;;  %v7279_v9 = vrot.slane %v1513_v29, 7  ;;  %v845_v40 = vrot.slane %v841_v33, 4  ;;  %v673_v1 = vsel %vm6899_vm2, 0, %v672_v54  ;;  %v856_v36 = vshrl.u32 %v776_v44, 16 }
  0x48   : > { %1592 = vrot.lane.b32.xlu0 %v1409_v8, %s6830_s9  ;;  %1596 = vrot.lane.b32.xlu1 %v1425_v14, %s6830_s9  ;;  %v844_v8 = vor.u32 %v842_v31, %v841_v33  ;;  %v818_v14 = vor.u32 %v816_v22, %v7153_v26  ;;  %v7281_v46 = vrot.slane %v847_v45, 7  ;;  %674 = vst [vmem:[#allocation2 + $0x30] sm:$0x1] %v673_v1  ;;  %v859_v29 = vshll.u32 %v776_v44, 16  ;;  %v777_v31 = vld [vmem:[%s7090_s12 + $0x1c] sm:$0xf] }
  0x49   : > { %v779_v33 = vld [vmem:[%s7090_s12 + $0x24] sm:$0xf]  ;;  %v1516_v22 = vshll.u32 %v7227_v15, 16  ;;  %v1519_v58 = vrot.slane %v7279_v9, 4  ;;  %v858_v45 = vrot.slane %v856_v36, 7  ;;  %v726_v44 = vsel %vm6908_vm4, 0, %v725_v60 }
  0x4a   : > { %v819_v26 = vsel %vm6936_vm7, %v811_v30, %v818_v14  ;;  %v1144_v54 = vld [vmem:[#allocation2 + $0x24] sm:$0xf]  ;;  %v836_v30 = vsel %vm6936_vm7, %v828_v35, %v835_v13  ;;  %v728_v14 = vld [vmem:[#allocation2 + $0x38] sm:$0x1]  ;;  %v678_v37 = vld [vmem:[#allocation2 + $0x48] sm:$0x1] }
  0x4b   : > { %1131 = vst.msk [vmem:[#allocation2 + $0x10] sm:$0xf] %vm1125_vm10, %v819_v26  ;;  %v1145_v23 = vsel %vm7213_vm12, %v844_v8, %v1144_v54  ;;  %v854_v26 = vrot.slane %v7281_v46, 4  ;;  %1140 = vst.msk [vmem:[#allocation2 + $0x1c] sm:$0xf] %vm1125_vm10, %v836_v30  ;;  %v873_v8 = vshrl.u32 %v778_v55, 16  ;;  %v861_v60 = vor.u32 %v859_v29, %v858_v45 }
  0x4c   : > { %1598 = vrot.lane.b32.xlu0 %v1426_v5, %s6830_s9  ;;  %1600 = vrot.lane.b32.xlu1 %v7176_v27, %s6830_s9  ;;  %v1524_v5 = vshll.u32 %v7069_v28, 16  ;;  %v852_v27 = vor.u32 %v850_v4, %v7281_v46  ;;  %1146 = vst [vmem:[#allocation2 + $0x24] sm:$0xf] %v1145_v23  ;;  %727 = vst [vmem:[#allocation2 + $0x2c] sm:$0x1] %v726_v44  ;;  %v676_v4 = vsel %vm6899_vm2, 0, %v675_v3 }
  0x4d   : > { %v780_v35 = vld [vmem:[%s7090_s12 + $0x28] sm:$0xf]  ;;  %677 = vst [vmem:[#allocation2 + $0x3c] sm:$0x1] %v676_v4  ;;  %v876_v46 = vshll.u32 %v778_v55, 16  ;;  %v864_v13 = vshrl.u32 %v777_v31, 16 }
  0x4e   : > { %v853_v1 = vsel %vm6936_vm7, %v845_v40, %v852_v27  ;;  %v862_v40 = vrot.slane %v858_v45, 4  ;;  %v731_v36 = vld [vmem:[#allocation2 + $0x44] sm:$0x1]  ;;  %v875_v54 = vrot.slane %v873_v8, 7  ;;  %v867_v27 = vshll.u32 %v777_v31, 16 }
  0x4f   : > { %1147 = vst.msk [vmem:[#allocation2 + $0x28] sm:$0xf] %vm1125_vm10, %v853_v1  ;;  %v881_v3 = vshrl.u32 %v779_v33, 16  ;;  %v884_v23 = vshll.u32 %v779_v33, 16  ;;  %v681_v30 = vld [vmem:[#allocation2 + $0x54] sm:$0x1] }
  0x50   : > { %1602 = vrot.lane.b32.xlu0 %v7062_v24, %s6830_s9  ;;  %1606 = vrot.lane.b32.xlu1 %v7206_v0, %s6830_s9  ;;  %v7318_v44 = vrot.slane %v864_v13, 7  ;;  %v729_v24 = vsel %vm6908_vm4, 0, %v728_v14  ;;  %v679_v0 = vsel %vm6899_vm2, 0, %v678_v37  ;;  %v890_v29 = vshrl.u32 %v780_v35, 16  ;;  %v782_v55 = vld [vmem:[%s7090_s12 + $0x30] sm:$0xf] }
  0x51   : > { %v1151_v45 = vld [vmem:[#allocation2 + $0x30] sm:$0xf]  ;;  %v878_v1 = vor.u32 %v876_v46, %v875_v54  ;;  %v879_v4 = vrot.slane %v875_v54, 4  ;;  %v7325_v8 = vrot.slane %v881_v3, 7  ;;  %730 = vst [vmem:[#allocation2 + $0x38] sm:$0x1] %v729_v24 }
  0x52   : > { %680 = vst [vmem:[#allocation2 + $0x48] sm:$0x1] %v679_v0  ;;  %v893_v31 = vshll.u32 %v780_v35, 16  ;;  %v1152_v33 = vsel %vm7213_vm12, %v861_v60, %v1151_v45  ;;  %v869_v14 = vor.u32 %v867_v27, %v7318_v44  ;;  %v871_v37 = vrot.slane %v7318_v44, 4  ;;  %v781_v13 = vld [vmem:[%s7090_s12 + $0x2c] sm:$0xf] }
  0x53   : > { %v7336_v46 = vrot.slane %v890_v29, 7  ;;  %v783_v54 = vld [vmem:[%s7090_s12 + $0x34] sm:$0xf]  ;;  %1153 = vst [vmem:[#allocation2 + $0x30] sm:$0xf] %v1152_v33  ;;  %v886_v35 = vor.u32 %v884_v23, %v7325_v8  ;;  %v888_v48 = vrot.slane %v7325_v8, 4 }
  0x54   : > { %1604 = vrot.lane.b32.xlu0 %v1443_v20, %s6830_s9  ;;  %1608 = vrot.lane.b32.xlu1 %v7221_v51, %s6830_s9  ;;  %v732_v20 = vsel %vm6908_vm4, 0, %v731_v36  ;;  %v682_v51 = vsel %vm6899_vm2, 0, %v681_v30  ;;  %v734_v60 = vld [vmem:[#allocation2 + $0x50] sm:$0x1]  ;;  %v1148_v3 = vld [vmem:[#allocation2 + $0x2c] sm:$0x1]  ;;  %v870_v27 = vsel %vm6936_vm7, %v862_v40, %v869_v14 }
  0x55   : > { %v895_v44 = vor.u32 %v893_v31, %v7336_v46  ;;  %733 = vst [vmem:[#allocation2 + $0x44] sm:$0x1] %v732_v20  ;;  %683 = vst [vmem:[#allocation2 + $0x54] sm:$0x1] %v682_v51  ;;  %v907_v24 = vshrl.u32 %v782_v55, 16  ;;  %v910_v0 = vshll.u32 %v782_v55, 16  ;;  %v1149_v29 = vsel %vm7192_vm11, %v854_v26, %v1148_v3 }
  0x56   : > { %v737_v23 = vld [vmem:[#allocation2 + $0x5c] sm:$0x1]  ;;  %1154 = vst.msk [vmem:[#allocation2 + $0x34] sm:$0xf] %vm1125_vm10, %v870_v27  ;;  %v887_v30 = vsel %vm6936_vm7, %v879_v4, %v886_v35  ;;  %v896_v45 = vrot.slane %v7336_v46, 4  ;;  %v898_v40 = vshrl.u32 %v781_v13, 16 }
  0x57   : > { %v1158_v36 = vld [vmem:[#allocation2 + $0x3c] sm:$0xf]  ;;  %1150 = vst [vmem:[#allocation2 + $0x2c] sm:$0x1] %v1149_v29  ;;  %1161 = vst.msk [vmem:[#allocation2 + $0x40] sm:$0xf] %vm1125_vm10, %v887_v30  ;;  %v1493_v30 = vsel %vm6936_vm7, %v1485_v19, %v7246_v10 }
  0x58   : > { %1610 = vrot.lane.b32.xlu0 %v1460_v49, %s6830_s9  ;;  %1612 = vrot.lane.b32.xlu1 %v7241_v57, %s6830_s9  ;;  %v1159_v26 = vsel %vm7213_vm12, %v878_v1, %v1158_v36  ;;  %v909_v55 = vrot.slane %v907_v24, 7  ;;  %v901_v31 = vshll.u32 %v781_v13, 16  ;;  %v915_v4 = vshrl.u32 %v783_v54, 16  ;;  %v7364_v33 = vld [vmem:[%s7090_s12 + $0x38] sm:$0xf] }
  0x59   : > { %1160 = vst [vmem:[#allocation2 + $0x3c] sm:$0xf] %v1159_v26  ;;  %v7366_v14 = vrot.slane %v898_v40, 7  ;;  %v918_v46 = vshll.u32 %v783_v54, 16  ;;  %v735_v21 = vsel %vm6908_vm4, 0, %v734_v60  ;;  %v738_v49 = vsel %vm6908_vm4, 0, %v737_v23 }
  0x5a   : > { %v785_v57 = vld [vmem:[%s7090_s12 + $0x3c] sm:$0xf]  ;;  %v8717_v1 = vrot.slane %v7106_v59, 4  ;;  %v1155_v35 = vld [vmem:[#allocation2 + $0x38] sm:$0x1]  ;;  %v912_v51 = vor.u32 %v910_v0, %v909_v55  ;;  %v913_v3 = vrot.slane %v909_v55, 4  ;;  %v7383_v60 = vor.u32 %v1541_v53, %v7231_v63 }
  0x5b   : > { %v1165_v20 = vld [vmem:[#allocation2 + $0x48] sm:$0xf]  ;;  %v917_v54 = vrot.slane %v915_v4, 7  ;;  %736 = vst [vmem:[#allocation2 + $0x50] sm:$0x1] %v735_v21  ;;  %v1156_v27 = vsel %vm7192_vm11, %v871_v37, %v1155_v35  ;;  %v903_v24 = vor.u32 %v901_v31, %v7366_v14  ;;  %v905_v61 = vrot.slane %v7366_v14, 4 }
  0x5c   : > { %v7378_v13 = vsel %vm6936_vm7, %v8717_v1, %v7209_v38  ;;  %739 = vst [vmem:[#allocation2 + $0x5c] sm:$0x1] %v738_v49  ;;  %v1166_v38 = vsel %vm7213_vm12, %v895_v44, %v1165_v20  ;;  %v740_v23 = vld [vmem:[#allocation2 + $0x68] sm:$0x1]  ;;  %v743_v0 = vld [vmem:[#allocation2 + $0x74] sm:$0x1]  ;;  %1614 = vrot.lane.b32.xlu0 %v7202_v25, %s6830_s9  ;;  %1618 = vrot.lane.b32.xlu1 %v7252_v18, %s6830_s9 }
  0x5d   : > { %v7391_v29 = vld [vmem:[%s7090_s12 + $0x44] sm:$0xf]  ;;  %1157 = vst [vmem:[#allocation2 + $0x38] sm:$0x1] %v1156_v27  ;;  %1167 = vst [vmem:[#allocation2 + $0x48] sm:$0xf] %v1166_v38  ;;  %v920_v53 = vor.u32 %v918_v46, %v917_v54  ;;  %v904_v18 = vsel %vm6936_vm7, %v896_v45, %v903_v24  ;;  %v1501_v21 = vor.u32 %v1499_v16, %v7106_v59 }
  0x5e   : > { %v922_v37 = vrot.slane %v917_v54, 4  ;;  %v924_v44 = vshrl.u32 %v7364_v33, 16  ;;  %v7400_v36 = vld [vmem:[%s7090_s12 + $0x48] sm:$0xf]  ;;  %v1162_v25 = vld [vmem:[#allocation2 + $0x44] sm:$0x1]  ;;  %v1518_v49 = vor.u32 %v1516_v22, %v7279_v9 }
  0x5f   : > { %v1172_v40 = vld [vmem:[#allocation2 + $0x54] sm:$0xf]  ;;  %v932_v26 = vshrl.u32 %v785_v57, 16  ;;  %v935_v55 = vshll.u32 %v785_v57, 16  ;;  %v1163_v31 = vsel %vm7192_vm11, %v888_v48, %v1162_v25  ;;  %1168 = vst.msk [vmem:[#allocation2 + $0x4c] sm:$0xf] %vm1125_vm10, %v904_v18  ;;  %v921_v11 = vsel %vm6936_vm7, %v913_v3, %v920_v53 }
  0x60   : > { %v1173_v4 = vsel %vm7213_vm12, %v912_v51, %v1172_v40  ;;  %v926_v10 = vrot.slane %v924_v44, 7  ;;  %1164 = vst [vmem:[#allocation2 + $0x44] sm:$0x1] %v1163_v31  ;;  %1175 = vst.msk [vmem:[#allocation2 + $0x58] sm:$0xf] %vm1125_vm10, %v921_v11  ;;  %v741_v8 = vsel %vm6908_vm4, 0, %v740_v23  ;;  %1620 = vrot.lane.b32.xlu1 %v1493_v30, %s6830_s9 }
  0x61   : > { %1174 = vst [vmem:[#allocation2 + $0x54] sm:$0xf] %v1173_v4  ;;  %v7419_v19 = vrot.slane %v932_v26, 7  ;;  %v744_v48 = vsel %vm6908_vm4, 0, %v743_v0  ;;  %v949_v45 = vshrl.u32 %v7391_v29, 16  ;;  %v8718_v46 = vrot.slane %v7077_v32, 4 }
  0x62   : > { %v789_v14 = vld [vmem:[%s7090_s12 + $0x4c] sm:$0xf]  ;;  %v930_v57 = vrot.slane %v926_v10, 4  ;;  %742 = vst [vmem:[#allocation2 + $0x68] sm:$0x1] %v741_v8  ;;  %v958_v1 = vshrl.u32 %v7400_v36, 16  ;;  %v1526_v32 = vor.u32 %v1524_v5, %v7144_v62 }
  0x63   : > { %1616 = vrot.lane.b32.xlu0 %v8718_v46, %s6830_s9  ;;  %745 = vst [vmem:[#allocation2 + $0x74] sm:$0x1] %v744_v48  ;;  %v684_v35 = vld [vmem:[#allocation2 + $0x60] sm:$0x1]  ;;  %v1533_v51 = vshll.u32 %v7104_v56, 16  ;;  %v937_v16 = vor.u32 %v935_v55, %v7419_v19  ;;  %v951_v15 = vrot.slane %v949_v45, 7 }
  0x64   : > { %v746_v20 = vld [vmem:[#allocation2 + $0x80] sm:$0x1]  ;;  %v1169_v12 = vld [vmem:[#allocation2 + $0x50] sm:$0x1]  ;;  %v1176_v59 = vld [vmem:[#allocation2 + $0x5c] sm:$0x1]  ;;  %1624 = vrot.lane.b32.xlu1 %v1501_v21, %s6830_s9  ;;  %v1527_v55 = vsel %vm6936_vm7, %v1519_v58, %v1526_v32 }
  0x65   : > { %v1170_v22 = vsel %vm7192_vm11, %v905_v61, %v1169_v12  ;;  %v1177_v3 = vsel %vm7192_vm11, %v922_v37, %v1176_v59  ;;  %v7447_v54 = vrot.slane %v958_v1, 7  ;;  %v966_v27 = vshrl.u32 %v789_v14, 16  ;;  %v687_v38 = vld [vmem:[#allocation2 + $0x6c] sm:$0x1]  ;;  %v786_v28 = vld [vmem:[%s7090_s12 + $0x40] sm:$0xf] }
  0x66   : > { %1171 = vst [vmem:[#allocation2 + $0x50] sm:$0x1] %v1170_v22  ;;  %1178 = vst [vmem:[#allocation2 + $0x5c] sm:$0x1] %v1177_v3  ;;  %v927_v56 = vshll.u32 %v7364_v33, 16  ;;  %v938_v5 = vsel %vm6936_vm7, %v930_v57, %v937_v16  ;;  %v939_v24 = vrot.slane %v7419_v19, 4  ;;  %v7486_v48 = vor.u32 %v1533_v51, %v7163_v43 }
  0x67   : > { %v969_v23 = vshll.u32 %v789_v14, 16  ;;  %v749_v0 = vld [vmem:[#allocation2 + $0x8c] sm:$0x1]  ;;  %v8719_v61 = vrot.slane %v7096_v42, 4  ;;  %1182 = vst.msk [vmem:[#allocation2 + $0x64] sm:$0xf] %vm1125_vm10, %v938_v5 }
  0x68   : > { %v956_v53 = vrot.slane %v951_v15, 4  ;;  %v964_v37 = vrot.slane %v7447_v54, 4  ;;  %v7460_v33 = vrot.slane %v966_v27, 7  ;;  %v685_v44 = vsel %vm6899_vm2, 0, %v684_v35  ;;  %v7465_v30 = vld [vmem:[%s7090_s12 + $0x54] sm:$0xf]  ;;  %1630 = vrot.lane.b32.xlu1 %v1518_v49, %s6830_s9 }
  0x69   : > { %1622 = vrot.lane.b32.xlu0 %v8719_v61, %s6830_s9  ;;  %v1545_v25 = vrot.slane %v7231_v63, 4  ;;  %686 = vst [vmem:[#allocation2 + $0x60] sm:$0x1] %v685_v44  ;;  %v747_v42 = vsel %vm6908_vm4, 0, %v746_v20  ;;  %v688_v40 = vsel %vm6899_vm2, 0, %v687_v38  ;;  %v941_v18 = vshrl.u32 %v786_v28, 16 }
  0x6a   : > { %v7473_v26 = vld [vmem:[%s7090_s12 + $0x58] sm:$0xf]  ;;  %v971_v31 = vor.u32 %v969_v23, %v7460_v33  ;;  %748 = vst [vmem:[#allocation2 + $0x80] sm:$0x1] %v747_v42  ;;  %689 = vst [vmem:[#allocation2 + $0x6c] sm:$0x1] %v688_v40  ;;  %v929_v45 = vor.u32 %v927_v56, %v926_v10 }
  0x6b   : > { %v944_v4 = vshll.u32 %v786_v28, 16  ;;  %v750_v11 = vsel %vm6908_vm4, 0, %v749_v0  ;;  %v7483_v19 = vld [vmem:[%s7090_s12 + $0x5c] sm:$0xf]  ;;  %v752_v8 = vld [vmem:[#allocation2 + $0x98] sm:$0x1] }
  0x6c   : > { %v1183_v14 = vld [vmem:[#allocation2 + $0x68] sm:$0x1]  ;;  %v1190_v9 = vld [vmem:[#allocation2 + $0x74] sm:$0x1]  ;;  %v943_v46 = vrot.slane %v941_v18, 7  ;;  %v983_v58 = vshrl.u32 %v7465_v30, 16  ;;  %v972_v10 = vsel %vm6936_vm7, %v964_v37, %v971_v31  ;;  %1632 = vrot.lane.b32.xlu1 %v1527_v55, %s6830_s9 }
  0x6d   : > { %751 = vst [vmem:[#allocation2 + $0x8c] sm:$0x1] %v750_v11  ;;  %1626 = vrot.lane.b32.xlu0 %v7378_v13, %s6830_s9  ;;  %v1184_v21 = vsel %vm7192_vm11, %v939_v24, %v1183_v14  ;;  %v1191_v57 = vsel %vm7192_vm11, %v956_v53, %v1190_v9  ;;  %v952_v1 = vshll.u32 %v7391_v29, 16  ;;  %v690_v35 = vld [vmem:[#allocation2 + $0x78] sm:$0x1]  ;;  %v961_v13 = vshll.u32 %v7400_v36, 16 }
  0x6e   : > { %v755_v20 = vld [vmem:[#allocation2 + $0xa4] sm:$0x1]  ;;  %1185 = vst [vmem:[#allocation2 + $0x68] sm:$0x1] %v1184_v21  ;;  %1192 = vst [vmem:[#allocation2 + $0x74] sm:$0x1] %v1191_v57  ;;  %v946_v59 = vor.u32 %v944_v4, %v943_v46 }
  0x6f   : > { %1196 = vst.msk [vmem:[#allocation2 + $0x7c] sm:$0xf] %vm1125_vm10, %v972_v10  ;;  %v7501_v49 = vrot.slane %v983_v58, 7  ;;  %v947_v32 = vrot.slane %v943_v46, 4  ;;  %v992_v51 = vshrl.u32 %v7473_v26, 16  ;;  %v973_v29 = vrot.slane %v7460_v33, 4 }
  0x70   : > { %v7505_v12 = vld [vmem:[%s7090_s12 + $0x64] sm:$0xf]  ;;  %v954_v16 = vor.u32 %v952_v1, %v951_v15  ;;  %v1000_v22 = vshrl.u32 %v7483_v19, 16  ;;  %v7510_v36 = vld [vmem:[%s7090_s12 + $0x50] sm:$0xf]  ;;  %v1003_v28 = vshll.u32 %v7483_v19, 16  ;;  %1636 = vrot.lane.b32.xlu1 %v7486_v48, %s6830_s9 }
  0x71   : > { %v693_v3 = vld [vmem:[#allocation2 + $0x84] sm:$0x1]  ;;  %v990_v27 = vrot.slane %v7501_v49, 4  ;;  %v7513_v38 = vrot.slane %v992_v51, 7  ;;  %v753_v56 = vsel %vm6908_vm4, 0, %v752_v8  ;;  %v8720_v15 = vrot.slane %v7132_v52, 4 }
  0x72   : > { %v7519_v5 = vld [vmem:[%s7090_s12 + $0x68] sm:$0xf]  ;;  %v1179_v24 = vld [vmem:[#allocation2 + $0x60] sm:$0xf]  ;;  %v955_v23 = vsel %vm6936_vm7, %v947_v32, %v954_v16  ;;  %v1002_v0 = vrot.slane %v1000_v22, 7  ;;  %v691_v61 = vsel %vm6899_vm2, 0, %v690_v35  ;;  %v963_v35 = vor.u32 %v961_v13, %v7447_v54 }
  0x73   : > { %1628 = vrot.lane.b32.xlu0 %v8720_v15, %s6830_s9  ;;  %754 = vst [vmem:[#allocation2 + $0x98] sm:$0x1] %v753_v56  ;;  %v756_v53 = vsel %vm6908_vm4, 0, %v755_v20  ;;  %v7532_v37 = vld [vmem:[%s7090_s12 + $0x6c] sm:$0xf]  ;;  %v8721_v52 = vrot.slane %v7163_v43, 4  ;;  %v1180_v42 = vsel %vm7213_vm12, %v929_v45, %v1179_v24 }
  0x74   : > { %v7539_v44 = vld [vmem:[#allocation2 + $0x8] ss:$0 sps:$4 sm:$0x11]   ;;  %v1197_v40 = vld [vmem:[#allocation2 + $0x80] sm:$0x1]  ;;  %v998_v55 = vrot.slane %v7513_v38, 4  ;;  %v1005_v8 = vor.u32 %v1003_v28, %v1002_v0  ;;  %1640 = vrot.lane.b32.xlu1 %v1545_v25, %s6830_s9 }
  0x75   : > { %v1544_v33 = vsel %vm6936_vm7, %v8721_v52, %v7383_v60  ;;  %v1186_v18 = vld [vmem:[#allocation2 + $0x6c] sm:$0xf]  ;;  %1189 = vst.msk [vmem:[#allocation2 + $0x70] sm:$0xf] %vm1125_vm10, %v955_v23  ;;  %692 = vst [vmem:[#allocation2 + $0x78] sm:$0x1] %v691_v61  ;;  %v1198_v60 = vsel %vm7192_vm11, %v973_v29, %v1197_v40 }
  0x76   : > { %757 = vst [vmem:[#allocation2 + $0xa4] sm:$0x1] %v756_v53  ;;  %v1017_v31 = vshrl.u32 %v7505_v12, 16  ;;  %v8722_v43 = vshrl.u32 %v7186_v50, 16  ;;  %1181 = vst [vmem:[#allocation2 + $0x60] sm:$0xf] %v1180_v42  ;;  %v1187_v11 = vsel %vm7213_vm12, %v946_v59, %v1186_v18  ;;  %v1006_v58 = vsel %vm6936_vm7, %v998_v55, %v1005_v8 }
  0x77   : > { %v1204_v19 = vld [vmem:[#allocation2 + $0x8c] sm:$0x1]  ;;  %v758_v45 = vld [vmem:[#allocation2 + $0xb0] sm:$0x1]  ;;  %1199 = vst [vmem:[#allocation2 + $0x80] sm:$0x1] %v1198_v60 }
  0x78   : > { %v2300_v4 = vor.u32 %v7268_v7, %v8722_v43  ;;  %1188 = vst [vmem:[#allocation2 + $0x6c] sm:$0xf] %v1187_v11  ;;  %v1205_v14 = vsel %vm7192_vm11, %v990_v27, %v1204_v19  ;;  %v7555_v9 = vrot.slane %v1017_v31, 7  ;;  %v694_v50 = vsel %vm6899_vm2, 0, %v693_v3  ;;  %v761_v1 = vld [vmem:[#allocation2 + $0xbc] sm:$0x1] }
  0x79   : > { %v975_v7 = vshrl.u32 %v7510_v36, 16  ;;  %v8723_v46 = vrot.slane %v7144_v62, 4  ;;  %1206 = vst [vmem:[#allocation2 + $0x8c] sm:$0x1] %v1205_v14  ;;  %v1007_v21 = vrot.slane %v1002_v0, 4  ;;  %v978_v57 = vshll.u32 %v7510_v36, 16 }
  0x7a   : > { %695 = vst [vmem:[#allocation2 + $0x84] sm:$0x1] %v694_v50  ;;  %v1026_v10 = vshrl.u32 %v7519_v5, 16  ;;  %1210 = vst.msk [vmem:[#allocation2 + $0x94] sm:$0xf] %vm1125_vm10, %v1006_v58  ;;  %v1024_v62 = vrot.slane %v7555_v9, 4  ;;  %v2305_v61 = vsel %vm2293_vm13, %v2300_v4, %v7272_v17 }
  0x7b   : > { %1634 = vrot.lane.b32.xlu0 %v8723_v46, %s6830_s9  ;;  %v977_v20 = vrot.slane %v975_v7, 7  ;;  %v1034_v48 = vshrl.u32 %v7532_v37, 16  ;;  %v7574_v32 = vld [vmem:[%s7090_s12 + $0x74] sm:$0xf]  ;;  %v7577_v51 = vld [vmem:[%s7090_s12 + $0x78] sm:$0xf] }
  0x7c   : > { %v7579_v29 = vrot.slane %v1026_v10, 7  ;;  %v1037_v59 = vshll.u32 %v7532_v37, 16  ;;  %v986_v16 = vshll.u32 %v7465_v30, 16  ;;  %v759_v54 = vsel %vm6908_vm4, 0, %v758_v45  ;;  %v801_v13 = vld [vmem:[%s7090_s12 + $0x7c] sm:$0xf] }
  0x7d   : > { %v2729_v22 = vrot.slane %v7539_v44, 1  ;;  %v1211_v3 = vld [vmem:[#allocation2 + $0x98] sm:$0x1]  ;;  %v1036_v36 = vrot.slane %v1034_v48, 7  ;;  %v981_v27 = vrot.slane %v977_v20, 4  ;;  %v762_v28 = vsel %vm6908_vm4, 0, %v761_v1 }
  0x7e   : > { %760 = vst [vmem:[#allocation2 + $0xb0] sm:$0x1] %v759_v54  ;;  %v1212_v30 = vsel %vm7192_vm11, %v1007_v21, %v1211_v3  ;;  %v1193_v56 = vld [vmem:[#allocation2 + $0x78] sm:$0xf]  ;;  %v1218_v15 = vld [vmem:[#allocation2 + $0xa4] sm:$0x1]  ;;  %v980_v24 = vor.u32 %v978_v57, %v977_v20  ;;  %v988_v0 = vor.u32 %v986_v16, %v7501_v49 }
  0x7f   : > { %1638 = vrot.lane.b32.xlu0 %v1544_v33, %s6830_s9  ;;  %v1032_v23 = vrot.slane %v7579_v29, 4  ;;  %763 = vst [vmem:[#allocation2 + $0xbc] sm:$0x1] %v762_v28  ;;  %1213 = vst [vmem:[#allocation2 + $0x98] sm:$0x1] %v1212_v30  ;;  %v1194_v53 = vsel %vm7213_vm12, %v963_v35, %v1193_v56  ;;  %v1219_v63 = vsel %vm7192_vm11, %v1024_v62, %v1218_v15  ;;  %v6627_v37 = vld [vmem:[#allocation2] sm:$0xff]  }
  0x80   : > { %v1039_v25 = vor.u32 %v1037_v59, %v1036_v36  ;;  %1195 = vst [vmem:[#allocation2 + $0x78] sm:$0xf] %v1194_v53  ;;  %1220 = vst [vmem:[#allocation2 + $0xa4] sm:$0x1] %v1219_v63  ;;  %v989_v52 = vsel %vm6936_vm7, %v981_v27, %v988_v0  ;;  %v1051_v49 = vshrl.u32 %v7574_v32, 16  ;;  %v1060_v33 = vshrl.u32 %v7577_v51, 16 }
  0x81   : > { %v696_v17 = vld [vmem:[#allocation2 + $0x90] sm:$0x1]  ;;  %v699_v44 = vld [vmem:[#allocation2 + $0x9c] sm:$0x1]  ;;  %v1200_v42 = vld [vmem:[#allocation2 + $0x84] sm:$0xf] }
  0x82   : > { %v1040_v40 = vsel %vm6936_vm7, %v1032_v23, %v1039_v25  ;;  %v1041_v18 = vrot.slane %v1036_v36, 4  ;;  %1203 = vst.msk [vmem:[#allocation2 + $0x88] sm:$0xf] %vm1125_vm10, %v989_v52  ;;  %v1068_v55 = vshrl.u32 %v801_v13, 16  ;;  %v794_v31 = vld [vmem:[%s7090_s12 + $0x60] sm:$0xf]  ;;  %v1201_v43 = vsel %vm7213_vm12, %v980_v24, %v1200_v42 }
  0x83   : > { %2486 = vrot.lane.b32.xlu0 %v2305_v61, %s6831_s13  ;;  %1224 = vst.msk [vmem:[#allocation2 + $0xac] sm:$0xf] %vm1125_vm10, %v1040_v40  ;;  %v1053_v4 = vrot.slane %v1051_v49, 7  ;;  %v7615_v60 = vrot.slane %v1060_v33, 7  ;;  %v1071_v11 = vshll.u32 %v801_v13, 16  ;;  %v8724_v19 = vrot.slane %v7243_v34, 1 }
  0x84   : > { %1202 = vst [vmem:[#allocation2 + $0x84] sm:$0xf] %v1201_v43  ;;  %v7620_v45 = vrot.slane %v1068_v55, 7  ;;  %v697_v14 = vsel %vm6899_vm2, 0, %v696_v17  ;;  %v995_v50 = vshll.u32 %v7473_v26, 16  ;;  %2101 = vst.msk [vmem:[#allocation3] sm:$0xff] %vm2100_vm15, %v6627_v37 }
  0x85   : > { %v2730_v8 = vsel %vm2727_vm14, %v8724_v19, %v2729_v22  ;;  %v1225_v7 = vld [vmem:[#allocation2 + $0xb0] sm:$0x1]  ;;  %v1058_v46 = vrot.slane %v1053_v4, 4  ;;  %v1066_v58 = vrot.slane %v7615_v60, 4  ;;  %698 = vst [vmem:[#allocation2 + $0x90] sm:$0x1] %v697_v14 }
  0x86   : > { %v1226_v34 = vsel %vm7192_vm11, %v1041_v18, %v1225_v7  ;;  %v1232_v21 = vld [vmem:[#allocation2 + $0xbc] sm:$0x1]  ;;  %v1073_v57 = vor.u32 %v1071_v11, %v7620_v45  ;;  %v700_v10 = vsel %vm6899_vm2, 0, %v699_v44  ;;  %v1009_v1 = vshrl.u32 %v794_v31, 16  ;;  %v702_v59 = vld [vmem:[#allocation2 + $0xa8] sm:$0x1] }
  0x87   : > { %2776 = vrot.lane.b32.xlu0 %v2730_v8, %s6832_s14  ;;  %1227 = vst [vmem:[#allocation2 + $0xb0] sm:$0x1] %v1226_v34  ;;  %v1233_v26 = vsel %vm7192_vm11, %v1058_v46, %v1232_v21  ;;  %701 = vst [vmem:[#allocation2 + $0x9c] sm:$0x1] %v700_v10  ;;  %v1012_v35 = vshll.u32 %v794_v31, 16  ;;  %v1020_v62 = vshll.u32 %v7505_v12, 16  ;;  %v997_v16 = vor.u32 %v995_v50, %v7513_v38 }
  0x88   : > { %v1029_v20 = vshll.u32 %v7519_v5, 16  ;;  %1234 = vst [vmem:[#allocation2 + $0xbc] sm:$0x1] %v1233_v26  ;;  %v1074_v48 = vsel %vm6936_vm7, %v1066_v58, %v1073_v57  ;;  %v1011_v54 = vrot.slane %v1009_v1, 7  ;;  %v703_v22 = vsel %vm6899_vm2, 0, %v702_v59 }
  0x89   : > { %1238 = vst.msk [vmem:[#allocation2 + $0xc4] sm:$0xf] %vm1125_vm10, %v1074_v48  ;;  %v1022_v13 = vor.u32 %v1020_v62, %v7555_v9  ;;  %704 = vst [vmem:[#allocation2 + $0xa8] sm:$0x1] %v703_v22  ;;  %v705_v36 = vld [vmem:[#allocation2 + $0xb4] sm:$0x1] }
  0x8a   : > { %v1014_v12 = vor.u32 %v1012_v35, %v1011_v54  ;;  %v1015_v3 = vrot.slane %v1011_v54, 4  ;;  %v706_v27 = vsel %vm6899_vm2, 0, %v705_v36  ;;  %v798_v28 = vld [vmem:[%s7090_s12 + $0x70] sm:$0xf]  ;;  %v1031_v15 = vor.u32 %v1029_v20, %v7579_v29  ;;  %v1692_v33 = vld [vmem:[#allocation2 + $0xc] sm:$0xf]  ;;  %v1551_v18 = vpop.permute.xlu1 %1550  ;;  %v1547_v55 = vpop.permute.xlu0 %1546 }
  0x8b   : > { %707 = vst [vmem:[#allocation2 + $0xb4] sm:$0x1] %v706_v27  ;;  %v1043_v9 = vshrl.u32 %v798_v28, 16  ;;  %v1046_v56 = vshll.u32 %v798_v28, 16  ;;  %v1054_v61 = vshll.u32 %v7574_v32, 16  ;;  %v1063_v31 = vshll.u32 %v7577_v51, 16 }
  0x8c   : > { %v1207_v5 = vld [vmem:[#allocation2 + $0x90] sm:$0xf]  ;;  %v1023_v30 = vsel %vm6936_vm7, %v1015_v3, %v1022_v13  ;;  %v1699_v32 = vld [vmem:[#allocation2 + $0x14] sm:$0x1]  ;;  %v708_v44 = vld [vmem:[#allocation2 + $0xc0] sm:$0x1]  ;;  %v1693_v41 = vsel %vm7658_vm6, %v1547_v55, %v1692_v33 }
  0x8d   : > { %v1208_v38 = vsel %vm7213_vm12, %v997_v16, %v1207_v5  ;;  %1217 = vst.msk [vmem:[#allocation2 + $0xa0] sm:$0xf] %vm1125_vm10, %v1023_v30  ;;  %v1045_v0 = vrot.slane %v1043_v9, 7  ;;  %v1056_v37 = vor.u32 %v1054_v61, %v1053_v4  ;;  %v709_v40 = vsel %vm6899_vm2, 0, %v708_v44  ;;  %1694 = vst [vmem:[#allocation2 + $0xc] sm:$0xf] %v1693_v41 }
  0x8e   : > { %1209 = vst [vmem:[#allocation2 + $0x90] sm:$0xf] %v1208_v38  ;;  %v1214_v24 = vld [vmem:[#allocation2 + $0x9c] sm:$0xf]  ;;  %710 = vst [vmem:[#allocation2 + $0xc0] sm:$0x1] %v709_v40  ;;  %v1700_v4 = vsel %vm7663_vm8, %v1551_v18, %v1699_v32  ;;  %v1553_v8 = vpop.permute.xlu1 %1552  ;;  %v1557_v14 = vpop.permute.xlu0 %1556  ;;  %v1065_v50 = vor.u32 %v1063_v31, %v7615_v60 }
  0x8f   : > { %v1215_v23 = vsel %vm7213_vm12, %v1014_v12, %v1214_v24  ;;  %v1048_v29 = vor.u32 %v1046_v56, %v1045_v0  ;;  %v1049_v25 = vrot.slane %v1045_v0, 4  ;;  %1701 = vst [vmem:[#allocation2 + $0x14] sm:$0x1] %v1700_v4  ;;  %v1702_v11 = vld [vmem:[#allocation2 + $0x18] sm:$0xf] }
  0x90   : > { %1216 = vst [vmem:[#allocation2 + $0x9c] sm:$0xf] %v1215_v23  ;;  %v1221_v63 = vld [vmem:[#allocation2 + $0xa8] sm:$0xf]  ;;  %v1706_v19 = vld [vmem:[#allocation2 + $0x20] sm:$0x1]  ;;  %v1703_v51 = vsel %vm7658_vm6, %v1553_v8, %v1702_v11 }
  0x91   : > { %v1222_v49 = vsel %vm7213_vm12, %v1031_v15, %v1221_v63  ;;  %v1057_v17 = vsel %vm6936_vm7, %v1049_v25, %v1056_v37  ;;  %v1707_v7 = vsel %vm7663_vm8, %v1557_v14, %v1706_v19  ;;  %1704 = vst [vmem:[#allocation2 + $0x18] sm:$0xf] %v1703_v51  ;;  %v1709_v46 = vld [vmem:[#allocation2 + $0x24] sm:$0xf]  ;;  %v764_v58 = vld [vmem:[#allocation2 + $0xc8] sm:$0x1] }
  0x92   : > { %1223 = vst [vmem:[#allocation2 + $0xa8] sm:$0xf] %v1222_v49  ;;  %v1228_v42 = vld [vmem:[#allocation2 + $0xb4] sm:$0xf]  ;;  %1231 = vst.msk [vmem:[#allocation2 + $0xb8] sm:$0xf] %vm1125_vm10, %v1057_v17  ;;  %v1559_v57 = vpop.permute.xlu1 %1558  ;;  %v1549_v10 = vpop.permute.xlu0 %1548 }
  0x93   : > { %v1229_v43 = vsel %vm7213_vm12, %v1048_v29, %v1228_v42  ;;  %1708 = vst [vmem:[#allocation2 + $0x20] sm:$0x1] %v1707_v7  ;;  %v765_v21 = vsel %vm6908_vm4, 0, %v764_v58  ;;  %v1710_v60 = vsel %vm7658_vm6, %v1559_v57, %v1709_v46  ;;  %1696 = vst.msk [vmem:[#allocation2 + $0x10] sm:$0xf] %vm1690_vm1, %v1549_v10  ;;  %vm3753_vm7 = vcmask 195584  }
  0x94   : > { %1230 = vst [vmem:[#allocation2 + $0xb4] sm:$0xf] %v1229_v43  ;;  %766 = vst [vmem:[#allocation2 + $0xc8] sm:$0x1] %v765_v21  ;;  %v1716_v48 = vld [vmem:[#allocation2 + $0x30] sm:$0xf] }
  0x95   : > { %v1235_v34 = vld [vmem:[#allocation2 + $0xc0] sm:$0xf]  ;;  %1711 = vst [vmem:[#allocation2 + $0x24] sm:$0xf] %v1710_v60  ;;  %v1713_v39 = vld [vmem:[#allocation2 + $0x2c] sm:$0x1] }
  0x96   : > { %v1236_v26 = vsel %vm7213_vm12, %v1065_v50, %v1235_v34  ;;  %v6564_v1 = vld [vmem:[#allocation2 + $0x14] ss:$0 sps:$4 sm:$0x11]   ;;  %v1561_v62 = vpop.permute.xlu1 %1560  ;;  %v1555_v20 = vpop.permute.xlu0 %1554  ;;  %v1723_v12 = vld [vmem:[#allocation2 + $0x3c] sm:$0xf] }
  0x97   : > { %1237 = vst [vmem:[#allocation2 + $0xc0] sm:$0xf] %v1236_v26  ;;  %v7693_v35 = vld [vmem:[#allocation2 + $0x14] ss:$0 sps:$4 sm:$0x11]   ;;  %v2732_v54 = vrot.slane %v6564_v1, 1 }
  0x98   : > { %v7695_v59 = vld [vmem:[#allocation2 + $0x14] ss:$0 sps:$4 sm:$0x11]   ;;  %1712 = vst.msk [vmem:[#allocation2 + $0x28] sm:$0xf] %vm1690_vm1, %v1561_v62  ;;  %v3613_v36 = vrot.slane %v7693_v35, 1 }
  0x99   : > { %1705 = vst.msk [vmem:[#allocation2 + $0x1c] sm:$0xf] %vm1690_vm1, %v1555_v20  ;;  %v3188_v5 = vshll.u32 %v7695_v59, 16  ;;  %v1720_v63 = vld [vmem:[#allocation2 + $0x38] sm:$0x1] }
  0x9a   : > { %v6566_v16 = vld [vmem:[#allocation2 + $0x20] ss:$0 sps:$4 sm:$0x11]   ;;  %v1565_v13 = vpop.permute.xlu1 %1564  ;;  %v1563_v22 = vpop.permute.xlu0 %1562  ;;  %v6563_v3 = vld [vmem:[#allocation2 + $0xc] sm:$0xfe]  }
  0x9b   : > { %v1717_v27 = vsel %vm7658_vm6, %v1565_v13, %v1716_v48  ;;  %v1714_v28 = vsel %vm7663_vm8, %v1563_v22, %v1713_v39  ;;  %v6567_v38 = vld [vmem:[#allocation2 + $0xc] sm:$0xfe]   ;;  %v7705_v30 = vld [vmem:[#allocation2 + $0x20] ss:$0 sps:$4 sm:$0x11]   ;;  %v2731_v9 = vrot.slane %v6563_v3, 1 }
  0x9c   : > { %1718 = vst [vmem:[#allocation2 + $0x30] sm:$0xf] %v1717_v27  ;;  %1715 = vst [vmem:[#allocation2 + $0x2c] sm:$0x1] %v1714_v28  ;;  %v2735_v56 = vrot.slane %v6566_v16, 1  ;;  %v7707_v24 = vld [vmem:[#allocation2 + $0xc] sm:$0xff]  }
  0x9d   : > { %v6584_v15 = vld [vmem:[#allocation2 + $0x20] ss:$0 sps:$4 sm:$0x11]   ;;  %v2733_v61 = vsel %vm2727_vm14, %v2731_v9, %v2732_v54  ;;  %v3612_v44 = vrot.slane %v6567_v38, 1  ;;  %v3616_v18 = vrot.slane %v7705_v30, 1  ;;  %v3181_v8 = vshrl.u32 %v7707_v24, 16 }
  0x9e   : > { %v1571_v23 = vpop.permute.xlu1 %1570  ;;  %v1567_v0 = vpop.permute.xlu0 %1566  ;;  %2778 = vrot.lane.b32.xlu1 %v2733_v61, %s6832_s14  ;;  %v1730_v4 = vld [vmem:[#allocation2 + $0x48] sm:$0xf]  ;;  %v1727_v41 = vld [vmem:[#allocation2 + $0x44] sm:$0x1]  ;;  %v2326_v19 = vshll.u32 %v6584_v15, 16  ;;  %v3183_v58 = vshll.u32 %v7707_v24, 16 }
  0x9f   : > { %v1724_v25 = vsel %vm7658_vm6, %v1571_v23, %v1723_v12  ;;  %1719 = vst.msk [vmem:[#allocation2 + $0x34] sm:$0xf] %vm1690_vm1, %v1567_v0  ;;  %v6569_v37 = vld [vmem:[#allocation2 + $0x24] sm:$0xfe]   ;;  %v7730_v34 = vld [vmem:[#allocation2 + $0xc] sm:$0xff]   ;;  %v3614_v10 = vsel %vm2727_vm14, %v3612_v44, %v3613_v36  ;;  %v7754_v38 = vrot.slane %v3188_v5, 1 }
  0xa0   : > { %v6565_v29 = vld [vmem:[#allocation2 + $0x18] sm:$0xfe]   ;;  %1725 = vst [vmem:[#allocation2 + $0x3c] sm:$0xf] %v1724_v25  ;;  %v7714_v33 = vld [vmem:[#allocation2 + $0x24] sm:$0xfe]  }
  0xa1   : > { %v6571_v49 = vld [vmem:[#allocation2 + $0x18] sm:$0xfe]   ;;  %v2734_v32 = vrot.slane %v6565_v29, 1  ;;  %v2737_v42 = vrot.slane %v6569_v37, 1  ;;  %v3618_v11 = vrot.slane %v7714_v33, 1  ;;  %v7746_v54 = vrot.slane %v2326_v19, 1 }
  0xa2   : > { %v7716_v17 = vld [vmem:[#allocation2 + $0x18] sm:$0xff]   ;;  %v3615_v40 = vrot.slane %v6571_v49, 1  ;;  %v1573_v55 = vpop.permute.xlu1 %1572  ;;  %v1569_v31 = vpop.permute.xlu0 %1568  ;;  %v1737_v26 = vld [vmem:[#allocation2 + $0x54] sm:$0xf]  ;;  %v7750_v12 = vrot.slane %v3183_v58, 1  ;;  %v2309_v30 = vshll.u32 %v7730_v34, 16 }
  0xa3   : > { %v2736_v43 = vsel %vm2727_vm14, %v2734_v32, %v2735_v56  ;;  %1726 = vst.msk [vmem:[#allocation2 + $0x40] sm:$0xf] %vm1690_vm1, %v1573_v55  ;;  %v1721_v14 = vsel %vm7663_vm8, %v1569_v31, %v1720_v63  ;;  %v6570_v50 = vld [vmem:[#allocation2 + $0x2c] ss:$0 sps:$4 sm:$0x11]   ;;  %v2321_v51 = vshll.u32 %v7716_v17, 16 }
  0xa4   : > { %2780 = vrot.lane.b32.xlu0 %v2736_v43, %s6832_s14  ;;  %1722 = vst [vmem:[#allocation2 + $0x38] sm:$0x1] %v1721_v14  ;;  %v2738_v7 = vrot.slane %v6570_v50, 1  ;;  %v7727_v46 = vld [vmem:[#allocation2 + $0x2c] ss:$0 sps:$4 sm:$0x11]   ;;  %v3617_v56 = vsel %vm2727_vm14, %v3615_v40, %v3616_v18 }
  0xa5   : > { %v2319_v48 = vshrl.u32 %v7716_v17, 16  ;;  %v3619_v39 = vrot.slane %v7727_v46, 1  ;;  %v7744_v16 = vrot.slane %v2321_v51, 1  ;;  %v1734_v27 = vld [vmem:[#allocation2 + $0x50] sm:$0x1]  ;;  %v7762_v0 = vld [vmem:[#allocation2 + $0x24] sm:$0xff]  }
  0xa6   : > { %v1577_v21 = vpop.permute.xlu1 %1576  ;;  %v1575_v57 = vpop.permute.xlu0 %1574  ;;  %v6573_v60 = vld [vmem:[#allocation2 + $0x30] sm:$0xfe]   ;;  %v2739_v62 = vsel %vm2727_vm14, %v2737_v42, %v2738_v7  ;;  %v2307_v5 = vshrl.u32 %v7730_v34, 16  ;;  %v1741_v32 = vld [vmem:[#allocation2 + $0x5c] sm:$0x1]  ;;  %v7768_v42 = vrot.slane %v2309_v30, 1 }
  0xa7   : > { %v1731_v1 = vsel %vm7658_vm6, %v1577_v21, %v1730_v4  ;;  %v1728_v35 = vsel %vm7663_vm8, %v1575_v57, %v1727_v41  ;;  %v7739_v20 = vld [vmem:[#allocation2 + $0x30] sm:$0xfe]   ;;  %2782 = vrot.lane.b32.xlu1 %v2739_v62, %s6832_s14  ;;  %v2740_v22 = vrot.slane %v6573_v60, 1  ;;  %v1744_v40 = vld [vmem:[#allocation2 + $0x60] sm:$0xf]  ;;  %v2333_v14 = vshll.u32 %v7762_v0, 16 }
  0xa8   : > { %3660 = vrot.lane.b32.xlu0 %v3614_v10, %s6832_s14  ;;  %1732 = vst [vmem:[#allocation2 + $0x48] sm:$0xf] %v1731_v1  ;;  %1729 = vst [vmem:[#allocation2 + $0x44] sm:$0x1] %v1728_v35  ;;  %v7748_v13 = vld [vmem:[#allocation2 + $0x30] sm:$0xff]   ;;  %v3621_v23 = vrot.slane %v7739_v20, 1  ;;  %v3620_v21 = vsel %vm2727_vm14, %v3618_v11, %v3619_v39 }
  0xa9   : > { %v6590_v63 = vld [vmem:[#allocation2 + $0x14] ss:$0 sps:$4 sm:$0x11]   ;;  %v2343_v29 = vshrl.u32 %v7748_v13, 16  ;;  %v2345_v25 = vshll.u32 %v7748_v13, 16  ;;  %v2331_v35 = vshrl.u32 %v7762_v0, 16 }
  0xaa   : > { %v1583_v3 = vpop.permute.xlu1 %1582  ;;  %v1579_v36 = vpop.permute.xlu0 %1578  ;;  %v6577_v28 = vld [vmem:[#allocation2 + $0x3c] sm:$0xfe]   ;;  %v2314_v41 = vshll.u32 %v6590_v63, 16  ;;  %v1751_v46 = vld [vmem:[#allocation2 + $0x6c] sm:$0xf]  ;;  %v7791_v11 = vld [vmem:[#allocation2 + $0x24] sm:$0xff]  }
  0xab   : > { %v1738_v9 = vsel %vm7658_vm6, %v1583_v3, %v1737_v26  ;;  %1733 = vst.msk [vmem:[#allocation2 + $0x4c] sm:$0xf] %vm1690_vm1, %v1579_v36  ;;  %v6574_v15 = vld [vmem:[#allocation2 + $0x38] ss:$0 sps:$4 sm:$0x11]   ;;  %3662 = vrot.lane.b32.xlu1 %v3617_v56, %s6832_s14  ;;  %v2743_v44 = vrot.slane %v6577_v28, 1 }
  0xac   : > { %1739 = vst [vmem:[#allocation2 + $0x54] sm:$0xf] %v1738_v9  ;;  %v6580_v59 = vld [vmem:[#allocation2 + $0x38] ss:$0 sps:$4 sm:$0x11]   ;;  %v2741_v61 = vrot.slane %v6574_v15, 1 }
  0xad   : > { %v3622_v43 = vrot.slane %v6580_v59, 1  ;;  %v6592_v19 = vld [vmem:[#allocation2 + $0x38] ss:$0 sps:$4 sm:$0x11]   ;;  %v7786_v26 = vrot.slane %v2345_v25, 1  ;;  %v7789_v33 = vrot.slane %v2314_v41, 1 }
  0xae   : > { %v1585_v37 = vpop.permute.xlu1 %1584  ;;  %v1581_v49 = vpop.permute.xlu0 %1580  ;;  %v2742_v55 = vsel %vm2727_vm14, %v2740_v22, %v2741_v61  ;;  %v2350_v60 = vshll.u32 %v6592_v19, 16  ;;  %v6594_v1 = vld [vmem:[#allocation2 + $0x2c] ss:$0 sps:$4 sm:$0x11]   ;;  %v1748_v20 = vld [vmem:[#allocation2 + $0x68] sm:$0x1] }
  0xaf   : > { %1740 = vst.msk [vmem:[#allocation2 + $0x58] sm:$0xf] %vm1690_vm1, %v1585_v37  ;;  %v1735_v18 = vsel %vm7663_vm8, %v1581_v49, %v1734_v27  ;;  %v6578_v31 = vld [vmem:[#allocation2 + $0x44] ss:$0 sps:$4 sm:$0x11]   ;;  %2784 = vrot.lane.b32.xlu0 %v2742_v55, %s6832_s14  ;;  %v7793_v3 = vrot.slane %v2333_v14, 1  ;;  %v3623_v27 = vsel %vm2727_vm14, %v3621_v23, %v3622_v43  ;;  %v2324_v23 = vor.u32 %v7744_v16, %v2319_v48 }
  0xb0   : > { %1736 = vst [vmem:[#allocation2 + $0x50] sm:$0x1] %v1735_v18  ;;  %v2744_v4 = vrot.slane %v6578_v31, 1  ;;  %v2338_v30 = vshll.u32 %v6594_v1, 16  ;;  %v7800_v56 = vrot.slane %v2350_v60, 1  ;;  %v3205_v59 = vshrl.u32 %v7791_v11, 16 }
  0xb1   : > { %v6596_v15 = vld [vmem:[#allocation2 + $0x2c] ss:$0 sps:$4 sm:$0x11]   ;;  %v3207_v61 = vshll.u32 %v7791_v11, 16  ;;  %v7807_v25 = vld [vmem:[#allocation2 + $0x18] sm:$0xff]   ;;  %v2329_v19 = vsel %vm2293_vm13, %v2324_v23, %v7746_v54 }
  0xb2   : > { %v1587_v50 = vpop.permute.xlu0 %1586  ;;  %v6581_v51 = vld [vmem:[#allocation2 + $0x48] sm:$0xfe]   ;;  %v1589_v7 = vpop.permute.xlu1 %1588  ;;  %v2745_v57 = vsel %vm2727_vm14, %v2743_v44, %v2744_v4  ;;  %v1755_v49 = vld [vmem:[#allocation2 + $0x74] sm:$0x1]  ;;  %v3212_v44 = vshll.u32 %v6596_v15, 16  ;;  %v2340_v43 = vrot.slane %v2338_v30, 1 }
  0xb3   : > { %v1742_v58 = vsel %vm7663_vm8, %v1587_v50, %v1741_v32  ;;  %v1745_v10 = vsel %vm7658_vm6, %v1589_v7, %v1744_v40  ;;  %3664 = vrot.lane.b32.xlu0 %v3620_v21, %s6832_s14  ;;  %2786 = vrot.lane.b32.xlu1 %v2745_v57, %s6832_s14  ;;  %v2746_v39 = vrot.slane %v6581_v51, 1  ;;  %v7814_v17 = vrot.slane %v3207_v61, 1  ;;  %v6598_v48 = vld [vmem:[#allocation2 + $0x20] ss:$0 sps:$4 sm:$0x11]   ;;  %v7817_v4 = vld [vmem:[#allocation2 + $0x48] sm:$0xff]  }
  0xb4   : > { %1743 = vst [vmem:[#allocation2 + $0x5c] sm:$0x1] %v1742_v58  ;;  %1746 = vst [vmem:[#allocation2 + $0x60] sm:$0xf] %v1745_v10  ;;  %v3195_v16 = vshll.u32 %v7807_v25, 16  ;;  %v3186_v50 = vor.u32 %v7750_v12, %v3181_v8  ;;  %v7824_v51 = vld [vmem:[#allocation2 + $0x3c] sm:$0xff]  }
  0xb5   : > { %v1758_v41 = vld [vmem:[#allocation2 + $0x78] sm:$0xf]  ;;  %v7829_v58 = vrot.slane %v3212_v44, 1  ;;  %v3193_v21 = vshrl.u32 %v7807_v25, 16  ;;  %v3200_v57 = vshll.u32 %v6598_v48, 16  ;;  %v2369_v12 = vshll.u32 %v7817_v4, 16 }
  0xb6   : > { %v1591_v62 = vpop.permute.xlu0 %1590  ;;  %v6585_v22 = vld [vmem:[#allocation2 + $0x54] sm:$0xfe]   ;;  %v1595_v36 = vpop.permute.xlu1 %1594  ;;  %v3197_v8 = vrot.slane %v3195_v16, 1  ;;  %v1765_v1 = vld [vmem:[#allocation2 + $0x84] sm:$0xf]  ;;  %v2367_v34 = vshrl.u32 %v7817_v4, 16  ;;  %v3210_v16 = vor.u32 %v7814_v17, %v3205_v59 }
  0xb7   : > { %1747 = vst.msk [vmem:[#allocation2 + $0x64] sm:$0xf] %vm1690_vm1, %v1591_v62  ;;  %v6582_v28 = vld [vmem:[#allocation2 + $0x50] ss:$0 sps:$4 sm:$0x11]   ;;  %v1752_v9 = vsel %vm7658_vm6, %v1595_v36, %v1751_v46  ;;  %3666 = vrot.lane.b32.xlu1 %v3623_v27, %s6832_s14  ;;  %v2749_v32 = vrot.slane %v6585_v22, 1  ;;  %v2312_v46 = vor.u32 %v7768_v42, %v2307_v5  ;;  %v3191_v27 = vsel %vm2293_vm13, %v3186_v50, %v7754_v38 }
  0xb8   : > { %1753 = vst [vmem:[#allocation2 + $0x6c] sm:$0xf] %v1752_v9  ;;  %v2747_v63 = vrot.slane %v6582_v28, 1  ;;  %v6600_v10 = vld [vmem:[#allocation2 + $0x50] ss:$0 sps:$4 sm:$0x11]   ;;  %v2348_v38 = vor.u32 %v7786_v26, %v2343_v29  ;;  %v3215_v59 = vsel %vm2293_vm13, %v3210_v16, %v7829_v58 }
  0xb9   : > { %v2374_v5 = vshll.u32 %v6600_v10, 16  ;;  %v2355_v42 = vshrl.u32 %v7824_v51, 16  ;;  %v7840_v62 = vld [vmem:[#allocation2 + $0x3c] sm:$0xff]   ;;  %v3202_v30 = vrot.slane %v3200_v57, 1  ;;  %v2371_v9 = vrot.slane %v2369_v12, 1  ;;  %v7876_v50 = vld [vmem:[#allocation2 + $0x54] sm:$0xff]  }
  0xba   : > { %v1593_v37 = vpop.permute.xlu0 %1592  ;;  %v1597_v40 = vpop.permute.xlu1 %1596  ;;  %v2748_v55 = vsel %vm2727_vm14, %v2746_v39, %v2747_v63  ;;  %v2357_v39 = vshll.u32 %v7824_v51, 16  ;;  %v1762_v28 = vld [vmem:[#allocation2 + $0x80] sm:$0x1]  ;;  %v2317_v61 = vsel %vm2293_vm13, %v2312_v46, %v7789_v33  ;;  %v6604_v25 = vld [vmem:[#allocation2 + $0x44] ss:$0 sps:$4 sm:$0x11]   ;;  %v2353_v13 = vsel %vm2293_vm13, %v2348_v38, %v7800_v56 }
  0xbb   : > { %v1749_v18 = vsel %vm7663_vm8, %v1593_v37, %v1748_v20  ;;  %v6586_v31 = vld [vmem:[#allocation2 + $0x5c] ss:$0 sps:$4 sm:$0x11]   ;;  %1754 = vst.msk [vmem:[#allocation2 + $0x70] sm:$0xf] %vm1690_vm1, %v1597_v40  ;;  %2788 = vrot.lane.b32.xlu0 %v2748_v55, %s6832_s14  ;;  %v7850_v63 = vrot.slane %v2374_v5, 1 }
  0xbc   : > { %1750 = vst [vmem:[#allocation2 + $0x68] sm:$0x1] %v1749_v18  ;;  %v2750_v14 = vrot.slane %v6586_v31, 1  ;;  %v6602_v20 = vld [vmem:[#allocation2 + $0x44] ss:$0 sps:$4 sm:$0x11]  }
  0xbd   : > { %v2362_v23 = vshll.u32 %v6602_v20, 16  ;;  %v3231_v37 = vshll.u32 %v7840_v62, 16  ;;  %v3229_v44 = vshrl.u32 %v7840_v62, 16  ;;  %v3236_v40 = vshll.u32 %v6604_v25, 16  ;;  %v7864_v18 = vld [vmem:[#allocation2 + $0x30] sm:$0xff]  }
  0xbe   : > { %v1599_v7 = vpop.permute.xlu0 %1598  ;;  %v1601_v60 = vpop.permute.xlu1 %1600  ;;  %v2751_v24 = vsel %vm2727_vm14, %v2749_v32, %v2750_v14  ;;  %v2359_v32 = vrot.slane %v2357_v39, 1  ;;  %v1769_v26 = vld [vmem:[#allocation2 + $0x8c] sm:$0x1]  ;;  %v6606_v31 = vld [vmem:[#allocation2 + $0x38] ss:$0 sps:$4 sm:$0x11]   ;;  %v2372_v39 = vor.u32 %v2371_v9, %v2367_v34 }
  0xbf   : > { %v1756_v54 = vsel %vm7663_vm8, %v1599_v7, %v1755_v49  ;;  %2490 = vrot.lane.b32.xlu0 %v2329_v19, %s6831_s13  ;;  %2790 = vrot.lane.b32.xlu1 %v2751_v24, %s6832_s14  ;;  %v1759_v22 = vsel %vm7658_vm6, %v1601_v60, %v1758_v41  ;;  %v2336_v49 = vor.u32 %v7793_v3, %v2331_v35  ;;  %v2364_v0 = vrot.slane %v2362_v23, 1  ;;  %v1772_v3 = vld [vmem:[#allocation2 + $0x90] sm:$0xf]  ;;  %v7874_v14 = vld [vmem:[#allocation2 + $0x3c] sm:$0xfe]   ;;  %v6613_v34 = vld [vmem:[#allocation2 + $0x48] sm:$0xff]  }
  0xc0   : > { %1757 = vst [vmem:[#allocation2 + $0x74] sm:$0x1] %v1756_v54  ;;  %1760 = vst [vmem:[#allocation2 + $0x78] sm:$0xf] %v1759_v22  ;;  %v3198_v41 = vor.u32 %v3197_v8, %v3193_v21  ;;  %v3233_v19 = vrot.slane %v3231_v37, 1  ;;  %v3219_v56 = vshll.u32 %v7864_v18, 16  ;;  %v2360_v22 = vor.u32 %v2359_v32, %v2355_v42 }
  0xc1   : > { %v2341_v29 = vsel %vm2293_vm13, %v2336_v49, %v2340_v43  ;;  %v3224_v43 = vshll.u32 %v6606_v31, 16  ;;  %v7882_v7 = vld [vmem:[#allocation2 + $0x44] ss:$0 sps:$4 sm:$0x11]   ;;  %v3238_v17 = vrot.slane %v3236_v40, 1  ;;  %v3217_v46 = vshrl.u32 %v7864_v18, 16 }
  0xc2   : > { %v1603_v36 = vpop.permute.xlu0 %1602  ;;  %v1607_v15 = vpop.permute.xlu1 %1606  ;;  %v7884_v11 = vld [vmem:[#allocation2 + $0x60] sm:$0xff]   ;;  %v3221_v57 = vrot.slane %v3219_v56, 1  ;;  %v3624_v60 = vrot.slane %v7874_v14, 1  ;;  %v2379_v54 = vshrl.u32 %v7876_v50, 16  ;;  %v1779_v8 = vld [vmem:[#allocation2 + $0x9c] sm:$0xf]  ;;  %v2365_v23 = vsel %vm2293_vm13, %v2360_v22, %v2364_v0 }
  0xc3   : > { %1761 = vst.msk [vmem:[#allocation2 + $0x7c] sm:$0xf] %vm1690_vm1, %v1603_v36  ;;  %3372 = vrot.lane.b32.xlu0 %v3191_v27, %s6831_s13  ;;  %2488 = vrot.lane.b32.xlu1 %v2317_v61, %s6831_s13  ;;  %v1766_v33 = vsel %vm7658_vm6, %v1607_v15, %v1765_v1  ;;  %v3226_v10 = vrot.slane %v3224_v43, 1  ;;  %v3203_v1 = vsel %vm2293_vm13, %v3198_v41, %v3202_v30  ;;  %v6610_v5 = vld [vmem:[#allocation2 + $0x5c] ss:$0 sps:$4 sm:$0x11]  }
  0xc4   : > { %1767 = vst [vmem:[#allocation2 + $0x84] sm:$0xf] %v1766_v33  ;;  %v2381_v58 = vshll.u32 %v7876_v50, 16  ;;  %v3625_v36 = vrot.slane %v7882_v7, 1  ;;  %v2393_v27 = vshll.u32 %v7884_v11, 16  ;;  %v2377_v61 = vsel %vm2293_vm13, %v2372_v39, %v7850_v63 }
  0xc5   : > { %v6612_v30 = vld [vmem:[#allocation2 + $0x68] ss:$0 sps:$4 sm:$0x11]   ;;  %v1776_v25 = vld [vmem:[#allocation2 + $0x98] sm:$0x1]  ;;  %v2391_v4 = vshrl.u32 %v7884_v11, 16  ;;  %v3234_v63 = vor.u32 %v3233_v19, %v3229_v44  ;;  %v3222_v40 = vor.u32 %v3221_v57, %v3217_v46 }
  0xc6   : > { %v1605_v55 = vpop.permute.xlu0 %1604  ;;  %v1609_v35 = vpop.permute.xlu1 %1608  ;;  %v2383_v51 = vrot.slane %v2381_v58, 1  ;;  %v2395_v42 = vrot.slane %v2393_v27, 1  ;;  %v2398_v37 = vshll.u32 %v6612_v30, 16  ;;  %v6614_v38 = vld [vmem:[#allocation2 + $0x50] ss:$0 sps:$4 sm:$0x11]  }
  0xc7   : > { %v1763_v48 = vsel %vm7663_vm8, %v1605_v55, %v1762_v28  ;;  %1768 = vst.msk [vmem:[#allocation2 + $0x88] sm:$0xf] %vm1690_vm1, %v1609_v35  ;;  %2494 = vrot.lane.b32.xlu0 %v2353_v13, %s6831_s13  ;;  %2492 = vrot.lane.b32.xlu1 %v2341_v29, %s6831_s13  ;;  %v2386_v28 = vshll.u32 %v6610_v5, 16  ;;  %v3243_v32 = vshll.u32 %v6613_v34, 16  ;;  %v3241_v18 = vshrl.u32 %v6613_v34, 16  ;;  %v7918_v29 = vld [vmem:[#allocation2 + $0x54] sm:$0xff]  }
  0xc8   : > { %1764 = vst [vmem:[#allocation2 + $0x80] sm:$0x1] %v1763_v48  ;;  %v3248_v55 = vshll.u32 %v6614_v38, 16  ;;  %v7916_v13 = vld [vmem:[#allocation2 + $0x60] sm:$0xfe]   ;;  %v3239_v0 = vsel %vm2293_vm13, %v3234_v63, %v3238_v17  ;;  %v2400_v35 = vrot.slane %v2398_v37, 1  ;;  %v3227_v16 = vsel %vm2293_vm13, %v3222_v40, %v3226_v10 }
  0xc9   : > { %v2388_v33 = vrot.slane %v2386_v28, 1  ;;  %v1783_v31 = vld [vmem:[#allocation2 + $0xa4] sm:$0x1]  ;;  %v1786_v62 = vld [vmem:[#allocation2 + $0xa8] sm:$0xf]  ;;  %v3245_v41 = vrot.slane %v3243_v32, 1  ;;  %v2384_v50 = vor.u32 %v2383_v51, %v2379_v54  ;;  %v2396_v56 = vor.u32 %v2395_v42, %v2391_v4 }
  0xca   : > { %v1611_v21 = vpop.permute.xlu0 %1610  ;;  %v1613_v24 = vpop.permute.xlu1 %1612  ;;  %v3250_v19 = vrot.slane %v3248_v55, 1  ;;  %v2752_v43 = vrot.slane %v7916_v13, 1  ;;  %v6617_v7 = vld [vmem:[#allocation2 + $0x48] sm:$0xfe]   ;;  %v3626_v17 = vsel %vm2727_vm14, %v3624_v60, %v3625_v36  ;;  %v3255_v5 = vshll.u32 %v7918_v29, 16 }
  0xcb   : > { %v1770_v12 = vsel %vm7663_vm8, %v1611_v21, %v1769_v26  ;;  %v1773_v20 = vsel %vm7658_vm6, %v1613_v24, %v1772_v3  ;;  %3376 = vrot.lane.b32.xlu0 %v3215_v59, %s6831_s13  ;;  %3374 = vrot.lane.b32.xlu1 %v3203_v1, %s6831_s13  ;;  %v7921_v3 = vld [vmem:[#allocation2 + $0x68] ss:$0 sps:$4 sm:$0x11]   ;;  %v6618_v11 = vld [vmem:[#allocation2 + $0x50] ss:$0 sps:$4 sm:$0x11]   ;;  %v2389_v46 = vsel %vm2293_vm13, %v2384_v50, %v2388_v33 }
  0xcc   : > { %1771 = vst [vmem:[#allocation2 + $0x8c] sm:$0x1] %v1770_v12  ;;  %1774 = vst [vmem:[#allocation2 + $0x90] sm:$0xf] %v1773_v20  ;;  %v2753_v21 = vrot.slane %v7921_v3, 1  ;;  %v3627_v57 = vrot.slane %v6617_v7, 1  ;;  %v2401_v60 = vsel %vm2293_vm13, %v2396_v56, %v2400_v35  ;;  %v3246_v58 = vor.u32 %v3245_v41, %v3241_v18 }
  0xcd   : > { %v6620_v10 = vld [vmem:[#allocation2 + $0x5c] ss:$0 sps:$4 sm:$0x11]   ;;  %v6621_v24 = vld [vmem:[#allocation2 + $0x6c] sm:$0xff]   ;;  %v1793_v12 = vld [vmem:[#allocation2 + $0xb4] sm:$0xf] }
  0xce   : > { %v1615_v15 = vpop.permute.xlu0 %1614  ;;  %v1619_v9 = vpop.permute.xlu1 %1618  ;;  %v3628_v1 = vrot.slane %v6618_v11, 1  ;;  %v3260_v20 = vshll.u32 %v6620_v10, 16  ;;  %v6622_v39 = vld [vmem:[#allocation2 + $0x74] ss:$0 sps:$4 sm:$0x11]   ;;  %v3253_v22 = vshrl.u32 %v7918_v29, 16  ;;  %v3251_v4 = vsel %vm2293_vm13, %v3246_v58, %v3250_v19 }
  0xcf   : > { %1775 = vst.msk [vmem:[#allocation2 + $0x94] sm:$0xf] %vm1690_vm1, %v1615_v15  ;;  %v1780_v49 = vsel %vm7658_vm6, %v1619_v9, %v1779_v8  ;;  %2498 = vrot.lane.b32.xlu0 %v2377_v61, %s6831_s13  ;;  %2496 = vrot.lane.b32.xlu1 %v2365_v23, %s6831_s13  ;;  %v3257_v36 = vrot.slane %v3255_v5, 1  ;;  %v2403_v27 = vshrl.u32 %v6621_v24, 16  ;;  %v2405_v28 = vshll.u32 %v6621_v24, 16  ;;  %v6628_v23 = vld [vmem:[#allocation2 + $0x78] sm:$0xff]  }
  0xd0   : > { %1781 = vst [vmem:[#allocation2 + $0x9c] sm:$0xf] %v1780_v49  ;;  %v1790_v15 = vld [vmem:[#allocation2 + $0xb0] sm:$0x1]  ;;  %v2410_v61 = vshll.u32 %v6622_v39, 16  ;;  %v3262_v37 = vrot.slane %v3260_v20, 1  ;;  %v2754_v40 = vsel %vm2727_vm14, %v2752_v43, %v2753_v21 }
  0xd1   : > { %v2407_v34 = vrot.slane %v2405_v28, 1  ;;  %v6623_v9 = vld [vmem:[#allocation2 + $0x54] sm:$0xfe]   ;;  %v6624_v51 = vld [vmem:[#allocation2 + $0x5c] ss:$0 sps:$4 sm:$0x11]  }
  0xd2   : > { %v1621_v48 = vpop.permute.xlu1 %1620  ;;  %v2412_v38 = vrot.slane %v2410_v61, 1  ;;  %v3630_v49 = vrot.slane %v6623_v9, 1  ;;  %v6625_v63 = vld [vmem:[#allocation2 + $0x6c] sm:$0xfe]   ;;  %v2415_v33 = vshrl.u32 %v6628_v23, 16  ;;  %v2417_v13 = vshll.u32 %v6628_v23, 16 }
  0xd3   : > { %1782 = vst.msk [vmem:[#allocation2 + $0xa0] sm:$0xf] %vm1690_vm1, %v1621_v48  ;;  %3380 = vrot.lane.b32.xlu0 %v3239_v0, %s6831_s13  ;;  %3378 = vrot.lane.b32.xlu1 %v3227_v16, %s6831_s13  ;;  %v1797_v18 = vld [vmem:[#allocation2 + $0xbc] sm:$0x1]  ;;  %v3629_v0 = vsel %vm2727_vm14, %v3627_v57, %v3628_v1  ;;  %v3631_v35 = vrot.slane %v6624_v51, 1  ;;  %v6630_v3 = vld [vmem:[#allocation2 + $0x60] sm:$0xff]   ;;  %v3258_v48 = vor.u32 %v3257_v36, %v3253_v22 }
  0xd4   : > { %v6626_v55 = vld [vmem:[#allocation2 + $0x74] ss:$0 sps:$4 sm:$0x11]   ;;  %v2419_v16 = vrot.slane %v2417_v13, 1  ;;  %v6636_v41 = vld [vmem:[#allocation2 + $0x6c] sm:$0xff]   ;;  %v3265_v11 = vshrl.u32 %v6630_v3, 16 }
  0xd5   : > { %v1617_v26 = vpop.permute.xlu0 %1616  ;;  %v3263_v50 = vsel %vm2293_vm13, %v3258_v48, %v3262_v37  ;;  %v2756_v56 = vrot.slane %v6626_v55, 1  ;;  %v6631_v7 = vld [vmem:[#allocation2 + $0x68] ss:$0 sps:$4 sm:$0x11]   ;;  %v3277_v21 = vshrl.u32 %v6636_v41, 16  ;;  %v3632_v58 = vsel %vm2727_vm14, %v3630_v49, %v3631_v35  ;;  %v6640_v23 = vld [vmem:[#allocation2 + $0x78] sm:$0xff]  }
  0xd6   : > { %v1777_v44 = vsel %vm7663_vm8, %v1617_v26, %v1776_v25  ;;  %v1625_v8 = vpop.permute.xlu1 %1624  ;;  %v3272_v10 = vshll.u32 %v6631_v7, 16  ;;  %v6632_v24 = vld [vmem:[#allocation2 + $0x78] sm:$0xfe]   ;;  %v6634_v36 = vld [vmem:[#allocation2 + $0x60] sm:$0xfe]  }
  0xd7   : > { %1778 = vst [vmem:[#allocation2 + $0x98] sm:$0x1] %v1777_v44  ;;  %v1787_v14 = vsel %vm7658_vm6, %v1625_v8, %v1786_v62  ;;  %3668 = vrot.lane.b32.xlu0 %v3626_v17, %s6832_s14  ;;  %2500 = vrot.lane.b32.xlu1 %v2389_v46, %s6831_s13  ;;  %v2755_v62 = vrot.slane %v6625_v63, 1  ;;  %v6629_v44 = vld [vmem:[#allocation2 + $0x80] ss:$0 sps:$4 sm:$0x11]   ;;  %v2420_v8 = vor.u32 %v2419_v16, %v2415_v33 }
  0xd8   : > { %1788 = vst [vmem:[#allocation2 + $0xa8] sm:$0xf] %v1787_v14  ;;  %v2422_v43 = vshll.u32 %v6629_v44, 16  ;;  %v3267_v46 = vshll.u32 %v6630_v3, 16  ;;  %v3274_v5 = vrot.slane %v3272_v10, 1  ;;  %v2758_v14 = vrot.slane %v6632_v24, 1 }
  0xd9   : > { %v2757_v20 = vsel %vm2727_vm14, %v2755_v62, %v2756_v56  ;;  %v6637_v61 = vld [vmem:[#allocation2 + $0x74] ss:$0 sps:$4 sm:$0x11]   ;;  %v3289_v33 = vshrl.u32 %v6640_v23, 16  ;;  %v6642_v48 = vld [vmem:[#allocation2 + $0x84] sm:$0xfe]  }
  0xda   : > { %v1631_v25 = vpop.permute.xlu1 %1630  ;;  %v2424_v57 = vrot.slane %v2422_v43, 1  ;;  %v3284_v51 = vshll.u32 %v6637_v61, 16  ;;  %v6641_v13 = vld [vmem:[#allocation2 + $0x80] ss:$0 sps:$4 sm:$0x11]  }
  0xdb   : > { %v1623_v59 = vpop.permute.xlu0 %1622  ;;  %v1794_v42 = vsel %vm7658_vm6, %v1631_v25, %v1793_v12  ;;  %2502 = vrot.lane.b32.xlu0 %v2401_v60, %s6831_s13  ;;  %3382 = vrot.lane.b32.xlu1 %v3251_v4, %s6831_s13  ;;  %v3269_v12 = vrot.slane %v3267_v46, 1  ;;  %v6638_v60 = vld [vmem:[#allocation2 + $0x84] sm:$0xff]   ;;  %v3279_v4 = vshll.u32 %v6636_v41, 16  ;;  %v3296_v3 = vshll.u32 %v6641_v13, 16 }
  0xdc   : > { %v1784_v54 = vsel %vm7663_vm8, %v1623_v59, %v1783_v31  ;;  %1795 = vst [vmem:[#allocation2 + $0xb4] sm:$0xf] %v1794_v42  ;;  %v2408_v31 = vor.u32 %v2407_v34, %v2403_v27  ;;  %v6635_v27 = vld [vmem:[#allocation2 + $0x68] ss:$0 sps:$4 sm:$0x11]   ;;  %v2425_v28 = vsel %vm2293_vm13, %v2420_v8, %v2424_v57  ;;  %v2427_v34 = vshrl.u32 %v6638_v60, 16 }
  0xdd   : > { %1785 = vst [vmem:[#allocation2 + $0xa4] sm:$0x1] %v1784_v54  ;;  %v6633_v54 = vld [vmem:[#allocation2 + $0x80] ss:$0 sps:$4 sm:$0x11]   ;;  %v3270_v39 = vor.u32 %v3269_v12, %v3265_v11  ;;  %v3281_v37 = vrot.slane %v3279_v4, 1 }
  0xde   : > { %v1633_v29 = vpop.permute.xlu1 %1632  ;;  %v2413_v17 = vsel %vm2293_vm13, %v2408_v31, %v2412_v38  ;;  %v2759_v22 = vrot.slane %v6633_v54, 1  ;;  %v6639_v42 = vld [vmem:[#allocation2 + $0x8c] ss:$0 sps:$4 sm:$0x11]   ;;  %v2429_v38 = vshll.u32 %v6638_v60, 16  ;;  %v3286_v49 = vrot.slane %v3284_v51, 1 }
  0xdf   : > { %v1627_v30 = vpop.permute.xlu0 %1626  ;;  %1796 = vst.msk [vmem:[#allocation2 + $0xb8] sm:$0xf] %vm1690_vm1, %v1633_v29  ;;  %2792 = vrot.lane.b32.xlu0 %v2754_v40, %s6832_s14  ;;  %3670 = vrot.lane.b32.xlu1 %v3629_v0, %s6832_s14  ;;  %v3275_v9 = vsel %vm2293_vm13, %v3270_v39, %v3274_v5  ;;  %v2434_v63 = vshll.u32 %v6639_v42, 16  ;;  %v6643_v62 = vld [vmem:[#allocation2 + $0x8c] ss:$0 sps:$4 sm:$0x11]  }
  0xe0   : > { %1789 = vst.msk [vmem:[#allocation2 + $0xac] sm:$0xf] %vm1690_vm1, %v1627_v30  ;;  %v3633_v30 = vrot.slane %v6634_v36, 1  ;;  %v2431_v55 = vrot.slane %v2429_v38, 1  ;;  %v3298_v16 = vrot.slane %v3296_v3, 1  ;;  %v2761_v41 = vrot.slane %v6642_v48, 1 }
  0xe1   : > { %v2436_v0 = vrot.slane %v2434_v63, 1  ;;  %v6645_v7 = vld [vmem:[#allocation2 + $0x2c] ss:$0 sps:$4 sm:$0x11]   ;;  %v6646_v11 = vld [vmem:[#allocation2 + $0x18] sm:$0xff]   ;;  %v6652_v54 = vld [vmem:[#allocation2 + $0x90] sm:$0xff]  }
  0xe2   : > { %v2432_v35 = vor.u32 %v2431_v55, %v2427_v34  ;;  %v6647_v57 = vld [vmem:[#allocation2 + $0x20] ss:$0 sps:$4 sm:$0x11]   ;;  %v4512_v10 = vshll.u32 %v6646_v11, 16  ;;  %v4510_v5 = vshrl.u32 %v6646_v11, 16  ;;  %v2439_v39 = vshrl.u32 %v6652_v54, 16 }
  0xe3   : > { %3384 = vrot.lane.b32.xlu0 %v3263_v50, %s6831_s13  ;;  %2504 = vrot.lane.b32.xlu1 %v2413_v17, %s6831_s13  ;;  %v6644_v50 = vld [vmem:[#allocation2 + $0x24] sm:$0xff]   ;;  %v4517_v60 = vshll.u32 %v6647_v57, 16  ;;  %v6651_v61 = vld [vmem:[#allocation2 + $0x74] ss:$0 sps:$4 sm:$0x11]   ;;  %v2441_v42 = vshll.u32 %v6652_v54, 16 }
  0xe4   : > { %v2437_v43 = vsel %vm2293_vm13, %v2432_v35, %v2436_v0  ;;  %v4524_v17 = vshll.u32 %v6644_v50, 16  ;;  %v4522_v46 = vshrl.u32 %v6644_v50, 16  ;;  %v6660_v4 = vld [vmem:[#allocation2 + $0x84] sm:$0xff]   ;;  %v6653_v51 = vld [vmem:[#allocation2 + $0x98] ss:$0 sps:$4 sm:$0x11]  }
  0xe5   : > { %v1629_v32 = vpop.permute.xlu0 %1628  ;;  %v2446_v38 = vshll.u32 %v6653_v51, 16  ;;  %v6657_v0 = vld [vmem:[#allocation2 + $0x98] ss:$0 sps:$4 sm:$0x11]   ;;  %v3303_v3 = vshll.u32 %v6660_v4, 16 }
  0xe6   : > { %v1791_v26 = vsel %vm7663_vm8, %v1629_v32, %v1790_v15  ;;  %v3634_v15 = vrot.slane %v6635_v27, 1  ;;  %v3291_v32 = vshll.u32 %v6640_v23, 16  ;;  %v4526_v12 = vrot.slane %v4524_v17, 1  ;;  %v6663_v57 = vld [vmem:[#allocation2 + $0xa4] ss:$0 sps:$4 sm:$0x11]  }
  0xe7   : > { %1792 = vst [vmem:[#allocation2 + $0xb0] sm:$0x1] %v1791_v26  ;;  %3672 = vrot.lane.b32.xlu0 %v3632_v58, %s6832_s14  ;;  %2794 = vrot.lane.b32.xlu1 %v2757_v20, %s6832_s14  ;;  %v3282_v26 = vor.u32 %v3281_v37, %v3277_v21  ;;  %v4529_v21 = vshll.u32 %v6645_v7, 16  ;;  %v6648_v58 = vld [vmem:[#allocation2 + $0x78] sm:$0xfe]   ;;  %v4519_v27 = vrot.slane %v4517_v60, 1 }
  0xe8   : > { %v3635_v29 = vsel %vm2727_vm14, %v3633_v30, %v3634_v15  ;;  %v3293_v31 = vrot.slane %v3291_v32, 1  ;;  %v6649_v20 = vld [vmem:[#allocation2 + $0x80] ss:$0 sps:$4 sm:$0x11]   ;;  %v6650_v15 = vld [vmem:[#allocation2 + $0x6c] sm:$0xfe]  }
  0xe9   : > { %v3287_v56 = vsel %vm2293_vm13, %v3282_v26, %v3286_v49  ;;  %v3640_v30 = vrot.slane %v6649_v20, 1  ;;  %v3636_v34 = vrot.slane %v6650_v15, 1  ;;  %v2443_v37 = vrot.slane %v2441_v42, 1  ;;  %v6654_v49 = vld [vmem:[#allocation2 + $0x18] sm:$0xfe]  }
  0xea   : > { %v3294_v44 = vor.u32 %v3293_v31, %v3289_v33  ;;  %v6655_v32 = vld [vmem:[#allocation2 + $0x20] ss:$0 sps:$4 sm:$0x11]   ;;  %v2448_v55 = vrot.slane %v2446_v38, 1  ;;  %v4941_v13 = vrot.slane %v6654_v49, 1  ;;  %v3305_v11 = vrot.slane %v3303_v3, 1 }
  0xeb   : > { %2506 = vrot.lane.b32.xlu0 %v2425_v28, %s6831_s13  ;;  %3386 = vrot.lane.b32.xlu1 %v3275_v9, %s6831_s13  ;;  %v3639_v28 = vrot.slane %v6648_v58, 1  ;;  %v3637_v9 = vrot.slane %v6651_v61, 1  ;;  %v4942_v26 = vrot.slane %v6655_v32, 1  ;;  %v6661_v7 = vld [vmem:[#allocation2 + $0x8c] ss:$0 sps:$4 sm:$0x11]  }
  0xec   : > { %v3299_v24 = vsel %vm2293_vm13, %v3294_v44, %v3298_v16  ;;  %v6658_v44 = vld [vmem:[#allocation2 + $0x24] sm:$0xfe]   ;;  %v6659_v16 = vld [vmem:[#allocation2 + $0x2c] ss:$0 sps:$4 sm:$0x11]  }
  0xed   : > { %v1635_v19 = vpop.permute.xlu0 %1634  ;;  %v3641_v63 = vsel %vm2727_vm14, %v3639_v28, %v3640_v30  ;;  %v3638_v33 = vsel %vm2727_vm14, %v3636_v34, %v3637_v9  ;;  %v4943_v48 = vsel %vm2727_vm14, %v4941_v13, %v4942_v26  ;;  %v4944_v50 = vrot.slane %v6658_v44, 1  ;;  %v6665_v58 = vld [vmem:[#allocation2 + $0x98] ss:$0 sps:$4 sm:$0x11]   ;;  %v6674_v44 = vld [vmem:[#allocation2 + $0x84] sm:$0xfe]  }
  0xee   : > { %v1798_v59 = vsel %vm7663_vm8, %v1635_v19, %v1797_v18  ;;  %v2760_v18 = vsel %vm2727_vm14, %v2758_v14, %v2759_v22  ;;  %v2762_v19 = vrot.slane %v6643_v62, 1  ;;  %v4514_v14 = vrot.slane %v4512_v10, 1  ;;  %v6669_v51 = vld [vmem:[#allocation2 + $0x44] ss:$0 sps:$4 sm:$0x11]  }
  0xef   : > { %1799 = vst [vmem:[#allocation2 + $0xbc] sm:$0x1] %v1798_v59  ;;  %2796 = vrot.lane.b32.xlu0 %v2760_v18, %s6832_s14  ;;  %3674 = vrot.lane.b32.xlu1 %v3635_v29, %s6832_s14  ;;  %v1075_v59 = vrot.slane %v7620_v45, 4  ;;  %v4527_v22 = vor.u32 %v4526_v12, %v4522_v46  ;;  %v2444_v18 = vor.u32 %v2443_v37, %v2439_v39  ;;  %v6656_v29 = vld [vmem:[#allocation2 + $0x90] sm:$0xfe]   ;;  %v2765_v62 = vrot.slane %v6657_v0, 1 }
  0xf0   : > { %v2763_v8 = vsel %vm2727_vm14, %v2761_v41, %v2762_v19  ;;  %v4515_v36 = vor.u32 %v4514_v14, %v4510_v5  ;;  %v2764_v35 = vrot.slane %v6656_v29, 1  ;;  %v1637_v41 = vpop.permute.xlu1 %1636  ;;  %v1800_v19 = vld [vmem:[#allocation2 + $0xc0] sm:$0xf]  ;;  %v6664_v12 = vld [vmem:[#allocation2 + $0x90] sm:$0xff]   ;;  %v3320_v28 = vshll.u32 %v6665_v58, 16 }
  0xf1   : > { %v1639_v1 = vpop.permute.xlu0 %1638  ;;  %v2449_v31 = vsel %vm2293_vm13, %v2444_v18, %v2448_v55  ;;  %v6668_v14 = vld [vmem:[#allocation2 + $0x3c] sm:$0xff]   ;;  %v4553_v32 = vshll.u32 %v6669_v51, 16  ;;  %v6673_v3 = vld [vmem:[#allocation2 + $0x98] ss:$0 sps:$4 sm:$0x11]  }
  0xf2   : > { %1803 = vst.msk [vmem:[#allocation2 + $0xc4] sm:$0xf] %vm1690_vm1, %v1639_v1  ;;  %v4531_v1 = vrot.slane %v4529_v21, 1  ;;  %v2766_v17 = vsel %vm2727_vm14, %v2764_v35, %v2765_v62  ;;  %v6662_v21 = vld [vmem:[#allocation2 + $0x9c] sm:$0xff]   ;;  %v4546_v30 = vshrl.u32 %v6668_v14, 16  ;;  %v3322_v47 = vrot.slane %v3320_v28, 1 }
  0xf3   : > { %3388 = vrot.lane.b32.xlu0 %v3287_v56, %s6831_s13  ;;  %2508 = vrot.lane.b32.xlu1 %v2437_v43, %s6831_s13  ;;  %v4945_v56 = vrot.slane %v6659_v16, 1  ;;  %v1801_v43 = vsel %vm7658_vm6, %v1637_v41, %v1800_v19  ;;  %v2451_v54 = vshrl.u32 %v6662_v21, 16  ;;  %v2453_v53 = vshll.u32 %v6662_v21, 16  ;;  %v6666_v45 = vld [vmem:[#allocation2 + $0x9c] sm:$0xfe]  }
  0xf4   : > { %v4532_v23 = vsel %vm2293_vm13, %v4527_v22, %v4531_v1  ;;  %1802 = vst [vmem:[#allocation2 + $0xc0] sm:$0xf] %v1801_v43  ;;  %v2458_v1 = vshll.u32 %v6663_v57, 16  ;;  %v3313_v22 = vshrl.u32 %v6664_v12, 16  ;;  %v2767_v34 = vrot.slane %v6666_v45, 1  ;;  %v1641_v37 = vpop.permute.xlu1 %1640 }
  0xf5   : > { %v2487_v25 = vpop.permute.xlu0 %2486  ;;  %v4946_v46 = vsel %vm2727_vm14, %v4944_v50, %v4945_v56  ;;  %v2455_v20 = vrot.slane %v2453_v53, 1  ;;  %v4555_v26 = vrot.slane %v4553_v32, 1  ;;  %v3646_v41 = vrot.slane %v6673_v3, 1  ;;  %v6675_v19 = vld [vmem:[#allocation2 + $0x8c] ss:$0 sps:$4 sm:$0x11]  }
  0xf6   : > { %2535 = vst.msk [vmem:[#allocation3] sm:$0xff] %vm2534_vm0, %v2487_v25  ;;  %v4520_v25 = vsel %vm2293_vm13, %v4515_v36, %v4519_v27  ;;  %v2460_v39 = vrot.slane %v2458_v1, 1  ;;  %v3315_v36 = vshll.u32 %v6664_v12, 16  ;;  %v3642_v50 = vrot.slane %v6674_v44, 1  ;;  %v6676_v56 = vld [vmem:[#allocation2 + $0xa8] sm:$0xff]   ;;  %v6684_v53 = vld [vmem:[#allocation2 + $0x9c] sm:$0xff]  }
  0xf7   : > { %3390 = vrot.lane.b32.xlu0 %v3299_v24, %s6831_s13  ;;  %2798 = vrot.lane.b32.xlu1 %v2763_v8, %s6832_s14  ;;  %v3308_v24 = vshll.u32 %v6661_v7, 16  ;;  %v1239_v8 = vld [vmem:[#allocation2 + $0xc8] sm:$0x1]  ;;  %v2456_v15 = vor.u32 %v2455_v20, %v2451_v54  ;;  %v3643_v7 = vrot.slane %v6675_v19, 1  ;;  %v2463_v57 = vshrl.u32 %v6676_v56, 16 }
  0xf8   : > { %v1240_v5 = vsel %vm7192_vm11, %v1075_v59, %v1239_v8  ;;  %v3317_v61 = vrot.slane %v3315_v36, 1  ;;  %v4548_v59 = vshll.u32 %v6668_v14, 16  ;;  %v6678_v8 = vld [vmem:[#allocation2 + $0x30] sm:$0xfe]   ;;  %v3325_v36 = vshrl.u32 %v6684_v53, 16  ;;  %v6694_v19 = vld [vmem:[#allocation2 + $0x48] sm:$0xff]  }
  0xf9   : > { %v2777_v40 = vpop.permute.xlu0 %2776  ;;  %v3310_v60 = vrot.slane %v3308_v24, 1  ;;  %1241 = vst [vmem:[#allocation2 + $0xc8] sm:$0x1] %v1240_v5  ;;  %v6679_v12 = vld [vmem:[#allocation2 + $0x38] ss:$0 sps:$4 sm:$0x11]   ;;  %v3644_v1 = vsel %vm2727_vm14, %v3642_v50, %v3643_v7 }
  0xfa   : > { %2825 = vst.msk [vmem:[#allocation3] sm:$0xff] %vm2824_vm3, %v2777_v40  ;;  %v3301_v40 = vshrl.u32 %v6660_v4, 16  ;;  %v3318_v4 = vor.u32 %v3317_v61, %v3313_v22  ;;  %v4550_v42 = vrot.slane %v4548_v59, 1  ;;  %v4947_v14 = vrot.slane %v6678_v8, 1  ;;  %v6682_v45 = vld [vmem:[#allocation2 + $0x3c] sm:$0xfe]  }
  0xfb   : > { %4703 = vrot.lane.b32.xlu0 %v4532_v23, %s6831_s13  ;;  %4701 = vrot.lane.b32.xlu1 %v4520_v25, %s6831_s13  ;;  %v6667_v23 = vld [vmem:[#allocation2 + $0xa4] ss:$0 sps:$4 sm:$0x11]   ;;  %v2461_v25 = vsel %vm2293_vm13, %v2456_v15, %v2460_v39  ;;  %v6680_v39 = vld [vmem:[#allocation2 + $0xa8] sm:$0xfe]   ;;  %v3327_v59 = vshll.u32 %v6684_v53, 16 }
  0xfc   : > { %v3306_v10 = vor.u32 %v3305_v11, %v3301_v40  ;;  %v2768_v9 = vrot.slane %v6667_v23, 1  ;;  %v3323_v49 = vsel %vm2293_vm13, %v3318_v4, %v3322_v47  ;;  %v6671_v40 = vld [vmem:[#allocation2 + $0x38] ss:$0 sps:$4 sm:$0x11]   ;;  %v4551_v29 = vor.u32 %v4550_v42, %v4546_v30 }
  0xfd   : > { %v4541_v0 = vshll.u32 %v6671_v40, 16  ;;  %v6677_v11 = vld [vmem:[#allocation2 + $0xb0] ss:$0 sps:$4 sm:$0x11]   ;;  %v2770_v15 = vrot.slane %v6680_v39, 1  ;;  %vm3802_vm11 = vcmask 1043456  }
  0xfe   : > { %v3311_v27 = vsel %vm2293_vm13, %v3306_v10, %v3310_v60  ;;  %v2769_v18 = vsel %vm2727_vm14, %v2767_v34, %v2768_v9  ;;  %v4556_v52 = vsel %vm2293_vm13, %v4551_v29, %v4555_v26  ;;  %v2465_v10 = vshll.u32 %v6676_v56, 16  ;;  %v6681_v22 = vld [vmem:[#allocation2 + $0xb0] ss:$0 sps:$4 sm:$0x11]  }
  0xff   : > { %3678 = vrot.lane.b32.xlu0 %v3641_v63, %s6832_s14  ;;  %3676 = vrot.lane.b32.xlu1 %v3638_v33, %s6832_s14  ;;  %v6670_v63 = vld [vmem:[#allocation2 + $0x30] sm:$0xff]   ;;  %v2470_v24 = vshll.u32 %v6677_v11, 16  ;;  %v4948_v60 = vrot.slane %v6679_v12, 1  ;;  %v2771_v61 = vrot.slane %v6681_v22, 1  ;;  %v3329_v9 = vrot.slane %v3327_v59, 1 }
 0x100   : > { %v1804_v38 = vld [vmem:[#allocation2 + $0xc8] sm:$0x1]  ;;  %v4534_v55 = vshrl.u32 %v6670_v63, 16  ;;  %v4536_v13 = vshll.u32 %v6670_v63, 16  ;;  %v2467_v54 = vrot.slane %v2465_v10, 1  ;;  %v4558_v22 = vshrl.u32 %v6694_v19, 16 }
 0x101   : > { %v1805_v33 = vsel %vm7663_vm8, %v1641_v37, %v1804_v38  ;;  %v2472_v5 = vrot.slane %v2470_v24, 1  ;;  %v4949_v23 = vsel %vm2727_vm14, %v4947_v14, %v4948_v60  ;;  %v6683_v47 = vld [vmem:[#allocation2 + $0x44] ss:$0 sps:$4 sm:$0x11]   ;;  %v2772_v42 = vsel %vm2727_vm14, %v2770_v15, %v2771_v61  ;;  %v2841_v29 = vld [vmem:[#allocation3] sm:$0xff] }
 0x102   : > { %1806 = vst [vmem:[#allocation2 + $0xc8] sm:$0x1] %v1805_v33  ;;  %v4538_v35 = vrot.slane %v4536_v13, 1  ;;  %v2468_v20 = vor.u32 %v2467_v54, %v2463_v57  ;;  %v6685_v4 = vld [vmem:[#allocation2 + $0xa4] ss:$0 sps:$4 sm:$0x11]   ;;  %v3330_v33 = vor.u32 %v3329_v9, %v3325_v36  ;;  %6391 = vmatprep.mubr.msk.bf16.mxu0 %vm3753_vm7, %v2841_v29 }
 0x103   : > { %2510 = vrot.lane.b32.xlu0 %v2449_v31, %s6831_s13  ;;  %4989 = vrot.lane.b32.xlu1 %v4943_v48, %s6832_s14  ;;  %v6672_v31 = vld [vmem:[#allocation2 + $0x90] sm:$0xfe]   ;;  %v4543_v48 = vrot.slane %v4541_v0, 1  ;;  %v4951_v34 = vrot.slane %v6683_v47, 1  ;;  %v3332_v38 = vshll.u32 %v6685_v4, 16  ;;  %v6688_v13 = vld [vmem:[#allocation2 + $0xa8] sm:$0xff]  }
 0x104   : > { %v3645_v62 = vrot.slane %v6672_v31, 1  ;;  %v4539_v16 = vor.u32 %v4538_v35, %v4534_v55  ;;  %v2473_v30 = vsel %vm2293_vm13, %v2468_v20, %v2472_v5  ;;  %v6689_v0 = vld [vmem:[#allocation2 + $0xb0] ss:$0 sps:$4 sm:$0x11]   ;;  %v6700_v20 = vld [vmem:[#allocation2 + $0x18] sm:$0xff]   ;;  %v4560_v36 = vshll.u32 %v6694_v19, 16 }
 0x105   : > { %v6693_v24 = vld [vmem:[#allocation2 + $0x5c] ss:$0 sps:$4 sm:$0x11]   ;;  %v6695_v14 = vld [vmem:[#allocation2 + $0x50] ss:$0 sps:$4 sm:$0x11]  }
 0x106   : > { %v4544_v43 = vsel %vm2293_vm13, %v4539_v16, %v4543_v48  ;;  %v3647_v21 = vsel %vm2727_vm14, %v3645_v62, %v3646_v41  ;;  %v3339_v48 = vshll.u32 %v6688_v13, 16  ;;  %v6692_v62 = vld [vmem:[#allocation2 + $0x54] sm:$0xff]   ;;  %v3344_v16 = vshll.u32 %v6689_v0, 16  ;;  %v6696_v61 = vld [vmem:[#allocation2 + $0xa8] sm:$0xfe]   ;;  %2103 = vst.msk [vmem:[#allocation3 + $0x10] sm:$0xff] %vm2100_vm15, %v6700_v20 }
 0x107   : > { %2800 = vrot.lane.b32.xlu0 %v2766_v17, %s6832_s14  ;;  %4991 = vrot.lane.b32.xlu1 %v4946_v46, %s6832_s14  ;;  %v6690_v41 = vld [vmem:[#allocation2 + $0xb4] sm:$0xfe]   ;;  %v4570_v8 = vshrl.u32 %v6692_v62, 16  ;;  %v4572_v12 = vshll.u32 %v6692_v62, 16  ;;  %v4577_v5 = vshll.u32 %v6693_v24, 16  ;;  %v4565_v15 = vshll.u32 %v6695_v14, 16 }
 0x108   : > { %v3341_v56 = vrot.slane %v3339_v48, 1  ;;  %v3346_v11 = vrot.slane %v3344_v16, 1  ;;  %v6705_v48 = vld [vmem:[#allocation2 + $0xc] sm:$0xff]   ;;  %v6710_v14 = vld [vmem:[#allocation2 + $0x54] sm:$0xfe]  }
 0x109   : > { %v4567_v59 = vrot.slane %v4565_v15, 1  ;;  %2988 = vst.msk [vmem:[#allocation3] sm:$0xff] %vm2100_vm15, %v6705_v48  ;;  %v6712_v24 = vld [vmem:[#allocation2 + $0x30] sm:$0xff]   ;;  %v6711_v20 = vld [vmem:[#allocation2 + $0x5c] ss:$0 sps:$4 sm:$0x11]  }
 0x10a   : > { %2105 = vst.msk [vmem:[#allocation3 + $0x20] sm:$0xff] %vm2100_vm15, %v6712_v24  ;;  %v6724_v24 = vld [vmem:[#allocation2 + $0xbc] ss:$0 sps:$4 sm:$0x11]  }
 0x10b   : > { %3392 = vrot.lane.b32.xlu0 %v3311_v27, %s6831_s13  ;;  %2512 = vrot.lane.b32.xlu1 %v2461_v25, %s6831_s13  ;;  %v6686_v27 = vld [vmem:[#allocation2 + $0xb4] sm:$0xff]   ;;  %v4950_v25 = vrot.slane %v6682_v45, 1  ;;  %v4562_v45 = vrot.slane %v4560_v36, 1 }
 0x10c   : > { %v2475_v32 = vshrl.u32 %v6686_v27, 16  ;;  %v2477_v40 = vshll.u32 %v6686_v27, 16 }
 0x10d   : > { %v4952_v63 = vsel %vm2727_vm14, %v4950_v25, %v4951_v34  ;;  %v3651_v25 = vrot.slane %v6696_v61, 1  ;;  %v4563_v9 = vor.u32 %v4562_v45, %v4558_v22  ;;  %v6713_v22 = vld [vmem:[#allocation2 + $0x24] sm:$0xff]  }
 0x10e   : > { %v2479_v26 = vrot.slane %v2477_v40, 1  ;;  %2104 = vst.msk [vmem:[#allocation3 + $0x18] sm:$0xff] %vm2100_vm15, %v6713_v22  ;;  %v8105_v61 = vld [vmem:[%s8702_s6 + $0x8] ss:$0 sps:$4 sm:$0xff]  }
 0x10f   : > { %3394 = vrot.lane.b32.xlu0 %v3323_v49, %s6831_s13  ;;  %2802 = vrot.lane.b32.xlu1 %v2769_v18, %s6832_s14  ;;  %v6687_v49 = vld [vmem:[#allocation2 + $0xbc] ss:$0 sps:$4 sm:$0x11]   ;;  %v3334_v18 = vrot.slane %v3332_v38, 1  ;;  %v6698_v38 = vld [vmem:[#allocation2 + $0x9c] sm:$0xfe]  }
 0x110   : > { %v8022_v17 = vpop.permute.xlu1 %2778  ;;  %v2482_v55 = vshll.u32 %v6687_v49, 16  ;;  %v2480_v44 = vor.u32 %v2479_v26, %v2475_v32  ;;  %v6699_v49 = vld [vmem:[#allocation2 + $0xa4] ss:$0 sps:$4 sm:$0x11]   ;;  %v6703_v26 = vld [vmem:[#allocation2 + $0x48] sm:$0xfe]  }
 0x111   : > { %v3335_v31 = vsel %vm2293_vm13, %v3330_v33, %v3334_v18  ;;  %v3648_v33 = vrot.slane %v6698_v38, 1  ;;  %v3649_v32 = vrot.slane %v6699_v49, 1  ;;  %v6701_v18 = vld [vmem:[#allocation2 + $0xb4] sm:$0xff]   ;;  %v8122_v38 = vsel %vm3802_vm11, %v8105_v61, 0 }
 0x112   : > { %v2484_v35 = vrot.slane %v2482_v55, 1  ;;  %v6702_v55 = vld [vmem:[#allocation2 + $0xbc] ss:$0 sps:$4 sm:$0x11]   ;;  %v3349_v0 = vshrl.u32 %v6701_v18, 16 }
 0x113   : > { %4707 = vrot.lane.b32.xlu0 %v4556_v52, %s6831_s13  ;;  %4705 = vrot.lane.b32.xlu1 %v4544_v43, %s6831_s13  ;;  %v3337_v52 = vshrl.u32 %v6688_v13, 16  ;;  %v6691_v43 = vld [vmem:[#allocation2 + $0xbc] ss:$0 sps:$4 sm:$0x11]  }
 0x114   : > { %v2485_v7 = vsel %vm2293_vm13, %v2480_v44, %v2484_v35  ;;  %v2774_v10 = vrot.slane %v6691_v43, 1  ;;  %v3356_v35 = vshll.u32 %v6702_v55, 16  ;;  %v4953_v43 = vrot.slane %v6703_v26, 1 }
 0x115   : > { %v3342_v57 = vor.u32 %v3341_v56, %v3337_v52  ;;  %v6704_v52 = vld [vmem:[#allocation2 + $0x50] ss:$0 sps:$4 sm:$0x11]  }
 0x116   : > { %v8025_v46 = vpop.permute.xlu0 %2780  ;;  %v3358_v44 = vrot.slane %v3356_v35, 1  ;;  %v4954_v16 = vrot.slane %v6704_v52, 1 }
 0x117   : > { %3682 = vrot.lane.b32.xlu0 %v3647_v21, %s6832_s14  ;;  %3680 = vrot.lane.b32.xlu1 %v3644_v1, %s6832_s14  ;;  %v2773_v21 = vrot.slane %v6690_v41, 1  ;;  %v3347_v54 = vsel %vm2293_vm13, %v3342_v57, %v3346_v11  ;;  %v4574_v1 = vrot.slane %v4572_v12, 1  ;;  %v6706_v41 = vld [vmem:[#allocation2 + $0xc] sm:$0xff]  }
 0x118   : > { %2102 = vst.msk [vmem:[#allocation3 + $0x8] sm:$0xff] %vm2100_vm15, %v6706_v41  ;;  %v4955_v57 = vsel %vm2727_vm14, %v4953_v43, %v4954_v16  ;;  %v6721_v41 = vld [vmem:[#allocation2 + $0xc0] sm:$0xfe]   ;;  %v6725_v43 = vld [vmem:[%s8702_s6 + $0xc] sm:$0xff]  }
 0x119   : > { %v8031_v58 = vpop.permute.xlu1 %2782  ;;  %v2775_v39 = vsel %vm2727_vm14, %v2773_v21, %v2774_v10  ;;  %v4575_v27 = vor.u32 %v4574_v1, %v4570_v8  ;;  %v6708_v21 = vld [vmem:[#allocation2 + $0xc0] sm:$0xff]   ;;  %v6709_v10 = vld [vmem:[#allocation2 + $0xc8] ss:$0 sps:$4 sm:$0x11]   ;;  %6351 = vmatprep.subr.bf16.mxu1 %v6725_v43 }
 0x11a   : > { %v8033_v28 = vpop.permute.xlu0 %3660  ;;  %v3361_v12 = vshrl.u32 %v6708_v21, 16  ;;  %6352 = vmatpush3.bf16.msra.mxu1 %v6725_v43  ;;  %v6743_v43 = vld [vmem:[#allocation2 + $0x8c] ss:$0 sps:$4 sm:$0x11]  }
 0x11b   : > { %2514 = vrot.lane.b32.xlu0 %v2473_v30, %s6831_s13  ;;  %4993 = vrot.lane.b32.xlu1 %v4949_v23, %s6832_s14  ;;  %v4579_v30 = vrot.slane %v4577_v5, 1  ;;  %v6697_v23 = vld [vmem:[#allocation2 + $0xb0] ss:$0 sps:$4 sm:$0x11]  }
 0x11d   : > { %v8039_v51 = vpop.permute.xlu1 %3662  ;;  %v4580_v47 = vsel %vm2293_vm13, %v4575_v27, %v4579_v30  ;;  %v4956_v27 = vrot.slane %v6710_v14, 1  ;;  %v6715_v30 = vld [vmem:[#allocation2 + $0x6c] sm:$0xff]   ;;  %v6729_v14 = vld [vmem:[#allocation2 + $0x80] ss:$0 sps:$4 sm:$0x11]  }
 0x11f   : > { %2804 = vrot.lane.b32.xlu0 %v2772_v42, %s6832_s14  ;;  %4995 = vrot.lane.b32.xlu1 %v4952_v63, %s6832_s14  ;;  %v3652_v42 = vrot.slane %v6697_v23, 1  ;;  %v4568_v63 = vsel %vm2293_vm13, %v4563_v9, %v4567_v59  ;;  %v4594_v59 = vshrl.u32 %v6715_v30, 16  ;;  %v6717_v9 = vld [vmem:[#allocation2 + $0x60] sm:$0xff]  }
 0x121   : > { %v8042_v37 = vpop.permute.xlu0 %2784  ;;  %v3653_v40 = vsel %vm2727_vm14, %v3651_v25, %v3652_v42  ;;  %v4596_v25 = vshll.u32 %v6715_v30, 16  ;;  %v4613_v30 = vshll.u32 %v6729_v14, 16 }
 0x123   : > { %3396 = vrot.lane.b32.xlu0 %v3335_v31, %s6831_s13  ;;  %2516 = vrot.lane.b32.xlu1 %v2485_v7, %s6831_s13  ;;  %v3351_v31 = vshll.u32 %v6701_v18, 16  ;;  %v8082_v7 = vld [vmem:[%s8702_s6] sm:$0xff]   ;;  %v4598_v42 = vrot.slane %v4596_v25, 1 }
 0x124   : > { %6387 = vmatprep.subr.bf16.mxu0 %v8082_v7 }
 0x125   : > { %v8049_v3 = vpop.permute.xlu1 %2786  ;;  %v8052_v50 = vpop.permute.xlu0 %3664  ;;  %v3353_v62 = vrot.slane %v3351_v31, 1  ;;  %6388 = vmatpush3.bf16.msra.mxu0 %v8082_v7  ;;  %v4599_v18 = vor.u32 %v4598_v42, %v4594_v59  ;;  %v6720_v31 = vld [vmem:[#allocation2 + $0x18] sm:$0xff]   ;;  %v6734_v42 = vld [vmem:[#allocation2 + $0x30] sm:$0xff]  }
 0x126   : > { %6528 = vmatprep.subr.msk.bf16.mxu0 %vm3802_vm11, %v8105_v61 }
 0x127   : > { %3398 = vrot.lane.b32.xlu0 %v3347_v54, %s6831_s13  ;;  %2806 = vrot.lane.b32.xlu1 %v2775_v39, %s6832_s14  ;;  %v3354_v11 = vor.u32 %v3353_v62, %v3349_v0  ;;  %v3363_v54 = vshll.u32 %v6708_v21, 16  ;;  %v6719_v0 = vld [vmem:[#allocation2 + $0x24] sm:$0xff]   ;;  %v6723_v21 = vld [vmem:[#allocation2 + $0xb4] sm:$0xfe]  }
 0x129   : > { %v8057_v53 = vpop.permute.xlu1 %3666  ;;  %v3359_v8 = vsel %vm2293_vm13, %v3354_v11, %v3358_v44  ;;  %v3365_v39 = vrot.slane %v3363_v54, 1  ;;  %6390 = vmatpush3.bf16.msra.mxu0 %v8122_v38  ;;  %v3657_v11 = vrot.slane %v6721_v41, 1  ;;  %v6727_v54 = vld [vmem:[#allocation2 + $0x3c] sm:$0xff]  }
 0x12a   : > { %2106 = vst.msk [vmem:[#allocation3 + $0x28] sm:$0xff] %vm2100_vm15, %v6727_v54 }
 0x12b   : > { %4711 = vrot.lane.b32.xlu0 %v4580_v47, %s6831_s13  ;;  %4709 = vrot.lane.b32.xlu1 %v4568_v63, %s6831_s13  ;;  %v3366_v15 = vor.u32 %v3365_v39, %v3361_v12  ;;  %v6718_v63 = vld [vmem:[#allocation2 + $0x68] ss:$0 sps:$4 sm:$0x11]   ;;  %v3654_v12 = vrot.slane %v6723_v21, 1 }
 0x12c   : > { %v4589_v26 = vshll.u32 %v6718_v63, 16 }
 0x12d   : > { %v8059_v60 = vpop.permute.xlu0 %2788 }
 0x12e   : > { %v4591_v48 = vrot.slane %v4589_v26, 1 }
 0x12f   : > { %3686 = vrot.lane.b32.xlu0 %v3653_v40, %s6832_s14 }
 0x131   : > { %v2491_v4 = vpop.permute.xlu0 %2490  ;;  %v8066_v34 = vpop.permute.xlu1 %2790 }
 0x132   : > { %2537 = vst.msk [vmem:[#allocation3 + $0x10] sm:$0xff] %vm2534_vm0, %v2491_v4  ;;  %v6716_v4 = vld [vmem:[#allocation2 + $0x74] ss:$0 sps:$4 sm:$0x11]  }
 0x133   : > { %2827 = vst.msk [vmem:[#allocation3 + $0x10] sm:$0xff] %vm2824_vm3, %v8025_v46  ;;  %v3650_v46 = vsel %vm2727_vm14, %v3648_v33, %v3649_v32  ;;  %3400 = vrot.lane.b32.xlu0 %v3359_v8, %s6831_s13  ;;  %v4601_v49 = vshll.u32 %v6716_v4, 16  ;;  %v4582_v33 = vshrl.u32 %v6717_v9, 16  ;;  %v4584_v32 = vshll.u32 %v6717_v9, 16 }
 0x134   : > { %3684 = vrot.lane.b32.xlu1 %v3650_v46, %s6832_s14 }
 0x135   : > { %v3373_v13 = vpop.permute.xlu0 %3372  ;;  %v2489_v29 = vpop.permute.xlu1 %2488 }
 0x136   : > { %3420 = vst.msk [vmem:[#allocation3] sm:$0xff] %vm2534_vm0, %v3373_v13  ;;  %2536 = vst.msk [vmem:[#allocation3 + $0x8] sm:$0xff] %vm2534_vm0, %v2489_v29  ;;  %v4603_v13 = vrot.slane %v4601_v49, 1  ;;  %v4586_v29 = vrot.slane %v4584_v32, 1  ;;  %v6735_v32 = vld [vmem:[#allocation2 + $0x78] sm:$0xfe]  }
 0x137   : > { %3708 = vst.msk [vmem:[#allocation3] sm:$0xff] %vm2824_vm3, %v8033_v28  ;;  %2826 = vst.msk [vmem:[#allocation3 + $0x8] sm:$0xff] %vm2824_vm3, %v8022_v17  ;;  %v3368_v28 = vshll.u32 %v6709_v10, 16  ;;  %v4957_v17 = vrot.slane %v6711_v20, 1 }
 0x138   : > { %4997 = vrot.lane.b32.xlu1 %v4955_v57, %s6832_s14  ;;  %v4604_v52 = vsel %vm2293_vm13, %v4599_v18, %v4603_v13  ;;  %v4587_v46 = vor.u32 %v4586_v29, %v4582_v33  ;;  %v6726_v57 = vld [vmem:[#allocation2 + $0x48] sm:$0xff]   ;;  %v6739_v18 = vld [vmem:[#allocation2 + $0x54] sm:$0xff]  }
 0x139   : > { %v2495_v19 = vpop.permute.xlu0 %2494  ;;  %v2493_v56 = vpop.permute.xlu1 %2492  ;;  %v3370_v36 = vrot.slane %v3368_v28, 1  ;;  %v4958_v47 = vsel %vm2727_vm14, %v4956_v27, %v4957_v17  ;;  %2107 = vst.msk [vmem:[#allocation3 + $0x30] sm:$0xff] %vm2100_vm15, %v6726_v57  ;;  %2108 = vst.msk [vmem:[#allocation3 + $0x38] sm:$0xff] %vm2100_vm15, %v6739_v18 }
 0x13a   : > { %2539 = vst.msk [vmem:[#allocation3 + $0x20] sm:$0xff] %vm2534_vm0, %v2495_v19  ;;  %2538 = vst.msk [vmem:[#allocation3 + $0x18] sm:$0xff] %vm2534_vm0, %v2493_v56  ;;  %v2843_v55 = vld [vmem:[#allocation3 + $0x10] sm:$0xff]  ;;  %v4592_v19 = vsel %vm2293_vm13, %v4587_v46, %v4591_v48 }
 0x13b   : > { %2829 = vst.msk [vmem:[#allocation3 + $0x20] sm:$0xff] %vm2824_vm3, %v8042_v37  ;;  %v3371_v37 = vsel %vm2293_vm13, %v3366_v15, %v3370_v36  ;;  %2828 = vst.msk [vmem:[#allocation3 + $0x18] sm:$0xff] %vm2824_vm3, %v8031_v58  ;;  %v6722_v56 = vld [vmem:[#allocation2 + $0xc8] ss:$0 sps:$4 sm:$0x11]  }
 0x13c   : > { %4999 = vrot.lane.b32.xlu1 %v4958_v47, %s6832_s14  ;;  %3402 = vrot.lane.b32.xlu0 %v3371_v37, %s6831_s13  ;;  %2990 = vst.msk [vmem:[#allocation3 + $0x10] sm:$0xff] %vm2100_vm15, %v6719_v0  ;;  %v3658_v10 = vrot.slane %v6722_v56, 1  ;;  %v6731_v15 = vld [vmem:[#allocation2 + $0x68] ss:$0 sps:$4 sm:$0x11]   ;;  %v4615_v37 = vrot.slane %v4613_v30, 1 }
 0x13d   : > { %v3377_v1 = vpop.permute.xlu0 %3376  ;;  %v3375_v5 = vpop.permute.xlu1 %3374  ;;  %v4960_v4 = vrot.slane %v6731_v15, 1  ;;  %v6742_v56 = vld [vmem:[#allocation2 + $0x84] sm:$0xff]  }
 0x13e   : > { %v2842_v35 = vld [vmem:[#allocation3 + $0x8] sm:$0xff]  ;;  %v3724_v62 = vld [vmem:[#allocation3] sm:$0xff]  ;;  %3422 = vst.msk [vmem:[#allocation3 + $0x10] sm:$0xff] %vm2534_vm0, %v3377_v1  ;;  %v3659_v1 = vsel %vm2727_vm14, %v3657_v11, %v3658_v10  ;;  %v4618_v57 = vshrl.u32 %v6742_v56, 16  ;;  %v4620_v10 = vshll.u32 %v6742_v56, 16  ;;  %v6750_v30 = vld [vmem:[#allocation2 + $0xa8] sm:$0xff]  }
 0x13f   : > { %6392 = vmatmul.mubr.msk.bf16.vlgmr.msra.gmra.mrb[0].mxu0 %vm3753_vm7, %v2842_v35  ;;  %2989 = vst.msk [vmem:[#allocation3 + $0x8] sm:$0xff] %vm2100_vm15, %v6720_v31  ;;  %6355 = vmatprep.mubr.msk.bf16.mxu1 %vm3753_vm7, %v3724_v62  ;;  %v6737_v31 = vld [vmem:[#allocation2 + $0x6c] sm:$0xfe]   ;;  %v6738_v35 = vld [vmem:[#allocation2 + $0x74] ss:$0 sps:$4 sm:$0x11]  }
 0x140   : > { %4715 = vrot.lane.b32.xlu0 %v4604_v52, %s6831_s13  ;;  %3710 = vst.msk [vmem:[#allocation3 + $0x10] sm:$0xff] %vm2824_vm3, %v8052_v50  ;;  %6395 = vmatprep.mubr.msk.bf16.mxu0 %vm3753_vm7, %v2843_v55  ;;  %v4965_v55 = vrot.slane %v6735_v32, 1  ;;  %v4962_v46 = vrot.slane %v6737_v31, 1  ;;  %v4963_v48 = vrot.slane %v6738_v35, 1  ;;  %v4656_v32 = vshll.u32 %v6750_v30, 16 }
 0x141   : > { %v8107_v45 = vpop.permute.xlu0 %2498  ;;  %v8109_v23 = vpop.permute.xlu1 %2496  ;;  %3421 = vst.msk [vmem:[#allocation3 + $0x8] sm:$0xff] %vm2534_vm0, %v3375_v5  ;;  %4713 = vrot.lane.b32.xlu1 %v4592_v19, %s6831_s13  ;;  %v3655_v5 = vrot.slane %v6724_v24, 1  ;;  %v6741_v62 = vld [vmem:[#allocation2 + $0x98] ss:$0 sps:$4 sm:$0x11]  }
 0x142   : > { %3709 = vst.msk [vmem:[#allocation3 + $0x8] sm:$0xff] %vm2824_vm3, %v8039_v51  ;;  %v6728_v51 = vld [vmem:[#allocation2 + $0x78] sm:$0xff]   ;;  %v2844_v59 = vld [vmem:[#allocation3 + $0x18] sm:$0xff] }
 0x143   : > { %2541 = vst.msk [vmem:[#allocation3 + $0x30] sm:$0xff] %vm2534_vm0, %v8107_v45  ;;  %v3656_v28 = vsel %vm2727_vm14, %v3654_v12, %v3655_v5  ;;  %2540 = vst.msk [vmem:[#allocation3 + $0x28] sm:$0xff] %vm2534_vm0, %v8109_v23  ;;  %v4606_v20 = vshrl.u32 %v6728_v51, 16  ;;  %v4608_v39 = vshll.u32 %v6728_v51, 16  ;;  %v2845_v22 = vld [vmem:[#allocation3 + $0x20] sm:$0xff]  ;;  %v6745_v12 = vld [vmem:[#allocation2 + $0x48] sm:$0xff]  }
 0x144   : > { %3690 = vrot.lane.b32.xlu0 %v3659_v1, %s6832_s14  ;;  %2831 = vst.msk [vmem:[#allocation3 + $0x30] sm:$0xff] %vm2824_vm3, %v8059_v60  ;;  %2830 = vst.msk [vmem:[#allocation3 + $0x28] sm:$0xff] %vm2824_vm3, %v8049_v3  ;;  %v6730_v60 = vld [vmem:[#allocation2 + $0x60] sm:$0xfe]   ;;  %v6732_v23 = vld [vmem:[%s8702_s6 + $0x14] ss:$0 sps:$4 sm:$0xff]  }
 0x145   : > { %v8125_v40 = vpop.permute.xlu0 %3380  ;;  %v8127_v58 = vpop.permute.xlu1 %3378  ;;  %3688 = vrot.lane.b32.xlu1 %v3656_v28, %s6832_s14  ;;  %v4610_v17 = vrot.slane %v4608_v39, 1  ;;  %v6733_v45 = vld [vmem:[#allocation2 + $0x3c] sm:$0xff]   ;;  %v4959_v47 = vrot.slane %v6730_v60, 1  ;;  %6527 = vmatprep.subr.msk.bf16.mxu1 %vm3802_vm11, %v6732_v23  ;;  %v3804_v49 = vsel %vm3802_vm11, %v6732_v23, 0  ;;  %2991 = vst.msk [vmem:[#allocation3 + $0x18] sm:$0xff] %vm2100_vm15, %v6734_v42  ;;  %v4625_v5 = vshll.u32 %v6743_v43, 16 }
 0x146   : > { %2992 = vst.msk [vmem:[#allocation3 + $0x20] sm:$0xff] %vm2100_vm15, %v6733_v45  ;;  %6354 = vmatpush3.bf16.msra.mxu1 %v3804_v49  ;;  %v6746_v39 = vld [vmem:[#allocation2 + $0x90] sm:$0xfe]   ;;  %v6752_v45 = vld [vmem:[#allocation2 + $0x9c] sm:$0xff]   ;;  %v4654_v49 = vshrl.u32 %v6750_v30, 16 }
 0x147   : > { %v4611_v25 = vor.u32 %v4610_v17, %v4606_v20  ;;  %6396 = vmatmul.mubr.msk.bf16.gmra.mrb[4].mxu0 %vm3753_vm7, %v2844_v59  ;;  %3424 = vst.msk [vmem:[#allocation3 + $0x20] sm:$0xff] %vm2534_vm0, %v8125_v40  ;;  %v4961_v33 = vsel %vm2727_vm14, %v4959_v47, %v4960_v4  ;;  %v6736_v40 = vld [vmem:[#allocation2 + $0x80] ss:$0 sps:$4 sm:$0x11]   ;;  %3423 = vst.msk [vmem:[#allocation3 + $0x18] sm:$0xff] %vm2534_vm0, %v8127_v58  ;;  %6459 = vmatprep.subr.bf16.mxu1 %v8082_v7  ;;  %v3726_v58 = vld [vmem:[#allocation3 + $0x10] sm:$0xff] }
 0x148   : > { %6399 = vmatprep.mubr.msk.bf16.mxu0 %vm3753_vm7, %v2845_v22  ;;  %3711 = vst.msk [vmem:[#allocation3 + $0x18] sm:$0xff] %vm2824_vm3, %v8057_v53  ;;  %v4966_v0 = vrot.slane %v6736_v40, 1  ;;  %v6740_v53 = vld [vmem:[#allocation2 + $0x90] sm:$0xff]   ;;  %v4627_v20 = vrot.slane %v4625_v5, 1  ;;  %v6748_v59 = vld [vmem:[#allocation2 + $0x84] sm:$0xfe]  }
 0x149   : > { %v8132_v44 = vpop.permute.xlu0 %3668  ;;  %v8134_v16 = vpop.permute.xlu1 %2500  ;;  %v4616_v63 = vsel %vm2293_vm13, %v4611_v25, %v4615_v37  ;;  %5001 = vrot.lane.b32.xlu1 %v4961_v33, %s6832_s14  ;;  %v3725_v13 = vld [vmem:[#allocation3 + $0x8] sm:$0xff]  ;;  %v4630_v41 = vshrl.u32 %v6740_v53, 16  ;;  %v4632_v19 = vshll.u32 %v6740_v53, 16  ;;  %v6749_v25 = vld [vmem:[#allocation2 + $0x8c] ss:$0 sps:$4 sm:$0x11]  }
 0x14a   : > { %3712 = vst.msk [vmem:[#allocation3 + $0x20] sm:$0xff] %vm2824_vm3, %v8132_v44  ;;  %4717 = vrot.lane.b32.xlu0 %v4616_v63, %s6831_s13  ;;  %6356 = vmatmul.mubr.msk.bf16.vlgmr.msra.gmra.mrb[0].mxu1 %vm3753_vm7, %v3725_v13  ;;  %v4967_v52 = vsel %vm2727_vm14, %v4965_v55, %v4966_v0  ;;  %v4968_v37 = vrot.slane %v6748_v59, 1  ;;  %v4969_v4 = vrot.slane %v6749_v25, 1  ;;  %v6751_v42 = vld [vmem:[#allocation2 + $0xb0] ss:$0 sps:$4 sm:$0x11]  }
 0x14b   : > { %2542 = vst.msk [vmem:[#allocation3 + $0x38] sm:$0xff] %vm2534_vm0, %v8134_v16  ;;  %6461 = vmatpush3.bf16.msra.mxu1 %v8082_v7  ;;  %6359 = vmatprep.mubr.msk.bf16.mxu1 %vm3753_vm7, %v3726_v58  ;;  %v4964_v7 = vsel %vm2727_vm14, %v4962_v46, %v4963_v48  ;;  %v4634_v11 = vrot.slane %v4632_v19, 1  ;;  %v2846_v24 = vld [vmem:[#allocation3 + $0x28] sm:$0xff]  ;;  %v2847_v51 = vld [vmem:[#allocation3 + $0x30] sm:$0xff]  ;;  %v4642_v40 = vshrl.u32 %v6752_v45, 16  ;;  %v4661_v55 = vshll.u32 %v6751_v42, 16 }
 0x14c   : > { %2832 = vst.msk [vmem:[#allocation3 + $0x38] sm:$0xff] %vm2824_vm3, %v8066_v34  ;;  %6529 = vmatprep.subr.msk.bf16.mxu1 %vm3802_vm11, %v8105_v61  ;;  %v4637_v34 = vshll.u32 %v6741_v62, 16  ;;  %v6744_v61 = vld [vmem:[#allocation2 + $0x60] sm:$0xff]   ;;  %v4970_v18 = vsel %vm2727_vm14, %v4968_v37, %v4969_v4  ;;  %v4658_v0 = vrot.slane %v4656_v32, 1  ;;  %v4644_v31 = vshll.u32 %v6752_v45, 16  ;;  %v6755_v46 = vld [vmem:[#allocation2 + $0x6c] sm:$0xff]  }
 0x14d   : > { %v8151_v50 = vpop.permute.xlu0 %2502  ;;  %v8153_v8 = vpop.permute.xlu1 %3382  ;;  %5003 = vrot.lane.b32.xlu1 %v4964_v7, %s6832_s14  ;;  %2109 = vst.msk [vmem:[#allocation3 + $0x40] sm:$0xff] %vm2100_vm15, %v6744_v61  ;;  %v4635_v28 = vor.u32 %v4634_v11, %v4630_v41  ;;  %2993 = vst.msk [vmem:[#allocation3 + $0x28] sm:$0xff] %vm2100_vm15, %v6745_v12  ;;  %v6753_v13 = vld [vmem:[#allocation2 + $0xa4] ss:$0 sps:$4 sm:$0x11]   ;;  %v4663_v35 = vrot.slane %v4661_v55, 1 }
 0x14e   : > { %5005 = vrot.lane.b32.xlu0 %v4967_v52, %s6832_s14  ;;  %v4639_v21 = vrot.slane %v4637_v34, 1  ;;  %2543 = vst.msk [vmem:[#allocation3 + $0x40] sm:$0xff] %vm2534_vm0, %v8151_v50  ;;  %3425 = vst.msk [vmem:[#allocation3 + $0x28] sm:$0xff] %vm2534_vm0, %v8153_v8  ;;  %v6747_v50 = vld [vmem:[#allocation2 + $0x98] ss:$0 sps:$4 sm:$0x11]   ;;  %v4659_v62 = vor.u32 %v4658_v0, %v4654_v49 }
 0x14f   : > { %6462 = vmatpush3.bf16.msra.mxu1 %v8122_v38  ;;  %6400 = vmatmul.mubr.msk.bf16.gmra.mrb[8].mxu0 %vm3753_vm7, %v2846_v24  ;;  %v4622_v38 = vrot.slane %v4620_v10, 1  ;;  %v3727_v14 = vld [vmem:[#allocation3 + $0x18] sm:$0xff]  ;;  %v4972_v23 = vrot.slane %v6747_v50, 1  ;;  %v4649_v58 = vshll.u32 %v6753_v13, 16  ;;  %v4646_v7 = vrot.slane %v4644_v31, 1  ;;  %2110 = vst.msk [vmem:[#allocation3 + $0x48] sm:$0xff] %vm2100_vm15, %v6755_v46 }
 0x150   : > { %6403 = vmatprep.mubr.msk.bf16.mxu0 %vm3753_vm7, %v2847_v51  ;;  %v4640_v60 = vsel %vm2293_vm13, %v4635_v28, %v4639_v21  ;;  %v6754_v52 = vld [vmem:[#allocation2 + $0x54] sm:$0xff]   ;;  %v4664_v56 = vsel %vm2293_vm13, %v4659_v62, %v4663_v35  ;;  %v6756_v61 = vld [vmem:[#allocation2 + $0xa8] sm:$0xfe]   ;;  %v6757_v11 = vld [vmem:[#allocation2 + $0xb0] ss:$0 sps:$4 sm:$0x11]  }
 0x151   : > { %v8166_v36 = vpop.permute.xlu0 %2792  ;;  %v8168_v27 = vpop.permute.xlu1 %3670  ;;  %v3728_v22 = vld [vmem:[#allocation3 + $0x20] sm:$0xff]  ;;  %v4623_v17 = vor.u32 %v4622_v38, %v4618_v57  ;;  %v4651_v19 = vrot.slane %v4649_v58, 1  ;;  %2994 = vst.msk [vmem:[#allocation3 + $0x30] sm:$0xff] %vm2100_vm15, %v6754_v52  ;;  %v4647_v43 = vor.u32 %v4646_v7, %v4642_v40  ;;  %v6760_v21 = vld [vmem:[#allocation2 + $0xc0] sm:$0xff]   ;;  %v4978_v24 = vrot.slane %v6757_v11, 1 }
 0x152   : > { %2833 = vst.msk [vmem:[#allocation3 + $0x40] sm:$0xff] %vm2824_vm3, %v8166_v36  ;;  %6360 = vmatmul.mubr.msk.bf16.gmra.mrb[4].mxu1 %vm3753_vm7, %v3727_v14  ;;  %3713 = vst.msk [vmem:[#allocation3 + $0x28] sm:$0xff] %vm2824_vm3, %v8168_v27  ;;  %4721 = vrot.lane.b32.xlu0 %v4640_v60, %s6831_s13  ;;  %v4971_v36 = vrot.slane %v6746_v39, 1  ;;  %v6758_v12 = vld [vmem:[#allocation2 + $0x9c] sm:$0xfe]   ;;  %v4678_v51 = vshrl.u32 %v6760_v21, 16 }
 0x153   : > { %6363 = vmatprep.mubr.msk.bf16.mxu1 %vm3753_vm7, %v3728_v22  ;;  %v4628_v47 = vsel %vm2293_vm13, %v4623_v17, %v4627_v20  ;;  %v2848_v41 = vld [vmem:[#allocation3 + $0x38] sm:$0xff]  ;;  %v6759_v5 = vld [vmem:[#allocation2 + $0xa4] ss:$0 sps:$4 sm:$0x11]   ;;  %v4974_v38 = vrot.slane %v6758_v12, 1  ;;  %v4680_v14 = vshll.u32 %v6760_v21, 16 }
 0x154   : > { %4719 = vrot.lane.b32.xlu1 %v4628_v47, %s6831_s13  ;;  %v4973_v27 = vsel %vm2727_vm14, %v4971_v36, %v4972_v23  ;;  %v6762_v60 = vld [vmem:[#allocation2 + $0xb4] sm:$0xff]   ;;  %v6763_v30 = vld [vmem:[#allocation2 + $0xbc] ss:$0 sps:$4 sm:$0x11]   ;;  %v6766_v40 = vld [vmem:[#allocation2 + $0xc0] sm:$0xfe]  }
 0x155   : > { %v8178_v9 = vpop.permute.xlu0 %3384  ;;  %v8180_v3 = vpop.permute.xlu1 %2504  ;;  %v4682_v50 = vrot.slane %v4680_v14, 1  ;;  %v4666_v45 = vshrl.u32 %v6762_v60, 16  ;;  %v4668_v47 = vshll.u32 %v6762_v60, 16  ;;  %v6764_v23 = vld [vmem:[#allocation2 + $0x78] sm:$0xff]   ;;  %v4673_v25 = vshll.u32 %v6763_v30, 16  ;;  %v6777_v11 = vld [vmem:[#allocation2 + $0x24] sm:$0xff]  }
 0x156   : > { %5009 = vrot.lane.b32.xlu0 %v4973_v27, %s6832_s14  ;;  %3426 = vst.msk [vmem:[#allocation3 + $0x30] sm:$0xff] %vm2534_vm0, %v8178_v9  ;;  %2544 = vst.msk [vmem:[#allocation3 + $0x48] sm:$0xff] %vm2534_vm0, %v8180_v3  ;;  %v4652_v9 = vsel %vm2293_vm13, %v4647_v43, %v4651_v19  ;;  %v4977_v3 = vrot.slane %v6756_v61, 1  ;;  %v6765_v27 = vld [vmem:[#allocation2 + $0x60] sm:$0xff]   ;;  %v4983_v0 = vrot.slane %v6766_v40, 1  ;;  %v8319_v61 = vld [vmem:[#allocation2 + $0xcc] sm:$0xff]  }
 0x157   : > { %6404 = vmatmul.mubr.msk.bf16.gmra.mrb[12].mxu0 %vm3753_vm7, %v2848_v41  ;;  %v4683_v59 = vor.u32 %v4682_v50, %v4678_v51  ;;  %v4670_v4 = vrot.slane %v4668_v47, 1  ;;  %2111 = vst.msk [vmem:[#allocation3 + $0x50] sm:$0xff] %vm2100_vm15, %v6764_v23  ;;  %v4675_v32 = vrot.slane %v4673_v25, 1  ;;  %2995 = vst.msk [vmem:[#allocation3 + $0x38] sm:$0xff] %vm2100_vm15, %v6765_v27  ;;  %v6768_v35 = vld [vmem:[#allocation2 + $0xb4] sm:$0xfe]  }
 0x158   : > { %5007 = vrot.lane.b32.xlu1 %v4970_v18, %s6832_s14  ;;  %v4979_v28 = vsel %vm2727_vm14, %v4977_v3, %v4978_v24  ;;  %v6767_v18 = vld [vmem:[#allocation2 + $0xc8] ss:$0 sps:$4 sm:$0x11]   ;;  %v6769_v52 = vld [vmem:[#allocation2 + $0xbc] ss:$0 sps:$4 sm:$0x11]  }
 0x159   : > { %v8196_v29 = vpop.permute.xlu0 %3672  ;;  %v8198_v26 = vpop.permute.xlu1 %2794  ;;  %v3729_v34 = vld [vmem:[#allocation3 + $0x28] sm:$0xff]  ;;  %v4671_v13 = vor.u32 %v4670_v4, %v4666_v45  ;;  %v4984_v31 = vrot.slane %v6767_v18, 1  ;;  %v8306_v62 = vld [vmem:[#allocation3 + $0x40] sm:$0xff]  ;;  %v6772_v41 = vld [vmem:[#allocation2 + $0x6c] sm:$0xff]   ;;  %4318 = vst.msk [vmem:[#allocation3 + $0x8] sm:$0xff] %vm2100_vm15, %v6777_v11  ;;  %v4692_v2 = vshll.u32 %v8319_v61, 16 }
 0x15a   : > { %6364 = vmatmul.mubr.msk.bf16.gmra.mrb[8].mxu1 %vm3753_vm7, %v3729_v34  ;;  %4725 = vrot.lane.b32.xlu0 %v4664_v56, %s6831_s13  ;;  %3714 = vst.msk [vmem:[#allocation3 + $0x30] sm:$0xff] %vm2824_vm3, %v8196_v29  ;;  %2834 = vst.msk [vmem:[#allocation3 + $0x48] sm:$0xff] %vm2824_vm3, %v8198_v26  ;;  %v6761_v29 = vld [vmem:[#allocation2 + $0xc8] ss:$0 sps:$4 sm:$0x11]   ;;  %v4975_v26 = vrot.slane %v6759_v5, 1 }
 0x15b   : > { %v4685_v22 = vshll.u32 %v6761_v29, 16  ;;  %v4676_v58 = vsel %vm2293_vm13, %v4671_v13, %v4675_v32  ;;  %v6773_v19 = vld [vmem:[#allocation2 + $0x84] sm:$0xff]   ;;  %2996 = vst.msk [vmem:[#allocation3 + $0x40] sm:$0xff] %vm2100_vm15, %v6772_v41  ;;  %v6776_v56 = vld [vmem:[#allocation2 + $0x78] sm:$0xff]   ;;  %v8345_v12 = vld [vmem:[#allocation2 + $0xcc] sm:$0xfe]  }
 0x15c   : > { %4723 = vrot.lane.b32.xlu1 %v4652_v9, %s6831_s13  ;;  %v4976_v17 = vsel %vm2727_vm14, %v4974_v38, %v4975_v26  ;;  %2112 = vst.msk [vmem:[#allocation3 + $0x58] sm:$0xff] %vm2100_vm15, %v6773_v19  ;;  %v6778_v9 = vld [vmem:[#allocation2 + $0x18] sm:$0xff]   ;;  %v6783_v51 = vld [vmem:[%s8702_s6 + $0x20] ss:$0 sps:$4 sm:$0xff]   ;;  %v4986_v50 = vrot.slane %v8345_v12, 1  ;;  %v6799_v11 = vld [vmem:[#allocation2 + $0x84] sm:$0xff]  }
 0x15d   : > { %v8215_v44 = vpop.permute.xlu0 %2506  ;;  %v8217_v16 = vpop.permute.xlu1 %3386  ;;  %v4687_v36 = vrot.slane %v4685_v22, 1  ;;  %4317 = vst.msk [vmem:[#allocation3] sm:$0xff] %vm2100_vm15, %v6778_v9  ;;  %v6782_v5 = vld [vmem:[#allocation2 + $0x9c] sm:$0xff]   ;;  %v5131_v38 = vsel %vm3802_vm11, %v6783_v51, 0  ;;  %v4694_v22 = vrot.slane %v4692_v2, 1  ;;  %v6789_v32 = vld [vmem:[#allocation2 + $0xb4] sm:$0xff]  }
 0x15e   : > { %5013 = vrot.lane.b32.xlu0 %v4979_v28, %s6832_s14  ;;  %2545 = vst.msk [vmem:[#allocation3 + $0x50] sm:$0xff] %vm2534_vm0, %v8215_v44  ;;  %3427 = vst.msk [vmem:[#allocation3 + $0x38] sm:$0xff] %vm2534_vm0, %v8217_v16  ;;  %v767_v44 = vld [vmem:[#allocation2 + $0xd4] sm:$0x1]  ;;  %v4985_v16 = vsel %vm2727_vm14, %v4983_v0, %v4984_v31  ;;  %v6785_v14 = vld [vmem:[#allocation2 + $0x3c] sm:$0xff]  }
 0x15f   : > { %v4688_v49 = vsel %vm2293_vm13, %v4683_v59, %v4687_v36  ;;  %v768_v46 = vsel %vm6908_vm4, 0, %v767_v44  ;;  %v6784_v28 = vld [vmem:[#allocation2 + $0x90] sm:$0xff]   ;;  %2114 = vst.msk [vmem:[#allocation3 + $0x68] sm:$0xff] %vm2100_vm15, %v6782_v5  ;;  %4320 = vst.msk [vmem:[#allocation3 + $0x18] sm:$0xff] %vm2100_vm15, %v6785_v14  ;;  %v6787_v36 = vld [vmem:[#allocation2 + $0xa8] sm:$0xff]  }
 0x160   : > { %5011 = vrot.lane.b32.xlu1 %v4976_v17, %s6832_s14  ;;  %769 = vst [vmem:[#allocation2 + $0xd4] sm:$0x1] %v768_v46  ;;  %v6786_v17 = vld [vmem:[#allocation2 + $0x30] sm:$0xff]   ;;  %v6788_v23 = vld [vmem:[#allocation2 + $0x9c] sm:$0xff]   ;;  %2115 = vst.msk [vmem:[#allocation3 + $0x70] sm:$0xff] %vm2100_vm15, %v6787_v36 }
 0x161   : > { %v8222_v54 = vpop.permute.xlu0 %2796  ;;  %v8224_v1 = vpop.permute.xlu1 %3674  ;;  %v3730_v42 = vld [vmem:[#allocation3 + $0x30] sm:$0xff]  ;;  %v8316_v43 = vld [vmem:[#allocation3 + $0x48] sm:$0xff]  ;;  %4319 = vst.msk [vmem:[#allocation3 + $0x10] sm:$0xff] %vm2100_vm15, %v6786_v17  ;;  %2116 = vst.msk [vmem:[#allocation3 + $0x78] sm:$0xff] %vm2100_vm15, %v6789_v32 }
 0x162   : > { %6367 = vmatprep.mubr.msk.bf16.mxu1 %vm3753_vm7, %v3730_v42  ;;  %4729 = vrot.lane.b32.xlu0 %v4688_v49, %s6831_s13  ;;  %2835 = vst.msk [vmem:[#allocation3 + $0x50] sm:$0xff] %vm2824_vm3, %v8222_v54  ;;  %3715 = vst.msk [vmem:[#allocation3 + $0x38] sm:$0xff] %vm2824_vm3, %v8224_v1  ;;  %v4980_v54 = vrot.slane %v6768_v35, 1  ;;  %v4981_v1 = vrot.slane %v6769_v52, 1  ;;  %v6791_v35 = vld [vmem:[#allocation2 + $0x54] sm:$0xff]   ;;  %v6796_v41 = vld [vmem:[#allocation2 + $0x60] sm:$0xff]  }
 0x163   : > { %2997 = vst.msk [vmem:[#allocation3 + $0x48] sm:$0xff] %vm2100_vm15, %v6776_v56  ;;  %4322 = vst.msk [vmem:[#allocation3 + $0x28] sm:$0xff] %vm2100_vm15, %v6791_v35  ;;  %v6793_v19 = vld [vmem:[#allocation2 + $0xb4] sm:$0xff]   ;;  %v6801_v9 = vld [vmem:[#allocation2 + $0x9c] sm:$0xff]  }
 0x164   : > { %4727 = vrot.lane.b32.xlu1 %v4676_v58, %s6831_s13  ;;  %v4982_v6 = vsel %vm2727_vm14, %v4980_v54, %v4981_v1  ;;  %v6792_v58 = vld [vmem:[#allocation2 + $0x48] sm:$0xff]   ;;  %4323 = vst.msk [vmem:[#allocation3 + $0x30] sm:$0xff] %vm2100_vm15, %v6796_v41  ;;  %v6798_v56 = vld [vmem:[#allocation2 + $0x90] sm:$0xff]  }
 0x165   : > { %v8241_v15 = vpop.permute.xlu0 %3388  ;;  %v8243_v8 = vpop.permute.xlu1 %2508  ;;  %4321 = vst.msk [vmem:[#allocation3 + $0x20] sm:$0xff] %vm2100_vm15, %v6792_v58  ;;  %v6803_v2 = vld [vmem:[#allocation2 + $0xb4] sm:$0xff]  }
 0x166   : > { %5017 = vrot.lane.b32.xlu0 %v4985_v16, %s6832_s14  ;;  %3428 = vst.msk [vmem:[#allocation3 + $0x40] sm:$0xff] %vm2534_vm0, %v8241_v15  ;;  %2546 = vst.msk [vmem:[#allocation3 + $0x58] sm:$0xff] %vm2534_vm0, %v8243_v8  ;;  %v6795_v16 = vld [vmem:[#allocation2 + $0x6c] sm:$0xff]  }
 0x167   : > { %v1969_v3 = vld [vmem:[#allocation2 + $0xd4] sm:$0x1] }
 0x168   : > { %5015 = vrot.lane.b32.xlu1 %v4982_v6, %s6832_s14 }
 0x169   : > { %v8249_v63 = vpop.permute.xlu0 %3390  ;;  %v8251_v33 = vpop.permute.xlu1 %2798  ;;  %v3731_v15 = vld [vmem:[#allocation3 + $0x38] sm:$0xff]  ;;  %v8343_v24 = vld [vmem:[#allocation3 + $0x50] sm:$0xff] }
 0x16a   : > { %2836 = vst.msk [vmem:[#allocation3 + $0x58] sm:$0xff] %vm2824_vm3, %v8251_v33  ;;  %6368 = vmatmul.mubr.msk.bf16.gmra.mrb[12].mxu1 %vm3753_vm7, %v3731_v15  ;;  %v6780_v33 = vld [vmem:[%s8702_s6 + $0x18] sm:$0xff]  }
 0x16b   : > { %3429 = vst.msk [vmem:[#allocation3 + $0x48] sm:$0xff] %vm2534_vm0, %v8249_v63  ;;  %v1970_v63 = vsel %vm6899_vm2, 0, %v1969_v3  ;;  %6423 = vmatprep.subr.bf16.mxu0 %v6780_v33  ;;  %vm5486_vm2 = vcmask 31744  }
 0x16c   : > { %1971 = vst [vmem:[#allocation2 + $0xd4] sm:$0x1] %v1970_v63  ;;  %6424 = vmatpush3.bf16.msra.mxu0 %v6780_v33  ;;  %4324 = vst.msk [vmem:[#allocation3 + $0x38] sm:$0xff] %vm2100_vm15, %v6795_v16  ;;  %v6794_v63 = vld [vmem:[#allocation2 + $0xc0] sm:$0xff]  }
 0x16d   : > { %v8256_v48 = vpop.permute.xlu0 %4703  ;;  %v8258_v53 = vpop.permute.xlu1 %4701  ;;  %6530 = vmatprep.subr.msk.bf16.mxu0 %vm3802_vm11, %v6783_v51 }
 0x16e   : > { %4750 = vst.msk [vmem:[#allocation3 + $0x8] sm:$0xff] %vm2534_vm0, %v8256_v48  ;;  %4749 = vst.msk [vmem:[#allocation3] sm:$0xff] %vm2534_vm0, %v8258_v53  ;;  %v6781_v48 = vld [vmem:[#allocation2 + $0x84] sm:$0xff]  }
 0x16f   : > { %2998 = vst.msk [vmem:[#allocation3 + $0x50] sm:$0xff] %vm2100_vm15, %v6781_v48 }
 0x170   : > { %6426 = vmatpush3.bf16.msra.mxu0 %v5131_v38 }
 0x171   : > { %v8274_v57 = vpop.permute.xlu0 %3678  ;;  %v8276_v10 = vpop.permute.xlu1 %3676  ;;  %v8366_v29 = vld [vmem:[#allocation3 + $0x58] sm:$0xff] }
 0x172   : > { %3716 = vst.msk [vmem:[#allocation3 + $0x40] sm:$0xff] %vm2824_vm3, %v8276_v10  ;;  %3717 = vst.msk [vmem:[#allocation3 + $0x48] sm:$0xff] %vm2824_vm3, %v8274_v57  ;;  %v6779_v10 = vld [vmem:[#allocation2 + $0x90] sm:$0xff]  }
 0x173   : > { %2113 = vst.msk [vmem:[#allocation3 + $0x60] sm:$0xff] %vm2100_vm15, %v6779_v10  ;;  %2999 = vst.msk [vmem:[#allocation3 + $0x58] sm:$0xff] %vm2100_vm15, %v6784_v28  ;;  %v6771_v45 = vld [vmem:[#allocation2 + $0xd4] ss:$0 sps:$4 sm:$0x11]  }
 0x174   : > { %v6775_v59 = vld [vmem:[#allocation2 + $0xd4] ss:$0 sps:$4 sm:$0x11]  }
 0x175   : > { %v8282_v20 = vpop.permute.xlu0 %2510  ;;  %v8284_v39 = vpop.permute.xlu1 %4989  ;;  %v4987_v42 = vrot.slane %v6775_v59, 1 }
 0x176   : > { %2547 = vst.msk [vmem:[#allocation3 + $0x60] sm:$0xff] %vm2534_vm0, %v8282_v20 }
 0x177   : > { %5037 = vst.msk [vmem:[#allocation3] sm:$0xff] %vm2824_vm3, %v8284_v39  ;;  %v4690_v39 = vshrl.u32 %v8319_v61, 16  ;;  %v4988_v52 = vsel %vm2727_vm14, %v4986_v50, %v4987_v42  ;;  %v6804_v50 = vld [vmem:[#allocation2 + $0xcc] sm:$0xff]  }
 0x179   : > { %v8288_v37 = vpop.permute.xlu0 %2800  ;;  %v4992_v55 = vpop.permute.xlu1 %4991  ;;  %v3732_v53 = vld [vmem:[#allocation3 + $0x40] sm:$0xff]  ;;  %v3733_v60 = vld [vmem:[#allocation3 + $0x48] sm:$0xff]  ;;  %v4695_v27 = vor.u32 %v4694_v22, %v4690_v39 }
 0x17a   : > { %5038 = vst.msk [vmem:[#allocation3 + $0x8] sm:$0xff] %vm2824_vm3, %v4992_v55  ;;  %2837 = vst.msk [vmem:[#allocation3 + $0x60] sm:$0xff] %vm2824_vm3, %v8288_v37  ;;  %6371 = vmatprep.mubr.msk.bf16.mxu1 %vm3753_vm7, %v3732_v53  ;;  %v4697_v37 = vshll.u32 %v6771_v45, 16  ;;  %v6790_v55 = vld [vmem:[#allocation2 + $0xa8] sm:$0xff]  }
 0x17b   : > { %6372 = vmatmul.mubr.msk.bf16.gmra.mrb[16].mxu1 %vm3753_vm7, %v3733_v60  ;;  %4326 = vst.msk [vmem:[#allocation3 + $0x48] sm:$0xff] %vm2100_vm15, %v6799_v11  ;;  %v6800_v53 = vld [vmem:[#allocation2 + $0xa8] sm:$0xff]  }
 0x17c   : > { %v4699_v40 = vrot.slane %v4697_v37, 1 }
 0x17d   : > { %v3393_v7 = vpop.permute.xlu0 %3392  ;;  %v2513_v34 = vpop.permute.xlu1 %2512 }
 0x17e   : > { %3430 = vst.msk [vmem:[#allocation3 + $0x50] sm:$0xff] %vm2534_vm0, %v3393_v7  ;;  %2548 = vst.msk [vmem:[#allocation3 + $0x68] sm:$0xff] %vm2534_vm0, %v2513_v34  ;;  %v5053_v25 = vld [vmem:[#allocation3] sm:$0xff]  ;;  %v4700_v0 = vsel %vm2293_vm13, %v4695_v27, %v4699_v40 }
 0x17f   : > { %6427 = vmatprep.mubr.msk.bf16.mxu0 %vm3753_vm7, %v5053_v25  ;;  %4731 = vrot.lane.b32.xlu1 %v4700_v0, %s6831_s13  ;;  %v6797_v34 = vld [vmem:[#allocation2 + $0x78] sm:$0xff]  }
 0x180   : > { %4325 = vst.msk [vmem:[#allocation3 + $0x40] sm:$0xff] %vm2100_vm15, %v6797_v34 }
 0x181   : > { %v3395_v21 = vpop.permute.xlu0 %3394  ;;  %v2803_v8 = vpop.permute.xlu1 %2802  ;;  %v5054_v30 = vld [vmem:[#allocation3 + $0x8] sm:$0xff]  ;;  %v8383_v4 = vld [vmem:[#allocation3 + $0x60] sm:$0xff] }
 0x182   : > { %3431 = vst.msk [vmem:[#allocation3 + $0x58] sm:$0xff] %vm2534_vm0, %v3395_v21  ;;  %6428 = vmatmul.mubr.msk.bf16.vlgmr.msra.gmra.mrb[0].mxu0 %vm3753_vm7, %v5054_v30 }
 0x183   : > { %2838 = vst.msk [vmem:[#allocation3 + $0x68] sm:$0xff] %vm2824_vm3, %v2803_v8  ;;  %5019 = vrot.lane.b32.xlu1 %v4988_v52, %s6832_s14 }
 0x184   : > { %3000 = vst.msk [vmem:[#allocation3 + $0x60] sm:$0xff] %vm2100_vm15, %v6788_v23 }
 0x185   : > { %v4708_v57 = vpop.permute.xlu0 %4707  ;;  %v4706_v26 = vpop.permute.xlu1 %4705 }
 0x186   : > { %4752 = vst.msk [vmem:[#allocation3 + $0x18] sm:$0xff] %vm2534_vm0, %v4708_v57  ;;  %4751 = vst.msk [vmem:[#allocation3 + $0x10] sm:$0xff] %vm2534_vm0, %v4706_v26 }
 0x189   : > { %v3683_v20 = vpop.permute.xlu0 %3682  ;;  %v3681_v47 = vpop.permute.xlu1 %3680 }
 0x18a   : > { %3719 = vst.msk [vmem:[#allocation3 + $0x58] sm:$0xff] %vm2824_vm3, %v3683_v20  ;;  %3718 = vst.msk [vmem:[#allocation3 + $0x50] sm:$0xff] %vm2824_vm3, %v3681_v47  ;;  %v8390_v13 = vld [vmem:[#allocation3 + $0x68] sm:$0xff] }
 0x18b   : > { %3001 = vst.msk [vmem:[#allocation3 + $0x68] sm:$0xff] %vm2100_vm15, %v6790_v55  ;;  %v6802_v47 = vld [vmem:[#allocation2 + $0xc0] sm:$0xff]  }
 0x18d   : > { %v2515_v49 = vpop.permute.xlu0 %2514  ;;  %v4994_v18 = vpop.permute.xlu1 %4993 }
 0x18e   : > { %2549 = vst.msk [vmem:[#allocation3 + $0x70] sm:$0xff] %vm2534_vm0, %v2515_v49 }
 0x18f   : > { %5039 = vst.msk [vmem:[#allocation3 + $0x10] sm:$0xff] %vm2824_vm3, %v4994_v18 }
 0x191   : > { %v3735_v31 = vld [vmem:[#allocation3 + $0x58] sm:$0xff]  ;;  %v2805_v44 = vpop.permute.xlu0 %2804  ;;  %v4996_v46 = vpop.permute.xlu1 %4995  ;;  %v3734_v7 = vld [vmem:[#allocation3 + $0x50] sm:$0xff] }
 0x192   : > { %2839 = vst.msk [vmem:[#allocation3 + $0x70] sm:$0xff] %vm2824_vm3, %v2805_v44  ;;  %5040 = vst.msk [vmem:[#allocation3 + $0x18] sm:$0xff] %vm2824_vm3, %v4996_v46  ;;  %6375 = vmatprep.mubr.msk.bf16.mxu1 %vm3753_vm7, %v3734_v7 }
 0x193   : > { %6376 = vmatmul.mubr.msk.bf16.gmra.mrb[20].mxu1 %vm3753_vm7, %v3735_v31  ;;  %4327 = vst.msk [vmem:[#allocation3 + $0x50] sm:$0xff] %vm2100_vm15, %v6798_v56  ;;  %4328 = vst.msk [vmem:[#allocation3 + $0x58] sm:$0xff] %vm2100_vm15, %v6801_v9 }
 0x195   : > { %v3397_v54 = vpop.permute.xlu0 %3396  ;;  %v2517_v6 = vpop.permute.xlu1 %2516 }
 0x196   : > { %3432 = vst.msk [vmem:[#allocation3 + $0x60] sm:$0xff] %vm2534_vm0, %v3397_v54  ;;  %v5055_v1 = vld [vmem:[#allocation3 + $0x10] sm:$0xff]  ;;  %2550 = vst.msk [vmem:[#allocation3 + $0x78] sm:$0xff] %vm2534_vm0, %v2517_v6 }
 0x197   : > { %6431 = vmatprep.mubr.msk.bf16.mxu0 %vm3753_vm7, %v5055_v1 }
 0x199   : > { %v8408_v61 = vld [vmem:[#allocation3 + $0x70] sm:$0xff]  ;;  %v5056_v21 = vld [vmem:[#allocation3 + $0x18] sm:$0xff]  ;;  %v3399_v15 = vpop.permute.xlu0 %3398  ;;  %v2807_v8 = vpop.permute.xlu1 %2806 }
 0x19a   : > { %3002 = vst.msk [vmem:[#allocation3 + $0x70] sm:$0xff] %vm2100_vm15, %v6793_v19  ;;  %6432 = vmatmul.mubr.msk.bf16.gmra.mrb[4].mxu0 %vm3753_vm7, %v5056_v21 }
 0x19b   : > { %3433 = vst.msk [vmem:[#allocation3 + $0x68] sm:$0xff] %vm2534_vm0, %v3399_v15 }
 0x19c   : > { %2840 = vst.msk [vmem:[#allocation3 + $0x78] sm:$0xff] %vm2824_vm3, %v2807_v8 }
 0x19d   : > { %v4712_v3 = vpop.permute.xlu0 %4711  ;;  %v4710_v10 = vpop.permute.xlu1 %4709 }
 0x19e   : > { %4754 = vst.msk [vmem:[#allocation3 + $0x28] sm:$0xff] %vm2534_vm0, %v4712_v3  ;;  %4753 = vst.msk [vmem:[#allocation3 + $0x20] sm:$0xff] %vm2534_vm0, %v4710_v10 }
 0x1a1   : > { %v3687_v33 = vpop.permute.xlu0 %3686 }
 0x1a2   : > { %3721 = vst.msk [vmem:[#allocation3 + $0x68] sm:$0xff] %vm2824_vm3, %v3687_v33 }
 0x1a3   : > { %v8421_v12 = vld [vmem:[#allocation3 + $0x78] sm:$0xff] }
 0x1a4   : > { %3003 = vst.msk [vmem:[#allocation3 + $0x78] sm:$0xff] %vm2100_vm15, %v6794_v63 }
 0x1a5   : > { %v3401_v5 = vpop.permute.xlu0 %3400 }
 0x1a6   : > { %v3685_v48 = vpop.permute.xlu1 %3684  ;;  %3434 = vst.msk [vmem:[#allocation3 + $0x70] sm:$0xff] %vm2534_vm0, %v3401_v5 }
 0x1a7   : > { %3720 = vst.msk [vmem:[#allocation3 + $0x60] sm:$0xff] %vm2824_vm3, %v3685_v48 }
 0x1a9   : > { %v3737_v51 = vld [vmem:[#allocation3 + $0x68] sm:$0xff] }
 0x1aa   : > { %v4998_v57 = vpop.permute.xlu1 %4997  ;;  %4330 = vst.msk [vmem:[#allocation3 + $0x68] sm:$0xff] %vm2100_vm15, %v6803_v2 }
 0x1ab   : > { %5041 = vst.msk [vmem:[#allocation3 + $0x20] sm:$0xff] %vm2824_vm3, %v4998_v57 }
 0x1ae   : > { %v3736_v28 = vld [vmem:[#allocation3 + $0x60] sm:$0xff]  ;;  %v5000_v38 = vpop.permute.xlu1 %4999  ;;  %v3403_v26 = vpop.permute.xlu0 %3402 }
 0x1af   : > { %6379 = vmatprep.mubr.msk.bf16.mxu1 %vm3753_vm7, %v3736_v28  ;;  %4329 = vst.msk [vmem:[#allocation3 + $0x60] sm:$0xff] %vm2100_vm15, %v6800_v53 }
 0x1b0   : > { %6380 = vmatmul.mubr.msk.bf16.gmra.mrb[24].mxu1 %vm3753_vm7, %v3737_v51  ;;  %5042 = vst.msk [vmem:[#allocation3 + $0x28] sm:$0xff] %vm2824_vm3, %v5000_v38 }
 0x1b1   : > { %3435 = vst.msk [vmem:[#allocation3 + $0x78] sm:$0xff] %vm2534_vm0, %v3403_v26 }
 0x1b2   : > { %v5057_v14 = vld [vmem:[#allocation3 + $0x20] sm:$0xff]  ;;  %v4716_v20 = vpop.permute.xlu0 %4715 }
 0x1b3   : > { %6435 = vmatprep.mubr.msk.bf16.mxu0 %vm3753_vm7, %v5057_v14  ;;  %4756 = vst.msk [vmem:[#allocation3 + $0x38] sm:$0xff] %vm2534_vm0, %v4716_v20  ;;  %v4714_v22 = vpop.permute.xlu1 %4713 }
 0x1b4   : > { %4755 = vst.msk [vmem:[#allocation3 + $0x30] sm:$0xff] %vm2534_vm0, %v4714_v22 }
 0x1b6   : > { %v3691_v60 = vpop.permute.xlu0 %3690 }
 0x1b7   : > { %v5058_v39 = vld [vmem:[#allocation3 + $0x28] sm:$0xff]  ;;  %3723 = vst.msk [vmem:[#allocation3 + $0x78] sm:$0xff] %vm2824_vm3, %v3691_v60  ;;  %v3689_v17 = vpop.permute.xlu1 %3688 }
 0x1b8   : > { %6436 = vmatmul.mubr.msk.bf16.gmra.mrb[8].mxu0 %vm3753_vm7, %v5058_v39  ;;  %3722 = vst.msk [vmem:[#allocation3 + $0x70] sm:$0xff] %vm2824_vm3, %v3689_v17 }
 0x1bb   : > { %v5002_v36 = vpop.permute.xlu1 %5001 }
 0x1bc   : > { %v4718_v30 = vpop.permute.xlu0 %4717  ;;  %5043 = vst.msk [vmem:[#allocation3 + $0x30] sm:$0xff] %vm2824_vm3, %v5002_v36 }
 0x1bd   : > { %4757 = vst.msk [vmem:[#allocation3 + $0x40] sm:$0xff] %vm2534_vm0, %v4718_v30 }
 0x1be   : > { %v3739_v45 = vld [vmem:[#allocation3 + $0x78] sm:$0xff] }
 0x1bf   : > { %4332 = vst.msk [vmem:[#allocation3 + $0x78] sm:$0xff] %vm2100_vm15, %v6804_v50  ;;  %v3738_v23 = vld [vmem:[#allocation3 + $0x70] sm:$0xff]  ;;  %v5004_v25 = vpop.permute.xlu1 %5003 }
 0x1c0   : > { %6383 = vmatprep.mubr.msk.bf16.mxu1 %vm3753_vm7, %v3738_v23  ;;  %4331 = vst.msk [vmem:[#allocation3 + $0x70] sm:$0xff] %vm2100_vm15, %v6802_v47  ;;  %v5006_v59 = vpop.permute.xlu0 %5005 }
 0x1c1   : > { %6384 = vmatmul.mubr.msk.bf16.gmra.mrb[28].mxu1 %vm3753_vm7, %v3739_v45  ;;  %5045 = vst.msk [vmem:[#allocation3 + $0x40] sm:$0xff] %vm2824_vm3, %v5006_v59  ;;  %5044 = vst.msk [vmem:[#allocation3 + $0x38] sm:$0xff] %vm2824_vm3, %v5004_v25 }
 0x1c2   : > { %6407 = vmatprep.mubr.msk.bf16.mxu1 %vm3753_vm7, %v8306_v62 }
 0x1c3   : > { %v5059_v27 = vld [vmem:[#allocation3 + $0x30] sm:$0xff] }
 0x1c4   : > { %6439 = vmatprep.mubr.msk.bf16.mxu0 %vm3753_vm7, %v5059_v27  ;;  %v4722_v37 = vpop.permute.xlu0 %4721 }
 0x1c5   : > { %4759 = vst.msk [vmem:[#allocation3 + $0x50] sm:$0xff] %vm2534_vm0, %v4722_v37 }
 0x1c6   : > { %v4720_v62 = vpop.permute.xlu1 %4719 }
 0x1c7   : > { %4758 = vst.msk [vmem:[#allocation3 + $0x48] sm:$0xff] %vm2534_vm0, %v4720_v62 }
 0x1c8   : > { %v5061_v42 = vld [vmem:[#allocation3 + $0x40] sm:$0xff]  ;;  %v5060_v49 = vld [vmem:[#allocation3 + $0x38] sm:$0xff]  ;;  %v5010_v32 = vpop.permute.xlu0 %5009 }
 0x1c9   : > { %6408 = vmatmul.mubr.msk.bf16.vlgmr.msra.gmra.mrb[16].mxu1 %vm3753_vm7, %v8316_v43  ;;  %6440 = vmatmul.mubr.msk.bf16.gmra.mrb[12].mxu0 %vm3753_vm7, %v5060_v49  ;;  %5047 = vst.msk [vmem:[#allocation3 + $0x50] sm:$0xff] %vm2824_vm3, %v5010_v32 }
 0x1ca   : > { %6411 = vmatprep.mubr.msk.bf16.mxu1 %vm3753_vm7, %v8343_v24  ;;  %6443 = vmatprep.mubr.msk.bf16.mxu0 %vm3753_vm7, %v5061_v42  ;;  %v5008_v40 = vpop.permute.xlu1 %5007 }
 0x1cb   : > { %5046 = vst.msk [vmem:[#allocation3 + $0x48] sm:$0xff] %vm2824_vm3, %v5008_v40 }
 0x1cc   : > { %v4726_v43 = vpop.permute.xlu0 %4725 }
 0x1cd   : > { %4761 = vst.msk [vmem:[#allocation3 + $0x60] sm:$0xff] %vm2534_vm0, %v4726_v43 }
 0x1ce   : > { %v4724_v24 = vpop.permute.xlu1 %4723 }
 0x1cf   : > { %4760 = vst.msk [vmem:[#allocation3 + $0x58] sm:$0xff] %vm2534_vm0, %v4724_v24 }
 0x1d0   : > { %v5063_v18 = vld [vmem:[#allocation3 + $0x50] sm:$0xff]  ;;  %v5014_v0 = vpop.permute.xlu0 %5013 }
 0x1d1   : > { %6412 = vmatmul.mubr.msk.bf16.gmra.mrb[20].mxu1 %vm3753_vm7, %v8366_v29  ;;  %5049 = vst.msk [vmem:[#allocation3 + $0x60] sm:$0xff] %vm2824_vm3, %v5014_v0 }
 0x1d2   : > { %6415 = vmatprep.mubr.msk.bf16.mxu1 %vm3753_vm7, %v8383_v4  ;;  %v5062_v55 = vld [vmem:[#allocation3 + $0x48] sm:$0xff]  ;;  %v5012_v29 = vpop.permute.xlu1 %5011 }
 0x1d3   : > { %6444 = vmatmul.mubr.msk.bf16.gmra.mrb[16].mxu0 %vm3753_vm7, %v5062_v55  ;;  %5048 = vst.msk [vmem:[#allocation3 + $0x58] sm:$0xff] %vm2824_vm3, %v5012_v29 }
 0x1d4   : > { %6447 = vmatprep.mubr.msk.bf16.mxu0 %vm3753_vm7, %v5063_v18  ;;  %v4730_v4 = vpop.permute.xlu0 %4729 }
 0x1d5   : > { %4763 = vst.msk [vmem:[#allocation3 + $0x70] sm:$0xff] %vm2534_vm0, %v4730_v4 }
 0x1d8   : > { %v5065_v31 = vld [vmem:[#allocation3 + $0x60] sm:$0xff]  ;;  %v5018_v35 = vpop.permute.xlu0 %5017 }
 0x1d9   : > { %6416 = vmatmul.mubr.msk.bf16.gmra.mrb[24].mxu1 %vm3753_vm7, %v8390_v13  ;;  %v4728_v13 = vpop.permute.xlu1 %4727  ;;  %5051 = vst.msk [vmem:[#allocation3 + $0x70] sm:$0xff] %vm2824_vm3, %v5018_v35 }
 0x1da   : > { %6419 = vmatprep.mubr.msk.bf16.mxu1 %vm3753_vm7, %v8408_v61  ;;  %4762 = vst.msk [vmem:[#allocation3 + $0x68] sm:$0xff] %vm2534_vm0, %v4728_v13  ;;  %v5064_v44 = vld [vmem:[#allocation3 + $0x58] sm:$0xff] }
 0x1db   : > { %6448 = vmatmul.mubr.msk.bf16.gmra.mrb[20].mxu0 %vm3753_vm7, %v5064_v44 }
 0x1dc   : > { %6451 = vmatprep.mubr.msk.bf16.mxu0 %vm3753_vm7, %v5065_v31 }
 0x1dd   : > { %v5016_v58 = vpop.permute.xlu1 %5015 }
 0x1de   : > { %5050 = vst.msk [vmem:[#allocation3 + $0x68] sm:$0xff] %vm2824_vm3, %v5016_v58 }
 0x1e0   : > { %v5067_v52 = vld [vmem:[#allocation3 + $0x70] sm:$0xff] }
 0x1e1   : > { %6420 = vmatmul.mubr.msk.bf16.gmra.mrb[28].mxu1 %vm3753_vm7, %v8421_v12 }
 0x1e5   : > { %v5066_v46 = vld [vmem:[#allocation3 + $0x68] sm:$0xff] }
 0x1e6   : > { %6452 = vmatmul.mubr.msk.bf16.gmra.mrb[24].mxu0 %vm3753_vm7, %v5066_v46 }
 0x1e7   : > { %6455 = vmatprep.mubr.msk.bf16.mxu0 %vm3753_vm7, %v5067_v52 }
 0x1f1   : > { %v4732_v7 = vpop.permute.xlu1 %4731 }
 0x1f2   : > { %4764 = vst.msk [vmem:[#allocation3 + $0x78] sm:$0xff] %vm2534_vm0, %v4732_v7 }
 0x1f5   : > { %v5020_v16 = vpop.permute.xlu1 %5019 }
 0x1f6   : > { %5052 = vst.msk [vmem:[#allocation3 + $0x78] sm:$0xff] %vm2824_vm3, %v5020_v16 }
 0x1fd   : > { %v5068_v54 = vld [vmem:[#allocation3 + $0x78] sm:$0xff] }
 0x1fe   : > { %6456 = vmatmul.mubr.msk.bf16.gmra.mrb[28].mxu0 %vm3753_vm7, %v5068_v54 }
 0x21d   : > { %v6357_v41 = vpop.f32.mrb[0].mxu1 }
 0x21e   : > { %v3840_v1 = vpop.f32.mrb[1].mxu1 }
 0x21f   : > { %v6358_v19 = vpop.f32.mrb[2].mxu1 }
 0x220   : > { %v3843_v34 = vpop.f32.mrb[3].mxu1 }
 0x225   : > { %v6361_v6 = vpop.f32.mrb[4].mxu1 }
 0x226   : > { %v3856_v56 = vpop.f32.mrb[5].mxu1 }
 0x227   : > { %v6362_v61 = vpop.f32.mrb[6].mxu1 }
 0x228   : > { %v3859_v11 = vpop.f32.mrb[7].mxu1 }
 0x22d   : > { %v8487_v21 = vpop.f32.mrb[8].mxu1 }
 0x22e   : > { %v8489_v15 = vpop.f32.mrb[9].mxu1 }
 0x22f   : > { %v8491_v9 = vpop.f32.mrb[10].mxu1 }
 0x230   : > { %v8493_v8 = vpop.f32.mrb[11].mxu1 }
 0x23d   : > { %v8495_v3 = vpop.f32.mrb[12].mxu1 }
 0x23e   : > { %v8497_v10 = vpop.f32.mrb[13].mxu1 }
 0x23f   : > { %v8499_v33 = vpop.f32.mrb[14].mxu1 }
 0x240   : > { %v8501_v63 = vpop.f32.mrb[15].mxu1 }
 0x255   : > { %v6429_v12 = vpop.f32.mrb[0].mxu0 }
 0x256   : > { %v6463_v48 = vadd.f32 %v6429_v12, %v6357_v41  ;;  %v5167_v57 = vpop.f32.mrb[1].mxu0 }
 0x257   : > { %v6464_v2 = vadd.f32 %v5167_v57, %v3840_v1  ;;  %v6430_v5 = vpop.f32.mrb[2].mxu0 }
 0x258   : > { %v6267_v51 = vpack.c.bf16 %v6463_v48, %v6463_v48  ;;  %v6465_v53 = vadd.f32 %v6430_v5, %v6358_v19  ;;  %v5170_v28 = vpop.f32.mrb[3].mxu0  ;;  %v5560_v20 = vmul.f32 %v6463_v48, %v6463_v48  ;;  %v5490_v36 = vsel %vm5486_vm2, %v6463_v48, 0.0 }
 0x259   : > { %v6265_v38 = vpack.c.bf16 %v6464_v2, %v6464_v2  ;;  %v5558_v26 = vmul.f32 %v6464_v2, %v6464_v2  ;;  %v6466_v14 = vadd.f32 %v5170_v28, %v3843_v34  ;;  %v5487_v22 = vsel %vm5486_vm2, %v6464_v2, 0.0 }
 0x25a   : > { %5456 = vst.msk [vmem:[%s8507_s30 + $0x8] sm:$0xf] %vm1125_vm10, %v6267_v51  ;;  %v6268_v39 = vpack.c.bf16 %v6465_v53, %v6465_v53  ;;  %v5561_v47 = vmul.f32 %v6465_v53, %v6465_v53  ;;  %v5593_v27 = vsel %vm5486_vm2, %v5560_v20, 0.0  ;;  %v5492_v37 = vsel %vm5486_vm2, %v6465_v53, 0.0 }
 0x25b   : > { %5454 = vst.msk [vmem:[%s8507_s30] sm:$0xf] %vm1125_vm10, %v6265_v38  ;;  %v6266_v60 = vpack.c.bf16 %v6466_v14, %v6466_v14  ;;  %v5488_v17 = vsel %vm5486_vm2, %v6466_v14, 0.0  ;;  %v5559_v50 = vmul.f32 %v6466_v14, %v6466_v14  ;;  %v5590_v45 = vsel %vm5486_vm2, %v5558_v26, 0.0 }
 0x25c   : > { %5457 = vst.msk [vmem:[%s8507_s30 + $0xc] sm:$0xf] %vm1125_vm10, %v6268_v39  ;;  %v5489_v30 = vadd.f32 %v5488_v17, %v5487_v22  ;;  %v5595_v62 = vsel %vm5486_vm2, %v5561_v47, 0.0 }
 0x25d   : > { %5455 = vst.msk [vmem:[%s8507_s30 + $0x4] sm:$0xf] %vm1125_vm10, %v6266_v60  ;;  %v5591_v23 = vsel %vm5486_vm2, %v5559_v50, 0.0 }
 0x25e   : > { %v5491_v59 = vadd.f32 %v5490_v36, %v5489_v30  ;;  %v5592_v25 = vadd.f32 %v5591_v23, %v5590_v45 }
 0x260   : > { %v5594_v42 = vadd.f32 %v5593_v27, %v5592_v25  ;;  %v5493_v49 = vadd.f32 %v5492_v37, %v5491_v59 }
 0x262   : > { %v5596_v32 = vadd.f32 %v5595_v62, %v5594_v42 }
 0x26d   : > { %v6433_v40 = vpop.f32.mrb[4].mxu0 }
 0x26e   : > { %v6467_v43 = vadd.f32 %v6433_v40, %v6361_v6  ;;  %v5183_v24 = vpop.f32.mrb[5].mxu0 }
 0x26f   : > { %v6468_v18 = vadd.f32 %v5183_v24, %v3856_v56  ;;  %v6434_v55 = vpop.f32.mrb[6].mxu0 }
 0x270   : > { %v6271_v0 = vpack.c.bf16 %v6467_v43, %v6467_v43  ;;  %v6469_v29 = vadd.f32 %v6434_v55, %v6362_v61  ;;  %v5186_v4 = vpop.f32.mrb[7].mxu0  ;;  %v5564_v54 = vmul.f32 %v6467_v43, %v6467_v43  ;;  %v5498_v34 = vsel %vm5486_vm2, %v6467_v43, 0.0 }
 0x271   : > { %v6269_v13 = vpack.c.bf16 %v6468_v18, %v6468_v18  ;;  %v5494_v31 = vsel %vm5486_vm2, %v6468_v18, 0.0  ;;  %v5562_v35 = vmul.f32 %v6468_v18, %v6468_v18  ;;  %v6470_v44 = vadd.f32 %v5186_v4, %v3859_v11 }
 0x272   : > { %5460 = vst.msk [vmem:[%s8507_s30 + $0x18] sm:$0xf] %vm1125_vm10, %v6271_v0  ;;  %v5495_v58 = vadd.f32 %v5494_v31, %v5493_v49  ;;  %v6272_v52 = vpack.c.bf16 %v6469_v29, %v6469_v29  ;;  %v5565_v6 = vmul.f32 %v6469_v29, %v6469_v29  ;;  %v5500_v11 = vsel %vm5486_vm2, %v6469_v29, 0.0 }
 0x273   : > { %5458 = vst.msk [vmem:[%s8507_s30 + $0x10] sm:$0xf] %vm1125_vm10, %v6269_v13  ;;  %v5597_v46 = vsel %vm5486_vm2, %v5562_v35, 0.0  ;;  %v6270_v7 = vpack.c.bf16 %v6470_v44, %v6470_v44  ;;  %v5496_v16 = vsel %vm5486_vm2, %v6470_v44, 0.0  ;;  %v5563_v19 = vmul.f32 %v6470_v44, %v6470_v44 }
 0x274   : > { %v5598_v41 = vadd.f32 %v5597_v46, %v5596_v32  ;;  %5461 = vst.msk [vmem:[%s8507_s30 + $0x1c] sm:$0xf] %vm1125_vm10, %v6272_v52  ;;  %v5497_v1 = vadd.f32 %v5496_v16, %v5495_v58  ;;  %v5601_v48 = vsel %vm5486_vm2, %v5564_v54, 0.0  ;;  %v5603_v5 = vsel %vm5486_vm2, %v5565_v6, 0.0 }
 0x275   : > { %5459 = vst.msk [vmem:[%s8507_s30 + $0x14] sm:$0xf] %vm1125_vm10, %v6270_v7  ;;  %v5599_v61 = vsel %vm5486_vm2, %v5563_v19, 0.0 }
 0x276   : > { %v5499_v56 = vadd.f32 %v5498_v34, %v5497_v1  ;;  %v5600_v12 = vadd.f32 %v5599_v61, %v5598_v41 }
 0x278   : > { %v5501_v57 = vadd.f32 %v5500_v11, %v5499_v56  ;;  %v5602_v2 = vadd.f32 %v5601_v48, %v5600_v12 }
 0x27a   : > { %v5604_v51 = vadd.f32 %v5603_v5, %v5602_v2 }
 0x28b   : > { %v6437_v53 = vpop.f32.mrb[8].mxu0 }
 0x28c   : > { %v6471_v28 = vadd.f32 %v6437_v53, %v8487_v21  ;;  %v5199_v38 = vpop.f32.mrb[9].mxu0 }
 0x28d   : > { %v6472_v26 = vadd.f32 %v5199_v38, %v8489_v15  ;;  %v6438_v14 = vpop.f32.mrb[10].mxu0 }
 0x28e   : > { %v6275_v20 = vpack.c.bf16 %v6471_v28, %v6471_v28  ;;  %v6473_v39 = vadd.f32 %v6438_v14, %v8491_v9  ;;  %v5202_v22 = vpop.f32.mrb[11].mxu0  ;;  %v5568_v9 = vmul.f32 %v6471_v28, %v6471_v28  ;;  %v5506_v27 = vsel %vm5486_vm2, %v6471_v28, 0.0 }
 0x28f   : > { %v6273_v60 = vpack.c.bf16 %v6472_v26, %v6472_v26  ;;  %v5502_v17 = vsel %vm5486_vm2, %v6472_v26, 0.0  ;;  %v5566_v50 = vmul.f32 %v6472_v26, %v6472_v26  ;;  %v6474_v30 = vadd.f32 %v5202_v22, %v8493_v8 }
 0x290   : > { %5464 = vst.msk [vmem:[%s8507_s30 + $0x28] sm:$0xf] %vm1125_vm10, %v6275_v20  ;;  %v5503_v36 = vadd.f32 %v5502_v17, %v5501_v57  ;;  %v6276_v21 = vpack.c.bf16 %v6473_v39, %v6473_v39  ;;  %v5569_v8 = vmul.f32 %v6473_v39, %v6473_v39  ;;  %v5508_v49 = vsel %vm5486_vm2, %v6473_v39, 0.0 }
 0x291   : > { %5462 = vst.msk [vmem:[%s8507_s30 + $0x20] sm:$0xf] %vm1125_vm10, %v6273_v60  ;;  %v5605_v15 = vsel %vm5486_vm2, %v5566_v50, 0.0  ;;  %v6274_v45 = vpack.c.bf16 %v6474_v30, %v6474_v30  ;;  %v5504_v47 = vsel %vm5486_vm2, %v6474_v30, 0.0  ;;  %v5567_v25 = vmul.f32 %v6474_v30, %v6474_v30 }
 0x292   : > { %v5606_v23 = vadd.f32 %v5605_v15, %v5604_v51  ;;  %5465 = vst.msk [vmem:[%s8507_s30 + $0x2c] sm:$0xf] %vm1125_vm10, %v6276_v21  ;;  %v5505_v59 = vadd.f32 %v5504_v47, %v5503_v36  ;;  %v5609_v32 = vsel %vm5486_vm2, %v5568_v9, 0.0  ;;  %v5611_v24 = vsel %vm5486_vm2, %v5569_v8, 0.0 }
 0x293   : > { %5463 = vst.msk [vmem:[%s8507_s30 + $0x24] sm:$0xf] %vm1125_vm10, %v6274_v45  ;;  %v5607_v42 = vsel %vm5486_vm2, %v5567_v25, 0.0 }
 0x294   : > { %v5507_v37 = vadd.f32 %v5506_v27, %v5505_v59  ;;  %v5608_v62 = vadd.f32 %v5607_v42, %v5606_v23 }
 0x296   : > { %v5509_v40 = vadd.f32 %v5508_v49, %v5507_v37  ;;  %v5610_v43 = vadd.f32 %v5609_v32, %v5608_v62 }
 0x298   : > { %v5612_v18 = vadd.f32 %v5611_v24, %v5610_v43 }
 0x29c   : > { %v6409_v55 = vpop.f32.mrb[16].mxu1  ;;  %v6441_v13 = vpop.f32.mrb[12].mxu0 }
 0x29d   : > { %v4125_v0 = vpop.f32.mrb[17].mxu1  ;;  %v6475_v31 = vadd.f32 %v6441_v13, %v8495_v3  ;;  %v5215_v35 = vpop.f32.mrb[13].mxu0 }
 0x29e   : > { %v6410_v29 = vpop.f32.mrb[18].mxu1  ;;  %v6476_v44 = vadd.f32 %v5215_v35, %v8497_v10  ;;  %v6442_v58 = vpop.f32.mrb[14].mxu0 }
 0x29f   : > { %v4128_v4 = vpop.f32.mrb[19].mxu1  ;;  %v6279_v52 = vpack.c.bf16 %v6475_v31, %v6475_v31  ;;  %v6477_v46 = vadd.f32 %v6442_v58, %v8499_v33  ;;  %v5218_v7 = vpop.f32.mrb[15].mxu0  ;;  %v5572_v11 = vmul.f32 %v6475_v31, %v6475_v31  ;;  %v5514_v2 = vsel %vm5486_vm2, %v6475_v31, 0.0 }
 0x2a0   : > { %v6277_v16 = vpack.c.bf16 %v6476_v44, %v6476_v44  ;;  %v5510_v54 = vsel %vm5486_vm2, %v6476_v44, 0.0  ;;  %v5570_v41 = vmul.f32 %v6476_v44, %v6476_v44  ;;  %v6478_v1 = vadd.f32 %v5218_v7, %v8501_v63 }
 0x2a1   : > { %5468 = vst.msk [vmem:[%s8507_s30 + $0x38] sm:$0xf] %vm1125_vm10, %v6279_v52  ;;  %v5511_v3 = vadd.f32 %v5510_v54, %v5509_v40  ;;  %v6280_v34 = vpack.c.bf16 %v6477_v46, %v6477_v46  ;;  %v5573_v5 = vmul.f32 %v6477_v46, %v6477_v46  ;;  %v5516_v28 = vsel %vm5486_vm2, %v6477_v46, 0.0 }
 0x2a2   : > { %5466 = vst.msk [vmem:[%s8507_s30 + $0x30] sm:$0xf] %vm1125_vm10, %v6277_v16  ;;  %v5613_v33 = vsel %vm5486_vm2, %v5570_v41, 0.0  ;;  %v6278_v6 = vpack.c.bf16 %v6478_v1, %v6478_v1  ;;  %v5512_v56 = vsel %vm5486_vm2, %v6478_v1, 0.0  ;;  %v5571_v48 = vmul.f32 %v6478_v1, %v6478_v1 }
 0x2a3   : > { %v5614_v63 = vadd.f32 %v5613_v33, %v5612_v18  ;;  %5469 = vst.msk [vmem:[%s8507_s30 + $0x3c] sm:$0xf] %vm1125_vm10, %v6280_v34  ;;  %v5513_v12 = vadd.f32 %v5512_v56, %v5511_v3  ;;  %v5617_v26 = vsel %vm5486_vm2, %v5572_v11, 0.0  ;;  %v5619_v22 = vsel %vm5486_vm2, %v5573_v5, 0.0 }
 0x2a4   : > { %v8566_v19 = vpop.f32.mrb[20].mxu1  ;;  %5467 = vst.msk [vmem:[%s8507_s30 + $0x34] sm:$0xf] %vm1125_vm10, %v6278_v6  ;;  %v5615_v53 = vsel %vm5486_vm2, %v5571_v48, 0.0 }
 0x2a5   : > { %v8570_v10 = vpop.f32.mrb[21].mxu1  ;;  %v5515_v51 = vadd.f32 %v5514_v2, %v5513_v12  ;;  %v5616_v38 = vadd.f32 %v5615_v53, %v5614_v63 }
 0x2a6   : > { %v8576_v61 = vpop.f32.mrb[22].mxu1  ;;  %v6445_v60 = vpop.f32.mrb[16].mxu0 }
 0x2a7   : > { %v8580_v57 = vpop.f32.mrb[23].mxu1  ;;  %v5517_v14 = vadd.f32 %v5516_v28, %v5515_v51  ;;  %v5618_v20 = vadd.f32 %v5617_v26, %v5616_v38  ;;  %v6479_v50 = vadd.f32 %v6445_v60, %v6409_v55  ;;  %v5231_v30 = vpop.f32.mrb[17].mxu0 }
 0x2a8   : > { %v6480_v15 = vadd.f32 %v5231_v30, %v4125_v0  ;;  %v6446_v45 = vpop.f32.mrb[18].mxu0 }
 0x2a9   : > { %v5620_v36 = vadd.f32 %v5619_v22, %v5618_v20  ;;  %v6283_v9 = vpack.c.bf16 %v6479_v50, %v6479_v50  ;;  %v6481_v23 = vadd.f32 %v6446_v45, %v6410_v29  ;;  %v5234_v59 = vpop.f32.mrb[19].mxu0  ;;  %v5576_v43 = vmul.f32 %v6479_v50, %v6479_v50 }
 0x2aa   : > { %v6281_v25 = vpack.c.bf16 %v6480_v15, %v6480_v15  ;;  %v5518_v27 = vsel %vm5486_vm2, %v6480_v15, 0.0  ;;  %v5574_v8 = vmul.f32 %v6480_v15, %v6480_v15  ;;  %v6482_v37 = vadd.f32 %v5234_v59, %v4128_v4 }
 0x2ab   : > { %5472 = vst.msk [vmem:[%s8507_s30 + $0x48] sm:$0xf] %vm1125_vm10, %v6283_v9  ;;  %v5519_v42 = vadd.f32 %v5518_v27, %v5517_v14  ;;  %v6284_v49 = vpack.c.bf16 %v6481_v23, %v6481_v23  ;;  %v5522_v29 = vsel %vm5486_vm2, %v6479_v50, 0.0  ;;  %v5577_v13 = vmul.f32 %v6481_v23, %v6481_v23 }
 0x2ac   : > { %v8588_v39 = vpop.f32.mrb[24].mxu1  ;;  %5470 = vst.msk [vmem:[%s8507_s30 + $0x40] sm:$0xf] %vm1125_vm10, %v6281_v25  ;;  %v5621_v62 = vsel %vm5486_vm2, %v5574_v8, 0.0  ;;  %v6282_v32 = vpack.c.bf16 %v6482_v37, %v6482_v37  ;;  %v5520_v40 = vsel %vm5486_vm2, %v6482_v37, 0.0  ;;  %v5575_v55 = vmul.f32 %v6482_v37, %v6482_v37 }
 0x2ad   : > { %v8591_v17 = vpop.f32.mrb[25].mxu1  ;;  %v5622_v24 = vadd.f32 %v5621_v62, %v5620_v36  ;;  %5473 = vst.msk [vmem:[%s8507_s30 + $0x4c] sm:$0xf] %vm1125_vm10, %v6284_v49  ;;  %v5521_v18 = vadd.f32 %v5520_v40, %v5519_v42  ;;  %v5524_v58 = vsel %vm5486_vm2, %v6481_v23, 0.0  ;;  %v5625_v7 = vsel %vm5486_vm2, %v5576_v43, 0.0 }
 0x2ae   : > { %v8593_v21 = vpop.f32.mrb[26].mxu1  ;;  %5471 = vst.msk [vmem:[%s8507_s30 + $0x44] sm:$0xf] %vm1125_vm10, %v6282_v32  ;;  %v5623_v35 = vsel %vm5486_vm2, %v5575_v55, 0.0  ;;  %v6449_v41 = vpop.f32.mrb[20].mxu0  ;;  %v5627_v1 = vsel %vm5486_vm2, %v5577_v13, 0.0 }
 0x2af   : > { %v8595_v47 = vpop.f32.mrb[27].mxu1  ;;  %v5523_v31 = vadd.f32 %v5522_v29, %v5521_v18  ;;  %v5624_v52 = vadd.f32 %v5623_v35, %v5622_v24  ;;  %v6483_v3 = vadd.f32 %v6449_v41, %v8566_v19  ;;  %v5247_v34 = vpop.f32.mrb[21].mxu0 }
 0x2b0   : > { %v6484_v33 = vadd.f32 %v5247_v34, %v8570_v10  ;;  %v6450_v56 = vpop.f32.mrb[22].mxu0 }
 0x2b1   : > { %v5525_v16 = vadd.f32 %v5524_v58, %v5523_v31  ;;  %v5626_v54 = vadd.f32 %v5625_v7, %v5624_v52  ;;  %v6287_v11 = vpack.c.bf16 %v6483_v3, %v6483_v3  ;;  %v6485_v63 = vadd.f32 %v6450_v56, %v8576_v61  ;;  %v5250_v12 = vpop.f32.mrb[23].mxu0 }
 0x2b2   : > { %v6285_v48 = vpack.c.bf16 %v6484_v33, %v6484_v33  ;;  %v5526_v2 = vsel %vm5486_vm2, %v6484_v33, 0.0  ;;  %v5578_v5 = vmul.f32 %v6484_v33, %v6484_v33  ;;  %v6486_v51 = vadd.f32 %v5250_v12, %v8580_v57 }
 0x2b3   : > { %v5628_v6 = vadd.f32 %v5627_v1, %v5626_v54  ;;  %5476 = vst.msk [vmem:[%s8507_s30 + $0x58] sm:$0xf] %vm1125_vm10, %v6287_v11  ;;  %v5527_v19 = vadd.f32 %v5526_v2, %v5525_v16  ;;  %v6288_v53 = vpack.c.bf16 %v6485_v63, %v6485_v63  ;;  %v5580_v61 = vmul.f32 %v6483_v3, %v6483_v3 }
 0x2b4   : > { %v8606_v0 = vpop.f32.mrb[28].mxu1  ;;  %5474 = vst.msk [vmem:[%s8507_s30 + $0x50] sm:$0xf] %vm1125_vm10, %v6285_v48  ;;  %v5629_v10 = vsel %vm5486_vm2, %v5578_v5, 0.0  ;;  %v6286_v28 = vpack.c.bf16 %v6486_v51, %v6486_v51  ;;  %v5528_v38 = vsel %vm5486_vm2, %v6486_v51, 0.0  ;;  %v5579_v20 = vmul.f32 %v6486_v51, %v6486_v51 }
 0x2b5   : > { %v8611_v4 = vpop.f32.mrb[29].mxu1  ;;  %v5630_v26 = vadd.f32 %v5629_v10, %v5628_v6  ;;  %5477 = vst.msk [vmem:[%s8507_s30 + $0x5c] sm:$0xf] %vm1125_vm10, %v6288_v53  ;;  %v5529_v14 = vadd.f32 %v5528_v38, %v5527_v19  ;;  %v5530_v22 = vsel %vm5486_vm2, %v6483_v3, 0.0  ;;  %v5581_v57 = vmul.f32 %v6485_v63, %v6485_v63 }
 0x2b6   : > { %v8614_v44 = vpop.f32.mrb[30].mxu1  ;;  %5475 = vst.msk [vmem:[%s8507_s30 + $0x54] sm:$0xf] %vm1125_vm10, %v6286_v28  ;;  %v5631_v50 = vsel %vm5486_vm2, %v5579_v20, 0.0  ;;  %v5532_v30 = vsel %vm5486_vm2, %v6485_v63, 0.0  ;;  %v5633_v15 = vsel %vm5486_vm2, %v5580_v61, 0.0 }
 0x2b7   : > { %v8617_v46 = vpop.f32.mrb[31].mxu1  ;;  %v5531_v60 = vadd.f32 %v5530_v22, %v5529_v14  ;;  %v5632_v36 = vadd.f32 %v5631_v50, %v5630_v26  ;;  %v5635_v27 = vsel %vm5486_vm2, %v5581_v57, 0.0 }
 0x2b9   : > { %v6453_v45 = vpop.f32.mrb[24].mxu0  ;;  %v5533_v9 = vadd.f32 %v5532_v30, %v5531_v60  ;;  %v5634_v23 = vadd.f32 %v5633_v15, %v5632_v36 }
 0x2ba   : > { %v6487_v59 = vadd.f32 %v6453_v45, %v8588_v39  ;;  %v5263_v25 = vpop.f32.mrb[25].mxu0 }
 0x2bb   : > { %v6488_v8 = vadd.f32 %v5263_v25, %v8591_v17  ;;  %v6454_v37 = vpop.f32.mrb[26].mxu0  ;;  %v5636_v49 = vadd.f32 %v5635_v27, %v5634_v23 }
 0x2bc   : > { %v6291_v42 = vpack.c.bf16 %v6487_v59, %v6487_v59  ;;  %v5266_v62 = vpop.f32.mrb[27].mxu0  ;;  %v6489_v24 = vadd.f32 %v6454_v37, %v8593_v21  ;;  %v5584_v55 = vmul.f32 %v6487_v59, %v6487_v59  ;;  %v5538_v52 = vsel %vm5486_vm2, %v6487_v59, 0.0 }
 0x2bd   : > { %v6289_v32 = vpack.c.bf16 %v6488_v8, %v6488_v8  ;;  %v5534_v40 = vsel %vm5486_vm2, %v6488_v8, 0.0  ;;  %v5582_v43 = vmul.f32 %v6488_v8, %v6488_v8  ;;  %v6490_v18 = vadd.f32 %v5266_v62, %v8595_v47 }
 0x2be   : > { %5480 = vst.msk [vmem:[%s8507_s30 + $0x68] sm:$0xf] %vm1125_vm10, %v6291_v42  ;;  %v5535_v39 = vadd.f32 %v5534_v40, %v5533_v9  ;;  %v6292_v29 = vpack.c.bf16 %v6489_v24, %v6489_v24  ;;  %v5585_v7 = vmul.f32 %v6489_v24, %v6489_v24  ;;  %v5641_v41 = vsel %vm5486_vm2, %v5584_v55, 0.0 }
 0x2bf   : > { %5478 = vst.msk [vmem:[%s8507_s30 + $0x60] sm:$0xf] %vm1125_vm10, %v6289_v32  ;;  %v5637_v17 = vsel %vm5486_vm2, %v5582_v43, 0.0  ;;  %v6290_v31 = vpack.c.bf16 %v6490_v18, %v6490_v18  ;;  %v5536_v35 = vsel %vm5486_vm2, %v6490_v18, 0.0  ;;  %v5583_v58 = vmul.f32 %v6490_v18, %v6490_v18 }
 0x2c0   : > { %v5638_v13 = vadd.f32 %v5637_v17, %v5636_v49  ;;  %5481 = vst.msk [vmem:[%s8507_s30 + $0x6c] sm:$0xf] %vm1125_vm10, %v6292_v29  ;;  %v5537_v21 = vadd.f32 %v5536_v35, %v5535_v39  ;;  %v5540_v1 = vsel %vm5486_vm2, %v6489_v24, 0.0  ;;  %v5643_v33 = vsel %vm5486_vm2, %v5585_v7, 0.0 }
 0x2c1   : > { %5479 = vst.msk [vmem:[%s8507_s30 + $0x64] sm:$0xf] %vm1125_vm10, %v6290_v31  ;;  %v5639_v47 = vsel %vm5486_vm2, %v5583_v58, 0.0 }
 0x2c2   : > { %v5539_v16 = vadd.f32 %v5538_v52, %v5537_v21  ;;  %v5640_v54 = vadd.f32 %v5639_v47, %v5638_v13 }
 0x2c4   : > { %v5642_v3 = vadd.f32 %v5641_v41, %v5640_v54  ;;  %v5541_v34 = vadd.f32 %v5540_v1, %v5539_v16 }
 0x2c6   : > { %v5644_v6 = vadd.f32 %v5643_v33, %v5642_v3 }
 0x2d1   : > { %v6457_v56 = vpop.f32.mrb[28].mxu0 }
 0x2d2   : > { %v6491_v11 = vadd.f32 %v6457_v56, %v8606_v0  ;;  %v5279_v63 = vpop.f32.mrb[29].mxu0 }
 0x2d3   : > { %v6492_v12 = vadd.f32 %v5279_v63, %v8611_v4  ;;  %v6458_v48 = vpop.f32.mrb[30].mxu0 }
 0x2d4   : > { %v6295_v2 = vpack.c.bf16 %v6491_v11, %v6491_v11  ;;  %v6493_v5 = vadd.f32 %v6458_v48, %v8614_v44  ;;  %v5282_v51 = vpop.f32.mrb[31].mxu0  ;;  %v5588_v44 = vmul.f32 %v6491_v11, %v6491_v11  ;;  %v5546_v57 = vsel %vm5486_vm2, %v6491_v11, 0.0 }
 0x2d5   : > { %v6293_v19 = vpack.c.bf16 %v6492_v12, %v6492_v12  ;;  %v5542_v53 = vsel %vm5486_vm2, %v6492_v12, 0.0  ;;  %v5586_v10 = vmul.f32 %v6492_v12, %v6492_v12  ;;  %v6494_v28 = vadd.f32 %v5282_v51, %v8617_v46 }
 0x2d6   : > { %5484 = vst.msk [vmem:[%s8507_s30 + $0x78] sm:$0xf] %vm1125_vm10, %v6295_v2  ;;  %v5543_v38 = vadd.f32 %v5542_v53, %v5541_v34  ;;  %v6296_v0 = vpack.c.bf16 %v6493_v5, %v6493_v5  ;;  %v5589_v46 = vmul.f32 %v6493_v5, %v6493_v5  ;;  %v5548_v30 = vsel %vm5486_vm2, %v6493_v5, 0.0 }
 0x2d7   : > { %5482 = vst.msk [vmem:[%s8507_s30 + $0x70] sm:$0xf] %vm1125_vm10, %v6293_v19  ;;  %v5645_v4 = vsel %vm5486_vm2, %v5586_v10, 0.0  ;;  %v6294_v61 = vpack.c.bf16 %v6494_v28, %v6494_v28  ;;  %v5544_v26 = vsel %vm5486_vm2, %v6494_v28, 0.0  ;;  %v5587_v22 = vmul.f32 %v6494_v28, %v6494_v28 }
 0x2d8   : > { %v5646_v14 = vadd.f32 %v5645_v4, %v5644_v6  ;;  %5485 = vst.msk [vmem:[%s8507_s30 + $0x7c] sm:$0xf] %vm1125_vm10, %v6296_v0  ;;  %v5545_v20 = vadd.f32 %v5544_v26, %v5543_v38  ;;  %v5649_v15 = vsel %vm5486_vm2, %v5588_v44, 0.0  ;;  %v5651_v23 = vsel %vm5486_vm2, %v5589_v46, 0.0 }
 0x2d9   : > { %5483 = vst.msk [vmem:[%s8507_s30 + $0x74] sm:$0xf] %vm1125_vm10, %v6294_v61  ;;  %v5647_v50 = vsel %vm5486_vm2, %v5587_v22, 0.0 }
 0x2da   : > { %v5547_v60 = vadd.f32 %v5546_v57, %v5545_v20  ;;  %v5648_v36 = vadd.f32 %v5647_v50, %v5646_v14 }
 0x2dc   : > { %v5549_v45 = vadd.f32 %v5548_v30, %v5547_v60  ;;  %v5650_v9 = vadd.f32 %v5649_v15, %v5648_v36 }
 0x2de   : > { %v5550_v59 = vrot.slane %v5549_v45, 4  ;;  %v5652_v25 = vadd.f32 %v5651_v23, %v5650_v9 }
 0x2e0   : > { %v5551_v27 = vadd.f32 %v5550_v59, %v5549_v45  ;;  %v5653_v8 = vrot.slane %v5652_v25, 4 }
 0x2e2   : > { %v5552_v37 = vrot.slane %v5551_v27, 2  ;;  %v5654_v42 = vadd.f32 %v5653_v8, %v5652_v25 }
 0x2e4   : > { %v5553_v49 = vadd.f32 %v5552_v37, %v5551_v27  ;;  %v5655_v62 = vrot.slane %v5654_v42, 2 }
 0x2e6   : > { %v5554_v32 = vrot.slane %v5553_v49, 1  ;;  %v5656_v40 = vadd.f32 %v5655_v62, %v5654_v42 }
 0x2e8   : > { %v5555_v43 = vadd.f32 %v5554_v32, %v5553_v49  ;;  %v5657_v24 = vrot.slane %v5656_v40, 1 }
 0x2ea   : > { %5557 = vst.msk [vmem:[%s655_s11] sm:$0x1] %vm1132_vm9, %v5555_v43  ;;  %v5658_v39 = vadd.f32 %v5657_v24, %v5656_v40 }
 0x2ec   : > { %5659 = vst.msk [vmem:[%s655_s11 + $0x1] sm:$0x1] %vm1132_vm9, %v5658_v39 }
 0x2ed PF: > { %s19_s3 = sadd.s32 1, %s6827_s3   ;;  %s8729_s27 = smov %s6823_s2 }
 0x2ee   : > { %p16_p5 = scmp.ge.s32.totalorder %s19_s3, 4   ;;  %s8730_s2 = smov %s8732_s4 }
 0x2f0   :  { %18 = sbr.rel (!%p16_p5) target bundleno = 2 (0x2), region = 127 }

</bundles_post_ra>
